<compile_context>
chip_gen: v7x
topology: tpu7x:2x2x1
jax: 0.10.0
libtpu: 0.0.40
codegen_flags: <defaults>
</compile_context>

<pallas_src>
import functools

import numpy as np

import jax
import jax.numpy as jnp
from jax.experimental import pallas as pl
from jax.experimental.pallas import tpu as pltpu

BN_EPS = 1e-5


def _full_spec(shape):
    # One whole-array block (block_shape == full dims satisfies the tiling rule).
    return pl.BlockSpec(shape, lambda *_: (0,) * len(shape))


# ------------------------------ fused kernel --------------------------------

def _vgg_kernel(stem_ref, w1_ref, w2_ref, w3_ref, w4_ref, w5_ref,
                g1_ref, be1_ref, g2_ref, be2_ref, g3_ref, be3_ref,
                g4_ref, be4_ref, g5_ref, be5_ref,
                gfa_ref, sfa_ref, gfb_ref, sfb_ref,
                gfc_ref, sfc_ref, gfd_ref, sfd_ref,
                wc_ref, fcb_ref,
                o_ref,
                pa_ref, pc_ref, pd_ref,
                *, n, h1, w1):
    h2, w2 = h1 // 2, w1 // 2
    h3 = h2 // 2

    def bn_relu(y, g_ref, b_ref, gf_ref, sf_ref, count):
        # Training-mode BatchNorm (batch stats, biased variance) fused with
        # ReLU, computed in the W-folded layout.  gf: (L, C) sums the w-blocks
        # into per-channel stats, sf: (C, L) broadcasts them back.
        inv = 1.0 / count
        rs = jnp.sum(y, axis=0, keepdims=True)                     # (1, L)
        rss = jnp.sum(y * y, axis=0, keepdims=True)
        cs = jnp.dot(rs, gf_ref[...], preferred_element_type=jnp.float32)
        css = jnp.dot(rss, gf_ref[...], preferred_element_type=jnp.float32)
        mean = cs * inv
        var = css * inv - mean * mean                              # (1, C)
        sc_c = g_ref[...] * jax.lax.rsqrt(var + BN_EPS)
        sh_c = b_ref[...] - mean * sc_c
        sc = jnp.dot(sc_c, sf_ref[...], preferred_element_type=jnp.float32)
        sh = jnp.dot(sh_c, sf_ref[...], preferred_element_type=jnp.float32)
        return jnp.maximum(y * sc + sh, 0.0)

    def conv3x3(pad_ref, w_ref, hh):
        # 3x3 / pad-1 conv as 3 banded matmuls (one per kernel row dh).
        # W-padding (and conv4's stride-2 pooled-lane read) live in the
        # host-built banded weights; only the 1-row H halo lives in VMEM.
        lin = pad_ref.shape[2]
        acc = None
        for dh in range(3):
            lhs = pad_ref[:, dh:dh + hh, :].reshape(n * hh, lin)   # bf16
            p = jnp.dot(lhs, w_ref[dh], preferred_element_type=jnp.float32)
            acc = p if acc is None else acc + p
        return acc                                                 # (n*hh, ww*cout) f32

    def maxpool2x2(y, c):
        # rows=(n,h): adjacent-row max via leading-dim reshape; lanes=(w,c):
        # adjacent-column max via an XLU roll.  Output keeps full lane width;
        # only the even-w channel blocks are consumed downstream (the next
        # layer's banded weights / classifier weights skip the odd blocks).
        r, l = y.shape
        v = y.reshape(r // 2, 2, l)
        hm = jnp.maximum(v[:, 0, :], v[:, 1, :])
        return jnp.maximum(hm, pltpu.roll(hm, shift=l - c, axis=1))

    # Zero only the 1-row top/bottom halos of the padded-activation buffers
    # (interiors are fully overwritten below; W padding lives in the weights).
    pa_ref[:, 0:1, :] = jnp.zeros((n, 1, w1 * 6), jnp.bfloat16)
    pa_ref[:, h1 + 1:h1 + 2, :] = jnp.zeros((n, 1, w1 * 6), jnp.bfloat16)
    pc_ref[:, 0:1, :] = jnp.zeros((n, 1, w1 * 16), jnp.bfloat16)
    pc_ref[:, h2 + 1:h2 + 2, :] = jnp.zeros((n, 1, w1 * 16), jnp.bfloat16)
    pd_ref[:, 0:1, :] = jnp.zeros((n, 1, w2 * 32), jnp.bfloat16)
    pd_ref[:, h2 + 1:h2 + 2, :] = jnp.zeros((n, 1, w2 * 32), jnp.bfloat16)

    # ---- stem: 7x7 / stride-7 / pad-1 conv (3->6) as ONE banded matmul -----
    y = jnp.dot(stem_ref[...], w1_ref[...], preferred_element_type=jnp.float32)
    y = bn_relu(y, g1_ref, be1_ref, gfa_ref, sfa_ref, n * h1 * w1)  # (n*h1, 96)

    # ---- conv2: 6 -> 6 (16x16) ---------------------------------------------
    pa_ref[:, 1:h1 + 1, :] = y.astype(jnp.bfloat16).reshape(n, h1, w1 * 6)
    y = bn_relu(conv3x3(pa_ref, w2_ref, h1), g2_ref, be2_ref,
                gfa_ref, sfa_ref, n * h1 * w1)

    # ---- conv3: 6 -> 16 (16x16) --------------------------------------------
    pa_ref[:, 1:h1 + 1, :] = y.astype(jnp.bfloat16).reshape(n, h1, w1 * 6)
    y = bn_relu(conv3x3(pa_ref, w3_ref, h1), g3_ref, be3_ref,
                gfb_ref, sfb_ref, n * h1 * w1)

    # ---- maxpool 2x2 -> (n*h2, w1*16), even-w blocks hold the pooled map ---
    y = maxpool2x2(y, 16)

    # ---- conv4: 16 -> 32 (8x8); banded weights read the stride-2 lanes -----
    pc_ref[:, 1:h2 + 1, :] = y.astype(jnp.bfloat16).reshape(n, h2, w1 * 16)
    y = bn_relu(conv3x3(pc_ref, w4_ref, h2), g4_ref, be4_ref,
                gfc_ref, sfc_ref, n * h2 * w2)

    # ---- conv5: 32 -> 64 (8x8) ---------------------------------------------
    pd_ref[:, 1:h2 + 1, :] = y.astype(jnp.bfloat16).reshape(n, h2, w2 * 32)
    y = bn_relu(conv3x3(pd_ref, w5_ref, h2), g5_ref, be5_ref,
                gfd_ref, sfd_ref, n * h2 * w2)

    # ---- maxpool 2x2 -> (n*h3, w2*64), even-w blocks valid -----------------
    y = maxpool2x2(y, 64)

    # ---- classifier: F.avg_pool2d(.,2) + NCHW flatten + Linear folded into
    #      wc (4 small bf16 matmuls, one per pooled row). --------------------
    x3 = y.astype(jnp.bfloat16).reshape(n, h3, w2 * 64)
    acc = jnp.zeros(o_ref.shape, jnp.float32)
    for ph in range(h3):
        acc = acc + jnp.dot(x3[:, ph, :], wc_ref[ph],
                            preferred_element_type=jnp.float32)
    o_ref[...] = acc + fcb_ref[...]


# ------------------------- host-side weight folding -------------------------

def prepare_params(params):
    """Build the banded / folded kernel operands (done once, on host)."""
    f32, bf16 = jnp.float32, jnp.bfloat16

    def banded_3x3(w, ww, stride_in=1):
        # w: (cout, cin, 3, 3) -> (3, ww*stride_in*cin, ww*cout) banded weights
        # mapping the W-folded input lanes to W-folded output lanes.
        w = np.asarray(w, np.float32)
        cout, cin = w.shape[0], w.shape[1]
        lin, lout = ww * stride_in * cin, ww * cout
        b = np.zeros((3, lin, lout), np.float32)
        for dh in range(3):
            for ow in range(ww):
                for dw in range(3):
                    wi = ow + dw - 1
                    if 0 <= wi < ww:
                        r0 = wi * stride_in * cin
                        b[dh, r0:r0 + cin, ow * cout:(ow + 1) * cout] = \
                            w[:, :, dh, dw].T
        return jnp.asarray(b).astype(bf16)

    def banded_stem(w, wpad=112, wo=16):
        # w: (6, 3, 7, 7).  LHS rows hold 7 padded input rows (kh, iw, ci);
        # the banded weight realizes the stride-7 W taps + W padding.
        w = np.asarray(w, np.float32)
        cout, cin, k, _ = w.shape
        b = np.zeros((k * wpad * cin, wo * cout), np.float32)
        for kh in range(k):
            for ow in range(wo):
                for kw in range(k):
                    iw = ow * 7 + kw
                    r0 = kh * wpad * cin + iw * cin
                    b[r0:r0 + cin, ow * cout:(ow + 1) * cout] = w[:, :, kh, kw].T
        return jnp.asarray(b).astype(bf16)

    def fold_mats(ww, c):
        # G: (ww*c, c) sums the w-blocks per channel; S = G.T broadcasts back.
        g = np.zeros((ww * c, c), np.float32)
        for w in range(ww):
            g[w * c:(w + 1) * c, :] = np.eye(c, dtype=np.float32)
        return jnp.asarray(g, f32), jnp.asarray(g.T.copy(), f32)

    def classifier_w(fc_w):
        # fc_w: (nc, 256), idx = ch*4 + i*2 + j (NCHW flatten of the 2x2x64
        # avg-pooled map).  Fold the 0.25 avg-pool and the un-compacted
        # (even-w) pooled lane layout into (h3=4, 8*64, nc).
        fc_w = np.asarray(fc_w, np.float32)
        nc = fc_w.shape[0]
        h3p, w3p, c = 4, 4, 64
        wc = np.zeros((h3p, 8 * c, nc), np.float32)
        for ph in range(h3p):
            for pw in range(w3p):
                for ch in range(c):
                    idx = ch * 4 + (ph // 2) * 2 + (pw // 2)
                    wc[ph, (2 * pw) * c + ch, :] = 0.25 * fc_w[:, idx]
        return jnp.asarray(wc).astype(bf16)

    def row(v):
        return jnp.asarray(np.asarray(v, np.float32).reshape(1, -1), f32)

    gfa, sfa = fold_mats(16, 6)
    gfb, sfb = fold_mats(16, 16)
    gfc, sfc = fold_mats(8, 32)
    gfd, sfd = fold_mats(8, 64)

    return dict(
        w1b=banded_stem(params["w1"]),
        w2b=banded_3x3(params["w2"], 16),
        w3b=banded_3x3(params["w3"], 16),
        w4b=banded_3x3(params["w4"], 8, stride_in=2),
        w5b=banded_3x3(params["w5"], 8),
        g1=row(params["g1"]), b1=row(params["b1"]),
        g2=row(params["g2"]), b2=row(params["b2"]),
        g3=row(params["g3"]), b3=row(params["b3"]),
        g4=row(params["g4"]), b4=row(params["b4"]),
        g5=row(params["g5"]), b5=row(params["b5"]),
        gfa=gfa, sfa=sfa, gfb=gfb, sfb=sfb,
        gfc=gfc, sfc=sfc, gfd=gfd, sfd=sfd,
        wc=classifier_w(params["fc_w"]),
        fcb=row(params["fc_b"]),
    )


# -------------------------------- wrapper ------------------------------------

def vgg_forward(prep, x_nchw):
    n, _, hin, win = x_nchw.shape
    h1 = (hin + 2 - 7) // 7 + 1
    w1 = (win + 2 - 7) // 7 + 1
    assert h1 == 16 and w1 == 16, "nn.Linear(256, .) requires 110x110 input"
    h2, w2 = h1 // 2, w1 // 2
    nc = prep["fcb"].shape[1]

    # Stem LHS: pad to 112x112 NHWC; since stride==kernel==7 and 112 = 16*7,
    # regrouping rows of 7 into lanes is a pure reshape (same bytes as the raw
    # input, fused by XLA).  One row per (sample, output row).
    x = jnp.transpose(x_nchw, (0, 2, 3, 1))
    x = jnp.pad(x, ((0, 0), (1, 1), (1, 1), (0, 0)))
    stem = x.reshape(n * h1, 7 * (win + 2) * 3).astype(jnp.bfloat16)

    args = (stem, prep["w1b"], prep["w2b"], prep["w3b"], prep["w4b"], prep["w5b"],
            prep["g1"], prep["b1"], prep["g2"], prep["b2"], prep["g3"], prep["b3"],
            prep["g4"], prep["b4"], prep["g5"], prep["b5"],
            prep["gfa"], prep["sfa"], prep["gfb"], prep["sfb"],
            prep["gfc"], prep["sfc"], prep["gfd"], prep["sfd"],
            prep["wc"], prep["fcb"])

    kernel = functools.partial(_vgg_kernel, n=n, h1=h1, w1=w1)
    return pl.pallas_call(
        kernel,
        grid=(1,),
        out_shape=jax.ShapeDtypeStruct((n, nc), jnp.float32),
        in_specs=[_full_spec(a.shape) for a in args],
        out_specs=_full_spec((n, nc)),
        scratch_shapes=[
            pltpu.VMEM((n, h1 + 2, w1 * 6), jnp.bfloat16),    # conv2/3 input (+H halo)
            pltpu.VMEM((n, h2 + 2, w1 * 16), jnp.bfloat16),   # conv4 input (un-compacted pool1)
            pltpu.VMEM((n, h2 + 2, w2 * 32), jnp.bfloat16),   # conv5 input
        ],
        compiler_params=pltpu.CompilerParams(
            dimension_semantics=("arbitrary",)),
    )(*args)


# ------------------------------- parameters ----------------------------------

def init_params(key, num_classes=10):
    # PyTorch-layout parameters.  Conv biases intentionally omitted: they
    # cancel exactly under training-mode BatchNorm's batch-mean subtraction.
    ks = jax.random.split(key, 12)
    p = {
        "w1": 0.1 * jax.random.normal(ks[0], (6, 3, 7, 7), jnp.float32),
        "w2": 0.1 * jax.random.normal(ks[1], (6, 6, 3, 3), jnp.float32),
        "w3": 0.1 * jax.random.normal(ks[2], (16, 6, 3, 3), jnp.float32),
        "w4": 0.1 * jax.random.normal(ks[3], (32, 16, 3, 3), jnp.float32),
        "w5": 0.1 * jax.random.normal(ks[4], (64, 32, 3, 3), jnp.float32),
    }
    for i, c in enumerate([6, 6, 16, 32, 64], start=1):
        kg, kb = jax.random.split(ks[4 + i])
        p[f"g{i}"] = 1.0 + 0.1 * jax.random.normal(kg, (c,), jnp.float32)
        p[f"b{i}"] = 0.05 * jax.random.normal(kb, (c,), jnp.float32)
    p["fc_w"] = 0.1 * jax.random.normal(ks[10], (num_classes, 256), jnp.float32)
    p["fc_b"] = 0.01 * jax.random.normal(ks[11], (num_classes,), jnp.float32)
    return p


if __name__ == "__main__":
    key = jax.random.PRNGKey(0)
    pkey, xkey = jax.random.split(key)
    params = init_params(pkey, num_classes=10)
    prep = prepare_params(params)
    # Spatial 110 makes the flattened feature vector exactly 256
    # (= nn.Linear in_features).  Layout is NCHW like the PyTorch module.
    x = jax.random.normal(xkey, (2, 3, 110, 110), jnp.float32)
    fwd = jax.jit(lambda inp: vgg_forward(prep, inp))
    out = jax.block_until_ready(fwd(x))
    assert out.shape == (2, 10) and out.dtype == jnp.float32
    assert bool(jnp.all(jnp.isfinite(out)))
    print("KERNEL_OK")
</pallas_src>

<mosaic_0001>
module attributes {stable_mosaic.version = 11 : i64} {
  func.func @_vgg_kernel(%arg0: i32, %arg1: memref<32x2352xbf16, #tpu.memory_space<vmem>>, %arg2: memref<2352x96xbf16, #tpu.memory_space<vmem>>, %arg3: memref<3x96x96xbf16, #tpu.memory_space<vmem>>, %arg4: memref<3x96x256xbf16, #tpu.memory_space<vmem>>, %arg5: memref<3x256x256xbf16, #tpu.memory_space<vmem>>, %arg6: memref<3x256x512xbf16, #tpu.memory_space<vmem>>, %arg7: memref<1x6xf32, #tpu.memory_space<vmem>>, %arg8: memref<1x6xf32, #tpu.memory_space<vmem>>, %arg9: memref<1x6xf32, #tpu.memory_space<vmem>>, %arg10: memref<1x6xf32, #tpu.memory_space<vmem>>, %arg11: memref<1x16xf32, #tpu.memory_space<vmem>>, %arg12: memref<1x16xf32, #tpu.memory_space<vmem>>, %arg13: memref<1x32xf32, #tpu.memory_space<vmem>>, %arg14: memref<1x32xf32, #tpu.memory_space<vmem>>, %arg15: memref<1x64xf32, #tpu.memory_space<vmem>>, %arg16: memref<1x64xf32, #tpu.memory_space<vmem>>, %arg17: memref<96x6xf32, #tpu.memory_space<vmem>>, %arg18: memref<6x96xf32, #tpu.memory_space<vmem>>, %arg19: memref<256x16xf32, #tpu.memory_space<vmem>>, %arg20: memref<16x256xf32, #tpu.memory_space<vmem>>, %arg21: memref<256x32xf32, #tpu.memory_space<vmem>>, %arg22: memref<32x256xf32, #tpu.memory_space<vmem>>, %arg23: memref<512x64xf32, #tpu.memory_space<vmem>>, %arg24: memref<64x512xf32, #tpu.memory_space<vmem>>, %arg25: memref<4x512x10xbf16, #tpu.memory_space<vmem>>, %arg26: memref<1x10xf32, #tpu.memory_space<vmem>>, %arg27: memref<2x10xf32, #tpu.memory_space<vmem>>, %arg28: memref<2x18x96xbf16, #tpu.memory_space<vmem>>, %arg29: memref<2x10x256xbf16, #tpu.memory_space<vmem>>, %arg30: memref<2x10x256xbf16, #tpu.memory_space<vmem>>) attributes {dimension_semantics = [#tpu.dimension_semantics<arbitrary>], iteration_bounds = array<i64: 1>, scalar_prefetch = 0 : i64, scratch_operands = 3 : i64, tpu.core_type = #tpu.core_type<tc>, window_params = [{pipeline_mode = #tpu.pipeline_mode<synchronous>, transform_indices = @transform_0, window_bounds = array<i64: 32, 2352>}, {pipeline_mode = #tpu.pipeline_mode<synchronous>, transform_indices = @transform_1, window_bounds = array<i64: 2352, 96>}, {pipeline_mode = #tpu.pipeline_mode<synchronous>, transform_indices = @transform_2, window_bounds = array<i64: 3, 96, 96>}, {pipeline_mode = #tpu.pipeline_mode<synchronous>, transform_indices = @transform_3, window_bounds = array<i64: 3, 96, 256>}, {pipeline_mode = #tpu.pipeline_mode<synchronous>, transform_indices = @transform_4, window_bounds = array<i64: 3, 256, 256>}, {pipeline_mode = #tpu.pipeline_mode<synchronous>, transform_indices = @transform_5, window_bounds = array<i64: 3, 256, 512>}, {pipeline_mode = #tpu.pipeline_mode<synchronous>, transform_indices = @transform_6, window_bounds = array<i64: 1, 6>}, {pipeline_mode = #tpu.pipeline_mode<synchronous>, transform_indices = @transform_7, window_bounds = array<i64: 1, 6>}, {pipeline_mode = #tpu.pipeline_mode<synchronous>, transform_indices = @transform_8, window_bounds = array<i64: 1, 6>}, {pipeline_mode = #tpu.pipeline_mode<synchronous>, transform_indices = @transform_9, window_bounds = array<i64: 1, 6>}, {pipeline_mode = #tpu.pipeline_mode<synchronous>, transform_indices = @transform_10, window_bounds = array<i64: 1, 16>}, {pipeline_mode = #tpu.pipeline_mode<synchronous>, transform_indices = @transform_11, window_bounds = array<i64: 1, 16>}, {pipeline_mode = #tpu.pipeline_mode<synchronous>, transform_indices = @transform_12, window_bounds = array<i64: 1, 32>}, {pipeline_mode = #tpu.pipeline_mode<synchronous>, transform_indices = @transform_13, window_bounds = array<i64: 1, 32>}, {pipeline_mode = #tpu.pipeline_mode<synchronous>, transform_indices = @transform_14, window_bounds = array<i64: 1, 64>}, {pipeline_mode = #tpu.pipeline_mode<synchronous>, transform_indices = @transform_15, window_bounds = array<i64: 1, 64>}, {pipeline_mode = #tpu.pipeline_mode<synchronous>, transform_indices = @transform_16, window_bounds = array<i64: 96, 6>}, {pipeline_mode = #tpu.pipeline_mode<synchronous>, transform_indices = @transform_17, window_bounds = array<i64: 6, 96>}, {pipeline_mode = #tpu.pipeline_mode<synchronous>, transform_indices = @transform_18, window_bounds = array<i64: 256, 16>}, {pipeline_mode = #tpu.pipeline_mode<synchronous>, transform_indices = @transform_19, window_bounds = array<i64: 16, 256>}, {pipeline_mode = #tpu.pipeline_mode<synchronous>, transform_indices = @transform_20, window_bounds = array<i64: 256, 32>}, {pipeline_mode = #tpu.pipeline_mode<synchronous>, transform_indices = @transform_21, window_bounds = array<i64: 32, 256>}, {pipeline_mode = #tpu.pipeline_mode<synchronous>, transform_indices = @transform_22, window_bounds = array<i64: 512, 64>}, {pipeline_mode = #tpu.pipeline_mode<synchronous>, transform_indices = @transform_23, window_bounds = array<i64: 64, 512>}, {pipeline_mode = #tpu.pipeline_mode<synchronous>, transform_indices = @transform_24, window_bounds = array<i64: 4, 512, 10>}, {pipeline_mode = #tpu.pipeline_mode<synchronous>, transform_indices = @transform_25, window_bounds = array<i64: 1, 10>}, {pipeline_mode = #tpu.pipeline_mode<synchronous>, transform_indices = @transform_26, window_bounds = array<i64: 2, 10>}]} {
    %cst = arith.constant 0.000000e+00 : bf16
    %0 = vector.broadcast %cst : bf16 to vector<2x1x96xbf16>
    %c0 = arith.constant 0 : index
    %c0_0 = arith.constant 0 : index
    %c0_1 = arith.constant 0 : index
    %1 = vector.load %arg28[%c0, %c0_0, %c0_1] : memref<2x18x96xbf16, #tpu.memory_space<vmem>>, vector<2x1x96xbf16>
    tpu.vector_store %arg28[%c0, %c0_0, %c0_1], %0 {strides = array<i32>} : memref<2x18x96xbf16, #tpu.memory_space<vmem>>, vector<2x1x96xbf16>,
    %cst_2 = arith.constant 0.000000e+00 : bf16
    %2 = vector.broadcast %cst_2 : bf16 to vector<2x1x96xbf16>
    %c0_3 = arith.constant 0 : index
    %c17 = arith.constant 17 : index
    %c0_4 = arith.constant 0 : index
    %3 = vector.load %arg28[%c0_3, %c17, %c0_4] : memref<2x18x96xbf16, #tpu.memory_space<vmem>>, vector<2x1x96xbf16>
    tpu.vector_store %arg28[%c0_3, %c17, %c0_4], %2 {strides = array<i32>} : memref<2x18x96xbf16, #tpu.memory_space<vmem>>, vector<2x1x96xbf16>,
    %cst_5 = arith.constant 0.000000e+00 : bf16
    %4 = vector.broadcast %cst_5 : bf16 to vector<2x1x256xbf16>
    %c0_6 = arith.constant 0 : index
    %c0_7 = arith.constant 0 : index
    %c0_8 = arith.constant 0 : index
    %5 = vector.load %arg29[%c0_6, %c0_7, %c0_8] : memref<2x10x256xbf16, #tpu.memory_space<vmem>>, vector<2x1x256xbf16>
    tpu.vector_store %arg29[%c0_6, %c0_7, %c0_8], %4 {strides = array<i32>} : memref<2x10x256xbf16, #tpu.memory_space<vmem>>, vector<2x1x256xbf16>,
    %cst_9 = arith.constant 0.000000e+00 : bf16
    %6 = vector.broadcast %cst_9 : bf16 to vector<2x1x256xbf16>
    %c0_10 = arith.constant 0 : index
    %c9 = arith.constant 9 : index
    %c0_11 = arith.constant 0 : index
    %7 = vector.load %arg29[%c0_10, %c9, %c0_11] : memref<2x10x256xbf16, #tpu.memory_space<vmem>>, vector<2x1x256xbf16>
    tpu.vector_store %arg29[%c0_10, %c9, %c0_11], %6 {strides = array<i32>} : memref<2x10x256xbf16, #tpu.memory_space<vmem>>, vector<2x1x256xbf16>,
    %cst_12 = arith.constant 0.000000e+00 : bf16
    %8 = vector.broadcast %cst_12 : bf16 to vector<2x1x256xbf16>
    %c0_13 = arith.constant 0 : index
    %c0_14 = arith.constant 0 : index
    %c0_15 = arith.constant 0 : index
    %9 = vector.load %arg30[%c0_13, %c0_14, %c0_15] : memref<2x10x256xbf16, #tpu.memory_space<vmem>>, vector<2x1x256xbf16>
    tpu.vector_store %arg30[%c0_13, %c0_14, %c0_15], %8 {strides = array<i32>} : memref<2x10x256xbf16, #tpu.memory_space<vmem>>, vector<2x1x256xbf16>,
    %cst_16 = arith.constant 0.000000e+00 : bf16
    %10 = vector.broadcast %cst_16 : bf16 to vector<2x1x256xbf16>
    %c0_17 = arith.constant 0 : index
    %c9_18 = arith.constant 9 : index
    %c0_19 = arith.constant 0 : index
    %11 = vector.load %arg30[%c0_17, %c9_18, %c0_19] : memref<2x10x256xbf16, #tpu.memory_space<vmem>>, vector<2x1x256xbf16>
    tpu.vector_store %arg30[%c0_17, %c9_18, %c0_19], %10 {strides = array<i32>} : memref<2x10x256xbf16, #tpu.memory_space<vmem>>, vector<2x1x256xbf16>,
    %c0_20 = arith.constant 0 : index
    %c0_21 = arith.constant 0 : index
    %12 = vector.load %arg1[%c0_20, %c0_21] : memref<32x2352xbf16, #tpu.memory_space<vmem>>, vector<32x2352xbf16>
    %c0_22 = arith.constant 0 : index
    %c0_23 = arith.constant 0 : index
    %13 = vector.load %arg2[%c0_22, %c0_23] : memref<2352x96xbf16, #tpu.memory_space<vmem>>, vector<2352x96xbf16>
    %cst_24 = arith.constant dense<0.000000e+00> : vector<32x96xf32>
    %14 = tpu.matmul %12, %13, %cst_24 {dimension_numbers = #tpu.dot_dimension_numbers<[1], [0], [0], [1], [0, 0, 1, 1], [], []>} : vector<32x2352xbf16>, vector<2352x96xbf16>, vector<32x96xf32> -> vector<32x96xf32>
    %cst_25 = arith.constant dense<0.000000e+00> : vector<96xf32>
    %15 = vector.multi_reduction <add>, %14, %cst_25 [0] : vector<32x96xf32> to vector<96xf32>
    %16 = vector.shape_cast %15 : vector<96xf32> to vector<1x96xf32>
    %17 = arith.mulf %14, %14 : vector<32x96xf32>
    %cst_26 = arith.constant dense<0.000000e+00> : vector<96xf32>
    %18 = vector.multi_reduction <add>, %17, %cst_26 [0] : vector<32x96xf32> to vector<96xf32>
    %19 = vector.shape_cast %18 : vector<96xf32> to vector<1x96xf32>
    %c0_27 = arith.constant 0 : index
    %c0_28 = arith.constant 0 : index
    %20 = vector.load %arg17[%c0_27, %c0_28] : memref<96x6xf32, #tpu.memory_space<vmem>>, vector<96x6xf32>
    %cst_29 = arith.constant dense<0.000000e+00> : vector<1x6xf32>
    %21 = tpu.matmul %16, %20, %cst_29 {dimension_numbers = #tpu.dot_dimension_numbers<[1], [0], [0], [1], [0, 0, 1, 1], [], []>} : vector<1x96xf32>, vector<96x6xf32>, vector<1x6xf32> -> vector<1x6xf32>
    %c0_30 = arith.constant 0 : index
    %c0_31 = arith.constant 0 : index
    %22 = vector.load %arg17[%c0_30, %c0_31] : memref<96x6xf32, #tpu.memory_space<vmem>>, vector<96x6xf32>
    %cst_32 = arith.constant dense<0.000000e+00> : vector<1x6xf32>
    %23 = tpu.matmul %19, %22, %cst_32 {dimension_numbers = #tpu.dot_dimension_numbers<[1], [0], [0], [1], [0, 0, 1, 1], [], []>} : vector<1x96xf32>, vector<96x6xf32>, vector<1x6xf32> -> vector<1x6xf32>
    %cst_33 = arith.constant 0.001953125 : f32
    %24 = vector.broadcast %cst_33 : f32 to vector<1x6xf32>
    %25 = arith.mulf %21, %24 : vector<1x6xf32>
    %cst_34 = arith.constant 0.001953125 : f32
    %26 = vector.broadcast %cst_34 : f32 to vector<1x6xf32>
    %27 = arith.mulf %23, %26 : vector<1x6xf32>
    %28 = arith.mulf %25, %25 : vector<1x6xf32>
    %29 = arith.subf %27, %28 : vector<1x6xf32>
    %c0_35 = arith.constant 0 : index
    %c0_36 = arith.constant 0 : index
    %30 = vector.load %arg7[%c0_35, %c0_36] : memref<1x6xf32, #tpu.memory_space<vmem>>, vector<1x6xf32>
    %cst_37 = arith.constant 9.99999974E-6 : f32
    %31 = vector.broadcast %cst_37 : f32 to vector<1x6xf32>
    %32 = arith.addf %29, %31 : vector<1x6xf32>
    %33 = math.rsqrt %32 : vector<1x6xf32>
    %34 = arith.mulf %30, %33 : vector<1x6xf32>
    %c0_38 = arith.constant 0 : index
    %c0_39 = arith.constant 0 : index
    %35 = vector.load %arg8[%c0_38, %c0_39] : memref<1x6xf32, #tpu.memory_space<vmem>>, vector<1x6xf32>
    %36 = arith.mulf %25, %34 : vector<1x6xf32>
    %37 = arith.subf %35, %36 : vector<1x6xf32>
    %c0_40 = arith.constant 0 : index
    %c0_41 = arith.constant 0 : index
    %38 = vector.load %arg18[%c0_40, %c0_41] : memref<6x96xf32, #tpu.memory_space<vmem>>, vector<6x96xf32>
    %cst_42 = arith.constant dense<0.000000e+00> : vector<1x96xf32>
    %39 = tpu.matmul %34, %38, %cst_42 {dimension_numbers = #tpu.dot_dimension_numbers<[1], [0], [0], [1], [0, 0, 1, 1], [], []>} : vector<1x6xf32>, vector<6x96xf32>, vector<1x96xf32> -> vector<1x96xf32>
    %c0_43 = arith.constant 0 : index
    %c0_44 = arith.constant 0 : index
    %40 = vector.load %arg18[%c0_43, %c0_44] : memref<6x96xf32, #tpu.memory_space<vmem>>, vector<6x96xf32>
    %cst_45 = arith.constant dense<0.000000e+00> : vector<1x96xf32>
    %41 = tpu.matmul %37, %40, %cst_45 {dimension_numbers = #tpu.dot_dimension_numbers<[1], [0], [0], [1], [0, 0, 1, 1], [], []>} : vector<1x6xf32>, vector<6x96xf32>, vector<1x96xf32> -> vector<1x96xf32>
    %42 = vector.broadcast %39 : vector<1x96xf32> to vector<32x96xf32>
    %43 = arith.mulf %14, %42 : vector<32x96xf32>
    %44 = vector.broadcast %41 : vector<1x96xf32> to vector<32x96xf32>
    %45 = arith.addf %43, %44 : vector<32x96xf32>
    %cst_46 = arith.constant 0.000000e+00 : f32
    %46 = vector.broadcast %cst_46 : f32 to vector<32x96xf32>
    %47 = arith.maximumf %45, %46 : vector<32x96xf32>
    %48 = arith.truncf %47 : vector<32x96xf32> to vector<32x96xbf16>
    %49 = vector.shape_cast %48 : vector<32x96xbf16> to vector<2x16x96xbf16>
    %c0_47 = arith.constant 0 : index
    %c1 = arith.constant 1 : index
    %c0_48 = arith.constant 0 : index
    %50 = vector.load %arg28[%c0_47, %c1, %c0_48] : memref<2x18x96xbf16, #tpu.memory_space<vmem>>, vector<2x16x96xbf16>
    tpu.vector_store %arg28[%c0_47, %c1, %c0_48], %49 {strides = array<i32>} : memref<2x18x96xbf16, #tpu.memory_space<vmem>>, vector<2x16x96xbf16>,
    %c0_49 = arith.constant 0 : index
    %c0_50 = arith.constant 0 : index
    %c0_51 = arith.constant 0 : index
    %51 = vector.load %arg28[%c0_49, %c0_50, %c0_51] : memref<2x18x96xbf16, #tpu.memory_space<vmem>>, vector<2x16x96xbf16>
    %52 = vector.shape_cast %51 : vector<2x16x96xbf16> to vector<32x96xbf16>
    %c0_52 = arith.constant 0 : index
    %c0_53 = arith.constant 0 : index
    %c0_54 = arith.constant 0 : index
    %53 = vector.load %arg3[%c0_52, %c0_53, %c0_54] : memref<3x96x96xbf16, #tpu.memory_space<vmem>>, vector<1x96x96xbf16>
    %54 = vector.shape_cast %53 : vector<1x96x96xbf16> to vector<96x96xbf16>
    %cst_55 = arith.constant dense<0.000000e+00> : vector<32x96xf32>
    %55 = tpu.matmul %52, %54, %cst_55 {dimension_numbers = #tpu.dot_dimension_numbers<[1], [0], [0], [1], [0, 0, 1, 1], [], []>} : vector<32x96xbf16>, vector<96x96xbf16>, vector<32x96xf32> -> vector<32x96xf32>
    %c0_56 = arith.constant 0 : index
    %c1_57 = arith.constant 1 : index
    %c0_58 = arith.constant 0 : index
    %56 = vector.load %arg28[%c0_56, %c1_57, %c0_58] : memref<2x18x96xbf16, #tpu.memory_space<vmem>>, vector<2x16x96xbf16>
    %57 = vector.shape_cast %56 : vector<2x16x96xbf16> to vector<32x96xbf16>
    %c1_59 = arith.constant 1 : index
    %c0_60 = arith.constant 0 : index
    %c0_61 = arith.constant 0 : index
    %58 = vector.load %arg3[%c1_59, %c0_60, %c0_61] : memref<3x96x96xbf16, #tpu.memory_space<vmem>>, vector<1x96x96xbf16>
    %59 = vector.shape_cast %58 : vector<1x96x96xbf16> to vector<96x96xbf16>
    %cst_62 = arith.constant dense<0.000000e+00> : vector<32x96xf32>
    %60 = tpu.matmul %57, %59, %cst_62 {dimension_numbers = #tpu.dot_dimension_numbers<[1], [0], [0], [1], [0, 0, 1, 1], [], []>} : vector<32x96xbf16>, vector<96x96xbf16>, vector<32x96xf32> -> vector<32x96xf32>
    %61 = arith.addf %55, %60 : vector<32x96xf32>
    %c0_63 = arith.constant 0 : index
    %c2 = arith.constant 2 : index
    %c0_64 = arith.constant 0 : index
    %62 = vector.load %arg28[%c0_63, %c2, %c0_64] : memref<2x18x96xbf16, #tpu.memory_space<vmem>>, vector<2x16x96xbf16>
    %63 = vector.shape_cast %62 : vector<2x16x96xbf16> to vector<32x96xbf16>
    %c2_65 = arith.constant 2 : index
    %c0_66 = arith.constant 0 : index
    %c0_67 = arith.constant 0 : index
    %64 = vector.load %arg3[%c2_65, %c0_66, %c0_67] : memref<3x96x96xbf16, #tpu.memory_space<vmem>>, vector<1x96x96xbf16>
    %65 = vector.shape_cast %64 : vector<1x96x96xbf16> to vector<96x96xbf16>
    %cst_68 = arith.constant dense<0.000000e+00> : vector<32x96xf32>
    %66 = tpu.matmul %63, %65, %cst_68 {dimension_numbers = #tpu.dot_dimension_numbers<[1], [0], [0], [1], [0, 0, 1, 1], [], []>} : vector<32x96xbf16>, vector<96x96xbf16>, vector<32x96xf32> -> vector<32x96xf32>
    %67 = arith.addf %61, %66 : vector<32x96xf32>
    %cst_69 = arith.constant dense<0.000000e+00> : vector<96xf32>
    %68 = vector.multi_reduction <add>, %67, %cst_69 [0] : vector<32x96xf32> to vector<96xf32>
    %69 = vector.shape_cast %68 : vector<96xf32> to vector<1x96xf32>
    %70 = arith.mulf %67, %67 : vector<32x96xf32>
    %cst_70 = arith.constant dense<0.000000e+00> : vector<96xf32>
    %71 = vector.multi_reduction <add>, %70, %cst_70 [0] : vector<32x96xf32> to vector<96xf32>
    %72 = vector.shape_cast %71 : vector<96xf32> to vector<1x96xf32>
    %c0_71 = arith.constant 0 : index
    %c0_72 = arith.constant 0 : index
    %73 = vector.load %arg17[%c0_71, %c0_72] : memref<96x6xf32, #tpu.memory_space<vmem>>, vector<96x6xf32>
    %cst_73 = arith.constant dense<0.000000e+00> : vector<1x6xf32>
    %74 = tpu.matmul %69, %73, %cst_73 {dimension_numbers = #tpu.dot_dimension_numbers<[1], [0], [0], [1], [0, 0, 1, 1], [], []>} : vector<1x96xf32>, vector<96x6xf32>, vector<1x6xf32> -> vector<1x6xf32>
    %c0_74 = arith.constant 0 : index
    %c0_75 = arith.constant 0 : index
    %75 = vector.load %arg17[%c0_74, %c0_75] : memref<96x6xf32, #tpu.memory_space<vmem>>, vector<96x6xf32>
    %cst_76 = arith.constant dense<0.000000e+00> : vector<1x6xf32>
    %76 = tpu.matmul %72, %75, %cst_76 {dimension_numbers = #tpu.dot_dimension_numbers<[1], [0], [0], [1], [0, 0, 1, 1], [], []>} : vector<1x96xf32>, vector<96x6xf32>, vector<1x6xf32> -> vector<1x6xf32>
    %cst_77 = arith.constant 0.001953125 : f32
    %77 = vector.broadcast %cst_77 : f32 to vector<1x6xf32>
    %78 = arith.mulf %74, %77 : vector<1x6xf32>
    %cst_78 = arith.constant 0.001953125 : f32
    %79 = vector.broadcast %cst_78 : f32 to vector<1x6xf32>
    %80 = arith.mulf %76, %79 : vector<1x6xf32>
    %81 = arith.mulf %78, %78 : vector<1x6xf32>
    %82 = arith.subf %80, %81 : vector<1x6xf32>
    %c0_79 = arith.constant 0 : index
    %c0_80 = arith.constant 0 : index
    %83 = vector.load %arg9[%c0_79, %c0_80] : memref<1x6xf32, #tpu.memory_space<vmem>>, vector<1x6xf32>
    %cst_81 = arith.constant 9.99999974E-6 : f32
    %84 = vector.broadcast %cst_81 : f32 to vector<1x6xf32>
    %85 = arith.addf %82, %84 : vector<1x6xf32>
    %86 = math.rsqrt %85 : vector<1x6xf32>
    %87 = arith.mulf %83, %86 : vector<1x6xf32>
    %c0_82 = arith.constant 0 : index
    %c0_83 = arith.constant 0 : index
    %88 = vector.load %arg10[%c0_82, %c0_83] : memref<1x6xf32, #tpu.memory_space<vmem>>, vector<1x6xf32>
    %89 = arith.mulf %78, %87 : vector<1x6xf32>
    %90 = arith.subf %88, %89 : vector<1x6xf32>
    %c0_84 = arith.constant 0 : index
    %c0_85 = arith.constant 0 : index
    %91 = vector.load %arg18[%c0_84, %c0_85] : memref<6x96xf32, #tpu.memory_space<vmem>>, vector<6x96xf32>
    %cst_86 = arith.constant dense<0.000000e+00> : vector<1x96xf32>
    %92 = tpu.matmul %87, %91, %cst_86 {dimension_numbers = #tpu.dot_dimension_numbers<[1], [0], [0], [1], [0, 0, 1, 1], [], []>} : vector<1x6xf32>, vector<6x96xf32>, vector<1x96xf32> -> vector<1x96xf32>
    %c0_87 = arith.constant 0 : index
    %c0_88 = arith.constant 0 : index
    %93 = vector.load %arg18[%c0_87, %c0_88] : memref<6x96xf32, #tpu.memory_space<vmem>>, vector<6x96xf32>
    %cst_89 = arith.constant dense<0.000000e+00> : vector<1x96xf32>
    %94 = tpu.matmul %90, %93, %cst_89 {dimension_numbers = #tpu.dot_dimension_numbers<[1], [0], [0], [1], [0, 0, 1, 1], [], []>} : vector<1x6xf32>, vector<6x96xf32>, vector<1x96xf32> -> vector<1x96xf32>
    %95 = vector.broadcast %92 : vector<1x96xf32> to vector<32x96xf32>
    %96 = arith.mulf %67, %95 : vector<32x96xf32>
    %97 = vector.broadcast %94 : vector<1x96xf32> to vector<32x96xf32>
    %98 = arith.addf %96, %97 : vector<32x96xf32>
    %cst_90 = arith.constant 0.000000e+00 : f32
    %99 = vector.broadcast %cst_90 : f32 to vector<32x96xf32>
    %100 = arith.maximumf %98, %99 : vector<32x96xf32>
    %101 = arith.truncf %100 : vector<32x96xf32> to vector<32x96xbf16>
    %102 = vector.shape_cast %101 : vector<32x96xbf16> to vector<2x16x96xbf16>
    %c0_91 = arith.constant 0 : index
    %c1_92 = arith.constant 1 : index
    %c0_93 = arith.constant 0 : index
    %103 = vector.load %arg28[%c0_91, %c1_92, %c0_93] : memref<2x18x96xbf16, #tpu.memory_space<vmem>>, vector<2x16x96xbf16>
    tpu.vector_store %arg28[%c0_91, %c1_92, %c0_93], %102 {strides = array<i32>} : memref<2x18x96xbf16, #tpu.memory_space<vmem>>, vector<2x16x96xbf16>,
    %c0_94 = arith.constant 0 : index
    %c0_95 = arith.constant 0 : index
    %c0_96 = arith.constant 0 : index
    %104 = vector.load %arg28[%c0_94, %c0_95, %c0_96] : memref<2x18x96xbf16, #tpu.memory_space<vmem>>, vector<2x16x96xbf16>
    %105 = vector.shape_cast %104 : vector<2x16x96xbf16> to vector<32x96xbf16>
    %c0_97 = arith.constant 0 : index
    %c0_98 = arith.constant 0 : index
    %c0_99 = arith.constant 0 : index
    %106 = vector.load %arg4[%c0_97, %c0_98, %c0_99] : memref<3x96x256xbf16, #tpu.memory_space<vmem>>, vector<1x96x256xbf16>
    %107 = vector.shape_cast %106 : vector<1x96x256xbf16> to vector<96x256xbf16>
    %cst_100 = arith.constant dense<0.000000e+00> : vector<32x256xf32>
    %108 = tpu.matmul %105, %107, %cst_100 {dimension_numbers = #tpu.dot_dimension_numbers<[1], [0], [0], [1], [0, 0, 1, 1], [], []>} : vector<32x96xbf16>, vector<96x256xbf16>, vector<32x256xf32> -> vector<32x256xf32>
    %c0_101 = arith.constant 0 : index
    %c1_102 = arith.constant 1 : index
    %c0_103 = arith.constant 0 : index
    %109 = vector.load %arg28[%c0_101, %c1_102, %c0_103] : memref<2x18x96xbf16, #tpu.memory_space<vmem>>, vector<2x16x96xbf16>
    %110 = vector.shape_cast %109 : vector<2x16x96xbf16> to vector<32x96xbf16>
    %c1_104 = arith.constant 1 : index
    %c0_105 = arith.constant 0 : index
    %c0_106 = arith.constant 0 : index
    %111 = vector.load %arg4[%c1_104, %c0_105, %c0_106] : memref<3x96x256xbf16, #tpu.memory_space<vmem>>, vector<1x96x256xbf16>
    %112 = vector.shape_cast %111 : vector<1x96x256xbf16> to vector<96x256xbf16>
    %cst_107 = arith.constant dense<0.000000e+00> : vector<32x256xf32>
    %113 = tpu.matmul %110, %112, %cst_107 {dimension_numbers = #tpu.dot_dimension_numbers<[1], [0], [0], [1], [0, 0, 1, 1], [], []>} : vector<32x96xbf16>, vector<96x256xbf16>, vector<32x256xf32> -> vector<32x256xf32>
    %114 = arith.addf %108, %113 : vector<32x256xf32>
    %c0_108 = arith.constant 0 : index
    %c2_109 = arith.constant 2 : index
    %c0_110 = arith.constant 0 : index
    %115 = vector.load %arg28[%c0_108, %c2_109, %c0_110] : memref<2x18x96xbf16, #tpu.memory_space<vmem>>, vector<2x16x96xbf16>
    %116 = vector.shape_cast %115 : vector<2x16x96xbf16> to vector<32x96xbf16>
    %c2_111 = arith.constant 2 : index
    %c0_112 = arith.constant 0 : index
    %c0_113 = arith.constant 0 : index
    %117 = vector.load %arg4[%c2_111, %c0_112, %c0_113] : memref<3x96x256xbf16, #tpu.memory_space<vmem>>, vector<1x96x256xbf16>
    %118 = vector.shape_cast %117 : vector<1x96x256xbf16> to vector<96x256xbf16>
    %cst_114 = arith.constant dense<0.000000e+00> : vector<32x256xf32>
    %119 = tpu.matmul %116, %118, %cst_114 {dimension_numbers = #tpu.dot_dimension_numbers<[1], [0], [0], [1], [0, 0, 1, 1], [], []>} : vector<32x96xbf16>, vector<96x256xbf16>, vector<32x256xf32> -> vector<32x256xf32>
    %120 = arith.addf %114, %119 : vector<32x256xf32>
    %cst_115 = arith.constant dense<0.000000e+00> : vector<256xf32>
    %121 = vector.multi_reduction <add>, %120, %cst_115 [0] : vector<32x256xf32> to vector<256xf32>
    %122 = vector.shape_cast %121 : vector<256xf32> to vector<1x256xf32>
    %123 = arith.mulf %120, %120 : vector<32x256xf32>
    %cst_116 = arith.constant dense<0.000000e+00> : vector<256xf32>
    %124 = vector.multi_reduction <add>, %123, %cst_116 [0] : vector<32x256xf32> to vector<256xf32>
    %125 = vector.shape_cast %124 : vector<256xf32> to vector<1x256xf32>
    %c0_117 = arith.constant 0 : index
    %c0_118 = arith.constant 0 : index
    %126 = vector.load %arg19[%c0_117, %c0_118] : memref<256x16xf32, #tpu.memory_space<vmem>>, vector<256x16xf32>
    %cst_119 = arith.constant dense<0.000000e+00> : vector<1x16xf32>
    %127 = tpu.matmul %122, %126, %cst_119 {dimension_numbers = #tpu.dot_dimension_numbers<[1], [0], [0], [1], [0, 0, 1, 1], [], []>} : vector<1x256xf32>, vector<256x16xf32>, vector<1x16xf32> -> vector<1x16xf32>
    %c0_120 = arith.constant 0 : index
    %c0_121 = arith.constant 0 : index
    %128 = vector.load %arg19[%c0_120, %c0_121] : memref<256x16xf32, #tpu.memory_space<vmem>>, vector<256x16xf32>
    %cst_122 = arith.constant dense<0.000000e+00> : vector<1x16xf32>
    %129 = tpu.matmul %125, %128, %cst_122 {dimension_numbers = #tpu.dot_dimension_numbers<[1], [0], [0], [1], [0, 0, 1, 1], [], []>} : vector<1x256xf32>, vector<256x16xf32>, vector<1x16xf32> -> vector<1x16xf32>
    %cst_123 = arith.constant 0.001953125 : f32
    %130 = vector.broadcast %cst_123 : f32 to vector<1x16xf32>
    %131 = arith.mulf %127, %130 : vector<1x16xf32>
    %cst_124 = arith.constant 0.001953125 : f32
    %132 = vector.broadcast %cst_124 : f32 to vector<1x16xf32>
    %133 = arith.mulf %129, %132 : vector<1x16xf32>
    %134 = arith.mulf %131, %131 : vector<1x16xf32>
    %135 = arith.subf %133, %134 : vector<1x16xf32>
    %c0_125 = arith.constant 0 : index
    %c0_126 = arith.constant 0 : index
    %136 = vector.load %arg11[%c0_125, %c0_126] : memref<1x16xf32, #tpu.memory_space<vmem>>, vector<1x16xf32>
    %cst_127 = arith.constant 9.99999974E-6 : f32
    %137 = vector.broadcast %cst_127 : f32 to vector<1x16xf32>
    %138 = arith.addf %135, %137 : vector<1x16xf32>
    %139 = math.rsqrt %138 : vector<1x16xf32>
    %140 = arith.mulf %136, %139 : vector<1x16xf32>
    %c0_128 = arith.constant 0 : index
    %c0_129 = arith.constant 0 : index
    %141 = vector.load %arg12[%c0_128, %c0_129] : memref<1x16xf32, #tpu.memory_space<vmem>>, vector<1x16xf32>
    %142 = arith.mulf %131, %140 : vector<1x16xf32>
    %143 = arith.subf %141, %142 : vector<1x16xf32>
    %c0_130 = arith.constant 0 : index
    %c0_131 = arith.constant 0 : index
    %144 = vector.load %arg20[%c0_130, %c0_131] : memref<16x256xf32, #tpu.memory_space<vmem>>, vector<16x256xf32>
    %cst_132 = arith.constant dense<0.000000e+00> : vector<1x256xf32>
    %145 = tpu.matmul %140, %144, %cst_132 {dimension_numbers = #tpu.dot_dimension_numbers<[1], [0], [0], [1], [0, 0, 1, 1], [], []>} : vector<1x16xf32>, vector<16x256xf32>, vector<1x256xf32> -> vector<1x256xf32>
    %c0_133 = arith.constant 0 : index
    %c0_134 = arith.constant 0 : index
    %146 = vector.load %arg20[%c0_133, %c0_134] : memref<16x256xf32, #tpu.memory_space<vmem>>, vector<16x256xf32>
    %cst_135 = arith.constant dense<0.000000e+00> : vector<1x256xf32>
    %147 = tpu.matmul %143, %146, %cst_135 {dimension_numbers = #tpu.dot_dimension_numbers<[1], [0], [0], [1], [0, 0, 1, 1], [], []>} : vector<1x16xf32>, vector<16x256xf32>, vector<1x256xf32> -> vector<1x256xf32>
    %148 = vector.broadcast %145 : vector<1x256xf32> to vector<32x256xf32>
    %149 = arith.mulf %120, %148 : vector<32x256xf32>
    %150 = vector.broadcast %147 : vector<1x256xf32> to vector<32x256xf32>
    %151 = arith.addf %149, %150 : vector<32x256xf32>
    %cst_136 = arith.constant 0.000000e+00 : f32
    %152 = vector.broadcast %cst_136 : f32 to vector<32x256xf32>
    %153 = arith.maximumf %151, %152 : vector<32x256xf32>
    %154 = vector.shape_cast %153 : vector<32x256xf32> to vector<16x2x256xf32>
    %155 = vector.extract_strided_slice %154 {offsets = [0, 0, 0], sizes = [16, 1, 256], strides = [1, 1, 1]} : vector<16x2x256xf32> to vector<16x1x256xf32>
    %156 = vector.shape_cast %155 : vector<16x1x256xf32> to vector<16x256xf32>
    %157 = vector.extract_strided_slice %154 {offsets = [0, 1, 0], sizes = [16, 1, 256], strides = [1, 1, 1]} : vector<16x2x256xf32> to vector<16x1x256xf32>
    %158 = vector.shape_cast %157 : vector<16x1x256xf32> to vector<16x256xf32>
    %159 = arith.maximumf %156, %158 : vector<16x256xf32>
    %c240_i32 = arith.constant 240 : i32
    %160 = tpu.dynamic_rotate %159 by %c240_i32 dim 1 : vector<16x256xf32>, i32 -> vector<16x256xf32>
    %161 = arith.maximumf %159, %160 : vector<16x256xf32>
    %162 = arith.truncf %161 : vector<16x256xf32> to vector<16x256xbf16>
    %163 = vector.shape_cast %162 : vector<16x256xbf16> to vector<2x8x256xbf16>
    %c0_137 = arith.constant 0 : index
    %c1_138 = arith.constant 1 : index
    %c0_139 = arith.constant 0 : index
    %164 = vector.load %arg29[%c0_137, %c1_138, %c0_139] : memref<2x10x256xbf16, #tpu.memory_space<vmem>>, vector<2x8x256xbf16>
    tpu.vector_store %arg29[%c0_137, %c1_138, %c0_139], %163 {strides = array<i32>} : memref<2x10x256xbf16, #tpu.memory_space<vmem>>, vector<2x8x256xbf16>,
    %c0_140 = arith.constant 0 : index
    %c0_141 = arith.constant 0 : index
    %c0_142 = arith.constant 0 : index
    %165 = vector.load %arg29[%c0_140, %c0_141, %c0_142] : memref<2x10x256xbf16, #tpu.memory_space<vmem>>, vector<2x8x256xbf16>
    %166 = vector.shape_cast %165 : vector<2x8x256xbf16> to vector<16x256xbf16>
    %c0_143 = arith.constant 0 : index
    %c0_144 = arith.constant 0 : index
    %c0_145 = arith.constant 0 : index
    %167 = vector.load %arg5[%c0_143, %c0_144, %c0_145] : memref<3x256x256xbf16, #tpu.memory_space<vmem>>, vector<1x256x256xbf16>
    %168 = vector.shape_cast %167 : vector<1x256x256xbf16> to vector<256x256xbf16>
    %cst_146 = arith.constant dense<0.000000e+00> : vector<16x256xf32>
    %169 = tpu.matmul %166, %168, %cst_146 {dimension_numbers = #tpu.dot_dimension_numbers<[1], [0], [0], [1], [0, 0, 1, 1], [], []>} : vector<16x256xbf16>, vector<256x256xbf16>, vector<16x256xf32> -> vector<16x256xf32>
    %c0_147 = arith.constant 0 : index
    %c1_148 = arith.constant 1 : index
    %c0_149 = arith.constant 0 : index
    %170 = vector.load %arg29[%c0_147, %c1_148, %c0_149] : memref<2x10x256xbf16, #tpu.memory_space<vmem>>, vector<2x8x256xbf16>
    %171 = vector.shape_cast %170 : vector<2x8x256xbf16> to vector<16x256xbf16>
    %c1_150 = arith.constant 1 : index
    %c0_151 = arith.constant 0 : index
    %c0_152 = arith.constant 0 : index
    %172 = vector.load %arg5[%c1_150, %c0_151, %c0_152] : memref<3x256x256xbf16, #tpu.memory_space<vmem>>, vector<1x256x256xbf16>
    %173 = vector.shape_cast %172 : vector<1x256x256xbf16> to vector<256x256xbf16>
    %cst_153 = arith.constant dense<0.000000e+00> : vector<16x256xf32>
    %174 = tpu.matmul %171, %173, %cst_153 {dimension_numbers = #tpu.dot_dimension_numbers<[1], [0], [0], [1], [0, 0, 1, 1], [], []>} : vector<16x256xbf16>, vector<256x256xbf16>, vector<16x256xf32> -> vector<16x256xf32>
    %175 = arith.addf %169, %174 : vector<16x256xf32>
    %c0_154 = arith.constant 0 : index
    %c2_155 = arith.constant 2 : index
    %c0_156 = arith.constant 0 : index
    %176 = vector.load %arg29[%c0_154, %c2_155, %c0_156] : memref<2x10x256xbf16, #tpu.memory_space<vmem>>, vector<2x8x256xbf16>
    %177 = vector.shape_cast %176 : vector<2x8x256xbf16> to vector<16x256xbf16>
    %c2_157 = arith.constant 2 : index
    %c0_158 = arith.constant 0 : index
    %c0_159 = arith.constant 0 : index
    %178 = vector.load %arg5[%c2_157, %c0_158, %c0_159] : memref<3x256x256xbf16, #tpu.memory_space<vmem>>, vector<1x256x256xbf16>
    %179 = vector.shape_cast %178 : vector<1x256x256xbf16> to vector<256x256xbf16>
    %cst_160 = arith.constant dense<0.000000e+00> : vector<16x256xf32>
    %180 = tpu.matmul %177, %179, %cst_160 {dimension_numbers = #tpu.dot_dimension_numbers<[1], [0], [0], [1], [0, 0, 1, 1], [], []>} : vector<16x256xbf16>, vector<256x256xbf16>, vector<16x256xf32> -> vector<16x256xf32>
    %181 = arith.addf %175, %180 : vector<16x256xf32>
    %cst_161 = arith.constant dense<0.000000e+00> : vector<256xf32>
    %182 = vector.multi_reduction <add>, %181, %cst_161 [0] : vector<16x256xf32> to vector<256xf32>
    %183 = vector.shape_cast %182 : vector<256xf32> to vector<1x256xf32>
    %184 = arith.mulf %181, %181 : vector<16x256xf32>
    %cst_162 = arith.constant dense<0.000000e+00> : vector<256xf32>
    %185 = vector.multi_reduction <add>, %184, %cst_162 [0] : vector<16x256xf32> to vector<256xf32>
    %186 = vector.shape_cast %185 : vector<256xf32> to vector<1x256xf32>
    %c0_163 = arith.constant 0 : index
    %c0_164 = arith.constant 0 : index
    %187 = vector.load %arg21[%c0_163, %c0_164] : memref<256x32xf32, #tpu.memory_space<vmem>>, vector<256x32xf32>
    %cst_165 = arith.constant dense<0.000000e+00> : vector<1x32xf32>
    %188 = tpu.matmul %183, %187, %cst_165 {dimension_numbers = #tpu.dot_dimension_numbers<[1], [0], [0], [1], [0, 0, 1, 1], [], []>} : vector<1x256xf32>, vector<256x32xf32>, vector<1x32xf32> -> vector<1x32xf32>
    %c0_166 = arith.constant 0 : index
    %c0_167 = arith.constant 0 : index
    %189 = vector.load %arg21[%c0_166, %c0_167] : memref<256x32xf32, #tpu.memory_space<vmem>>, vector<256x32xf32>
    %cst_168 = arith.constant dense<0.000000e+00> : vector<1x32xf32>
    %190 = tpu.matmul %186, %189, %cst_168 {dimension_numbers = #tpu.dot_dimension_numbers<[1], [0], [0], [1], [0, 0, 1, 1], [], []>} : vector<1x256xf32>, vector<256x32xf32>, vector<1x32xf32> -> vector<1x32xf32>
    %cst_169 = arith.constant 7.812500e-03 : f32
    %191 = vector.broadcast %cst_169 : f32 to vector<1x32xf32>
    %192 = arith.mulf %188, %191 : vector<1x32xf32>
    %cst_170 = arith.constant 7.812500e-03 : f32
    %193 = vector.broadcast %cst_170 : f32 to vector<1x32xf32>
    %194 = arith.mulf %190, %193 : vector<1x32xf32>
    %195 = arith.mulf %192, %192 : vector<1x32xf32>
    %196 = arith.subf %194, %195 : vector<1x32xf32>
    %c0_171 = arith.constant 0 : index
    %c0_172 = arith.constant 0 : index
    %197 = vector.load %arg13[%c0_171, %c0_172] : memref<1x32xf32, #tpu.memory_space<vmem>>, vector<1x32xf32>
    %cst_173 = arith.constant 9.99999974E-6 : f32
    %198 = vector.broadcast %cst_173 : f32 to vector<1x32xf32>
    %199 = arith.addf %196, %198 : vector<1x32xf32>
    %200 = math.rsqrt %199 : vector<1x32xf32>
    %201 = arith.mulf %197, %200 : vector<1x32xf32>
    %c0_174 = arith.constant 0 : index
    %c0_175 = arith.constant 0 : index
    %202 = vector.load %arg14[%c0_174, %c0_175] : memref<1x32xf32, #tpu.memory_space<vmem>>, vector<1x32xf32>
    %203 = arith.mulf %192, %201 : vector<1x32xf32>
    %204 = arith.subf %202, %203 : vector<1x32xf32>
    %c0_176 = arith.constant 0 : index
    %c0_177 = arith.constant 0 : index
    %205 = vector.load %arg22[%c0_176, %c0_177] : memref<32x256xf32, #tpu.memory_space<vmem>>, vector<32x256xf32>
    %cst_178 = arith.constant dense<0.000000e+00> : vector<1x256xf32>
    %206 = tpu.matmul %201, %205, %cst_178 {dimension_numbers = #tpu.dot_dimension_numbers<[1], [0], [0], [1], [0, 0, 1, 1], [], []>} : vector<1x32xf32>, vector<32x256xf32>, vector<1x256xf32> -> vector<1x256xf32>
    %c0_179 = arith.constant 0 : index
    %c0_180 = arith.constant 0 : index
    %207 = vector.load %arg22[%c0_179, %c0_180] : memref<32x256xf32, #tpu.memory_space<vmem>>, vector<32x256xf32>
    %cst_181 = arith.constant dense<0.000000e+00> : vector<1x256xf32>
    %208 = tpu.matmul %204, %207, %cst_181 {dimension_numbers = #tpu.dot_dimension_numbers<[1], [0], [0], [1], [0, 0, 1, 1], [], []>} : vector<1x32xf32>, vector<32x256xf32>, vector<1x256xf32> -> vector<1x256xf32>
    %209 = vector.broadcast %206 : vector<1x256xf32> to vector<16x256xf32>
    %210 = arith.mulf %181, %209 : vector<16x256xf32>
    %211 = vector.broadcast %208 : vector<1x256xf32> to vector<16x256xf32>
    %212 = arith.addf %210, %211 : vector<16x256xf32>
    %cst_182 = arith.constant 0.000000e+00 : f32
    %213 = vector.broadcast %cst_182 : f32 to vector<16x256xf32>
    %214 = arith.maximumf %212, %213 : vector<16x256xf32>
    %215 = arith.truncf %214 : vector<16x256xf32> to vector<16x256xbf16>
    %216 = vector.shape_cast %215 : vector<16x256xbf16> to vector<2x8x256xbf16>
    %c0_183 = arith.constant 0 : index
    %c1_184 = arith.constant 1 : index
    %c0_185 = arith.constant 0 : index
    %217 = vector.load %arg30[%c0_183, %c1_184, %c0_185] : memref<2x10x256xbf16, #tpu.memory_space<vmem>>, vector<2x8x256xbf16>
    tpu.vector_store %arg30[%c0_183, %c1_184, %c0_185], %216 {strides = array<i32>} : memref<2x10x256xbf16, #tpu.memory_space<vmem>>, vector<2x8x256xbf16>,
    %c0_186 = arith.constant 0 : index
    %c0_187 = arith.constant 0 : index
    %c0_188 = arith.constant 0 : index
    %218 = vector.load %arg30[%c0_186, %c0_187, %c0_188] : memref<2x10x256xbf16, #tpu.memory_space<vmem>>, vector<2x8x256xbf16>
    %219 = vector.shape_cast %218 : vector<2x8x256xbf16> to vector<16x256xbf16>
    %c0_189 = arith.constant 0 : index
    %c0_190 = arith.constant 0 : index
    %c0_191 = arith.constant 0 : index
    %220 = vector.load %arg6[%c0_189, %c0_190, %c0_191] : memref<3x256x512xbf16, #tpu.memory_space<vmem>>, vector<1x256x512xbf16>
    %221 = vector.shape_cast %220 : vector<1x256x512xbf16> to vector<256x512xbf16>
    %cst_192 = arith.constant dense<0.000000e+00> : vector<16x512xf32>
    %222 = tpu.matmul %219, %221, %cst_192 {dimension_numbers = #tpu.dot_dimension_numbers<[1], [0], [0], [1], [0, 0, 1, 1], [], []>} : vector<16x256xbf16>, vector<256x512xbf16>, vector<16x512xf32> -> vector<16x512xf32>
    %c0_193 = arith.constant 0 : index
    %c1_194 = arith.constant 1 : index
    %c0_195 = arith.constant 0 : index
    %223 = vector.load %arg30[%c0_193, %c1_194, %c0_195] : memref<2x10x256xbf16, #tpu.memory_space<vmem>>, vector<2x8x256xbf16>
    %224 = vector.shape_cast %223 : vector<2x8x256xbf16> to vector<16x256xbf16>
    %c1_196 = arith.constant 1 : index
    %c0_197 = arith.constant 0 : index
    %c0_198 = arith.constant 0 : index
    %225 = vector.load %arg6[%c1_196, %c0_197, %c0_198] : memref<3x256x512xbf16, #tpu.memory_space<vmem>>, vector<1x256x512xbf16>
    %226 = vector.shape_cast %225 : vector<1x256x512xbf16> to vector<256x512xbf16>
    %cst_199 = arith.constant dense<0.000000e+00> : vector<16x512xf32>
    %227 = tpu.matmul %224, %226, %cst_199 {dimension_numbers = #tpu.dot_dimension_numbers<[1], [0], [0], [1], [0, 0, 1, 1], [], []>} : vector<16x256xbf16>, vector<256x512xbf16>, vector<16x512xf32> -> vector<16x512xf32>
    %228 = arith.addf %222, %227 : vector<16x512xf32>
    %c0_200 = arith.constant 0 : index
    %c2_201 = arith.constant 2 : index
    %c0_202 = arith.constant 0 : index
    %229 = vector.load %arg30[%c0_200, %c2_201, %c0_202] : memref<2x10x256xbf16, #tpu.memory_space<vmem>>, vector<2x8x256xbf16>
    %230 = vector.shape_cast %229 : vector<2x8x256xbf16> to vector<16x256xbf16>
    %c2_203 = arith.constant 2 : index
    %c0_204 = arith.constant 0 : index
    %c0_205 = arith.constant 0 : index
    %231 = vector.load %arg6[%c2_203, %c0_204, %c0_205] : memref<3x256x512xbf16, #tpu.memory_space<vmem>>, vector<1x256x512xbf16>
    %232 = vector.shape_cast %231 : vector<1x256x512xbf16> to vector<256x512xbf16>
    %cst_206 = arith.constant dense<0.000000e+00> : vector<16x512xf32>
    %233 = tpu.matmul %230, %232, %cst_206 {dimension_numbers = #tpu.dot_dimension_numbers<[1], [0], [0], [1], [0, 0, 1, 1], [], []>} : vector<16x256xbf16>, vector<256x512xbf16>, vector<16x512xf32> -> vector<16x512xf32>
    %234 = arith.addf %228, %233 : vector<16x512xf32>
    %cst_207 = arith.constant dense<0.000000e+00> : vector<512xf32>
    %235 = vector.multi_reduction <add>, %234, %cst_207 [0] : vector<16x512xf32> to vector<512xf32>
    %236 = vector.shape_cast %235 : vector<512xf32> to vector<1x512xf32>
    %237 = arith.mulf %234, %234 : vector<16x512xf32>
    %cst_208 = arith.constant dense<0.000000e+00> : vector<512xf32>
    %238 = vector.multi_reduction <add>, %237, %cst_208 [0] : vector<16x512xf32> to vector<512xf32>
    %239 = vector.shape_cast %238 : vector<512xf32> to vector<1x512xf32>
    %c0_209 = arith.constant 0 : index
    %c0_210 = arith.constant 0 : index
    %240 = vector.load %arg23[%c0_209, %c0_210] : memref<512x64xf32, #tpu.memory_space<vmem>>, vector<512x64xf32>
    %cst_211 = arith.constant dense<0.000000e+00> : vector<1x64xf32>
    %241 = tpu.matmul %236, %240, %cst_211 {dimension_numbers = #tpu.dot_dimension_numbers<[1], [0], [0], [1], [0, 0, 1, 1], [], []>} : vector<1x512xf32>, vector<512x64xf32>, vector<1x64xf32> -> vector<1x64xf32>
    %c0_212 = arith.constant 0 : index
    %c0_213 = arith.constant 0 : index
    %242 = vector.load %arg23[%c0_212, %c0_213] : memref<512x64xf32, #tpu.memory_space<vmem>>, vector<512x64xf32>
    %cst_214 = arith.constant dense<0.000000e+00> : vector<1x64xf32>
    %243 = tpu.matmul %239, %242, %cst_214 {dimension_numbers = #tpu.dot_dimension_numbers<[1], [0], [0], [1], [0, 0, 1, 1], [], []>} : vector<1x512xf32>, vector<512x64xf32>, vector<1x64xf32> -> vector<1x64xf32>
    %cst_215 = arith.constant 7.812500e-03 : f32
    %244 = vector.broadcast %cst_215 : f32 to vector<1x64xf32>
    %245 = arith.mulf %241, %244 : vector<1x64xf32>
    %cst_216 = arith.constant 7.812500e-03 : f32
    %246 = vector.broadcast %cst_216 : f32 to vector<1x64xf32>
    %247 = arith.mulf %243, %246 : vector<1x64xf32>
    %248 = arith.mulf %245, %245 : vector<1x64xf32>
    %249 = arith.subf %247, %248 : vector<1x64xf32>
    %c0_217 = arith.constant 0 : index
    %c0_218 = arith.constant 0 : index
    %250 = vector.load %arg15[%c0_217, %c0_218] : memref<1x64xf32, #tpu.memory_space<vmem>>, vector<1x64xf32>
    %cst_219 = arith.constant 9.99999974E-6 : f32
    %251 = vector.broadcast %cst_219 : f32 to vector<1x64xf32>
    %252 = arith.addf %249, %251 : vector<1x64xf32>
    %253 = math.rsqrt %252 : vector<1x64xf32>
    %254 = arith.mulf %250, %253 : vector<1x64xf32>
    %c0_220 = arith.constant 0 : index
    %c0_221 = arith.constant 0 : index
    %255 = vector.load %arg16[%c0_220, %c0_221] : memref<1x64xf32, #tpu.memory_space<vmem>>, vector<1x64xf32>
    %256 = arith.mulf %245, %254 : vector<1x64xf32>
    %257 = arith.subf %255, %256 : vector<1x64xf32>
    %c0_222 = arith.constant 0 : index
    %c0_223 = arith.constant 0 : index
    %258 = vector.load %arg24[%c0_222, %c0_223] : memref<64x512xf32, #tpu.memory_space<vmem>>, vector<64x512xf32>
    %cst_224 = arith.constant dense<0.000000e+00> : vector<1x512xf32>
    %259 = tpu.matmul %254, %258, %cst_224 {dimension_numbers = #tpu.dot_dimension_numbers<[1], [0], [0], [1], [0, 0, 1, 1], [], []>} : vector<1x64xf32>, vector<64x512xf32>, vector<1x512xf32> -> vector<1x512xf32>
    %c0_225 = arith.constant 0 : index
    %c0_226 = arith.constant 0 : index
    %260 = vector.load %arg24[%c0_225, %c0_226] : memref<64x512xf32, #tpu.memory_space<vmem>>, vector<64x512xf32>
    %cst_227 = arith.constant dense<0.000000e+00> : vector<1x512xf32>
    %261 = tpu.matmul %257, %260, %cst_227 {dimension_numbers = #tpu.dot_dimension_numbers<[1], [0], [0], [1], [0, 0, 1, 1], [], []>} : vector<1x64xf32>, vector<64x512xf32>, vector<1x512xf32> -> vector<1x512xf32>
    %262 = vector.broadcast %259 : vector<1x512xf32> to vector<16x512xf32>
    %263 = arith.mulf %234, %262 : vector<16x512xf32>
    %264 = vector.broadcast %261 : vector<1x512xf32> to vector<16x512xf32>
    %265 = arith.addf %263, %264 : vector<16x512xf32>
    %cst_228 = arith.constant 0.000000e+00 : f32
    %266 = vector.broadcast %cst_228 : f32 to vector<16x512xf32>
    %267 = arith.maximumf %265, %266 : vector<16x512xf32>
    %268 = vector.shape_cast %267 : vector<16x512xf32> to vector<8x2x512xf32>
    %269 = vector.extract_strided_slice %268 {offsets = [0, 0, 0], sizes = [8, 1, 512], strides = [1, 1, 1]} : vector<8x2x512xf32> to vector<8x1x512xf32>
    %270 = vector.shape_cast %269 : vector<8x1x512xf32> to vector<8x512xf32>
    %271 = vector.extract_strided_slice %268 {offsets = [0, 1, 0], sizes = [8, 1, 512], strides = [1, 1, 1]} : vector<8x2x512xf32> to vector<8x1x512xf32>
    %272 = vector.shape_cast %271 : vector<8x1x512xf32> to vector<8x512xf32>
    %273 = arith.maximumf %270, %272 : vector<8x512xf32>
    %c448_i32 = arith.constant 448 : i32
    %274 = tpu.dynamic_rotate %273 by %c448_i32 dim 1 : vector<8x512xf32>, i32 -> vector<8x512xf32>
    %275 = arith.maximumf %273, %274 : vector<8x512xf32>
    %276 = arith.truncf %275 : vector<8x512xf32> to vector<8x512xbf16>
    %277 = vector.shape_cast %276 : vector<8x512xbf16> to vector<2x4x512xbf16>
    %cst_229 = arith.constant 0.000000e+00 : f32
    %278 = vector.broadcast %cst_229 : f32 to vector<2x10xf32>
    %279 = vector.extract_strided_slice %277 {offsets = [0, 0, 0], sizes = [2, 1, 512], strides = [1, 1, 1]} : vector<2x4x512xbf16> to vector<2x1x512xbf16>
    %280 = vector.shape_cast %279 : vector<2x1x512xbf16> to vector<2x512xbf16>
    %c0_230 = arith.constant 0 : index
    %c0_231 = arith.constant 0 : index
    %c0_232 = arith.constant 0 : index
    %281 = vector.load %arg25[%c0_230, %c0_231, %c0_232] : memref<4x512x10xbf16, #tpu.memory_space<vmem>>, vector<1x512x10xbf16>
    %282 = vector.shape_cast %281 : vector<1x512x10xbf16> to vector<512x10xbf16>
    %cst_233 = arith.constant dense<0.000000e+00> : vector<2x10xf32>
    %283 = tpu.matmul %280, %282, %cst_233 {dimension_numbers = #tpu.dot_dimension_numbers<[1], [0], [0], [1], [0, 0, 1, 1], [], []>} : vector<2x512xbf16>, vector<512x10xbf16>, vector<2x10xf32> -> vector<2x10xf32>
    %284 = arith.addf %278, %283 : vector<2x10xf32>
    %285 = vector.extract_strided_slice %277 {offsets = [0, 1, 0], sizes = [2, 1, 512], strides = [1, 1, 1]} : vector<2x4x512xbf16> to vector<2x1x512xbf16>
    %286 = vector.shape_cast %285 : vector<2x1x512xbf16> to vector<2x512xbf16>
    %c1_234 = arith.constant 1 : index
    %c0_235 = arith.constant 0 : index
    %c0_236 = arith.constant 0 : index
    %287 = vector.load %arg25[%c1_234, %c0_235, %c0_236] : memref<4x512x10xbf16, #tpu.memory_space<vmem>>, vector<1x512x10xbf16>
    %288 = vector.shape_cast %287 : vector<1x512x10xbf16> to vector<512x10xbf16>
    %cst_237 = arith.constant dense<0.000000e+00> : vector<2x10xf32>
    %289 = tpu.matmul %286, %288, %cst_237 {dimension_numbers = #tpu.dot_dimension_numbers<[1], [0], [0], [1], [0, 0, 1, 1], [], []>} : vector<2x512xbf16>, vector<512x10xbf16>, vector<2x10xf32> -> vector<2x10xf32>
    %290 = arith.addf %284, %289 : vector<2x10xf32>
    %291 = vector.extract_strided_slice %277 {offsets = [0, 2, 0], sizes = [2, 1, 512], strides = [1, 1, 1]} : vector<2x4x512xbf16> to vector<2x1x512xbf16>
    %292 = vector.shape_cast %291 : vector<2x1x512xbf16> to vector<2x512xbf16>
    %c2_238 = arith.constant 2 : index
    %c0_239 = arith.constant 0 : index
    %c0_240 = arith.constant 0 : index
    %293 = vector.load %arg25[%c2_238, %c0_239, %c0_240] : memref<4x512x10xbf16, #tpu.memory_space<vmem>>, vector<1x512x10xbf16>
    %294 = vector.shape_cast %293 : vector<1x512x10xbf16> to vector<512x10xbf16>
    %cst_241 = arith.constant dense<0.000000e+00> : vector<2x10xf32>
    %295 = tpu.matmul %292, %294, %cst_241 {dimension_numbers = #tpu.dot_dimension_numbers<[1], [0], [0], [1], [0, 0, 1, 1], [], []>} : vector<2x512xbf16>, vector<512x10xbf16>, vector<2x10xf32> -> vector<2x10xf32>
    %296 = arith.addf %290, %295 : vector<2x10xf32>
    %297 = vector.extract_strided_slice %277 {offsets = [0, 3, 0], sizes = [2, 1, 512], strides = [1, 1, 1]} : vector<2x4x512xbf16> to vector<2x1x512xbf16>
    %298 = vector.shape_cast %297 : vector<2x1x512xbf16> to vector<2x512xbf16>
    %c3 = arith.constant 3 : index
    %c0_242 = arith.constant 0 : index
    %c0_243 = arith.constant 0 : index
    %299 = vector.load %arg25[%c3, %c0_242, %c0_243] : memref<4x512x10xbf16, #tpu.memory_space<vmem>>, vector<1x512x10xbf16>
    %300 = vector.shape_cast %299 : vector<1x512x10xbf16> to vector<512x10xbf16>
    %cst_244 = arith.constant dense<0.000000e+00> : vector<2x10xf32>
    %301 = tpu.matmul %298, %300, %cst_244 {dimension_numbers = #tpu.dot_dimension_numbers<[1], [0], [0], [1], [0, 0, 1, 1], [], []>} : vector<2x512xbf16>, vector<512x10xbf16>, vector<2x10xf32> -> vector<2x10xf32>
    %302 = arith.addf %296, %301 : vector<2x10xf32>
    %c0_245 = arith.constant 0 : index
    %c0_246 = arith.constant 0 : index
    %303 = vector.load %arg26[%c0_245, %c0_246] : memref<1x10xf32, #tpu.memory_space<vmem>>, vector<1x10xf32>
    %304 = vector.broadcast %303 : vector<1x10xf32> to vector<2x10xf32>
    %305 = arith.addf %302, %304 : vector<2x10xf32>
    %c0_247 = arith.constant 0 : index
    %c0_248 = arith.constant 0 : index
    %306 = vector.load %arg27[%c0_247, %c0_248] : memref<2x10xf32, #tpu.memory_space<vmem>>, vector<2x10xf32>
    tpu.vector_store %arg27[%c0_247, %c0_248], %305 {strides = array<i32>} : memref<2x10xf32, #tpu.memory_space<vmem>>, vector<2x10xf32>,
    return
  }
  func.func @transform_0(%arg0: i32) -> (i32, i32) {
    %c0_i32 = arith.constant 0 : i32
    %c0_i32_0 = arith.constant 0 : i32
    %c0_i32_1 = arith.constant 0 : i32
    return %c0_i32, %c0_i32_0 : i32, i32
  }
  func.func @transform_1(%arg0: i32) -> (i32, i32) {
    %c0_i32 = arith.constant 0 : i32
    %c0_i32_0 = arith.constant 0 : i32
    %c0_i32_1 = arith.constant 0 : i32
    return %c0_i32, %c0_i32_0 : i32, i32
  }
  func.func @transform_2(%arg0: i32) -> (i32, i32, i32) {
    %c0_i32 = arith.constant 0 : i32
    %c0_i32_0 = arith.constant 0 : i32
    %c0_i32_1 = arith.constant 0 : i32
    %c0_i32_2 = arith.constant 0 : i32
    return %c0_i32, %c0_i32_0, %c0_i32_1 : i32, i32, i32
  }
  func.func @transform_3(%arg0: i32) -> (i32, i32, i32) {
    %c0_i32 = arith.constant 0 : i32
    %c0_i32_0 = arith.constant 0 : i32
    %c0_i32_1 = arith.constant 0 : i32
    %c0_i32_2 = arith.constant 0 : i32
    return %c0_i32, %c0_i32_0, %c0_i32_1 : i32, i32, i32
  }
  func.func @transform_4(%arg0: i32) -> (i32, i32, i32) {
    %c0_i32 = arith.constant 0 : i32
    %c0_i32_0 = arith.constant 0 : i32
    %c0_i32_1 = arith.constant 0 : i32
    %c0_i32_2 = arith.constant 0 : i32
    return %c0_i32, %c0_i32_0, %c0_i32_1 : i32, i32, i32
  }
  func.func @transform_5(%arg0: i32) -> (i32, i32, i32) {
    %c0_i32 = arith.constant 0 : i32
    %c0_i32_0 = arith.constant 0 : i32
    %c0_i32_1 = arith.constant 0 : i32
    %c0_i32_2 = arith.constant 0 : i32
    return %c0_i32, %c0_i32_0, %c0_i32_1 : i32, i32, i32
  }
  func.func @transform_6(%arg0: i32) -> (i32, i32) {
    %c0_i32 = arith.constant 0 : i32
    %c0_i32_0 = arith.constant 0 : i32
    %c0_i32_1 = arith.constant 0 : i32
    return %c0_i32, %c0_i32_0 : i32, i32
  }
  func.func @transform_7(%arg0: i32) -> (i32, i32) {
    %c0_i32 = arith.constant 0 : i32
    %c0_i32_0 = arith.constant 0 : i32
    %c0_i32_1 = arith.constant 0 : i32
    return %c0_i32, %c0_i32_0 : i32, i32
  }
  func.func @transform_8(%arg0: i32) -> (i32, i32) {
    %c0_i32 = arith.constant 0 : i32
    %c0_i32_0 = arith.constant 0 : i32
    %c0_i32_1 = arith.constant 0 : i32
    return %c0_i32, %c0_i32_0 : i32, i32
  }
  func.func @transform_9(%arg0: i32) -> (i32, i32) {
    %c0_i32 = arith.constant 0 : i32
    %c0_i32_0 = arith.constant 0 : i32
    %c0_i32_1 = arith.constant 0 : i32
    return %c0_i32, %c0_i32_0 : i32, i32
  }
  func.func @transform_10(%arg0: i32) -> (i32, i32) {
    %c0_i32 = arith.constant 0 : i32
    %c0_i32_0 = arith.constant 0 : i32
    %c0_i32_1 = arith.constant 0 : i32
    return %c0_i32, %c0_i32_0 : i32, i32
  }
  func.func @transform_11(%arg0: i32) -> (i32, i32) {
    %c0_i32 = arith.constant 0 : i32
    %c0_i32_0 = arith.constant 0 : i32
    %c0_i32_1 = arith.constant 0 : i32
    return %c0_i32, %c0_i32_0 : i32, i32
  }
  func.func @transform_12(%arg0: i32) -> (i32, i32) {
    %c0_i32 = arith.constant 0 : i32
    %c0_i32_0 = arith.constant 0 : i32
    %c0_i32_1 = arith.constant 0 : i32
    return %c0_i32, %c0_i32_0 : i32, i32
  }
  func.func @transform_13(%arg0: i32) -> (i32, i32) {
    %c0_i32 = arith.constant 0 : i32
    %c0_i32_0 = arith.constant 0 : i32
    %c0_i32_1 = arith.constant 0 : i32
    return %c0_i32, %c0_i32_0 : i32, i32
  }
  func.func @transform_14(%arg0: i32) -> (i32, i32) {
    %c0_i32 = arith.constant 0 : i32
    %c0_i32_0 = arith.constant 0 : i32
    %c0_i32_1 = arith.constant 0 : i32
    return %c0_i32, %c0_i32_0 : i32, i32
  }
  func.func @transform_15(%arg0: i32) -> (i32, i32) {
    %c0_i32 = arith.constant 0 : i32
    %c0_i32_0 = arith.constant 0 : i32
    %c0_i32_1 = arith.constant 0 : i32
    return %c0_i32, %c0_i32_0 : i32, i32
  }
  func.func @transform_16(%arg0: i32) -> (i32, i32) {
    %c0_i32 = arith.constant 0 : i32
    %c0_i32_0 = arith.constant 0 : i32
    %c0_i32_1 = arith.constant 0 : i32
    return %c0_i32, %c0_i32_0 : i32, i32
  }
  func.func @transform_17(%arg0: i32) -> (i32, i32) {
    %c0_i32 = arith.constant 0 : i32
    %c0_i32_0 = arith.constant 0 : i32
    %c0_i32_1 = arith.constant 0 : i32
    return %c0_i32, %c0_i32_0 : i32, i32
  }
  func.func @transform_18(%arg0: i32) -> (i32, i32) {
    %c0_i32 = arith.constant 0 : i32
    %c0_i32_0 = arith.constant 0 : i32
    %c0_i32_1 = arith.constant 0 : i32
    return %c0_i32, %c0_i32_0 : i32, i32
  }
  func.func @transform_19(%arg0: i32) -> (i32, i32) {
    %c0_i32 = arith.constant 0 : i32
    %c0_i32_0 = arith.constant 0 : i32
    %c0_i32_1 = arith.constant 0 : i32
    return %c0_i32, %c0_i32_0 : i32, i32
  }
  func.func @transform_20(%arg0: i32) -> (i32, i32) {
    %c0_i32 = arith.constant 0 : i32
    %c0_i32_0 = arith.constant 0 : i32
    %c0_i32_1 = arith.constant 0 : i32
    return %c0_i32, %c0_i32_0 : i32, i32
  }
  func.func @transform_21(%arg0: i32) -> (i32, i32) {
    %c0_i32 = arith.constant 0 : i32
    %c0_i32_0 = arith.constant 0 : i32
    %c0_i32_1 = arith.constant 0 : i32
    return %c0_i32, %c0_i32_0 : i32, i32
  }
  func.func @transform_22(%arg0: i32) -> (i32, i32) {
    %c0_i32 = arith.constant 0 : i32
    %c0_i32_0 = arith.constant 0 : i32
    %c0_i32_1 = arith.constant 0 : i32
    return %c0_i32, %c0_i32_0 : i32, i32
  }
  func.func @transform_23(%arg0: i32) -> (i32, i32) {
    %c0_i32 = arith.constant 0 : i32
    %c0_i32_0 = arith.constant 0 : i32
    %c0_i32_1 = arith.constant 0 : i32
    return %c0_i32, %c0_i32_0 : i32, i32
  }
  func.func @transform_24(%arg0: i32) -> (i32, i32, i32) {
    %c0_i32 = arith.constant 0 : i32
    %c0_i32_0 = arith.constant 0 : i32
    %c0_i32_1 = arith.constant 0 : i32
    %c0_i32_2 = arith.constant 0 : i32
    return %c0_i32, %c0_i32_0, %c0_i32_1 : i32, i32, i32
  }
  func.func @transform_25(%arg0: i32) -> (i32, i32) {
    %c0_i32 = arith.constant 0 : i32
    %c0_i32_0 = arith.constant 0 : i32
    %c0_i32_1 = arith.constant 0 : i32
    return %c0_i32, %c0_i32_0 : i32, i32
  }
  func.func @transform_26(%arg0: i32) -> (i32, i32) {
    %c0_i32 = arith.constant 0 : i32
    %c0_i32_0 = arith.constant 0 : i32
    %c0_i32_1 = arith.constant 0 : i32
    return %c0_i32, %c0_i32_0 : i32, i32
  }
}

</mosaic_0001>

<bundles_post_ra>
// kernel: _lambda_.1
= control target key start
LH: loop header
LB: loop body
LE: loop exit
PB: predicated region body
PF: predicated region fallthrough
CT: control target
= control target key end

     0   :  { %s18370_s0 = inlined_call_operand.vmem [shape: bf16[32,2352], index: 0, kind: input, shape index: {}]   ;;  %s18371_s1 = inlined_call_operand.vmem [shape: bf16[2352,96], index: 1, kind: input, shape index: {}]   ;;  %s18372_s2 = inlined_call_operand.vmem [shape: bf16[3,96,96], index: 2, kind: input, shape index: {}]   ;;  %s18373_s3 = inlined_call_operand.vmem [shape: bf16[3,96,256], index: 3, kind: input, shape index: {}]   ;;  %s18374_s4 = inlined_call_operand.vmem [shape: bf16[3,256,256], index: 4, kind: input, shape index: {}]   ;;  %s18375_s5 = inlined_call_operand.vmem [shape: bf16[3,256,512], index: 5, kind: input, shape index: {}]   ;;  %s18376_s6 = inlined_call_operand.vmem [shape: f32[1,6], index: 6, kind: input, shape index: {}]   ;;  %s18377_s7 = inlined_call_operand.vmem [shape: f32[1,6], index: 7, kind: input, shape index: {}]   ;;  %s18378_s8 = inlined_call_operand.vmem [shape: f32[1,6], index: 8, kind: input, shape index: {}]   ;;  %s18379_s9 = inlined_call_operand.vmem [shape: f32[1,6], index: 9, kind: input, shape index: {}]   ;;  %s18380_s10 = inlined_call_operand.vmem [shape: f32[1,16], index: 10, kind: input, shape index: {}]   ;;  %s18381_s11 = inlined_call_operand.vmem [shape: f32[1,16], index: 11, kind: input, shape index: {}]   ;;  %s18382_s12 = inlined_call_operand.vmem [shape: f32[1,32], index: 12, kind: input, shape index: {}]   ;;  %s18383_s13 = inlined_call_operand.vmem [shape: f32[1,32], index: 13, kind: input, shape index: {}]   ;;  %s18384_s14 = inlined_call_operand.vmem [shape: f32[1,64], index: 14, kind: input, shape index: {}]   ;;  %s18385_s15 = inlined_call_operand.vmem [shape: f32[1,64], index: 15, kind: input, shape index: {}]   ;;  %s18386_s16 = inlined_call_operand.vmem [shape: f32[96,6], index: 16, kind: input, shape index: {}]   ;;  %s18387_s17 = inlined_call_operand.vmem [shape: f32[6,96], index: 17, kind: input, shape index: {}]   ;;  %s18388_s18 = inlined_call_operand.vmem [shape: f32[256,16], index: 18, kind: input, shape index: {}]   ;;  %s18389_s19 = inlined_call_operand.vmem [shape: f32[16,256], index: 19, kind: input, shape index: {}]   ;;  %s18390_s20 = inlined_call_operand.vmem [shape: f32[256,32], index: 20, kind: input, shape index: {}]   ;;  %s18391_s21 = inlined_call_operand.vmem [shape: f32[32,256], index: 21, kind: input, shape index: {}]   ;;  %s18392_s22 = inlined_call_operand.vmem [shape: f32[512,64], index: 22, kind: input, shape index: {}]   ;;  %s18393_s23 = inlined_call_operand.vmem [shape: f32[64,512], index: 23, kind: input, shape index: {}]   ;;  %s18394_s24 = inlined_call_operand.vmem [shape: bf16[4,512,10], index: 24, kind: input, shape index: {}]   ;;  %s18395_s25 = inlined_call_operand.vmem [shape: f32[1,10], index: 25, kind: input, shape index: {}]   ;;  %s18396_s26 = inlined_call_operand.hbm [shape: f32[2,10], index: 26, kind: output, shape index: {}]  }
   0x1   :  { %18415 = sst [smem:[#allocation14_spill]] %s18370_s0 }
   0x2   :  { %18416 = sst [smem:[#allocation15_spill]] %s18371_s1 }
   0x3   :  { %18417 = sst [smem:[#allocation16_spill]] %s18372_s2 }
   0x4   :  { %18418 = sst [smem:[#allocation17_spill]] %s18373_s3 }
   0x5   :  { %18419 = sst [smem:[#allocation18_spill]] %s18374_s4 }
   0x6   :  { %18420 = sst [smem:[#allocation19_spill]] %s18375_s5 }
   0x7   :  { %18421 = sst [smem:[#allocation20_spill]] %s18376_s6 }
   0x8   :  { %18422 = sst [smem:[#allocation21_spill]] %s18377_s7 }
   0x9   :  { %18423 = sst [smem:[#allocation22_spill]] %s18378_s8 }
   0xa   :  { %18424 = sst [smem:[#allocation23_spill]] %s18379_s9 }
   0xb   :  { %18425 = sst [smem:[#allocation24_spill]] %s18380_s10 }
   0xc   :  { %s18426_s7 = sld [smem:[#allocation15_spill]]  ;;  %s18427_s5 = sld [smem:[#allocation14_spill]]  ;;  %vm1542_vm0 = vcmask 392192   ;;  %vm14223_vm1 = vmmov 0  }
  0x12   :  { %v13349_v0 = vld [vmem:[%s18426_s7 + $0x40] sm:$0xff]   ;;  %v13353_v4 = vld [vmem:[%s18426_s7 + $0x48] sm:$0xff]   ;;  %v13357_v8 = vld [vmem:[%s18426_s7 + $0x50] sm:$0xff]  }
  0x13   :  { %v13350_v1 = vld [vmem:[%s18426_s7 + $0xc0] sm:$0xff]   ;;  %11894 = vmatprep.subr.bf16.mxu0 %v13349_v0  ;;  %v13354_v5 = vld [vmem:[%s18426_s7 + $0xc8] sm:$0xff]   ;;  %v13358_v9 = vld [vmem:[%s18426_s7 + $0xd0] sm:$0xff]  }
  0x14   :  { %v13351_v2 = vld [vmem:[%s18426_s7] sm:$0xff]   ;;  %11922 = vmatprep.subr.bf16.mxu1 %v13350_v1  ;;  %v13355_v6 = vld [vmem:[%s18426_s7 + $0x8] sm:$0xff]   ;;  %v13359_v10 = vld [vmem:[%s18426_s7 + $0x10] sm:$0xff]  }
  0x15   :  { %v13352_v3 = vld [vmem:[%s18426_s7 + $0x80] sm:$0xff]   ;;  %11895 = vmatpush3.bf16.msra.mxu0 %v13351_v2  ;;  %v13356_v7 = vld [vmem:[%s18426_s7 + $0x88] sm:$0xff]   ;;  %v13360_v11 = vld [vmem:[%s18426_s7 + $0x90] sm:$0xff]  }
  0x16   :  { %11923 = vmatpush3.bf16.msra.mxu1 %v13352_v3  ;;  %11896 = vmatprep.subr.bf16.mxu0 %v13353_v4  ;;  %v13361_v12 = vld [vmem:[%s18426_s7 + $0x58] sm:$0xff]   ;;  %v13365_v16 = vld [vmem:[%s18426_s7 + $0x60] sm:$0xff]   ;;  %v13369_v20 = vld [vmem:[%s18426_s7 + $0x68] sm:$0xff]  }
  0x17   :  { %11924 = vmatprep.subr.bf16.mxu1 %v13354_v5  ;;  %v13362_v13 = vld [vmem:[%s18426_s7 + $0xd8] sm:$0xff]   ;;  %v13366_v17 = vld [vmem:[%s18426_s7 + $0xe0] sm:$0xff]   ;;  %v13370_v21 = vld [vmem:[%s18426_s7 + $0xe8] sm:$0xff]  }
  0x18   :  { %v13363_v14 = vld [vmem:[%s18426_s7 + $0x18] sm:$0xff]   ;;  %v13367_v18 = vld [vmem:[%s18426_s7 + $0x20] sm:$0xff]   ;;  %v13371_v22 = vld [vmem:[%s18426_s7 + $0x28] sm:$0xff]  }
  0x19   :  { %11897 = vmatpush3.bf16.msra.mxu0 %v13355_v6  ;;  %v13364_v15 = vld [vmem:[%s18426_s7 + $0x98] sm:$0xff]   ;;  %v13368_v19 = vld [vmem:[%s18426_s7 + $0xa0] sm:$0xff]   ;;  %v13372_v23 = vld [vmem:[%s18426_s7 + $0xa8] sm:$0xff]  }
  0x1a   :  { %11925 = vmatpush3.bf16.msra.mxu1 %v13356_v7  ;;  %11898 = vmatprep.subr.bf16.mxu0 %v13357_v8  ;;  %v13373_v24 = vld [vmem:[%s18426_s7 + $0x70] sm:$0xff]   ;;  %v13377_v28 = vld [vmem:[%s18426_s7 + $0x78] sm:$0xff]   ;;  %v13381_v32 = vld [vmem:[%s18427_s5] ss:$76 sps:$4 sm:$0xff]  }
  0x1b   :  { %11926 = vmatprep.subr.bf16.mxu1 %v13358_v9  ;;  %v13374_v25 = vld [vmem:[%s18426_s7 + $0xf0] sm:$0xff]   ;;  %v13378_v29 = vld [vmem:[%s18426_s7 + $0xf8] sm:$0xff]   ;;  %v13387_v36 = vld [vmem:[%s18426_s7 + $0x140] sm:$0xff]  }
  0x1c   :  { %v13375_v26 = vld [vmem:[%s18426_s7 + $0x30] sm:$0xff]   ;;  %v13379_v30 = vld [vmem:[%s18426_s7 + $0x38] sm:$0xff]   ;;  %v13388_v37 = vld [vmem:[%s18426_s7 + $0x100] sm:$0xff]  }
  0x1d   :  { %11899 = vmatpush3.bf16.msra.mxu0 %v13359_v10  ;;  %v13376_v27 = vld [vmem:[%s18426_s7 + $0xb0] sm:$0xff]   ;;  %v13380_v31 = vld [vmem:[%s18426_s7 + $0xb8] sm:$0xff]   ;;  %v13389_v38 = vld [vmem:[%s18426_s7 + $0x1c0] sm:$0xff]  }
  0x1e   :  { %11927 = vmatpush3.bf16.msra.mxu1 %v13360_v11  ;;  %11900 = vmatprep.subr.bf16.mxu0 %v13361_v12  ;;  %v13383_v33 = vld [vmem:[%s18427_s5 + $0x4] ss:$76 sps:$4 sm:$0xff]   ;;  %v13384_v34 = vld [vmem:[%s18427_s5 + $0x8] ss:$76 sps:$4 sm:$0xff]   ;;  %v13386_v35 = vld [vmem:[%s18427_s5 + $0xc] ss:$76 sps:$4 sm:$0xff]  }
  0x1f   :  { %11928 = vmatprep.subr.bf16.mxu1 %v13362_v13  ;;  %1581 = vmatprep.mubr.bf16.mxu0 %v13383_v33  ;;  %v13390_v39 = vld [vmem:[%s18426_s7 + $0x180] sm:$0xff]   ;;  %v13391_v40 = vld [vmem:[%s18426_s7 + $0x148] sm:$0xff]   ;;  %v13395_v44 = vld [vmem:[%s18426_s7 + $0x150] sm:$0xff]  }
  0x20   :  { %1630 = vmatprep.mubr.bf16.mxu1 %v13386_v35  ;;  %v13392_v41 = vld [vmem:[%s18426_s7 + $0x108] sm:$0xff]   ;;  %v13396_v45 = vld [vmem:[%s18426_s7 + $0x110] sm:$0xff]   ;;  %v13399_v48 = vld [vmem:[%s18426_s7 + $0x158] sm:$0xff]  }
  0x21   :  { %11901 = vmatpush3.bf16.msra.mxu0 %v13363_v14  ;;  %v13393_v42 = vld [vmem:[%s18426_s7 + $0x1c8] sm:$0xff]   ;;  %v13397_v46 = vld [vmem:[%s18426_s7 + $0x1d0] sm:$0xff]   ;;  %v13400_v49 = vld [vmem:[%s18426_s7 + $0x118] sm:$0xff]  }
  0x22   :  { %11929 = vmatpush3.bf16.msra.mxu1 %v13364_v15  ;;  %11902 = vmatprep.subr.bf16.mxu0 %v13365_v16  ;;  %v13394_v43 = vld [vmem:[%s18426_s7 + $0x188] sm:$0xff]   ;;  %v13398_v47 = vld [vmem:[%s18426_s7 + $0x190] sm:$0xff]   ;;  %v13401_v50 = vld [vmem:[%s18426_s7 + $0x1d8] sm:$0xff]  }
  0x23   :  { %11930 = vmatprep.subr.bf16.mxu1 %v13366_v17  ;;  %v13402_v51 = vld [vmem:[%s18426_s7 + $0x198] sm:$0xff]   ;;  %v13403_v52 = vld [vmem:[%s18426_s7 + $0x160] sm:$0xff]   ;;  %v13407_v56 = vld [vmem:[%s18426_s7 + $0x168] sm:$0xff]  }
  0x24   :  { %v13404_v53 = vld [vmem:[%s18426_s7 + $0x120] sm:$0xff]   ;;  %v13408_v57 = vld [vmem:[%s18427_s5 + $0x9c] ss:$76 sps:$4 sm:$0xff]   ;;  %v13417_v0 = vld [vmem:[%s18426_s7 + $0x170] sm:$0xff]  }
  0x25   :  { %11903 = vmatpush3.bf16.msra.mxu0 %v13367_v18  ;;  %v13405_v54 = vld [vmem:[%s18426_s7 + $0x1e0] sm:$0xff]   ;;  %v13412_v59 = vld [vmem:[%s18426_s7 + $0x128] sm:$0xff]   ;;  %v13418_v1 = vld [vmem:[%s18426_s7 + $0x130] sm:$0xff]  }
  0x26   :  { %11931 = vmatpush3.bf16.msra.mxu1 %v13368_v19  ;;  %11904 = vmatprep.subr.bf16.mxu0 %v13369_v20  ;;  %v13406_v55 = vld [vmem:[%s18426_s7 + $0x1a0] sm:$0xff]   ;;  %v13415_v62 = vld [vmem:[%s18426_s7 + $0x1e8] sm:$0xff]   ;;  %v13419_v2 = vld [vmem:[%s18426_s7 + $0x1f0] sm:$0xff]  }
  0x27   :  { %11932 = vmatprep.subr.bf16.mxu1 %v13370_v21  ;;  %v13410_v58 = vld [vmem:[%s18427_s5 + $0xa4] ss:$76 sps:$4 sm:$0xff]   ;;  %v13414_v61 = vld [vmem:[%s18427_s5 + $0xa0] ss:$76 sps:$4 sm:$0xff]   ;;  %v13421_v4 = vld [vmem:[%s18426_s7 + $0x178] sm:$0xff]  }
  0x28   :  { %v13413_v60 = vld [vmem:[%s18427_s5 + $0x98] ss:$76 sps:$4 sm:$0xff]   ;;  %v13416_v63 = vld [vmem:[%s18426_s7 + $0x1a8] sm:$0xff]   ;;  %v13420_v3 = vld [vmem:[%s18426_s7 + $0x1b0] sm:$0xff]  }
  0x29   :  { %11905 = vmatpush3.bf16.msra.mxu0 %v13371_v22  ;;  %v13422_v5 = vld [vmem:[%s18426_s7 + $0x138] sm:$0xff]   ;;  %v13426_v8 = vld [vmem:[%s18427_s5 + $0x14] ss:$76 sps:$4 sm:$0xff]   ;;  %v13435_v16 = vld [vmem:[%s18426_s7 + $0x248] sm:$0xff]  }
  0x2a   :  { %11933 = vmatpush3.bf16.msra.mxu1 %v13372_v23  ;;  %11906 = vmatprep.subr.bf16.mxu0 %v13373_v24  ;;  %v13423_v6 = vld [vmem:[%s18426_s7 + $0x1f8] sm:$0xff]   ;;  %v13428_v10 = vld [vmem:[%s18426_s7 + $0x240] sm:$0xff]   ;;  %v13436_v17 = vld [vmem:[%s18426_s7 + $0x208] sm:$0xff]  }
  0x2b   :  { %11934 = vmatprep.subr.bf16.mxu1 %v13374_v25  ;;  %v13424_v7 = vld [vmem:[%s18427_s5 + $0x10] ss:$76 sps:$4 sm:$0xff]   ;;  %v13429_v11 = vld [vmem:[%s18427_s5 + $0x18] ss:$76 sps:$4 sm:$0xff]   ;;  %v13437_v18 = vld [vmem:[%s18426_s7 + $0x2c8] sm:$0xff]  }
  0x2c   :  { %v13427_v9 = vld [vmem:[%s18426_s7 + $0x1b8] sm:$0xff]   ;;  %v13432_v13 = vld [vmem:[%s18426_s7 + $0x200] sm:$0xff]   ;;  %v13440_v20 = vld [vmem:[%s18426_s7 + $0x288] sm:$0xff]  }
  0x2d   :  { %11907 = vmatpush3.bf16.msra.mxu0 %v13375_v26  ;;  %v13431_v12 = vld [vmem:[%s18427_s5 + $0x1c] ss:$76 sps:$4 sm:$0xff]   ;;  %v13433_v14 = vld [vmem:[%s18426_s7 + $0x2c0] sm:$0xff]   ;;  %v13438_v19 = vld [vmem:[%s18427_s5 + $0xac] ss:$76 sps:$4 sm:$0xff]  }
  0x2e   :  { %11935 = vmatpush3.bf16.msra.mxu1 %v13376_v27  ;;  %11908 = vmatprep.subr.bf16.mxu0 %v13377_v28  ;;  %v13434_v15 = vld [vmem:[%s18426_s7 + $0x280] sm:$0xff]   ;;  %v13441_v21 = vld [vmem:[%s18427_s5 + $0xa8] ss:$76 sps:$4 sm:$0xff]   ;;  %v13446_v25 = vld [vmem:[%s18427_s5 + $0xb0] ss:$76 sps:$4 sm:$0xff]  }
  0x2f   :  { %11936 = vmatprep.subr.bf16.mxu1 %v13378_v29  ;;  %v13442_v22 = vld [vmem:[%s18426_s7 + $0x250] sm:$0xff]   ;;  %v13449_v28 = vld [vmem:[%s18426_s7 + $0x258] sm:$0xff]   ;;  %v13454_v33 = vld [vmem:[%s18426_s7 + $0x220] sm:$0xff]  }
  0x30   :  { %v13443_v23 = vld [vmem:[%s18427_s5 + $0xb4] ss:$76 sps:$4 sm:$0xff]   ;;  %v13450_v29 = vld [vmem:[%s18426_s7 + $0x218] sm:$0xff]  }
  0x31   :  { %11909 = vmatpush3.bf16.msra.mxu0 %v13379_v30  ;;  %v13445_v24 = vld [vmem:[%s18426_s7 + $0x210] sm:$0xff]   ;;  %v13451_v30 = vld [vmem:[%s18426_s7 + $0x2d8] sm:$0xff]   ;;  %v13456_v35 = vld [vmem:[%s18426_s7 + $0x2a0] sm:$0xff]  }
  0x32   :  { %11937 = vmatpush3.bf16.msra.mxu1 %v13380_v31  ;;  %11950 = vmatprep.subr.bf16.mxu0 %v13387_v36  ;;  %v13447_v26 = vld [vmem:[%s18426_s7 + $0x2d0] sm:$0xff]   ;;  %v13452_v31 = vld [vmem:[%s18426_s7 + $0x298] sm:$0xff]   ;;  %v13457_v36 = vld [vmem:[%s18426_s7 + $0x268] sm:$0xff]  }
  0x33   :  { %11978 = vmatprep.subr.bf16.mxu1 %v13389_v38  ;;  %v13448_v27 = vld [vmem:[%s18426_s7 + $0x290] sm:$0xff]   ;;  %v13459_v38 = vld [vmem:[%s18426_s7 + $0x2e8] sm:$0xff]  }
  0x34   :  { %1582 = vmatmul.mubr.bf16.vlgmr.msra.gmra.mrb[0].mxu0 %v13381_v32  ;;  %v13453_v32 = vld [vmem:[%s18426_s7 + $0x260] sm:$0xff]  }
  0x35   :  { %1631 = vmatmul.mubr.bf16.vlgmr.msra.gmra.mrb[0].mxu1 %v13384_v34  ;;  %11951 = vmatpush3.bf16.msra.mxu0 %v13388_v37  ;;  %v13455_v34 = vld [vmem:[%s18426_s7 + $0x2e0] sm:$0xff]   ;;  %v13458_v37 = vld [vmem:[%s18426_s7 + $0x228] sm:$0xff]  }
  0x36   :  { %11979 = vmatpush3.bf16.msra.mxu1 %v13390_v39  ;;  %11952 = vmatprep.subr.bf16.mxu0 %v13391_v40  ;;  %v13460_v39 = vld [vmem:[%s18426_s7 + $0x2a8] sm:$0xff]   ;;  %v13461_v40 = vld [vmem:[%s18426_s7 + $0x270] sm:$0xff]  }
  0x37   :  { %11980 = vmatprep.subr.bf16.mxu1 %v13393_v42  ;;  %1589 = vmatprep.mubr.bf16.mxu0 %v13408_v57  ;;  %v13463_v42 = vld [vmem:[%s18426_s7 + $0x2f0] sm:$0xff]   ;;  %v13480_v57 = vld [vmem:[%s18426_s7 + $0x308] sm:$0xff]  }
  0x38   :  { %1638 = vmatprep.mubr.bf16.mxu1 %v13410_v58  ;;  %v13481_v58 = vld [vmem:[%s18426_s7 + $0x3c8] sm:$0xff]  }
  0x39   :  { %11953 = vmatpush3.bf16.msra.mxu0 %v13392_v41  ;;  %v13462_v41 = vld [vmem:[%s18426_s7 + $0x230] sm:$0xff]  }
  0x3a   :  { %11981 = vmatpush3.bf16.msra.mxu1 %v13394_v43  ;;  %11954 = vmatprep.subr.bf16.mxu0 %v13395_v44  ;;  %v13464_v43 = vld [vmem:[%s18426_s7 + $0x2b0] sm:$0xff]   ;;  %v13465_v44 = vld [vmem:[%s18426_s7 + $0x278] sm:$0xff]  }
  0x3b   :  { %11982 = vmatprep.subr.bf16.mxu1 %v13397_v46  ;;  %v13467_v46 = vld [vmem:[%s18426_s7 + $0x2f8] sm:$0xff]  }
  0x3c   :  { %1590 = vmatmul.mubr.bf16.gmra.mrb[4].mxu0 %v13413_v60  ;;  %v13484_v60 = vld [vmem:[%s18426_s7 + $0x388] sm:$0xff]  }
  0x3d   :  { %11955 = vmatpush3.bf16.msra.mxu0 %v13396_v45  ;;  %1639 = vmatmul.mubr.bf16.gmra.mrb[4].mxu1 %v13414_v61  ;;  %v13466_v45 = vld [vmem:[%s18426_s7 + $0x238] sm:$0xff]  }
  0x3e   :  { %11983 = vmatpush3.bf16.msra.mxu1 %v13398_v47  ;;  %11956 = vmatprep.subr.bf16.mxu0 %v13399_v48  ;;  %v13468_v47 = vld [vmem:[%s18427_s5 + $0x20] ss:$76 sps:$4 sm:$0xff]   ;;  %v13470_v48 = vld [vmem:[%s18427_s5 + $0x24] ss:$76 sps:$4 sm:$0xff]  }
  0x3f   :  { %11984 = vmatprep.subr.bf16.mxu1 %v13401_v50  ;;  %1679 = vmatprep.mubr.bf16.mxu0 %v13426_v8  ;;  %v13472_v50 = vld [vmem:[%s18426_s7 + $0x340] sm:$0xff]  }
  0x40   :  { %1728 = vmatprep.mubr.bf16.mxu1 %v13431_v12  ;;  %v13485_v61 = vld [vmem:[%s18427_s5 + $0xb8] ss:$76 sps:$4 sm:$0xff]   ;;  %v13501_v12 = vld [vmem:[%s18426_s7 + $0x368] sm:$0xff]  }
  0x41   :  { %11957 = vmatpush3.bf16.msra.mxu0 %v13400_v49  ;;  %v13471_v49 = vld [vmem:[%s18426_s7 + $0x2b8] sm:$0xff]   ;;  %v13497_v8 = vld [vmem:[%s18426_s7 + $0x360] sm:$0xff]  }
  0x42   :  { %11985 = vmatpush3.bf16.msra.mxu1 %v13402_v51  ;;  %11958 = vmatprep.subr.bf16.mxu0 %v13403_v52  ;;  %v13473_v51 = vld [vmem:[%s18427_s5 + $0x28] ss:$76 sps:$4 sm:$0xff]   ;;  %v13475_v52 = vld [vmem:[%s18427_s5 + $0x2c] ss:$76 sps:$4 sm:$0xff]  }
  0x43   :  { %11986 = vmatprep.subr.bf16.mxu1 %v13405_v54  ;;  %v13477_v54 = vld [vmem:[%s18426_s7 + $0x3c0] sm:$0xff]  }
  0x45   :  { %11959 = vmatpush3.bf16.msra.mxu0 %v13404_v53  ;;  %v13476_v53 = vld [vmem:[%s18426_s7 + $0x300] sm:$0xff]  }
  0x46   :  { %11987 = vmatpush3.bf16.msra.mxu1 %v13406_v55  ;;  %11960 = vmatprep.subr.bf16.mxu0 %v13407_v56  ;;  %v13478_v55 = vld [vmem:[%s18426_s7 + $0x380] sm:$0xff]   ;;  %v13479_v56 = vld [vmem:[%s18426_s7 + $0x348] sm:$0xff]  }
  0x47   :  { %11988 = vmatprep.subr.bf16.mxu1 %v13415_v62  ;;  %v13486_v62 = vld [vmem:[%s18426_s7 + $0x350] sm:$0xff]  }
  0x49   :  { %11961 = vmatpush3.bf16.msra.mxu0 %v13412_v59  ;;  %v13482_v59 = vld [vmem:[%s18427_s5 + $0xbc] ss:$76 sps:$4 sm:$0xff]  }
  0x4a   :  { %11989 = vmatpush3.bf16.msra.mxu1 %v13416_v63  ;;  %11962 = vmatprep.subr.bf16.mxu0 %v13417_v0  ;;  %v13487_v63 = vld [vmem:[%s18427_s5 + $0xc4] ss:$76 sps:$4 sm:$0xff]  }
  0x4b   :  { %11990 = vmatprep.subr.bf16.mxu1 %v13419_v2  ;;  %v13489_v0 = vld [vmem:[%s18426_s7 + $0x310] sm:$0xff]  }
  0x4c   :  { %v13491_v2 = vld [vmem:[%s18426_s7 + $0x3d0] sm:$0xff]  }
  0x4d   :  { %11963 = vmatpush3.bf16.msra.mxu0 %v13418_v1  ;;  %v13490_v1 = vld [vmem:[%s18427_s5 + $0xc0] ss:$76 sps:$4 sm:$0xff]  }
  0x4e   :  { %11991 = vmatpush3.bf16.msra.mxu1 %v13420_v3  ;;  %11964 = vmatprep.subr.bf16.mxu0 %v13421_v4  ;;  %v13492_v3 = vld [vmem:[%s18426_s7 + $0x390] sm:$0xff]   ;;  %v13493_v4 = vld [vmem:[%s18426_s7 + $0x358] sm:$0xff]  }
  0x4f   :  { %11992 = vmatprep.subr.bf16.mxu1 %v13423_v6  ;;  %v13495_v6 = vld [vmem:[%s18426_s7 + $0x3d8] sm:$0xff]  }
  0x51   :  { %11965 = vmatpush3.bf16.msra.mxu0 %v13422_v5  ;;  %v13494_v5 = vld [vmem:[%s18426_s7 + $0x318] sm:$0xff]  }
  0x52   :  { %11993 = vmatpush3.bf16.msra.mxu1 %v13427_v9  ;;  %12006 = vmatprep.subr.bf16.mxu0 %v13428_v10  ;;  %v13498_v9 = vld [vmem:[%s18426_s7 + $0x320] sm:$0xff]  }
  0x53   :  { %12034 = vmatprep.subr.bf16.mxu1 %v13433_v14  ;;  %v13499_v10 = vld [vmem:[%s18426_s7 + $0x3e0] sm:$0xff]   ;;  %v13503_v14 = vld [vmem:[%s18426_s7 + $0x3e8] sm:$0xff]  }
  0x54   :  { %1680 = vmatmul.mubr.bf16.vlgmr.msra.gmra.mrb[8].mxu0 %v13424_v7  ;;  %v13496_v7 = vld [vmem:[%s18426_s7 + $0x398] sm:$0xff]  }
  0x55   :  { %12007 = vmatpush3.bf16.msra.mxu0 %v13432_v13  ;;  %1729 = vmatmul.mubr.bf16.vlgmr.msra.gmra.mrb[8].mxu1 %v13429_v11  ;;  %v13500_v11 = vld [vmem:[%s18426_s7 + $0x3a0] sm:$0xff]   ;;  %v13502_v13 = vld [vmem:[%s18426_s7 + $0x328] sm:$0xff]  }
  0x56   :  { %12035 = vmatpush3.bf16.msra.mxu1 %v13434_v15  ;;  %12008 = vmatprep.subr.bf16.mxu0 %v13435_v16  ;;  %v13504_v15 = vld [vmem:[%s18426_s7 + $0x3a8] sm:$0xff]   ;;  %v13505_v16 = vld [vmem:[%s18426_s7 + $0x370] sm:$0xff]  }
  0x57   :  { %12036 = vmatprep.subr.bf16.mxu1 %v13437_v18  ;;  %1687 = vmatprep.mubr.bf16.mxu0 %v13438_v19  ;;  %v13507_v18 = vld [vmem:[%s18426_s7 + $0x3f0] sm:$0xff]  }
  0x58   :  { %1736 = vmatprep.mubr.bf16.mxu1 %v13443_v23  ;;  %v13508_v19 = vld [vmem:[%s18426_s7 + $0x3b0] sm:$0xff]  }
  0x59   :  { %12009 = vmatpush3.bf16.msra.mxu0 %v13436_v17  ;;  %v13506_v17 = vld [vmem:[%s18426_s7 + $0x330] sm:$0xff]  }
  0x5a   :  { %12037 = vmatpush3.bf16.msra.mxu1 %v13440_v20  ;;  %12010 = vmatprep.subr.bf16.mxu0 %v13442_v22  ;;  %v13509_v20 = vld [vmem:[%s18426_s7 + $0x378] sm:$0xff]  }
  0x5b   :  { %12038 = vmatprep.subr.bf16.mxu1 %v13447_v26  ;;  %v13511_v22 = vld [vmem:[%s18426_s7 + $0x3f8] sm:$0xff]   ;;  %v13516_v26 = vld [vmem:[%s18426_s7 + $0x440] sm:$0xff]  }
  0x5c   :  { %1688 = vmatmul.mubr.bf16.gmra.mrb[12].mxu0 %v13441_v21  ;;  %v13510_v21 = vld [vmem:[%s18426_s7 + $0x338] sm:$0xff]  }
  0x5d   :  { %12011 = vmatpush3.bf16.msra.mxu0 %v13445_v24  ;;  %1737 = vmatmul.mubr.bf16.gmra.mrb[12].mxu1 %v13446_v25  ;;  %v13512_v23 = vld [vmem:[%s18427_s5 + $0x30] ss:$76 sps:$4 sm:$0xff]   ;;  %v13514_v24 = vld [vmem:[%s18427_s5 + $0x34] ss:$76 sps:$4 sm:$0xff]  }
  0x5e   :  { %12039 = vmatpush3.bf16.msra.mxu1 %v13448_v27  ;;  %12012 = vmatprep.subr.bf16.mxu0 %v13449_v28  ;;  %v13515_v25 = vld [vmem:[%s18426_s7 + $0x3b8] sm:$0xff]  }
  0x5f   :  { %12040 = vmatprep.subr.bf16.mxu1 %v13451_v30  ;;  %1777 = vmatprep.mubr.bf16.mxu0 %v13470_v48  ;;  %v13517_v27 = vld [vmem:[%s18427_s5 + $0x38] ss:$76 sps:$4 sm:$0xff]   ;;  %v13519_v28 = vld [vmem:[%s18427_s5 + $0x3c] ss:$76 sps:$4 sm:$0xff]  }
  0x60   :  { %1826 = vmatprep.mubr.bf16.mxu1 %v13475_v52  ;;  %v13521_v30 = vld [vmem:[%s18426_s7 + $0x448] sm:$0xff]   ;;  %v13540_v48 = vld [vmem:[%s18426_s7 + $0x438] sm:$0xff]  }
  0x61   :  { %12013 = vmatpush3.bf16.msra.mxu0 %v13450_v29  ;;  %v13520_v29 = vld [vmem:[%s18426_s7 + $0x400] sm:$0xff]   ;;  %v13545_v52 = vld [vmem:[%s18426_s7 + $0x488] sm:$0xff]  }
  0x62   :  { %12041 = vmatpush3.bf16.msra.mxu1 %v13452_v31  ;;  %12014 = vmatprep.subr.bf16.mxu0 %v13453_v32  ;;  %v13522_v31 = vld [vmem:[%s18426_s7 + $0x408] sm:$0xff]  }
  0x63   :  { %12042 = vmatprep.subr.bf16.mxu1 %v13455_v34  ;;  %v13523_v32 = vld [vmem:[%s18427_s5 + $0xcc] ss:$76 sps:$4 sm:$0xff]   ;;  %v13526_v34 = vld [vmem:[%s18426_s7 + $0x450] sm:$0xff]  }
  0x65   :  { %12015 = vmatpush3.bf16.msra.mxu0 %v13454_v33  ;;  %v13525_v33 = vld [vmem:[%s18427_s5 + $0xc8] ss:$76 sps:$4 sm:$0xff]  }
  0x66   :  { %12043 = vmatpush3.bf16.msra.mxu1 %v13456_v35  ;;  %12016 = vmatprep.subr.bf16.mxu0 %v13457_v36  ;;  %v13527_v35 = vld [vmem:[%s18427_s5 + $0xd4] ss:$76 sps:$4 sm:$0xff]  }
  0x67   :  { %12044 = vmatprep.subr.bf16.mxu1 %v13459_v38  ;;  %v13529_v36 = vld [vmem:[%s18426_s7 + $0x410] sm:$0xff]   ;;  %v13531_v38 = vld [vmem:[%s18426_s7 + $0x458] sm:$0xff]  }
  0x69   :  { %12017 = vmatpush3.bf16.msra.mxu0 %v13458_v37  ;;  %v13530_v37 = vld [vmem:[%s18427_s5 + $0xd0] ss:$76 sps:$4 sm:$0xff]  }
  0x6a   :  { %12045 = vmatpush3.bf16.msra.mxu1 %v13460_v39  ;;  %12018 = vmatprep.subr.bf16.mxu0 %v13461_v40  ;;  %v13532_v39 = vld [vmem:[%s18426_s7 + $0x418] sm:$0xff]   ;;  %v13533_v40 = vld [vmem:[%s18426_s7 + $0x460] sm:$0xff]  }
  0x6b   :  { %12046 = vmatprep.subr.bf16.mxu1 %v13463_v42  ;;  %v13535_v42 = vld [vmem:[%s18426_s7 + $0x468] sm:$0xff]  }
  0x6d   :  { %12019 = vmatpush3.bf16.msra.mxu0 %v13462_v41  ;;  %v13534_v41 = vld [vmem:[%s18426_s7 + $0x420] sm:$0xff]  }
  0x6e   :  { %12047 = vmatpush3.bf16.msra.mxu1 %v13464_v43  ;;  %12020 = vmatprep.subr.bf16.mxu0 %v13465_v44  ;;  %v13536_v43 = vld [vmem:[%s18426_s7 + $0x428] sm:$0xff]   ;;  %v13543_v44 = vld [vmem:[%s18427_s5 + $0x44] ss:$76 sps:$4 sm:$0xff]  }
  0x6f   :  { %12048 = vmatprep.subr.bf16.mxu1 %v13467_v46  ;;  %v13538_v46 = vld [vmem:[%s18426_s7 + $0x430] sm:$0xff]  }
  0x71   :  { %12021 = vmatpush3.bf16.msra.mxu0 %v13466_v45  ;;  %v13537_v45 = vld [vmem:[%s18426_s7 + $0x470] sm:$0xff]  }
  0x72   :  { %12049 = vmatpush3.bf16.msra.mxu1 %v13471_v49  ;;  %12062 = vmatprep.subr.bf16.mxu0 %v13472_v50  ;;  %v13544_v49 = vld [vmem:[%s18426_s7 + $0x480] sm:$0xff]  }
  0x73   :  { %12090 = vmatprep.subr.bf16.mxu1 %v13477_v54  ;;  %v13541_v50 = vld [vmem:[%s18427_s5 + $0x40] ss:$76 sps:$4 sm:$0xff]   ;;  %v13548_v54 = vld [vmem:[%s18427_s5 + $0xd8] ss:$76 sps:$4 sm:$0xff]  }
  0x74   :  { %1778 = vmatmul.mubr.bf16.vlgmr.msra.gmra.mrb[16].mxu0 %v13468_v47  ;;  %v13539_v47 = vld [vmem:[%s18426_s7 + $0x478] sm:$0xff]  }
  0x75   :  { %12063 = vmatpush3.bf16.msra.mxu0 %v13476_v53  ;;  %1827 = vmatmul.mubr.bf16.vlgmr.msra.gmra.mrb[16].mxu1 %v13473_v51  ;;  %v13546_v51 = vld [vmem:[%s18427_s5 + $0xdc] ss:$76 sps:$4 sm:$0xff]   ;;  %v13549_v53 = vld [vmem:[%s18426_s7 + $0x490] sm:$0xff]  }
  0x76   :  { %12091 = vmatpush3.bf16.msra.mxu1 %v13478_v55  ;;  %12064 = vmatprep.subr.bf16.mxu0 %v13479_v56  ;;  %v13550_v55 = vld [vmem:[%s18427_s5 + $0x48] ss:$76 sps:$4 sm:$0xff]   ;;  %v13551_v56 = vld [vmem:[%s18427_s5 + $0xe0] ss:$76 sps:$4 sm:$0xff]  }
  0x77   :  { %12092 = vmatprep.subr.bf16.mxu1 %v13481_v58  ;;  %1785 = vmatprep.mubr.bf16.mxu0 %v13482_v59 }
  0x78   :  { %1834 = vmatprep.mubr.bf16.mxu1 %v13487_v63 }
  0x79   :  { %12065 = vmatpush3.bf16.msra.mxu0 %v13480_v57 }
  0x7a   :  { %12093 = vmatpush3.bf16.msra.mxu1 %v13484_v60  ;;  %12066 = vmatprep.subr.bf16.mxu0 %v13486_v62 }
  0x7b   :  { %12094 = vmatprep.subr.bf16.mxu1 %v13491_v2 }
  0x7c   :  { %1786 = vmatmul.mubr.bf16.gmra.mrb[20].mxu0 %v13485_v61 }
  0x7d   :  { %12067 = vmatpush3.bf16.msra.mxu0 %v13489_v0  ;;  %1835 = vmatmul.mubr.bf16.gmra.mrb[20].mxu1 %v13490_v1 }
  0x7e   :  { %12095 = vmatpush3.bf16.msra.mxu1 %v13492_v3  ;;  %12068 = vmatprep.subr.bf16.mxu0 %v13493_v4 }
  0x7f   :  { %12096 = vmatprep.subr.bf16.mxu1 %v13495_v6  ;;  %1875 = vmatprep.mubr.bf16.mxu0 %v13514_v24  ;;  %v14222_v24 = vmov 0.0|0.0  }
  0x80   :  { %1924 = vmatprep.mubr.bf16.mxu1 %v13519_v28 }
  0x81   :  { %12069 = vmatpush3.bf16.msra.mxu0 %v13494_v5 }
  0x82   :  { %12097 = vmatpush3.bf16.msra.mxu1 %v13496_v7  ;;  %12070 = vmatprep.subr.bf16.mxu0 %v13497_v8 }
  0x83   :  { %12098 = vmatprep.subr.bf16.mxu1 %v13499_v10 }
  0x85   :  { %12071 = vmatpush3.bf16.msra.mxu0 %v13498_v9 }
  0x86   :  { %12099 = vmatpush3.bf16.msra.mxu1 %v13500_v11  ;;  %12072 = vmatprep.subr.bf16.mxu0 %v13501_v12 }
  0x87   :  { %12100 = vmatprep.subr.bf16.mxu1 %v13503_v14 }
  0x89   :  { %12073 = vmatpush3.bf16.msra.mxu0 %v13502_v13 }
  0x8a   :  { %12101 = vmatpush3.bf16.msra.mxu1 %v13504_v15  ;;  %12074 = vmatprep.subr.bf16.mxu0 %v13505_v16 }
  0x8b   :  { %12102 = vmatprep.subr.bf16.mxu1 %v13507_v18 }
  0x8d   :  { %12075 = vmatpush3.bf16.msra.mxu0 %v13506_v17 }
  0x8e   :  { %12103 = vmatpush3.bf16.msra.mxu1 %v13508_v19  ;;  %12076 = vmatprep.subr.bf16.mxu0 %v13509_v20 }
  0x8f   :  { %12104 = vmatprep.subr.bf16.mxu1 %v13511_v22  ;;  %v2071_v22 = vld [vmem:[%s18386_s16 + $0x8] sm:$0xff] }
  0x91   :  { %12077 = vmatpush3.bf16.msra.mxu0 %v13510_v21  ;;  %v2070_v21 = vld [vmem:[%s18386_s16] sm:$0xff] }
  0x92   :  { %12105 = vmatpush3.bf16.msra.mxu1 %v13515_v25  ;;  %12118 = vmatprep.subr.bf16.mxu0 %v13516_v26  ;;  %v2072_v26 = vld [vmem:[%s18386_s16 + $0x10] sm:$0xff] }
  0x93   :  { %12877 = vmatprep.subr.bf16.mxu1 %v14222_v24 }
  0x94   :  { %1876 = vmatmul.mubr.bf16.vlgmr.msra.gmra.mrb[24].mxu0 %v13512_v23  ;;  %v14928_v23 = vpack.c.bf16 %v2071_v22, %v2070_v21 }
  0x95   :  { %12119 = vmatpush3.bf16.msra.mxu0 %v13520_v29  ;;  %1925 = vmatmul.mubr.bf16.vlgmr.msra.gmra.mrb[24].mxu1 %v13517_v27  ;;  %v2073_v27 = vld [vmem:[%s18386_s16 + $0x18] sm:$0xff] }
  0x96   :  { %12120 = vmatprep.subr.bf16.mxu0 %v13521_v30  ;;  %1883 = vmatprep.mubr.bf16.mxu0 %v13523_v32  ;;  %v14942_v29 = vpack.c.bf16 %v2073_v27, %v2072_v26 }
  0x97   :  { %1932 = vmatprep.mubr.bf16.mxu1 %v13527_v35  ;;  %12879 = vmatpush3.bf16.msra.mxu1 %v14928_v23 }
  0x98   :  { %12880 = vmatprep.subr.bf16.mxu1 %v14222_v24 }
  0x99   :  { %12121 = vmatpush3.bf16.msra.mxu0 %v13522_v31 }
  0x9a   :  { %12122 = vmatprep.subr.bf16.mxu0 %v13526_v34 }
  0x9b   :  { %12882 = vmatpush3.bf16.msra.mxu1 %v14942_v29 }
  0x9c   :  { %1884 = vmatmul.mubr.bf16.gmra.mrb[28].mxu0 %v13525_v33  ;;  %12883 = vmatprep.subr.bf16.mxu1 %v14222_v24 }
  0x9d   :  { %12123 = vmatpush3.bf16.msra.mxu0 %v13529_v36  ;;  %1933 = vmatmul.mubr.bf16.gmra.mrb[28].mxu1 %v13530_v37  ;;  %v2074_v37 = vld [vmem:[%s18386_s16 + $0x20] sm:$0xff] }
  0x9e   :  { %12124 = vmatprep.subr.bf16.mxu0 %v13531_v38  ;;  %1973 = vmatprep.mubr.bf16.mxu0 %v13543_v44  ;;  %v2075_v38 = vld [vmem:[%s18386_s16 + $0x28] sm:$0xff] }
  0xa1   :  { %12125 = vmatpush3.bf16.msra.mxu0 %v13532_v39 }
  0xa2   :  { %12126 = vmatprep.subr.bf16.mxu0 %v13533_v40 }
  0xa5   :  { %12127 = vmatpush3.bf16.msra.mxu0 %v13534_v41  ;;  %v14954_v41 = vpack.c.bf16 %v2075_v38, %v2074_v37 }
  0xa6   :  { %12128 = vmatprep.subr.bf16.mxu0 %v13535_v42 }
  0xa7   :  { %12885 = vmatpush3.bf16.msra.mxu1 %v14954_v41 }
  0xa8   :  { %12886 = vmatprep.subr.bf16.mxu1 %v14222_v24 }
  0xa9   :  { %12129 = vmatpush3.bf16.msra.mxu0 %v13536_v43 }
  0xaa   :  { %12130 = vmatprep.subr.bf16.mxu0 %v13537_v45 }
  0xad   :  { %12131 = vmatpush3.bf16.msra.mxu0 %v13538_v46  ;;  %v2076_v46 = vld [vmem:[%s18386_s16 + $0x30] sm:$0xff] }
  0xae   :  { %12132 = vmatprep.subr.bf16.mxu0 %v13539_v47  ;;  %v2077_v47 = vld [vmem:[%s18386_s16 + $0x38] sm:$0xff] }
  0xb1   :  { %12133 = vmatpush3.bf16.msra.mxu0 %v13540_v48 }
  0xb2   :  { %12691 = vmatprep.subr.bf16.mxu0 %v13544_v49 }
  0xb4   :  { %1974 = vmatmul.mubr.bf16.vlgmr.msra.gmra.mrb[32].mxu0 %v13541_v50 }
  0xb5   :  { %12692 = vmatpush3.bf16.msra.mxu0 %v13544_v49  ;;  %1981 = vmatprep.mubr.bf16.mxu0 %v13546_v51  ;;  %v14966_v49 = vpack.c.bf16 %v2077_v47, %v2076_v46 }
  0xb6   :  { %12693 = vmatprep.subr.bf16.mxu0 %v13545_v52 }
  0xb7   :  { %12888 = vmatpush3.bf16.msra.mxu1 %v14966_v49 }
  0xb8   :  { %12889 = vmatprep.subr.bf16.mxu1 %v14222_v24 }
  0xb9   :  { %12694 = vmatpush3.bf16.msra.mxu0 %v13545_v52  ;;  %v2078_v52 = vld [vmem:[%s18386_s16 + $0x40] sm:$0xff] }
  0xba   :  { %12695 = vmatprep.subr.bf16.mxu0 %v13549_v53 }
  0xbc   :  { %1982 = vmatmul.mubr.bf16.gmra.mrb[36].mxu0 %v13548_v54 }
  0xbd   :  { %12696 = vmatpush3.bf16.msra.mxu0 %v13549_v53  ;;  %12697 = vmatprep.mubr.msk.bf16.mxu0 %vm1542_vm0, %v13550_v55  ;;  %v2079_v53 = vld [vmem:[%s18386_s16 + $0x48] sm:$0xff] }
  0xbe   :  { %12895 = vmatprep.subr.bf16.mxu0 %v14222_v24 }
  0xc4   :  { %12698 = vmatmul.mubr.msk.bf16.vlgmr.msra.gmra.mrb[40].mxu0 %vm1542_vm0, %v13551_v56  ;;  %v14978_v56 = vpack.c.bf16 %v2079_v53, %v2078_v52 }
  0xc5   :  { %12897 = vmatpush3.bf16.msra.mxu0 %v14928_v23 }
  0xc6   :  { %12898 = vmatprep.subr.bf16.mxu0 %v14222_v24  ;;  %12891 = vmatpush3.bf16.msra.mxu1 %v14978_v56 }
  0xc7   :  { %12892 = vmatprep.subr.bf16.mxu1 %v14222_v24 }
  0xc9   :  { %12900 = vmatpush3.bf16.msra.mxu0 %v14942_v29 }
  0xca   :  { %12901 = vmatprep.subr.bf16.mxu0 %v14222_v24 }
  0xcd   :  { %12903 = vmatpush3.bf16.msra.mxu0 %v14954_v41 }
  0xce   :  { %12904 = vmatprep.subr.bf16.mxu0 %v14222_v24 }
  0xd1   :  { %12906 = vmatpush3.bf16.msra.mxu0 %v14966_v49 }
  0xd2   :  { %12907 = vmatprep.subr.bf16.mxu0 %v14222_v24 }
  0xd5   :  { %12909 = vmatpush3.bf16.msra.mxu0 %v14978_v56 }
  0xd6   :  { %12910 = vmatprep.subr.bf16.mxu0 %v14222_v24 }
 0x107   :  { %v11910_v57 = vpop.f32.mrb[0].mxu0 }
 0x108   :  { %v11938_v58 = vpop.f32.mrb[0].mxu1  ;;  %v11911_v59 = vpop.f32.mrb[1].mxu0 }
 0x109   :  { %v11912_v60 = vadd.f32 %v11911_v59, %v11910_v57  ;;  %v11939_v61 = vpop.f32.mrb[1].mxu1  ;;  %v11913_v62 = vpop.f32.mrb[2].mxu0 }
 0x10a   :  { %v11940_v63 = vadd.f32 %v11939_v61, %v11938_v58  ;;  %v11941_v0 = vpop.f32.mrb[2].mxu1  ;;  %v11914_v1 = vpop.f32.mrb[3].mxu0 }
 0x10b   :  { %v11915_v2 = vadd.f32 %v11914_v1, %v11913_v62  ;;  %v11942_v3 = vpop.f32.mrb[3].mxu1  ;;  %v2081_v1 = vld [vmem:[%s18386_s16 + $0x58] sm:$0xff] }
 0x10c   :  { %v1633_v4 = vadd.f32 %v11940_v63, %v11912_v60  ;;  %v11943_v5 = vadd.f32 %v11942_v3, %v11941_v0  ;;  %v2080_v0 = vld [vmem:[%s18386_s16 + $0x50] sm:$0xff] }
 0x10e   :  { %v1636_v6 = vadd.f32 %v11943_v5, %v11915_v2 }
 0x10f   :  { %v11916_v7 = vpop.f32.mrb[4].mxu0 }
 0x110   :  { %v11944_v8 = vpop.f32.mrb[4].mxu1  ;;  %v11917_v9 = vpop.f32.mrb[5].mxu0 }
 0x111   :  { %v11945_v10 = vpop.f32.mrb[5].mxu1  ;;  %v11918_v11 = vadd.f32 %v11917_v9, %v11916_v7  ;;  %v11919_v13 = vpop.f32.mrb[6].mxu0 }
 0x112   :  { %v11946_v12 = vadd.f32 %v11945_v10, %v11944_v8  ;;  %v11947_v14 = vpop.f32.mrb[6].mxu1  ;;  %v11920_v15 = vpop.f32.mrb[7].mxu0  ;;  %v18404_v8 = vmov 0.0  }
 0x113   :  { %v11948_v16 = vpop.f32.mrb[7].mxu1  ;;  %v11921_v18 = vadd.f32 %v11920_v15, %v11919_v13  ;;  %12725 = vmatprep.mubr.msk.f32.mxu1 %vm14223_vm1, %v18404_v8  ;;  %12752 = vmatprep.mubr.msk.f32.mxu0 %vm14223_vm1, %v18404_v8 }
 0x114   :  { %v1641_v17 = vadd.f32 %v11946_v12, %v11918_v11  ;;  %v11949_v19 = vadd.f32 %v11948_v16, %v11947_v14 }
 0x116   :  { %v14920_v20 = vadd.f32 %v11949_v19, %v11921_v18 }
 0x127   :  { %v11966_v25 = vpop.f32.mrb[8].mxu0 }
 0x128   :  { %v11967_v28 = vpop.f32.mrb[9].mxu0  ;;  %v11994_v32 = vpop.f32.mrb[8].mxu1 }
 0x129   :  { %v11968_v30 = vadd.f32 %v11967_v28, %v11966_v25  ;;  %v11969_v31 = vpop.f32.mrb[10].mxu0  ;;  %v11995_v36 = vpop.f32.mrb[9].mxu1 }
 0x12a   :  { %v11970_v33 = vpop.f32.mrb[11].mxu0  ;;  %v11996_v39 = vadd.f32 %v11995_v36, %v11994_v32  ;;  %v11997_v40 = vpop.f32.mrb[10].mxu1 }
 0x12b   :  { %v1682_v34 = vadd.f32 %v11968_v30, %v1633_v4  ;;  %v11971_v35 = vadd.f32 %v11970_v33, %v11969_v31  ;;  %v11998_v43 = vpop.f32.mrb[11].mxu1  ;;  %v14991_v4 = vpack.c.bf16 %v2081_v1, %v2080_v0 }
 0x12c   :  { %v11999_v45 = vadd.f32 %v11998_v43, %v11997_v40 }
 0x12d   :  { %v1685_v42 = vadd.f32 %v11971_v35, %v1636_v6  ;;  %v1731_v44 = vadd.f32 %v11996_v39, %v1682_v34  ;;  %12894 = vmatpush3.bf16.msra.mxu1 %v14991_v4  ;;  %12912 = vmatpush3.bf16.msra.mxu0 %v14991_v4 }
 0x12e   :  { %12913 = vmatprep.subr.bf16.mxu0 %v14222_v24  ;;  %12755 = vmatprep.subr.mxu1 %v18404_v8 }
 0x12f   :  { %v1734_v48 = vadd.f32 %v11999_v45, %v1685_v42  ;;  %v11972_v50 = vpop.f32.mrb[12].mxu0 }
 0x130   :  { %v11973_v51 = vpop.f32.mrb[13].mxu0  ;;  %v12000_v57 = vpop.f32.mrb[12].mxu1 }
 0x131   :  { %v11974_v54 = vadd.f32 %v11973_v51, %v11972_v50  ;;  %v11975_v55 = vpop.f32.mrb[14].mxu0  ;;  %v12001_v61 = vpop.f32.mrb[13].mxu1 }
 0x132   :  { %v11976_v58 = vpop.f32.mrb[15].mxu0  ;;  %v12002_v62 = vadd.f32 %v12001_v61, %v12000_v57  ;;  %v12003_v63 = vpop.f32.mrb[14].mxu1 }
 0x133   :  { %v1690_v59 = vadd.f32 %v11974_v54, %v1641_v17  ;;  %v11977_v60 = vadd.f32 %v11976_v58, %v11975_v55  ;;  %v12004_v3 = vpop.f32.mrb[15].mxu1 }
 0x134   :  { %v12005_v6 = vadd.f32 %v12004_v3, %v12003_v63 }
 0x135   :  { %v1693_v2 = vadd.f32 %v11977_v60, %v14920_v20  ;;  %v1739_v5 = vadd.f32 %v12002_v62, %v1690_v59 }
 0x137   :  { %v1742_v7 = vadd.f32 %v12005_v6, %v1693_v2 }
 0x147   :  { %v12022_v9 = vpop.f32.mrb[16].mxu0 }
 0x148   :  { %v12023_v10 = vpop.f32.mrb[17].mxu0  ;;  %v12050_v15 = vpop.f32.mrb[16].mxu1 }
 0x149   :  { %v12024_v11 = vadd.f32 %v12023_v10, %v12022_v9  ;;  %v12025_v12 = vpop.f32.mrb[18].mxu0  ;;  %v12051_v17 = vpop.f32.mrb[17].mxu1 }
 0x14a   :  { %v12026_v13 = vpop.f32.mrb[19].mxu0  ;;  %v12052_v19 = vadd.f32 %v12051_v17, %v12050_v15  ;;  %v12053_v20 = vpop.f32.mrb[18].mxu1 }
 0x14b   :  { %v1780_v14 = vadd.f32 %v12024_v11, %v1731_v44  ;;  %v12027_v16 = vadd.f32 %v12026_v13, %v12025_v12  ;;  %v12054_v21 = vpop.f32.mrb[19].mxu1 }
 0x14c   :  { %v12055_v25 = vadd.f32 %v12054_v21, %v12053_v20 }
 0x14d   :  { %v1783_v18 = vadd.f32 %v12027_v16, %v1734_v48  ;;  %v1829_v22 = vadd.f32 %v12052_v19, %v1780_v14 }
 0x14f   :  { %v1832_v26 = vadd.f32 %v12055_v25, %v1783_v18  ;;  %v12028_v27 = vpop.f32.mrb[20].mxu0 }
 0x150   :  { %v12029_v28 = vpop.f32.mrb[21].mxu0  ;;  %v12056_v32 = vpop.f32.mrb[20].mxu1 }
 0x151   :  { %v12030_v30 = vadd.f32 %v12029_v28, %v12028_v27  ;;  %v12031_v31 = vpop.f32.mrb[22].mxu0  ;;  %v12057_v36 = vpop.f32.mrb[21].mxu1 }
 0x152   :  { %v12032_v33 = vpop.f32.mrb[23].mxu0  ;;  %v12058_v37 = vadd.f32 %v12057_v36, %v12056_v32  ;;  %v12059_v38 = vpop.f32.mrb[22].mxu1 }
 0x153   :  { %v1788_v34 = vadd.f32 %v12030_v30, %v1739_v5  ;;  %v12033_v35 = vadd.f32 %v12032_v33, %v12031_v31  ;;  %v12060_v40 = vpop.f32.mrb[23].mxu1 }
 0x154   :  { %v12061_v43 = vadd.f32 %v12060_v40, %v12059_v38 }
 0x155   :  { %v1791_v39 = vadd.f32 %v12033_v35, %v1742_v7  ;;  %v1837_v42 = vadd.f32 %v12058_v37, %v1788_v34 }
 0x157   :  { %v1840_v44 = vadd.f32 %v12061_v43, %v1791_v39 }
 0x167   :  { %v12078_v45 = vpop.f32.mrb[24].mxu0 }
 0x168   :  { %v12079_v46 = vpop.f32.mrb[25].mxu0  ;;  %v12106_v50 = vpop.f32.mrb[24].mxu1 }
 0x169   :  { %v12080_v47 = vadd.f32 %v12079_v46, %v12078_v45  ;;  %v12081_v48 = vpop.f32.mrb[26].mxu0  ;;  %v12107_v54 = vpop.f32.mrb[25].mxu1 }
 0x16a   :  { %v12082_v51 = vpop.f32.mrb[27].mxu0  ;;  %v12108_v55 = vadd.f32 %v12107_v54, %v12106_v50  ;;  %v12109_v57 = vpop.f32.mrb[26].mxu1 }
 0x16b   :  { %v1878_v52 = vadd.f32 %v12080_v47, %v1829_v22  ;;  %v12083_v53 = vadd.f32 %v12082_v51, %v12081_v48  ;;  %v12110_v59 = vpop.f32.mrb[27].mxu1 }
 0x16c   :  { %v12111_v61 = vadd.f32 %v12110_v59, %v12109_v57 }
 0x16d   :  { %v1881_v58 = vadd.f32 %v12083_v53, %v1832_v26  ;;  %v1927_v60 = vadd.f32 %v12108_v55, %v1878_v52 }
 0x16f   :  { %v12084_v62 = vpop.f32.mrb[28].mxu0  ;;  %v1930_v63 = vadd.f32 %v12111_v61, %v1881_v58 }
 0x170   :  { %v12085_v0 = vpop.f32.mrb[29].mxu0  ;;  %v12112_v3 = vpop.f32.mrb[28].mxu1 }
 0x171   :  { %v12086_v1 = vadd.f32 %v12085_v0, %v12084_v62  ;;  %v12087_v2 = vpop.f32.mrb[30].mxu0  ;;  %v12113_v9 = vpop.f32.mrb[29].mxu1 }
 0x172   :  { %v12088_v5 = vpop.f32.mrb[31].mxu0  ;;  %v12114_v10 = vadd.f32 %v12113_v9, %v12112_v3  ;;  %v12115_v11 = vpop.f32.mrb[30].mxu1 }
 0x173   :  { %v1886_v6 = vadd.f32 %v12086_v1, %v1837_v42  ;;  %v12089_v7 = vadd.f32 %v12088_v5, %v12087_v2  ;;  %v12116_v13 = vpop.f32.mrb[31].mxu1 }
 0x174   :  { %v12117_v15 = vadd.f32 %v12116_v13, %v12115_v11 }
 0x175   :  { %v1889_v12 = vadd.f32 %v12089_v7, %v1840_v44  ;;  %v1935_v14 = vadd.f32 %v12114_v10, %v1886_v6 }
 0x177   :  { %v1938_v16 = vadd.f32 %v12117_v15, %v1889_v12 }
 0x187   :  { %v12134_v17 = vpop.f32.mrb[32].mxu0 }
 0x188   :  { %v12135_v18 = vpop.f32.mrb[33].mxu0 }
 0x189   :  { %v12136_v19 = vadd.f32 %v12135_v18, %v12134_v17  ;;  %v12137_v20 = vpop.f32.mrb[34].mxu0 }
 0x18a   :  { %31 = vsyncpa [#allocation6], 0  ;;  %v12138_v21 = vpop.f32.mrb[35].mxu0  ;;  %vm2039_vm2 = vcmask 785408   ;;  %v2239_v15 = vld [vmem:[%s18387_s17] sm:$0x3f] }
 0x18b   :  { %v12139_v22 = vadd.f32 %v12138_v21, %v12137_v20  ;;  %v1976_v25 = vadd.f32 %v12136_v19, %v1927_v60  ;;  %vm2244_vm3 = vcmask 1045504   ;;  %s18428_s1 = sld [smem:[#allocation20_spill]]  ;;  %vm2240_vm4 = vcmask 48128   ;;  %s18429_s7 = sld [smem:[#allocation21_spill]] }
 0x18c   :  { %vm85_vm5 = vcmask 778240   ;;  %vm86_vm6 = vsmask.f32 256  ;;  %vm94_vm8 = vsmask.f32 7938  ;;  %s18432_s8 = sld [smem:[#allocation16_spill]] }
 0x18d   :  { %v1979_v26 = vadd.f32 %v12139_v22, %v1930_v63  ;;  %vm15064_vm7 = vmand %vm85_vm5, %vm86_vm6  ;;  %vm5070_vm10 = vcmask 1043456   ;;  %vm5072_vm11 = vcmask 1047556   ;;  %vm115_vm12 = vsmask.f32 7954  ;;  %s18444_s10 = sld [smem:[#allocation22_spill]]  ;;  %s18448_s3 = sld [smem:[#allocation18_spill]] }
 0x18e   :  { %vm95_vm9 = vmand %vm85_vm5, %vm94_vm8  ;;  %vm2423_vm0 = vsmask.f32 4368  ;;  %vm2465_vm5 = vcmask 781312   ;;  %s14227_s27 = smov 112   ;;  %s14229_s4 = smov [#allocation5]  }
 0x18f   :  { %v12140_v27 = vpop.f32.mrb[36].mxu0  ;;  %vm5071_vm13 = vmand %vm5070_vm10, %vm94_vm8 }
 0x190   :  { %v12141_v28 = vpop.f32.mrb[37].mxu0  ;;  %vm5073_vm14 = vmand %vm5072_vm11, %vm115_vm12  ;;  %vm2500_vm11 = vsmask.f32 3328 }
 0x191   :  { %v12142_v30 = vadd.f32 %v12141_v28, %v12140_v27  ;;  %v12143_v31 = vpop.f32.mrb[38].mxu0  ;;  %v2232_v27 = vld [vmem:[%s18428_s1] sm:$0x1]  ;;  %vm15087_vm15 = vmor %vm5073_vm14, %vm5071_vm13  ;;  %vm2501_vm13 = vsmask.f32 7440  ;;  %s18445_s1 = sld [smem:[#allocation23_spill]] }
 0x192   :  { %v12144_v32 = vpop.f32.mrb[39].mxu0  ;;  %vm15122_vm10 = vmand %vm2465_vm5, %vm94_vm8 }
 0x193   :  { %v12145_v33 = vadd.f32 %v12144_v32, %v12143_v31  ;;  %v1984_v34 = vadd.f32 %v12142_v30, %v1935_v14  ;;  %v2236_v31 = vld [vmem:[%s18429_s7] sm:$0x1]  ;;  %vm15163_vm14 = vmor %vm2500_vm11, %vm2501_vm13  ;;  %vm2769_vm11 = vcmask 1046532   ;;  %s18446_s7 = sld [smem:[#allocation17_spill]] }
 0x195   :  { %v1987_v35 = vadd.f32 %v12145_v33, %v1938_v16 }
 0x197   :  { %v12699_v36 = vpop.f32.mrb[40].mxu0 }
 0x198   :  { %v15001_v37 = vadd.f32 %v12699_v36, %v1984_v34  ;;  %v2024_v38 = vpop.f32.mrb[41].mxu0  ;;  %v88_v34 = vld [vmem:[#allocation2] sm:$0x1]  ;;  %v91_v36 = vld [vmem:[#allocation2 + $0xc] sm:$0x1] }
 0x199   :  { %v15003_v39 = vadd.f32 %v2024_v38, %v1976_v25  ;;  %v12700_v40 = vpop.f32.mrb[42].mxu0  ;;  %v96_v38 = vld [vmem:[#allocation2 + $0x8] sm:$0x1] }
 0x19a   :  { %v15005_v42 = vadd.f32 %v12700_v40, %v1987_v35  ;;  %v2027_v43 = vpop.f32.mrb[43].mxu0  ;;  %v2055_v46 = vmul.f32 %v15001_v37, %v15001_v37  ;;  %v2043_v52 = vsel %vm2039_vm2, %v15001_v37, 0.0  ;;  %v89_v40 = vsel %vm15064_vm7, 0, %v88_v34 }
 0x19b   :  { %v2053_v44 = vmul.f32 %v15003_v39, %v15003_v39  ;;  %v15009_v45 = vadd.f32 %v2027_v43, %v1979_v26  ;;  %v2040_v47 = vsel %vm2039_vm2, %v15003_v39, 0.0  ;;  %v92_v43 = vsel %vm15064_vm7, 0, %v91_v36  ;;  %90 = vst [vmem:[#allocation2] sm:$0x1] %v89_v40 }
 0x19c   :  { %v2056_v54 = vmul.f32 %v15005_v42, %v15005_v42  ;;  %v2060_v59 = vsel %vm2039_vm2, %v2055_v46, 0.0  ;;  %v2045_v60 = vsel %vm2039_vm2, %v15005_v42, 0.0  ;;  %93 = vst [vmem:[#allocation2 + $0xc] sm:$0x1] %v92_v43  ;;  %v97_v46 = vsel %vm95_vm9, 0, %v96_v38 }
 0x19d   :  { %v2041_v48 = vsel %vm2039_vm2, %v15009_v45, 0.0  ;;  %v2054_v50 = vmul.f32 %v15009_v45, %v15009_v45  ;;  %v2057_v53 = vsel %vm2039_vm2, %v2053_v44, 0.0  ;;  %v99_v44 = vld [vmem:[#allocation2 + $0x14] sm:$0x1]  ;;  %98 = vst [vmem:[#allocation2 + $0x8] sm:$0x1] %v97_v46 }
 0x19e   :  { %v2042_v51 = vadd.f32 %v2041_v48, %v2040_v47  ;;  %v2062_v63 = vsel %vm2039_vm2, %v2056_v54, 0.0  ;;  %v100_v47 = vsel %vm95_vm9, 0, %v99_v44  ;;  %v13552_v48 = vld [vmem:[%s18432_s8 + $0x30] sm:$0xff]   ;;  %vm15116_vm9 = vmor %vm86_vm6, %vm2423_vm0  ;;  %vm2768_vm0 = vcmask 1042432  }
 0x19f   :  { %v2058_v55 = vsel %vm2039_vm2, %v2054_v50, 0.0  ;;  %101 = vst [vmem:[#allocation2 + $0x14] sm:$0x1] %v100_v47  ;;  %v13553_v50 = vld [vmem:[%s18432_s8 + $0x38] sm:$0xff]   ;;  %v13556_v54 = vld [vmem:[%s18432_s8 + $0x50] sm:$0xff]   ;;  %vm15202_vm13 = vmor %vm2768_vm0, %vm2769_vm11  ;;  %vm4568_vm0 = vcmask 1047559  }
 0x1a0   :  { %v2044_v57 = vadd.f32 %v2043_v52, %v2042_v51  ;;  %v2059_v58 = vadd.f32 %v2058_v55, %v2057_v53  ;;  %v13554_v51 = vld [vmem:[%s18432_s8 + $0x40] sm:$0xff]   ;;  %v13555_v52 = vld [vmem:[%s18432_s8 + $0x48] sm:$0xff]   ;;  %v13557_v55 = vld [vmem:[%s18432_s8 + $0x58] sm:$0xff]   ;;  %vm102_vm11 = vcmask 1040384  }
 0x1a2   :  { %v2046_v61 = vadd.f32 %v2045_v60, %v2044_v57  ;;  %v2061_v62 = vadd.f32 %v2060_v59, %v2059_v58  ;;  %v15100_v57 = vld [vmem:[%s18432_s8] sm:$0xff]   ;;  %v2391_v58 = vlaneseq }
 0x1a3   :  { %v2475_v46 = vld [vmem:[#allocation2 + $0xc] sm:$0xf] }
 0x1a4   :  { %v2047_v0 = vrot.slane %v2046_v61, 4  ;;  %v2063_v1 = vadd.f32 %v2062_v63, %v2061_v62  ;;  %v15104_v59 = vshrl.u32 %v2391_v58, 7  ;;  %v2472_v36 = vld [vmem:[#allocation2 + $0x8] sm:$0x1] }
 0x1a6   :  { %v2048_v2 = vadd.f32 %v2047_v0, %v2046_v61  ;;  %v2064_v3 = vrot.slane %v2063_v1, 4  ;;  %18435 = vst [vmem:[#allocation8_spill] sm:$0xff] %v15104_v59  ;;  %v15107_v60 = vsub.s32 0, %v15104_v59  ;;  %v2479_v47 = vld [vmem:[#allocation2 + $0x14] sm:$0x1] }
 0x1a8   :  { %v2049_v5 = vrot.slane %v2048_v2, 2  ;;  %v2065_v6 = vadd.f32 %v2064_v3, %v2063_v1 }
 0x1aa   :  { %v2050_v7 = vadd.f32 %v2049_v5, %v2048_v2  ;;  %v2066_v9 = vrot.slane %v2065_v6, 2 }
 0x1ac   :  { %v2051_v10 = vrot.slane %v2050_v7, 1  ;;  %v2067_v11 = vadd.f32 %v2066_v9, %v2065_v6 }
 0x1ae   :  { %v2052_v12 = vadd.f32 %v2051_v10, %v2050_v7  ;;  %v2068_v13 = vrot.slane %v2067_v11, 1 }
 0x1b0   :  { %12726 = vmatmul.mubr.msk.f32.vlgmr.msra.gmra.mrb[32].mxu1 %vm2039_vm2, %v2052_v12  ;;  %v2069_v14 = vadd.f32 %v2068_v13, %v2067_v11 }
 0x1b1   :  { %12757 = vmatprep.mubr.msk.f32.mxu1 %vm14223_vm1, %v18404_v8  ;;  %12756 = vmatpush3.msk.msra.mxu1 %vm2244_vm3, %v2239_v15 }
 0x1b2   :  { %12753 = vmatmul.mubr.msk.f32.vlgmr.msra.gmra.mrb[44].mxu0 %vm2039_vm2, %v2069_v14  ;;  %12760 = vmatprep.subr.mxu1 %v18404_v8 }
 0x1b3   :  { %12915 = vmatpush3.bf16.msra.mxu0 %v14928_v23  ;;  %12837 = vmatprep.mubr.msk.f32.mxu0 %vm14223_vm1, %v18404_v8 }
 0x1b4   :  { %12916 = vmatprep.subr.bf16.mxu0 %v14222_v24 }
 0x1b7   :  { %12918 = vmatpush3.bf16.msra.mxu0 %v14942_v29 }
 0x1b8   :  { %12919 = vmatprep.subr.bf16.mxu0 %v14222_v24 }
 0x1bb   :  { %12921 = vmatpush3.bf16.msra.mxu0 %v14954_v41 }
 0x1bc   :  { %12922 = vmatprep.subr.bf16.mxu0 %v14222_v24 }
 0x1bf   :  { %12924 = vmatpush3.bf16.msra.mxu0 %v14966_v49 }
 0x1c0   :  { %12925 = vmatprep.subr.bf16.mxu0 %v14222_v24 }
 0x1c3   :  { %12927 = vmatpush3.bf16.msra.mxu0 %v14978_v56 }
 0x1c4   :  { %12928 = vmatprep.subr.bf16.mxu0 %v14222_v24 }
 0x1c7   :  { %12930 = vmatpush3.bf16.msra.mxu0 %v14991_v4 }
 0x1c8   :  { %12931 = vmatprep.subr.bf16.mxu0 %v14222_v24 }
 0x283   :  { %v2151_v16 = vpop.f32.mrb[32].mxu1 }
 0x284   :  { %v2228_v17 = vmul.f32 0.001953125, %v2151_v16  ;;  %v12727_v18 = vpop.f32.mrb[33].mxu1 }
 0x285   :  { %v2224_v19 = vpop.f32.mrb[44].mxu0 }
 0x286   :  { %v2230_v20 = vmul.f32 %v2228_v17, %v2228_v17  ;;  %v2229_v21 = vmul.f32 0.001953125, %v2224_v19  ;;  %v12754_v22 = vpop.f32.mrb[45].mxu0 }
 0x288   :  { %v2231_v25 = vsub.f32 %v2229_v21, %v2230_v20 }
 0x28a   :  { %v2233_v26 = vadd.f32 1e-05, %v2231_v25 }
 0x28c   :  { %14188 = vrsqrt.f32 %v2233_v26 }
 0x296   :  { %v14189_v28 = vpop.eup %14188 }
 0x297   :  { %v2235_v30 = vmul.f32 %v14189_v28, %v2232_v27  ;;  %v2467_v28 = vld [vmem:[#allocation2] sm:$0xf] }
 0x299   :  { %12758 = vmatmul.mubr.msk.f32.vlgmr.msra.gmra.mrb[34].mxu1 %vm2240_vm4, %v2235_v30  ;;  %v2237_v32 = vmul.f32 %v2235_v30, %v2228_v17 }
 0x29a   :  { %12761 = vmatpush3.msk.msra.mxu1 %vm2244_vm3, %v2239_v15  ;;  %12762 = vmatprep.mubr.msk.f32.mxu1 %vm14223_vm1, %v18404_v8 }
 0x29b   :  { %v2238_v33 = vsub.f32 %v2236_v31, %v2237_v32  ;;  %12765 = vmatprep.subr.bf16.mxu1 %v13552_v48 }
 0x29d   :  { %12763 = vmatmul.mubr.msk.f32.vlgmr.msra.gmra.mrb[36].mxu1 %vm2240_vm4, %v2238_v33 }
 0x29e   :  { %12766 = vmatpush3.bf16.msra.mxu1 %v13552_v48 }
 0x29f   :  { %12767 = vmatprep.subr.bf16.mxu1 %v13553_v50 }
 0x2a2   :  { %12768 = vmatpush3.bf16.msra.mxu1 %v13553_v50 }
 0x2a3   :  { %12769 = vmatprep.subr.bf16.mxu1 %v13554_v51 }
 0x2a6   :  { %12770 = vmatpush3.bf16.msra.mxu1 %v13554_v51 }
 0x2a7   :  { %12771 = vmatprep.subr.bf16.mxu1 %v13555_v52 }
 0x2aa   :  { %12772 = vmatpush3.bf16.msra.mxu1 %v13555_v52 }
 0x2ab   :  { %12773 = vmatprep.subr.bf16.mxu1 %v13556_v54 }
 0x2ae   :  { %12774 = vmatpush3.bf16.msra.mxu1 %v13556_v54 }
 0x2af   :  { %12775 = vmatprep.subr.bf16.mxu1 %v13557_v55 }
 0x2b2   :  { %12776 = vmatpush3.bf16.msra.mxu1 %v13557_v55 }
 0x2b3   :  { %12781 = vmatprep.subr.bf16.mxu1 %v15100_v57 }
 0x36c   :  { %v2314_v61 = vpop.f32.mrb[34].mxu1 }
 0x36d   :  { %v2394_v62 = vrot.slane %v2314_v61, %v15107_v60  ;;  %v12759_v63 = vpop.f32.mrb[35].mxu1 }
 0x36f   :  { %v2395_v0 = vmul.f32 %v2394_v62, %v15003_v39  ;;  %v2396_v2 = vmul.f32 %v2394_v62, %v15009_v45  ;;  %v2397_v3 = vmul.f32 %v2394_v62, %v15001_v37  ;;  %v2398_v5 = vmul.f32 %v2394_v62, %v15005_v42 }
 0x370   :  { %v2387_v1 = vpop.f32.mrb[36].mxu1 }
 0x371   :  { %v2402_v6 = vrot.slane %v2387_v1, %v15107_v60  ;;  %v12764_v7 = vpop.f32.mrb[37].mxu1 }
 0x373   :  { %v2403_v9 = vadd.f32 %v2402_v6, %v2395_v0  ;;  %v2404_v10 = vadd.f32 %v2402_v6, %v2396_v2  ;;  %v2405_v11 = vadd.f32 %v2402_v6, %v2397_v3  ;;  %v2406_v12 = vadd.f32 %v2402_v6, %v2398_v5 }
 0x375   :  { %v2407_v13 = vmax.f32 %v2403_v9, 0.0  ;;  %v2408_v14 = vmax.f32 %v2404_v10, 0.0  ;;  %v2409_v15 = vmax.f32 %v2405_v11, 0.0  ;;  %v2410_v16 = vmax.f32 %v2406_v12, 0.0 }
 0x377   :  { %v11868_v17 = vpack.c.bf16 %v2407_v13, %v2407_v13  ;;  %v11869_v39 = vpack.c.bf16 %v2408_v14, %v2408_v14  ;;  %v11870_v18 = vpack.c.bf16 %v2409_v15, %v2409_v15  ;;  %v11871_v19 = vpack.c.bf16 %v2410_v16, %v2410_v16 }
 0x379   :  { %v2426_v45 = vshrl.u32 %v11868_v17, 16  ;;  %v2434_v37 = vshrl.u32 %v11869_v39, 16  ;;  %v2443_v42 = vshrl.u32 %v11870_v18, 16  ;;  %v2451_v20 = vshrl.u32 %v11871_v19, 16 }
 0x37a   :  { %v2429_v25 = vshll.u32 %v11868_v17, 16  ;;  %v2437_v27 = vshll.u32 %v11869_v39, 16  ;;  %v2446_v31 = vshll.u32 %v11870_v18, 16  ;;  %v2454_v33 = vshll.u32 %v11871_v19, 16 }
 0x37b   :  { %v2428_v22 = vrot.slane %v2426_v45, 7  ;;  %v2436_v26 = vrot.slane %v2434_v37, 7  ;;  %v2445_v30 = vrot.slane %v2443_v42, 7  ;;  %v2453_v32 = vrot.slane %v2451_v20, 7 }
 0x37d   :  { %v2431_v38 = vor.u32 %v2429_v25, %v2428_v22  ;;  %v2432_v40 = vrot.slane %v2428_v22, 4  ;;  %v2439_v43 = vor.u32 %v2437_v27, %v2436_v26  ;;  %v2441_v44 = vrot.slane %v2436_v26, 4 }
 0x37e   :  { %v2448_v48 = vor.u32 %v2446_v31, %v2445_v30  ;;  %v2449_v50 = vrot.slane %v2445_v30, 4  ;;  %v2456_v51 = vor.u32 %v2454_v33, %v2453_v32  ;;  %v2458_v52 = vrot.slane %v2453_v32, 4 }
 0x37f   :  { %v2440_v54 = vsel %vm15116_vm9, %v2432_v40, %v2439_v43  ;;  %v2468_v55 = vsel %vm15122_vm10, %v2431_v38, %v2467_v28  ;;  %v2473_v61 = vsel %vm15064_vm7, %v2441_v44, %v2472_v36 }
 0x380   :  { %v2457_v62 = vsel %vm15116_vm9, %v2449_v50, %v2456_v51  ;;  %2469 = vst [vmem:[#allocation2] sm:$0xf] %v2468_v55  ;;  %2471 = vst.msk [vmem:[#allocation2 + $0x4] sm:$0xf] %vm2465_vm5, %v2440_v54  ;;  %v2476_v63 = vsel %vm15122_vm10, %v2448_v48, %v2475_v46  ;;  %v2480_v0 = vsel %vm15064_vm7, %v2458_v52, %v2479_v47  ;;  %v13560_v52 = vld [vmem:[%s18432_s8 + $0x8] sm:$0xff]   ;;  %v13561_v55 = vld [vmem:[%s18432_s8 + $0x10] sm:$0xff]  }
 0x381   :  { %2474 = vst [vmem:[#allocation2 + $0x8] sm:$0x1] %v2473_v61  ;;  %2477 = vst [vmem:[#allocation2 + $0xc] sm:$0xf] %v2476_v63  ;;  %v13562_v61 = vld [vmem:[%s18432_s8 + $0x18] sm:$0xff]   ;;  %v13564_v63 = vld [vmem:[%s18432_s8 + $0x28] sm:$0xff]  }
 0x382   :  { %2478 = vst.msk [vmem:[#allocation2 + $0x10] sm:$0xf] %vm2465_vm5, %v2457_v62  ;;  %2481 = vst [vmem:[#allocation2 + $0x14] sm:$0x1] %v2480_v0  ;;  %v13563_v62 = vld [vmem:[%s18432_s8 + $0x20] sm:$0xff]  }
 0x387   :  { %v15140_v1 = vld [vmem:[#allocation2] sm:$0xf]  ;;  %v15142_v2 = vld [vmem:[#allocation2 + $0x4] sm:$0xf] }
 0x388   :  { %v15144_v3 = vld [vmem:[#allocation2 + $0x8] sm:$0x1]  ;;  %v2504_v5 = vshrl.u32 %v15140_v1, 16  ;;  %v2507_v6 = vshll.u32 %v15140_v1, 16  ;;  %v2513_v7 = vshll.u32 %v15142_v2, 16  ;;  %v2517_v9 = vshrl.u32 %v15142_v2, 16 }
 0x389   :  { %v15150_v10 = vld [vmem:[#allocation2 + $0xc] sm:$0xf]  ;;  %v2523_v11 = vshll.u32 %v15144_v3, 16  ;;  %v15153_v12 = vld [vmem:[#allocation2 + $0x10] sm:$0xf]  ;;  %v10883_v54 = vcombine.low %v15140_v1, %v15142_v2 }
 0x38a   :  { %v2528_v13 = vshrl.u32 %v15150_v10, 16  ;;  %v2506_v14 = vrot.slane %v2504_v5, 4  ;;  %v2509_v15 = vrot.slane %v2507_v6, 5  ;;  %v2515_v16 = vrot.slane %v2513_v7, 5  ;;  %v15156_v39 = vld [vmem:[#allocation2 + $0x14] sm:$0x1] }
 0x38b   :  { %v2519_v17 = vrot.slane %v2517_v9, 4  ;;  %v2531_v19 = vshll.u32 %v15150_v10, 16  ;;  %v2537_v45 = vshll.u32 %v15153_v12, 16  ;;  %v2541_v20 = vshrl.u32 %v15153_v12, 16  ;;  %v2762_v0 = vld [vmem:[#allocation2] sm:$0xe] }
 0x38c   :  { %v2530_v18 = vrot.slane %v2528_v13, 4  ;;  %v2510_v37 = vor.u32 %v2509_v15, %v2506_v14  ;;  %v2525_v25 = vrot.slane %v2523_v11, 5  ;;  %v2547_v32 = vshll.u32 %v15156_v39, 16  ;;  %v13566_v6 = vld [vmem:[%s18432_s8 + $0x60] sm:$0xff]   ;;  %v13567_v15 = vld [vmem:[%s18432_s8 + $0x68] sm:$0xff]  }
 0x38d   :  { %v2520_v42 = vor.u32 %v2519_v17, %v2515_v16  ;;  %v2533_v26 = vrot.slane %v2531_v19, 5  ;;  %v2539_v27 = vrot.slane %v2537_v45, 5  ;;  %v2543_v31 = vrot.slane %v2541_v20, 4  ;;  %v13570_v17 = vld [vmem:[%s18432_s8 + $0x80] sm:$0xff]   ;;  %v13571_v19 = vld [vmem:[%s18432_s8 + $0x88] sm:$0xff]  }
 0x38e   :  { %v2511_v28 = vrot.slane %v2510_v37, 4  ;;  %v2549_v47 = vrot.slane %v2547_v32, 5  ;;  %v10893_v7 = vrot.slane %v2762_v0, 9  ;;  %v2776_v9 = vrot.slane %v15144_v3, 5  ;;  %v2763_v45 = vld [vmem:[#allocation2 + $0xc] sm:$0xe] }
 0x38f   :  { %v2521_v30 = vrot.slane %v2520_v42, 4  ;;  %v2534_v33 = vor.u32 %v2533_v26, %v2530_v18  ;;  %v2544_v40 = vor.u32 %v2543_v31, %v2539_v27  ;;  %v10884_v13 = vcombine.low %v15150_v10, %v15153_v12  ;;  %v13569_v10 = vld [vmem:[%s18432_s8 + $0x78] sm:$0xff]  }
 0x390   :  { %v2516_v36 = vsel %vm15163_vm14, %v2511_v28, %v2515_v16  ;;  %v13568_v16 = vld [vmem:[%s18432_s8 + $0x70] sm:$0xff]   ;;  %v2780_v18 = vrot.slane %v15153_v12, 5  ;;  %v10894_v42 = vrot.slane %v2763_v45, 9  ;;  %v2783_v20 = vrot.slane %v15156_v39, 5 }
 0x391   :  { %v2526_v38 = vsel %vm15163_vm14, %v2521_v30, %v2525_v25  ;;  %v2535_v44 = vrot.slane %v2534_v33, 4  ;;  %v2545_v46 = vrot.slane %v2544_v40, 4 }
 0x392   :  { %v10873_v43 = vcombine.low %v2516_v36, %v2526_v38  ;;  %v2782_v37 = vrot.slane %v2780_v18, 4  ;;  %v2781_v12 = vsel %vm15202_vm13, %v10894_v42, %v2780_v18  ;;  %v3091_v18 = vld [vmem:[%s18444_s10] sm:$0x1] }
 0x393   :  { %v2540_v48 = vsel %vm15163_vm14, %v2535_v44, %v2539_v27  ;;  %v2550_v50 = vsel %vm15163_vm14, %v2545_v46, %v2549_v47 }
 0x394   :  { %12777 = vmatprep.mubr.msk.bf16.mxu1 %vm2039_vm2, %v10873_v43  ;;  %v10874_v51 = vcombine.low %v2540_v48, %v2550_v50  ;;  %v2784_v25 = vsel %vm15202_vm13, %v2782_v37, %v2783_v20  ;;  %v3095_v37 = vld [vmem:[%s18445_s1] sm:$0x1] }
 0x395   :  { %v10908_v26 = vcombine.low %v2781_v12, %v2784_v25  ;;  %v13574_v25 = vld [vmem:[%s18446_s7 + $0x64] ss:$8 sps:$4 sm:$0xff]   ;;  %v13572_v12 = vld [vmem:[%s18446_s7 + $0x60] ss:$8 sps:$4 sm:$0xff]  }
 0x396   :  { %12778 = vmatmul.mubr.msk.bf16.vlgmr.msra.gmra.mrb[40].mxu1 %vm2039_vm2, %v10874_v51 }
 0x397   :  { %12782 = vmatpush3.bf16.msra.mxu1 %v15100_v57  ;;  %12793 = vmatprep.mubr.msk.bf16.mxu1 %vm2039_vm2, %v10883_v54  ;;  %v2773_v57 = vrot.slane %v15142_v2, 5 }
 0x398   :  { %12783 = vmatprep.subr.bf16.mxu1 %v13560_v52 }
 0x399   :  { %v2775_v5 = vrot.slane %v2773_v57, 4  ;;  %v2774_v14 = vsel %vm15202_vm13, %v10893_v7, %v2773_v57 }
 0x39b   :  { %12784 = vmatpush3.bf16.msra.mxu1 %v13560_v52  ;;  %v2777_v11 = vsel %vm15202_vm13, %v2775_v5, %v2776_v9 }
 0x39c   :  { %12785 = vmatprep.subr.bf16.mxu1 %v13561_v55  ;;  %v10907_v3 = vcombine.low %v2774_v14, %v2777_v11 }
 0x39f   :  { %12786 = vmatpush3.bf16.msra.mxu1 %v13561_v55 }
 0x3a0   :  { %12787 = vmatprep.subr.bf16.mxu1 %v13562_v61 }
 0x3a3   :  { %12788 = vmatpush3.bf16.msra.mxu1 %v13562_v61 }
 0x3a4   :  { %12789 = vmatprep.subr.bf16.mxu1 %v13563_v62 }
 0x3a7   :  { %12790 = vmatpush3.bf16.msra.mxu1 %v13563_v62 }
 0x3a8   :  { %12791 = vmatprep.subr.bf16.mxu1 %v13564_v63 }
 0x3ab   :  { %12792 = vmatpush3.bf16.msra.mxu1 %v13564_v63 }
 0x3ac   :  { %12797 = vmatprep.subr.bf16.mxu1 %v13566_v6 }
 0x3ae   :  { %12794 = vmatmul.mubr.msk.bf16.vlgmr.msra.gmra.mrb[40].mxu1 %vm2039_vm2, %v10884_v13 }
 0x3af   :  { %12798 = vmatpush3.bf16.msra.mxu1 %v13566_v6  ;;  %12809 = vmatprep.mubr.msk.bf16.mxu1 %vm2039_vm2, %v10907_v3 }
 0x3b0   :  { %12799 = vmatprep.subr.bf16.mxu1 %v13567_v15 }
 0x3b3   :  { %12800 = vmatpush3.bf16.msra.mxu1 %v13567_v15 }
 0x3b4   :  { %12801 = vmatprep.subr.bf16.mxu1 %v13568_v16 }
 0x3b7   :  { %12802 = vmatpush3.bf16.msra.mxu1 %v13568_v16 }
 0x3b8   :  { %12803 = vmatprep.subr.bf16.mxu1 %v13569_v10 }
 0x3bb   :  { %12804 = vmatpush3.bf16.msra.mxu1 %v13569_v10 }
 0x3bc   :  { %12805 = vmatprep.subr.bf16.mxu1 %v13570_v17 }
 0x3bf   :  { %12806 = vmatpush3.bf16.msra.mxu1 %v13570_v17 }
 0x3c0   :  { %12807 = vmatprep.subr.bf16.mxu1 %v13571_v19 }
 0x3c3   :  { %12808 = vmatpush3.bf16.msra.mxu1 %v13571_v19 }
 0x3c6   :  { %12810 = vmatmul.mubr.msk.bf16.vlgmr.msra.gmra.mrb[40].mxu1 %vm2039_vm2, %v10908_v26  ;;  %v13575_v26 = vld [vmem:[%s18446_s7 + $0x70] ss:$8 sps:$4 sm:$0xff]  }
 0x499   :  { %v15236_v27 = vpop.f32.mrb[40].mxu1 }
 0x49a   :  { %v15238_v28 = vpop.f32.mrb[41].mxu1  ;;  %v2914_v32 = vmul.f32 %v15236_v27, %v15236_v27  ;;  %v2902_v43 = vsel %vm2039_vm2, %v15236_v27, 0.0 }
 0x49b   :  { %v2912_v30 = vmul.f32 %v15238_v28, %v15238_v28  ;;  %v15242_v31 = vpop.f32.mrb[42].mxu1  ;;  %v2899_v33 = vsel %vm2039_vm2, %v15238_v28, 0.0 }
 0x49c   :  { %v15244_v39 = vpop.f32.mrb[43].mxu1  ;;  %v2915_v46 = vmul.f32 %v15242_v31, %v15242_v31  ;;  %v2919_v51 = vsel %vm2039_vm2, %v2914_v32, 0.0  ;;  %v2904_v52 = vsel %vm2039_vm2, %v15242_v31, 0.0  ;;  %v13580_v32 = vld [vmem:[%s18446_s7 + $0x84] ss:$8 sps:$4 sm:$0xff]  }
 0x49d   :  { %v2900_v36 = vsel %vm2039_vm2, %v15244_v39, 0.0  ;;  %v2913_v38 = vmul.f32 %v15244_v39, %v15244_v39  ;;  %v2916_v44 = vsel %vm2039_vm2, %v2912_v30, 0.0  ;;  %v13577_v30 = vld [vmem:[%s18446_s7 + $0x74] ss:$8 sps:$4 sm:$0xff]  }
 0x49e   :  { %v2901_v40 = vadd.f32 %v2900_v36, %v2899_v33  ;;  %v2921_v61 = vsel %vm2039_vm2, %v2915_v46, 0.0  ;;  %v13578_v33 = vld [vmem:[%s18446_s7 + $0x80] ss:$8 sps:$4 sm:$0xff]   ;;  %v13583_v36 = vld [vmem:[%s18446_s7 + $0x94] ss:$8 sps:$4 sm:$0xff]  }
 0x49f   :  { %v2917_v47 = vsel %vm2039_vm2, %v2913_v38, 0.0  ;;  %v14225_v38 = vmov 0   ;;  %v13589_v46 = vld [vmem:[%s18446_s7 + $0xb4] ss:$8 sps:$4 sm:$0xff]  }
 0x4a0   :  { %v2903_v48 = vadd.f32 %v2902_v43, %v2901_v40  ;;  %v2918_v50 = vadd.f32 %v2917_v47, %v2916_v44  ;;  %v13581_v40 = vld [vmem:[%s18446_s7 + $0x90] ss:$8 sps:$4 sm:$0xff]   ;;  %v13586_v43 = vld [vmem:[%s18446_s7 + $0xa4] ss:$8 sps:$4 sm:$0xff]   ;;  %v13584_v44 = vld [vmem:[%s18446_s7 + $0xa0] ss:$8 sps:$4 sm:$0xff]  }
 0x4a1   :  { %v13587_v47 = vld [vmem:[%s18446_s7 + $0xb0] ss:$8 sps:$4 sm:$0xff]  }
 0x4a2   :  { %v2905_v54 = vadd.f32 %v2904_v52, %v2903_v48  ;;  %v2920_v55 = vadd.f32 %v2919_v51, %v2918_v50  ;;  %v13592_v48 = vld [vmem:[%s18446_s7 + $0x4] ss:$8 sps:$4 sm:$0xff]  }
 0x4a3   :  { %v3892_v50 = vld [vmem:[%s18388_s18 + $0x80] sm:$0xff]  ;;  %v3893_v51 = vld [vmem:[%s18388_s18 + $0x88] sm:$0xff] }
 0x4a4   :  { %v2906_v62 = vrot.slane %v2905_v54, 4  ;;  %v2922_v57 = vadd.f32 %v2921_v61, %v2920_v55  ;;  %v3876_v52 = vld [vmem:[%s18388_s18] sm:$0xff]  ;;  %v3877_v55 = vld [vmem:[%s18388_s18 + $0x8] sm:$0xff]  ;;  %v3894_v61 = vld [vmem:[%s18388_s18 + $0x90] sm:$0xff] }
 0x4a6   :  { %v2907_v63 = vadd.f32 %v2906_v62, %v2905_v54  ;;  %v2923_v9 = vrot.slane %v2922_v57, 4  ;;  %v15347_v54 = vpack.c.bf16 %v3893_v51, %v3892_v50  ;;  %v3895_v62 = vld [vmem:[%s18388_s18 + $0x98] sm:$0xff] }
 0x4a8   :  { %v2908_v0 = vrot.slane %v2907_v63, 2  ;;  %v2924_v11 = vadd.f32 %v2923_v9, %v2922_v57  ;;  %v15358_v57 = vpack.c.bf16 %v3877_v55, %v3876_v52  ;;  %12950 = vmatprep.subr.bf16.mxu1 %v15347_v54  ;;  %v3323_v52 = vld [vmem:[#allocation2 + $0x8] sm:$0x1] }
 0x4aa   :  { %v2909_v5 = vadd.f32 %v2908_v0, %v2907_v63  ;;  %v2925_v13 = vrot.slane %v2924_v11, 2  ;;  %v15360_v63 = vpack.c.bf16 %v3895_v62, %v3894_v61  ;;  %v3878_v0 = vld [vmem:[%s18388_s18 + $0x10] sm:$0xff]  ;;  %12952 = vmatpush3.bf16.msra.mxu1 %v15358_v57 }
 0x4ac   :  { %v2910_v6 = vrot.slane %v2909_v5, 1  ;;  %12954 = vmatprep.subr.bf16.mxu1 %v15360_v63 }
 0x4ae   :  { %v2911_v7 = vadd.f32 %v2910_v6, %v2909_v5  ;;  %v3879_v5 = vld [vmem:[%s18388_s18 + $0x18] sm:$0xff] }
 0x4af   :  { %v15370_v6 = vpack.c.bf16 %v3879_v5, %v3878_v0  ;;  %v3326_v0 = vld [vmem:[#allocation2 + $0xc] sm:$0xf]  ;;  %v3330_v5 = vld [vmem:[#allocation2 + $0x14] sm:$0x1] }
 0x4b0   :  { %12838 = vmatmul.mubr.msk.f32.vlgmr.msra.gmra.mrb[46].mxu0 %vm2039_vm2, %v2911_v7 }
 0x4b1   :  { %12933 = vmatpush3.bf16.msra.mxu0 %v14928_v23  ;;  %12864 = vmatprep.mubr.msk.f32.mxu0 %vm14223_vm1, %v18404_v8  ;;  %v2926_v23 = vadd.f32 %v2925_v13, %v2924_v11 }
 0x4b2   :  { %12934 = vmatprep.subr.bf16.mxu0 %v14222_v24  ;;  %12956 = vmatpush3.bf16.msra.mxu1 %v15370_v6 }
 0x4b3   :  { %v2927_v14 = vrot.slane %v2926_v23, 1 }
 0x4b5   :  { %12936 = vmatpush3.bf16.msra.mxu0 %v14942_v29  ;;  %v2928_v29 = vadd.f32 %v2927_v14, %v2926_v23 }
 0x4b6   :  { %12937 = vmatprep.subr.bf16.mxu0 %v14222_v24 }
 0x4b9   :  { %12939 = vmatpush3.bf16.msra.mxu0 %v14954_v41  ;;  %v3098_v41 = vld [vmem:[%s18387_s17] sm:$0x3f]  ;;  %s18447_s17 = sld [smem:[#allocation24_spill]] }
 0x4ba   :  { %12940 = vmatprep.subr.bf16.mxu0 %v14222_v24 }
 0x4bd   :  { %12942 = vmatpush3.bf16.msra.mxu0 %v14966_v49 }
 0x4be   :  { %12943 = vmatprep.subr.bf16.mxu0 %v14222_v24 }
 0x4c1   :  { %12945 = vmatpush3.bf16.msra.mxu0 %v14978_v56 }
 0x4c2   :  { %12946 = vmatprep.subr.bf16.mxu0 %v14222_v24 }
 0x4c5   :  { %12948 = vmatpush3.bf16.msra.mxu0 %v14991_v4 }
 0x4c6   :  { %12867 = vmatprep.subr.mxu0 %v18404_v8 }
 0x4c8   :  { %12865 = vmatmul.mubr.msk.f32.vlgmr.msra.gmra.mrb[48].mxu0 %vm2039_vm2, %v2928_v29 }
 0x4c9   :  { %12869 = vmatprep.mubr.msk.f32.mxu0 %vm14223_vm1, %v18404_v8  ;;  %12868 = vmatpush3.msk.msra.mxu0 %vm2244_vm3, %v3098_v41 }
 0x4ca   :  { %12872 = vmatprep.subr.mxu0 %v18404_v8 }
 0x583   :  { %v3010_v24 = vpop.f32.mrb[46].mxu0 }
 0x584   :  { %v12839_v49 = vpop.f32.mrb[47].mxu0  ;;  %v3087_v56 = vmul.f32 0.001953125, %v3010_v24 }
 0x586   :  { %v3089_v15 = vmul.f32 %v3087_v56, %v3087_v56 }
 0x59b   :  { %v3083_v4 = vpop.f32.mrb[48].mxu0 }
 0x59c   :  { %v3088_v3 = vmul.f32 0.001953125, %v3083_v4  ;;  %v12866_v16 = vpop.f32.mrb[49].mxu0 }
 0x59e   :  { %v3090_v10 = vsub.f32 %v3088_v3, %v3089_v15 }
 0x5a0   :  { %v3092_v17 = vadd.f32 1e-05, %v3090_v10 }
 0x5a2   :  { %14190 = vrsqrt.f32 %v3092_v17 }
 0x5ac   :  { %v14191_v19 = vpop.eup %14190 }
 0x5ad   :  { %v3094_v45 = vmul.f32 %v14191_v19, %v3091_v18 }
 0x5af   :  { %12870 = vmatmul.mubr.msk.f32.vlgmr.msra.gmra.mrb[50].mxu0 %vm2240_vm4, %v3094_v45  ;;  %v3096_v42 = vmul.f32 %v3094_v45, %v3087_v56 }
 0x5b0   :  { %12873 = vmatpush3.msk.msra.mxu0 %vm2244_vm3, %v3098_v41  ;;  %12874 = vmatprep.mubr.msk.f32.mxu0 %vm14223_vm1, %v18404_v8  ;;  %vm4063_vm1 = vcmask 130048   ;;  %vm18403_vm3 = vcmask 1042434  }
 0x5b1   :  { %v3097_v20 = vsub.f32 %v3095_v37, %v3096_v42  ;;  %3484 = vmatprep.subr.bf16.mxu0 %v13574_v25 }
 0x5b3   :  { %12875 = vmatmul.mubr.msk.f32.vlgmr.msra.gmra.mrb[52].mxu0 %vm2240_vm4, %v3097_v20  ;;  %vm4560_vm4 = vcmask 1043459  }
 0x5b4   :  { %3485 = vmatpush1.bf16.msra.mxu0 %v13572_v12  ;;  %3516 = vmatprep.mubr.bf16.mxu0 %v14225_v38 }
 0x5b5   :  { %3486 = vmatprep.subr.bf16.mxu0 %v13577_v30 }
 0x5b8   :  { %3487 = vmatpush1.bf16.msra.mxu0 %v13575_v26 }
 0x5b9   :  { %3488 = vmatprep.subr.bf16.mxu0 %v13580_v32 }
 0x5bc   :  { %3489 = vmatpush1.bf16.msra.mxu0 %v13578_v33 }
 0x5bd   :  { %3490 = vmatprep.subr.bf16.mxu0 %v13583_v36 }
 0x5c0   :  { %3491 = vmatpush1.bf16.msra.mxu0 %v13581_v40 }
 0x5c1   :  { %3492 = vmatprep.subr.bf16.mxu0 %v13586_v43 }
 0x5c4   :  { %3493 = vmatpush1.bf16.msra.mxu0 %v13584_v44 }
 0x5c5   :  { %3494 = vmatprep.subr.bf16.mxu0 %v13589_v46 }
 0x5c8   :  { %3495 = vmatpush1.bf16.msra.mxu0 %v13587_v47 }
 0x5c9   :  { %3613 = vmatprep.subr.bf16.mxu0 %v13592_v48 }
 0x682   :  { %v3171_v7 = vpop.f32.mrb[50].mxu0 }
 0x683   :  { %v3251_v9 = vrot.slane %v3171_v7, %v15107_v60  ;;  %v12871_v11 = vpop.f32.mrb[51].mxu0 }
 0x685   :  { %v3252_v13 = vmul.f32 %v3251_v9, %v15238_v28  ;;  %v3253_v23 = vmul.f32 %v3251_v9, %v15244_v39  ;;  %v3254_v14 = vmul.f32 %v15236_v27, %v3251_v9  ;;  %v3255_v29 = vmul.f32 %v15242_v31, %v3251_v9 }
 0x686   :  { %v3244_v41 = vpop.f32.mrb[52].mxu0 }
 0x687   :  { %v3259_v24 = vrot.slane %v3244_v41, %v15107_v60  ;;  %v12876_v49 = vpop.f32.mrb[53].mxu0 }
 0x689   :  { %v3260_v56 = vadd.f32 %v3259_v24, %v3252_v13  ;;  %v3261_v4 = vadd.f32 %v3259_v24, %v3253_v23  ;;  %v3262_v15 = vadd.f32 %v3259_v24, %v3254_v14  ;;  %v3263_v3 = vadd.f32 %v3259_v24, %v3255_v29 }
 0x68b   :  { %v3264_v16 = vmax.f32 %v3260_v56, 0.0  ;;  %v3265_v10 = vmax.f32 %v3261_v4, 0.0  ;;  %v3266_v17 = vmax.f32 %v3262_v15, 0.0  ;;  %v3267_v18 = vmax.f32 %v3263_v3, 0.0 }
 0x68d   :  { %v11872_v19 = vpack.c.bf16 %v3264_v16, %v3264_v16  ;;  %v11873_v28 = vpack.c.bf16 %v3265_v10, %v3265_v10  ;;  %v11874_v45 = vpack.c.bf16 %v3266_v17, %v3266_v17  ;;  %v11875_v39 = vpack.c.bf16 %v3267_v18, %v3267_v18 }
 0x68f   :  { %v3281_v37 = vshrl.u32 %v11872_v19, 16  ;;  %v3289_v27 = vshrl.u32 %v11873_v28, 16  ;;  %v3298_v42 = vshrl.u32 %v11874_v45, 16  ;;  %v3306_v31 = vshrl.u32 %v11875_v39, 16 }
 0x690   :  { %v3284_v25 = vshll.u32 %v11872_v19, 16  ;;  %v3292_v26 = vshll.u32 %v11873_v28, 16  ;;  %v3301_v32 = vshll.u32 %v11874_v45, 16  ;;  %v3309_v36 = vshll.u32 %v11875_v39, 16 }
 0x691   :  { %v3283_v20 = vrot.slane %v3281_v37, 7  ;;  %v3291_v12 = vrot.slane %v3289_v27, 7  ;;  %v3300_v30 = vrot.slane %v3298_v42, 7  ;;  %v3308_v33 = vrot.slane %v3306_v31, 7 }
 0x693   :  { %v3286_v40 = vor.u32 %v3284_v25, %v3283_v20  ;;  %v3287_v43 = vrot.slane %v3283_v20, 4  ;;  %v3294_v44 = vor.u32 %v3292_v26, %v3291_v12  ;;  %v3296_v46 = vrot.slane %v3291_v12, 4  ;;  %v13590_v12 = vld [vmem:[%s18446_s7] ss:$8 sps:$4 sm:$0xff]  }
 0x694   :  { %v3303_v47 = vor.u32 %v3301_v32, %v3300_v30  ;;  %v3304_v48 = vrot.slane %v3300_v30, 4  ;;  %v3311_v50 = vor.u32 %v3309_v36, %v3308_v33  ;;  %v3313_v51 = vrot.slane %v3308_v33, 4 }
 0x695   :  { %v3295_v55 = vsel %vm15116_vm9, %v3287_v43, %v3294_v44  ;;  %v3320_v61 = vsel %vm15122_vm10, %v3286_v40, %v15140_v1  ;;  %v3324_v62 = vsel %vm15064_vm7, %v3296_v46, %v3323_v52  ;;  %v13595_v40 = vld [vmem:[%s18446_s7 + $0x14] ss:$8 sps:$4 sm:$0xff]   ;;  %v13593_v46 = vld [vmem:[%s18446_s7 + $0x10] ss:$8 sps:$4 sm:$0xff]   ;;  %v13596_v52 = vld [vmem:[%s18446_s7 + $0x20] ss:$8 sps:$4 sm:$0xff]  }
 0x696   :  { %v3312_v7 = vsel %vm15116_vm9, %v3304_v48, %v3311_v50  ;;  %3321 = vst [vmem:[#allocation2] sm:$0xf] %v3320_v61  ;;  %3322 = vst.msk [vmem:[#allocation2 + $0x4] sm:$0xf] %vm2465_vm5, %v3295_v55  ;;  %v3327_v9 = vsel %vm15122_vm10, %v3303_v47, %v3326_v0  ;;  %v3331_v11 = vsel %vm15064_vm7, %v3313_v51, %v3330_v5  ;;  %v13598_v48 = vld [vmem:[%s18446_s7 + $0x24] ss:$8 sps:$4 sm:$0xff]  }
 0x697   :  { %3325 = vst [vmem:[#allocation2 + $0x8] sm:$0x1] %v3324_v62  ;;  %3328 = vst [vmem:[#allocation2 + $0xc] sm:$0xf] %v3327_v9  ;;  %v13601_v61 = vld [vmem:[%s18446_s7 + $0x34] ss:$8 sps:$4 sm:$0xff]  }
 0x698   :  { %3329 = vst.msk [vmem:[#allocation2 + $0x10] sm:$0xf] %vm2465_vm5, %v3312_v7  ;;  %3332 = vst [vmem:[#allocation2 + $0x14] sm:$0x1] %v3331_v11  ;;  %v13599_v62 = vld [vmem:[%s18446_s7 + $0x30] ss:$8 sps:$4 sm:$0xff]  }
 0x699   :  { %v13604_v0 = vld [vmem:[%s18446_s7 + $0x44] ss:$8 sps:$4 sm:$0xff]   ;;  %v13602_v5 = vld [vmem:[%s18446_s7 + $0x40] ss:$8 sps:$4 sm:$0xff]   ;;  %v13607_v7 = vld [vmem:[%s18446_s7 + $0x54] ss:$8 sps:$4 sm:$0xff]  }
 0x69a   :  { %v13605_v9 = vld [vmem:[%s18446_s7 + $0x50] ss:$8 sps:$4 sm:$0xff]   ;;  %v13611_v11 = vld [vmem:[%s18446_s7 + $0xc4] ss:$8 sps:$4 sm:$0xff]   ;;  %vm104_vm7 = vcmask 1044484   ;;  %vm4564_vm5 = vcmask 1045509  }
 0x69b   :  { %vm4566_vm9 = vcmask 1046534   ;;  %vm105_vm10 = vsmask.f32 4352 }
 0x69d   :  { %v15395_v1 = vld [vmem:[#allocation2] sm:$0xf]  ;;  %v15397_v13 = vld [vmem:[#allocation2 + $0x4] sm:$0xf] }
 0x69e   :  { %v15399_v21 = vld [vmem:[#allocation2 + $0x8] sm:$0x1]  ;;  %v3352_v23 = vshrl.u32 %v15395_v1, 16  ;;  %v3355_v14 = vshll.u32 %v15395_v1, 16  ;;  %v3361_v34 = vshll.u32 %v15397_v13, 16  ;;  %v3365_v29 = vshrl.u32 %v15397_v13, 16 }
 0x69f   :  { %v15405_v35 = vld [vmem:[#allocation2 + $0xc] sm:$0xf]  ;;  %v3371_v41 = vshll.u32 %v15399_v21, 16  ;;  %v15408_v24 = vld [vmem:[#allocation2 + $0x10] sm:$0xf] }
 0x6a0   :  { %v3354_v49 = vrot.slane %v3352_v23, 4  ;;  %v3357_v56 = vrot.slane %v3355_v14, 5  ;;  %v3363_v4 = vrot.slane %v3361_v34, 5  ;;  %v3367_v15 = vrot.slane %v3365_v29, 4  ;;  %v15414_v28 = vld [vmem:[#allocation2 + $0x14] sm:$0x1] }
 0x6a1   :  { %v3376_v3 = vshrl.u32 %v15405_v35, 16  ;;  %v3379_v16 = vshll.u32 %v15405_v35, 16  ;;  %v3385_v10 = vshll.u32 %v15408_v24, 16  ;;  %v3389_v19 = vshrl.u32 %v15408_v24, 16  ;;  %v13609_v23 = vld [vmem:[%s18446_s7 + $0xc0] ss:$8 sps:$4 sm:$0xff]  }
 0x6a2   :  { %v3358_v17 = vor.u32 %v3357_v56, %v3354_v49  ;;  %v3368_v18 = vor.u32 %v3367_v15, %v3363_v4  ;;  %v3373_v31 = vrot.slane %v3371_v41, 5  ;;  %v3395_v33 = vshll.u32 %v15414_v28, 16  ;;  %v13614_v34 = vld [vmem:[%s18446_s7 + $0xd4] ss:$8 sps:$4 sm:$0xff]   ;;  %v13612_v29 = vld [vmem:[%s18446_s7 + $0xd0] ss:$8 sps:$4 sm:$0xff]  }
 0x6a3   :  { %v3378_v45 = vrot.slane %v3376_v3, 4  ;;  %v3381_v39 = vrot.slane %v3379_v16, 5  ;;  %v3387_v37 = vrot.slane %v3385_v10, 5  ;;  %v3391_v20 = vrot.slane %v3389_v19, 4  ;;  %v13618_v41 = vld [vmem:[%s18446_s7 + $0xe4] ss:$8 sps:$4 sm:$0xff]  }
 0x6a4   :  { %v3359_v27 = vrot.slane %v3358_v17, 4  ;;  %v3369_v42 = vrot.slane %v3368_v18, 4  ;;  %v3397_v47 = vrot.slane %v3395_v33, 5  ;;  %v10955_v14 = vcombine.low %v15395_v1, %v15397_v13  ;;  %v13616_v1 = vld [vmem:[%s18446_s7 + $0xe0] ss:$8 sps:$4 sm:$0xff]   ;;  %v3898_v33 = vld [vmem:[%s18388_s18 + $0xb0] sm:$0xff] }
 0x6a5   :  { %v3382_v25 = vor.u32 %v3381_v39, %v3378_v45  ;;  %v3392_v32 = vor.u32 %v3391_v20, %v3387_v37  ;;  %v10956_v49 = vcombine.low %v15405_v35, %v15408_v24  ;;  %v13621_v56 = vld [vmem:[%s18446_s7 + $0xf4] ss:$8 sps:$4 sm:$0xff]   ;;  %v13624_v15 = vld [vmem:[%s18446_s7 + $0x104] ss:$8 sps:$4 sm:$0xff]   ;;  %v3674_v35 = vrot.slane %v15397_v13, 5 }
 0x6a6   :  { %v3364_v26 = vsel %vm15163_vm14, %v3359_v27, %v3363_v4  ;;  %v3374_v30 = vsel %vm15163_vm14, %v3369_v42, %v3373_v31  ;;  %v13619_v4 = vld [vmem:[%s18446_s7 + $0xf0] ss:$8 sps:$4 sm:$0xff]   ;;  %v13622_v3 = vld [vmem:[%s18446_s7 + $0x100] ss:$8 sps:$4 sm:$0xff]   ;;  %v13627_v16 = vld [vmem:[%s18446_s7 + $0x114] ss:$8 sps:$4 sm:$0xff]  }
 0x6a7   :  { %v10939_v36 = vcombine.low %v3364_v26, %v3374_v30  ;;  %v3383_v43 = vrot.slane %v3382_v25, 4  ;;  %v3393_v44 = vrot.slane %v3392_v32, 4  ;;  %v3666_v10 = vld [vmem:[#allocation2] sm:$0xe]  ;;  %v3676_v17 = vrot.slane %v3674_v35, 4  ;;  %v3881_v32 = vld [vmem:[%s18388_s18 + $0x28] sm:$0xff] }
 0x6a8   :  { %v3677_v18 = vrot.slane %v15399_v21, 5  ;;  %v13625_v19 = vld [vmem:[%s18446_s7 + $0x110] ss:$8 sps:$4 sm:$0xff]   ;;  %v10971_v13 = vrot.slane %v3666_v10, 9  ;;  %v3681_v39 = vrot.slane %v15408_v24, 5  ;;  %v3684_v20 = vrot.slane %v15414_v28, 5 }
 0x6a9   :  { %10953 = vmatmul.mubr.msk.bf16.vlgmr.msra.gmra.mrb[56].mxu0 %vm2039_vm2, %v10939_v36  ;;  %v3388_v50 = vsel %vm15163_vm14, %v3383_v43, %v3387_v37  ;;  %v3398_v51 = vsel %vm15163_vm14, %v3393_v44, %v3397_v47  ;;  %v3667_v42 = vld [vmem:[#allocation2 + $0xc] sm:$0xe]  ;;  %v3896_v26 = vld [vmem:[%s18388_s18 + $0xa0] sm:$0xff]  ;;  %v3882_v43 = vld [vmem:[%s18388_s18 + $0x30] sm:$0xff] }
 0x6aa   :  { %3614 = vmatpush1.bf16.msra.mxu0 %v13590_v12  ;;  %3526 = vmatprep.mubr.bf16.mxu0 %v14225_v38  ;;  %v10940_v55 = vcombine.low %v3388_v50, %v3398_v51  ;;  %v3678_v45 = vsel %vm15202_vm13, %v3676_v17, %v3677_v18  ;;  %v3675_v37 = vsel %vm15202_vm13, %v10971_v13, %v3674_v35  ;;  %v3683_v31 = vrot.slane %v3681_v39, 4  ;;  %v3880_v28 = vld [vmem:[%s18388_s18 + $0x20] sm:$0xff]  ;;  %v3883_v44 = vld [vmem:[%s18388_s18 + $0x38] sm:$0xff]  ;;  %v3901_v50 = vld [vmem:[%s18388_s18 + $0xc8] sm:$0xff] }
 0x6ab   :  { %3615 = vmatprep.subr.bf16.mxu0 %v13595_v40  ;;  %v10985_v27 = vcombine.low %v3675_v37, %v3678_v45  ;;  %v10972_v21 = vrot.slane %v3667_v42, 9  ;;  %v15538_v36 = vpack.c.bf16 %v3881_v32, %v3880_v28  ;;  %v3899_v40 = vld [vmem:[%s18388_s18 + $0xb8] sm:$0xff]  ;;  %v15553_v47 = vpack.c.bf16 %v3883_v44, %v3882_v43 }
 0x6ac   :  { %v3685_v25 = vsel %vm15202_vm13, %v3683_v31, %v3684_v20  ;;  %v3891_v35 = vld [vmem:[%s18388_s18 + $0x78] sm:$0xff] }
 0x6ad   :  { %v3682_v24 = vsel %vm15202_vm13, %v10972_v21, %v3681_v39 }
 0x6ae   :  { %3616 = vmatpush1.bf16.msra.mxu0 %v13593_v46  ;;  %v10986_v12 = vcombine.low %v3682_v24, %v3685_v25  ;;  %v15550_v46 = vpack.c.bf16 %v3899_v40, %v3898_v33 }
 0x6af   :  { %3617 = vmatprep.subr.bf16.mxu0 %v13598_v48  ;;  %v3900_v48 = vld [vmem:[%s18388_s18 + $0xc0] sm:$0xff] }
 0x6b0   :  { %v15563_v51 = vpack.c.bf16 %v3901_v50, %v3900_v48 }
 0x6b1   :  { %10954 = vmatmul.mubr.msk.bf16.gmra.mrb[60].mxu0 %vm2039_vm2, %v10940_v55  ;;  %v3885_v55 = vld [vmem:[%s18388_s18 + $0x48] sm:$0xff] }
 0x6b2   :  { %3618 = vmatpush1.bf16.msra.mxu0 %v13596_v52  ;;  %3645 = vmatprep.mubr.bf16.mxu0 %v14225_v38  ;;  %v3884_v52 = vld [vmem:[%s18388_s18 + $0x40] sm:$0xff] }
 0x6b3   :  { %3619 = vmatprep.subr.bf16.mxu0 %v13601_v61  ;;  %v15571_v61 = vpack.c.bf16 %v3885_v55, %v3884_v52 }
 0x6b6   :  { %3620 = vmatpush1.bf16.msra.mxu0 %v13599_v62  ;;  %v3902_v62 = vld [vmem:[%s18388_s18 + $0xd0] sm:$0xff] }
 0x6b7   :  { %3621 = vmatprep.subr.bf16.mxu0 %v13604_v0  ;;  %v3903_v0 = vld [vmem:[%s18388_s18 + $0xd8] sm:$0xff] }
 0x6ba   :  { %3622 = vmatpush1.bf16.msra.mxu0 %v13602_v5  ;;  %v3886_v5 = vld [vmem:[%s18388_s18 + $0x50] sm:$0xff] }
 0x6bb   :  { %3623 = vmatprep.subr.bf16.mxu0 %v13607_v7  ;;  %v15584_v7 = vpack.c.bf16 %v3903_v0, %v3902_v62 }
 0x6be   :  { %3624 = vmatpush1.bf16.msra.mxu0 %v13605_v9  ;;  %v3887_v9 = vld [vmem:[%s18388_s18 + $0x58] sm:$0xff] }
 0x6bf   :  { %3771 = vmatprep.subr.bf16.mxu0 %v13611_v11  ;;  %v3904_v11 = vld [vmem:[%s18388_s18 + $0xe0] sm:$0xff] }
 0x6c1   :  { %10969 = vmatmul.mubr.msk.bf16.vlgmr.msra.gmra.mrb[56].mxu0 %vm2039_vm2, %v10955_v14  ;;  %v15595_v14 = vpack.c.bf16 %v3887_v9, %v3886_v5 }
 0x6c2   :  { %3772 = vmatpush1.bf16.msra.mxu0 %v13609_v23  ;;  %3655 = vmatprep.mubr.bf16.mxu0 %v14225_v38  ;;  %v3905_v23 = vld [vmem:[%s18388_s18 + $0xe8] sm:$0xff] }
 0x6c3   :  { %3773 = vmatprep.subr.bf16.mxu0 %v13614_v34  ;;  %v15597_v34 = vpack.c.bf16 %v3905_v23, %v3904_v11 }
 0x6c6   :  { %3774 = vmatpush1.bf16.msra.mxu0 %v13612_v29  ;;  %v3888_v29 = vld [vmem:[%s18388_s18 + $0x60] sm:$0xff] }
 0x6c7   :  { %3775 = vmatprep.subr.bf16.mxu0 %v13618_v41  ;;  %v3889_v41 = vld [vmem:[%s18388_s18 + $0x68] sm:$0xff] }
 0x6c9   :  { %10970 = vmatmul.mubr.msk.bf16.gmra.mrb[60].mxu0 %vm2039_vm2, %v10956_v49  ;;  %v3907_v49 = vld [vmem:[%s18388_s18 + $0xf8] sm:$0xff] }
 0x6ca   :  { %3776 = vmatpush1.bf16.msra.mxu0 %v13616_v1  ;;  %3803 = vmatprep.mubr.bf16.mxu0 %v14225_v38  ;;  %v3906_v1 = vld [vmem:[%s18388_s18 + $0xf0] sm:$0xff] }
 0x6cb   :  { %3777 = vmatprep.subr.bf16.mxu0 %v13621_v56  ;;  %v15613_v56 = vpack.c.bf16 %v3889_v41, %v3888_v29 }
 0x6ce   :  { %3778 = vmatpush1.bf16.msra.mxu0 %v13619_v4  ;;  %v15616_v4 = vpack.c.bf16 %v3907_v49, %v3906_v1 }
 0x6cf   :  { %3779 = vmatprep.subr.bf16.mxu0 %v13624_v15  ;;  %v3890_v15 = vld [vmem:[%s18388_s18 + $0x70] sm:$0xff] }
 0x6d2   :  { %3780 = vmatpush1.bf16.msra.mxu0 %v13622_v3  ;;  %v15625_v3 = vpack.c.bf16 %v3891_v35, %v3890_v15 }
 0x6d3   :  { %3781 = vmatprep.subr.bf16.mxu0 %v13627_v16 }
 0x6d6   :  { %3782 = vmatpush1.bf16.msra.mxu0 %v13625_v19 }
 0x6d9   :  { %10999 = vmatmul.mubr.msk.bf16.vlgmr.msra.gmra.mrb[56].mxu0 %vm2039_vm2, %v10985_v27 }
 0x6da   :  { %3813 = vmatprep.mubr.bf16.mxu0 %v14225_v38  ;;  %v3897_v38 = vld [vmem:[%s18388_s18 + $0xa8] sm:$0xff]  ;;  %s10656_s18 = sshll.u32 %s14229_s4, 4  ;;  %s10657_s18 = int_to_ptr.vmem [resolvable:$true] %s10656_s18 }
 0x6db   :  { %v15527_v30 = vpack.c.bf16 %v3897_v38, %v3896_v26  ;;  %s14198_s29 = scalar_lea.vmem %s10657_s18, 32  ;;  %p14203_p1 = scmp.lt.s32.totalorder %s10657_s18, %s10657_s18 }
 0x6dc   :  { %p14199_p0 = scmp.ne.s32.totalorder %s10657_s18, %s14198_s29  ;;  %p14204_p2 = scmp.lt.s32.totalorder %s14198_s29, %s14198_s29 }
 0x6dd   :  { %12958 = vmatprep.subr.bf16.mxu1 %v15527_v30 }
 0x6de   :  { %12960 = vmatpush3.bf16.msra.mxu1 %v15538_v36  ;;  %p14205_p3 = por %p14204_p2, %p14203_p1 }
 0x6df   :  { %12962 = vmatprep.subr.bf16.mxu1 %v15550_v46 }
 0x6e0   :  { %p14206_p4 = pnand %p14205_p3, %p14199_p0 }
 0x6e1   :  { %11000 = vmatmul.mubr.msk.bf16.gmra.mrb[60].mxu0 %vm2039_vm2, %v10986_v12  ;;  %vm4556_vm2 = vcmask 1041409  }
 0x6e2   :  { %12964 = vmatpush3.bf16.msra.mxu1 %v15553_v47 }
 0x6e3   :  { %12966 = vmatprep.subr.bf16.mxu1 %v15563_v51 }
 0x6e6   :  { %12968 = vmatpush3.bf16.msra.mxu1 %v15571_v61 }
 0x6e7   :  { %12970 = vmatprep.subr.bf16.mxu1 %v15584_v7 }
 0x6ea   :  { %12972 = vmatpush3.bf16.msra.mxu1 %v15595_v14 }
 0x6eb   :  { %12974 = vmatprep.subr.bf16.mxu1 %v15597_v34 }
 0x6ee   :  { %12976 = vmatpush3.bf16.msra.mxu1 %v15613_v56 }
 0x6ef   :  { %12978 = vmatprep.subr.bf16.mxu1 %v15616_v4 }
 0x6f2   :  { %12980 = vmatpush3.bf16.msra.mxu1 %v15625_v3 }
 0x6f3   :  { %12982 = vmatprep.subr.bf16.mxu1 %v15347_v54 }
 0x7ac   :  { %v15630_v16 = vpop.f32.mrb[56].mxu0 }
 0x7ad   :  { %v15632_v10 = vpop.f32.mrb[57].mxu0  ;;  %v3850_v18 = vmul.f32 %v15630_v16, %v15630_v16 }
 0x7ae   :  { %v15634_v17 = vpop.f32.mrb[58].mxu0  ;;  %v3851_v54 = vmul.f32 %v15632_v10, %v15632_v10 }
 0x7af   :  { %v3832_v19 = vadd.f32 %v15634_v17, %v15630_v16  ;;  %v3852_v13 = vmul.f32 %v15634_v17, %v15634_v17  ;;  %v15642_v45 = vpop.f32.mrb[59].mxu0 }
 0x7b0   :  { %v3841_v39 = vadd.f32 %v15642_v45, %v15632_v10  ;;  %v3853_v37 = vmul.f32 %v15642_v45, %v15642_v45 }
 0x7b1   :  { %v3858_v27 = vadd.f32 %v3852_v13, %v3850_v18 }
 0x7b2   :  { %v3867_v42 = vadd.f32 %v3853_v37, %v3851_v54 }
 0x7b4   :  { %v15650_v31 = vpop.f32.mrb[60].mxu0 }
 0x7b5   :  { %v3833_v21 = vadd.f32 %v3832_v19, %v15650_v31  ;;  %v3854_v20 = vmul.f32 %v15650_v31, %v15650_v31  ;;  %v15655_v25 = vpop.f32.mrb[61].mxu0 }
 0x7b6   :  { %v3842_v24 = vadd.f32 %v3841_v39, %v15655_v25  ;;  %v3855_v12 = vmul.f32 %v15655_v25, %v15655_v25  ;;  %v15660_v26 = vpop.f32.mrb[62].mxu0 }
 0x7b7   :  { %v3859_v38 = vadd.f32 %v3858_v27, %v3854_v20  ;;  %v3834_v28 = vadd.f32 %v3833_v21, %v15660_v26  ;;  %v3856_v32 = vmul.f32 %v15660_v26, %v15660_v26  ;;  %v15665_v33 = vpop.f32.mrb[63].mxu0 }
 0x7b8   :  { %v3868_v40 = vadd.f32 %v3867_v42, %v3855_v12  ;;  %v3843_v43 = vadd.f32 %v3842_v24, %v15665_v33  ;;  %v3857_v44 = vmul.f32 %v15665_v33, %v15665_v33 }
 0x7b9   :  { %v3835_v48 = vrot.slane %v3834_v28, 4  ;;  %v3860_v50 = vadd.f32 %v3859_v38, %v3856_v32  ;;  %v4052_v38 = vld [vmem:[%s18447_s17] sm:$0x1] }
 0x7ba   :  { %v3844_v52 = vrot.slane %v3843_v43, 4  ;;  %v3869_v55 = vadd.f32 %v3868_v40, %v3857_v44  ;;  %v4056_v40 = vld [vmem:[%s18381_s11] sm:$0x1]  ;;  %s18467_s11 = sld [smem:[#allocation19_spill]] }
 0x7bb   :  { %v3836_v62 = vadd.f32 %v3835_v48, %v3834_v28  ;;  %v3861_v39 = vrot.slane %v3860_v50, 4  ;;  %v13628_v48 = vld [vmem:[%s18448_s3 + $0x100] ss:$8 sps:$4 sm:$0xff]  }
 0x7bc   :  { %v3845_v0 = vadd.f32 %v3844_v52, %v3843_v43  ;;  %v3870_v5 = vrot.slane %v3869_v55, 4  ;;  %v13633_v52 = vld [vmem:[%s18448_s3 + $0x114] ss:$8 sps:$4 sm:$0xff]  }
 0x7bd   :  { %v3837_v9 = vrot.slane %v3836_v62, 2  ;;  %v3862_v37 = vadd.f32 %v3861_v39, %v3860_v50  ;;  %v13630_v50 = vld [vmem:[%s18448_s3 + $0x104] ss:$8 sps:$4 sm:$0xff]  }
 0x7be   :  { %v3846_v11 = vrot.slane %v3845_v0, 2  ;;  %v3871_v23 = vadd.f32 %v3870_v5, %v3869_v55  ;;  %5352 = vmatprep.subr.bf16.mxu0 %v13630_v50  ;;  %v13631_v55 = vld [vmem:[%s18448_s3 + $0x110] ss:$8 sps:$4 sm:$0xff]   ;;  %v13639_v5 = vld [vmem:[%s18448_s3 + $0x134] ss:$8 sps:$4 sm:$0xff]  }
 0x7bf   :  { %v3838_v29 = vadd.f32 %v3837_v9, %v3836_v62  ;;  %5353 = vmatpush1.bf16.msra.mxu0 %v13628_v48  ;;  %v13636_v62 = vld [vmem:[%s18448_s3 + $0x124] ss:$8 sps:$4 sm:$0xff]   ;;  %v13637_v9 = vld [vmem:[%s18448_s3 + $0x130] ss:$8 sps:$4 sm:$0xff]  }
 0x7c0   :  { %v3847_v41 = vadd.f32 %v3846_v11, %v3845_v0  ;;  %v3872_v1 = vrot.slane %v3871_v23, 2  ;;  %5354 = vmatprep.subr.bf16.mxu0 %v13633_v52  ;;  %v13634_v0 = vld [vmem:[%s18448_s3 + $0x120] ss:$8 sps:$4 sm:$0xff]   ;;  %v14226_v11 = vmov 1983009808  }
 0x7c1   :  { %v3839_v49 = vrot.slane %v3838_v29, 1  ;;  %v13825_v2 = vld [vmem:[%s18467_s11 + $0x22c] ss:$16 sps:$4 sm:$0xff]   ;;  %v13823_v22 = vld [vmem:[%s18467_s11 + $0x228] ss:$16 sps:$4 sm:$0xff]  }
 0x7c2   :  { %v3848_v15 = vrot.slane %v3847_v41, 1  ;;  %v3873_v35 = vadd.f32 %v3872_v1, %v3871_v23  ;;  %v4263_v23 = vunpack.c.l.s4 %v14226_v11 }
 0x7c3   :  { %v3840_v13 = vadd.f32 %v3839_v49, %v3838_v29  ;;  %5355 = vmatpush1.bf16.msra.mxu0 %v13631_v55 }
 0x7c4   :  { %v3849_v18 = vadd.f32 %v3848_v15, %v3847_v41  ;;  %v3874_v19 = vrot.slane %v3873_v35, 1  ;;  %5356 = vmatprep.subr.bf16.mxu0 %v13636_v62  ;;  %v4264_v15 = vunpack.c.0.s8 %v4263_v23 }
 0x7c6   :  { %3972 = vmatprep.mubr.f32.mxu1 %v3849_v18  ;;  %v3875_v54 = vadd.f32 %v3874_v19, %v3873_v35 }
 0x7c7   :  { %3973 = vmatmul.mubr.f32.vlgmr.msra.gmra.mrb[38].mxu1 %v3840_v13  ;;  %5357 = vmatpush1.bf16.msra.mxu0 %v13634_v0 }
 0x7c8   :  { %12984 = vmatpush3.bf16.msra.mxu1 %v15358_v57  ;;  %4042 = vmatprep.mubr.f32.mxu1 %v3875_v54  ;;  %v3863_v57 = vrot.slane %v3862_v37, 2 }
 0x7c9   :  { %12986 = vmatprep.subr.bf16.mxu1 %v15360_v63  ;;  %5358 = vmatprep.subr.bf16.mxu0 %v13639_v5 }
 0x7ca   :  { %v3864_v63 = vadd.f32 %v3863_v57, %v3862_v37 }
 0x7cb   :  { %5359 = vmatpush1.bf16.msra.mxu0 %v13637_v9 }
 0x7cc   :  { %12988 = vmatpush3.bf16.msra.mxu1 %v15370_v6  ;;  %v3865_v6 = vrot.slane %v3864_v63, 1 }
 0x7cd   :  { %12990 = vmatprep.subr.bf16.mxu1 %v15527_v30 }
 0x7ce   :  { %v3866_v30 = vadd.f32 %v3865_v6, %v3864_v63 }
 0x7d0   :  { %12992 = vmatpush3.bf16.msra.mxu1 %v15538_v36  ;;  %v4060_v36 = vld [vmem:[%s18389_s19 + $0x8] sm:$0xff] }
 0x7d1   :  { %12994 = vmatprep.subr.bf16.mxu1 %v15550_v46  ;;  %v4062_v46 = vld [vmem:[%s18389_s19 + $0x18] sm:$0xff] }
 0x7d4   :  { %12996 = vmatpush3.bf16.msra.mxu1 %v15553_v47  ;;  %v4059_v47 = vld [vmem:[%s18389_s19] sm:$0xff] }
 0x7d5   :  { %12998 = vmatprep.subr.bf16.mxu1 %v15563_v51  ;;  %v13013_v51 = vpack.c.bf16 %v4062_v46, %v4060_v36 }
 0x7d8   :  { %13000 = vmatpush3.bf16.msra.mxu1 %v15571_v61  ;;  %v4061_v61 = vld [vmem:[%s18389_s19 + $0x10] sm:$0xff]  ;;  %s14228_s19 = smov 64  }
 0x7d9   :  { %13002 = vmatprep.subr.bf16.mxu1 %v15584_v7  ;;  %v13015_v7 = vpack.c.bf16 %v4061_v61, %v4059_v47 }
 0x7dc   :  { %13004 = vmatpush3.bf16.msra.mxu1 %v15595_v14 }
 0x7dd   :  { %13006 = vmatprep.subr.bf16.mxu1 %v15597_v34 }
 0x7e0   :  { %13008 = vmatpush3.bf16.msra.mxu1 %v15613_v56 }
 0x7e1   :  { %13010 = vmatprep.subr.bf16.mxu1 %v15616_v4 }
 0x7e4   :  { %13012 = vmatpush3.bf16.msra.mxu1 %v15625_v3 }
 0x7e5   :  { %13014 = vmatprep.subr.bf16.mxu1 %v13013_v51 }
 0x7e7   :  { %4043 = vmatmul.mubr.f32.vlgmr.msra.gmra.mrb[44].mxu1 %v3866_v30 }
 0x7e8   :  { %4131 = vmatprep.mubr.f32.mxu1 %v18404_v8  ;;  %13016 = vmatpush1.bf16.msra.mxu1 %v13015_v7 }
 0x7e9   :  { %13018 = vmatprep.subr.bf16.mxu1 %v13013_v51 }
 0x89a   :  { %v12267_v14 = vpop.f32.mrb[38].mxu1 }
 0x89b   :  { %v12268_v34 = vpop.f32.mrb[39].mxu1 }
 0x89c   :  { %v12269_v56 = vadd.f32 %v12268_v34, %v12267_v14 }
 0x89e   :  { %v4048_v4 = vmul.f32 0.001953125, %v12269_v56 }
 0x8a0   :  { %v4050_v21 = vmul.f32 %v4048_v4, %v4048_v4 }
 0x8ba   :  { %v12302_v3 = vpop.f32.mrb[44].mxu1 }
 0x8bb   :  { %v12303_v27 = vpop.f32.mrb[45].mxu1 }
 0x8bc   :  { %v12304_v42 = vadd.f32 %v12303_v27, %v12302_v3  ;;  %v15745_v3 = vsub.s32 2, %v15104_v59 }
 0x8be   :  { %v4049_v20 = vmul.f32 0.001953125, %v12304_v42  ;;  %18450 = vst [vmem:[#allocation10_spill] sm:$0xff] %v15745_v3 }
 0x8c0   :  { %v4051_v24 = vsub.f32 %v4049_v20, %v4050_v21 }
 0x8c2   :  { %v4053_v12 = vadd.f32 1e-05, %v4051_v24 }
 0x8c4   :  { %14192 = vrsqrt.f32 %v4053_v12 }
 0x8ce   :  { %v14193_v28 = vpop.eup %14192 }
 0x8cf   :  { %v4055_v32 = vmul.f32 %v14193_v28, %v4052_v38 }
 0x8d1   :  { %11001 = vmatmul.mubr.msk.f32.vlgmr.msra.gmra.mrb[46].mxu1 %vm4063_vm1, %v4055_v32  ;;  %v4057_v43 = vmul.f32 %v4055_v32, %v4048_v4 }
 0x8d2   :  { %13020 = vmatpush1.bf16.msra.mxu1 %v13015_v7  ;;  %4205 = vmatprep.mubr.f32.mxu1 %v18404_v8 }
 0x8d3   :  { %v4058_v44 = vsub.f32 %v4056_v40, %v4057_v43 }
 0x8d5   :  { %11002 = vmatmul.mubr.msk.f32.vlgmr.msra.gmra.mrb[48].mxu1 %vm4063_vm1, %v4058_v44  ;;  %vm15833_vm1 = vmand %vm102_vm11, %vm86_vm6 }
 0x8d6   :  { %vm15853_vm6 = vmand %vm102_vm11, %vm94_vm8 }
 0x8d7   :  { %vm116_vm8 = vmand %vm104_vm7, %vm115_vm12 }
 0x8d8   :  { %vm15894_vm12 = vmor %vm116_vm8, %vm15853_vm6 }
 0x9a4   :  { %v4133_v29 = vpop.f32.mrb[46].mxu1 }
 0x9a5   :  { %v4215_v41 = vrot.slane %v4133_v29, %v15107_v60  ;;  %v4135_v1 = vpop.f32.mrb[47].mxu1 }
 0x9a6   :  { %v4219_v49 = vrot.slane %v4135_v1, %v15107_v60 }
 0x9a7   :  { %v4220_v35 = vmul.f32 %v4215_v41, %v15630_v16  ;;  %v4222_v18 = vmul.f32 %v4215_v41, %v15634_v17  ;;  %v4224_v19 = vmul.f32 %v4215_v41, %v15650_v31  ;;  %v4226_v13 = vmul.f32 %v4215_v41, %v15660_v26 }
 0x9a8   :  { %v4221_v54 = vmul.f32 %v4219_v49, %v15632_v10  ;;  %v4223_v39 = vmul.f32 %v4219_v49, %v15642_v45  ;;  %v4225_v37 = vmul.f32 %v4219_v49, %v15655_v25  ;;  %v4227_v57 = vmul.f32 %v4219_v49, %v15665_v33  ;;  %v4207_v63 = vpop.f32.mrb[48].mxu1 }
 0x9a9   :  { %v4231_v6 = vrot.slane %v4207_v63, %v15107_v60  ;;  %v4209_v30 = vpop.f32.mrb[49].mxu1  ;;  %v15742_v17 = vsub.s32 %v4264_v15, %v15104_v59 }
 0x9aa   :  { %v4235_v16 = vrot.slane %v4209_v30, %v15107_v60 }
 0x9ab   :  { %18449 = vst [vmem:[#allocation9_spill] sm:$0xff] %v15742_v17  ;;  %v4236_v31 = vadd.f32 %v4231_v6, %v4220_v35  ;;  %v4238_v36 = vadd.f32 %v4231_v6, %v4222_v18  ;;  %v4240_v26 = vadd.f32 %v4231_v6, %v4224_v19  ;;  %v4242_v46 = vadd.f32 %v4231_v6, %v4226_v13 }
 0x9ac   :  { %v4237_v10 = vadd.f32 %v4235_v16, %v4221_v54  ;;  %v4239_v47 = vadd.f32 %v4235_v16, %v4223_v39  ;;  %v4241_v45 = vadd.f32 %v4235_v16, %v4225_v37  ;;  %v4243_v51 = vadd.f32 %v4235_v16, %v4227_v57 }
 0x9ad   :  { %v4244_v25 = vmax.f32 %v4236_v31, 0.0  ;;  %v4246_v61 = vmax.f32 %v4238_v36, 0.0  ;;  %v4248_v33 = vmax.f32 %v4240_v26, 0.0  ;;  %v4250_v7 = vmax.f32 %v4242_v46, 0.0 }
 0x9ae   :  { %v4245_v14 = vmax.f32 %v4237_v10, 0.0  ;;  %v4247_v34 = vmax.f32 %v4239_v47, 0.0  ;;  %v4249_v56 = vmax.f32 %v4241_v45, 0.0  ;;  %v4251_v4 = vmax.f32 %v4243_v51, 0.0 }
 0x9b0   :  { %v4260_v27 = vcombine.low %v4244_v25, %v4245_v14  ;;  %v4261_v42 = vcombine.high %v4244_v25, %v4245_v14  ;;  %v4278_v21 = vcombine.low %v4246_v61, %v4247_v34  ;;  %v4279_v20 = vcombine.high %v4246_v61, %v4247_v34 }
 0x9b1   :  { %v4296_v24 = vcombine.low %v4248_v33, %v4249_v56  ;;  %v4297_v12 = vcombine.high %v4248_v33, %v4249_v56  ;;  %v4314_v38 = vcombine.low %v4250_v7, %v4251_v4  ;;  %v4315_v28 = vcombine.high %v4250_v7, %v4251_v4 }
 0x9b2   :  { %v4268_v32 = vrot.slane %v4260_v27, %v15742_v17  ;;  %v4275_v40 = vrot.slane %v4261_v42, %v15742_v17  ;;  %v4286_v43 = vrot.slane %v4278_v21, %v15742_v17  ;;  %v4293_v44 = vrot.slane %v4279_v20, %v15742_v17 }
 0x9b3   :  { %v4304_v48 = vrot.slane %v4296_v24, %v15742_v17  ;;  %v4311_v50 = vrot.slane %v4297_v12, %v15742_v17  ;;  %v15754_v52 = vrot.slane %v4314_v38, %v15742_v17  ;;  %v15757_v23 = vrot.slane %v4315_v28, %v15742_v17  ;;  %v13642_v24 = vld [vmem:[%s18448_s3 + $0x144] ss:$8 sps:$4 sm:$0xff]  }
 0x9b4   :  { %v4276_v55 = vcombine.high %v4268_v32, %v4268_v32  ;;  %v4277_v62 = vcombine.high %v4275_v40, %v4275_v40  ;;  %v11003_v0 = vrot.slane %v4268_v32, 9  ;;  %v11005_v5 = vrot.slane %v4275_v40, 9  ;;  %5360 = vmatprep.subr.bf16.mxu0 %v13642_v24 }
 0x9b5   :  { %v4312_v9 = vcombine.high %v4304_v48, %v4304_v48  ;;  %v4313_v11 = vcombine.high %v4311_v50, %v4311_v50  ;;  %v11011_v29 = vrot.slane %v4304_v48, 9  ;;  %v11007_v49 = vrot.slane %v4286_v43, 9 }
 0x9b6   :  { %v11004_v41 = vrot.slane %v4276_v55, 9  ;;  %v11006_v1 = vrot.slane %v4277_v62, 9  ;;  %v11013_v15 = vrot.slane %v4311_v50, 9  ;;  %v11015_v19 = vrot.slane %v15754_v52, 9 }
 0x9b7   :  { %v11012_v35 = vrot.slane %v4312_v9, 9  ;;  %v11014_v18 = vrot.slane %v4313_v11, 9  ;;  %v15760_v13 = vmax.f32 %v4268_v32, %v11003_v0  ;;  %v15764_v39 = vmax.f32 %v4275_v40, %v11005_v5  ;;  %v13640_v40 = vld [vmem:[%s18448_s3 + $0x140] ss:$8 sps:$4 sm:$0xff]  }
 0x9b8   :  { %v15762_v54 = vmax.f32 %v4276_v55, %v11004_v41  ;;  %v15766_v37 = vmax.f32 %v4304_v48, %v11011_v29  ;;  %v4294_v57 = vcombine.high %v4286_v43, %v4286_v43  ;;  %v15770_v6 = vmax.f32 %v4311_v50, %v11013_v15  ;;  %5361 = vmatpush1.bf16.msra.mxu0 %v13640_v40 }
 0x9b9   :  { %v15768_v63 = vmax.f32 %v4312_v9, %v11012_v35  ;;  %v4295_v30 = vcombine.high %v4293_v44, %v4293_v44  ;;  %v11009_v16 = vrot.slane %v4293_v44, 9  ;;  %v15772_v31 = vmax.f32 %v4313_v11, %v11014_v18 }
 0x9ba   :  { %v11008_v36 = vrot.slane %v4294_v57, 9  ;;  %v15774_v26 = vmax.f32 %v4277_v62, %v11006_v1  ;;  %v15776_v46 = vmax.f32 %v4286_v43, %v11007_v49  ;;  %v4435_v45 = vrot.slane %v15760_v13, %v15745_v3 }
 0x9bb   :  { %v11010_v10 = vrot.slane %v4295_v30, 9  ;;  %v15778_v47 = vmax.f32 %v4293_v44, %v11009_v16  ;;  %v4443_v51 = vrot.slane %v15762_v54, %v15745_v3  ;;  %v4451_v61 = vrot.slane %v15764_v39, %v15745_v3 }
 0x9bc   :  { %v15784_v25 = vmax.f32 %v4294_v57, %v11008_v36  ;;  %v4459_v33 = vrot.slane %v15774_v26, %v15745_v3  ;;  %v4467_v7 = vrot.slane %v15776_v46, %v15745_v3  ;;  %v4431_v56 = vrot.slane %v15760_v13, %v15107_v60 }
 0x9bd   :  { %v15792_v14 = vmax.f32 %v4295_v30, %v11010_v10  ;;  %v4570_v34 = vsel %vm4556_vm2, %v4443_v51, %v4435_v45  ;;  %v4439_v4 = vrot.slane %v15762_v54, %v15107_v60  ;;  %v4483_v42 = vrot.slane %v15778_v47, %v15745_v3 }
 0x9be   :  { %v4475_v27 = vrot.slane %v15784_v25, %v15745_v3  ;;  %v4571_v21 = vsel %vm18403_vm3, %v4451_v61, %v4570_v34  ;;  %v4447_v20 = vrot.slane %v15764_v39, %v15107_v60  ;;  %v4455_v28 = vrot.slane %v15774_v26, %v15107_v60 }
 0x9bf   :  { %v4491_v12 = vrot.slane %v15792_v14, %v15745_v3  ;;  %v4572_v38 = vsel %vm4560_vm4, %v4459_v33, %v4571_v21  ;;  %v4463_v32 = vrot.slane %v15776_v46, %v15107_v60  ;;  %v4471_v44 = vrot.slane %v15784_v25, %v15107_v60 }
 0x9c0   :  { %v4573_v43 = vsel %vm104_vm7, %v4467_v7, %v4572_v38  ;;  %v4479_v48 = vrot.slane %v15778_v47, %v15107_v60  ;;  %v4557_v50 = vsel %vm4556_vm2, %v4439_v4, %v4431_v56  ;;  %v4330_v0 = vcombine.high %v15754_v52, %v15754_v52  ;;  %v118_v38 = vld [vmem:[#allocation3 + $0x8] sm:$0x11] }
 0x9c1   :  { %v4574_v55 = vsel %vm4564_vm5, %v4475_v27, %v4573_v43  ;;  %v4559_v62 = vsel %vm18403_vm3, %v4447_v20, %v4557_v50  ;;  %v4331_v5 = vcombine.high %v15757_v23, %v15757_v23  ;;  %v11017_v41 = vrot.slane %v15757_v23, 9  ;;  %vm15845_vm3 = vmand %vm104_vm7, %vm105_vm10  ;;  %v108_v27 = vld [vmem:[#allocation3] sm:$0x11] }
 0x9c2   :  { %v4575_v11 = vsel %vm4566_vm9, %v4483_v42, %v4574_v55  ;;  %v4561_v29 = vsel %vm4560_vm4, %v4455_v28, %v4559_v62  ;;  %v15841_v1 = vmax.f32 %v15754_v52, %v11015_v19  ;;  %v11016_v18 = vrot.slane %v4330_v0, 9  ;;  %vm15882_vm10 = vmor %vm15845_vm3, %vm15833_vm1  ;;  %v13805_v42 = vld [vmem:[%s18467_s11 + $0x360] ss:$16 sps:$4 sm:$0xff]  }
 0x9c3   :  { %v4576_v15 = vsel %vm4568_vm0, %v4491_v12, %v4575_v11  ;;  %v4563_v35 = vsel %vm104_vm7, %v4463_v32, %v4561_v29  ;;  %v11018_v57 = vrot.slane %v4331_v5, 9  ;;  %v4487_v52 = vrot.slane %v15792_v14, %v15107_v60 }
 0x9c4   :  { %4599 = vrot.lane.b32.xlu1 %v4576_v15, %s14227_s27  ;;  %v4565_v19 = vsel %vm4564_vm5, %v4471_v44, %v4563_v35  ;;  %v15862_v16 = vmax.f32 %v15757_v23, %v11017_v41  ;;  %v4507_v36 = vrot.slane %v15768_v63, %v15745_v3  ;;  %v15869_v45 = vmax.f32 %v4330_v0, %v11016_v18 }
 0x9c5   :  { %v4567_v10 = vsel %vm4566_vm9, %v4479_v48, %v4565_v19  ;;  %v15871_v51 = vmax.f32 %v4331_v5, %v11018_v57  ;;  %v4499_v61 = vrot.slane %v15766_v37, %v15745_v3  ;;  %v4515_v23 = vrot.slane %v15770_v6, %v15745_v3  ;;  %v121_v19 = vld [vmem:[#allocation3 + $0x18] sm:$0x11] }
 0x9c6   :  { %v4569_v33 = vsel %vm4568_vm0, %v4487_v52, %v4567_v10  ;;  %v4523_v34 = vrot.slane %v15772_v31, %v15745_v3  ;;  %v4531_v56 = vrot.slane %v15841_v1, %v15745_v3  ;;  %v4547_v21 = vrot.slane %v15862_v16, %v15745_v3  ;;  %v13645_v10 = vld [vmem:[%s18448_s3 + $0x154] ss:$8 sps:$4 sm:$0xff]  }
 0x9c7   :  { %4595 = vrot.lane.b32.xlu0 %v4569_v33, %s14227_s27  ;;  %v4584_v4 = vsel %vm4556_vm2, %v4507_v36, %v4499_v61  ;;  %vm18461_vm3 = vcmask 1042434   ;;  %v4495_v24 = vrot.slane %v15766_v37, %v15107_v60  ;;  %v4503_v12 = vrot.slane %v15768_v63, %v15107_v60  ;;  %v13643_v61 = vld [vmem:[%s18448_s3 + $0x150] ss:$8 sps:$4 sm:$0xff]   ;;  %5362 = vmatprep.subr.bf16.mxu0 %v13645_v10  ;;  %v13648_v33 = vld [vmem:[%s18448_s3 + $0x164] ss:$8 sps:$4 sm:$0xff]  }
 0x9c8   :  { %v4585_v20 = vsel %vm18461_vm3, %v4515_v23, %v4584_v4  ;;  %v4539_v28 = vrot.slane %v15869_v45, %v15745_v3  ;;  %v4555_v32 = vrot.slane %v15871_v51, %v15745_v3  ;;  %v4511_v43 = vrot.slane %v15770_v6, %v15107_v60  ;;  %vm18462_vm11 = vmmov %vm18461_vm3  ;;  %5363 = vmatpush1.bf16.msra.mxu0 %v13643_v61  ;;  %v13646_v23 = vld [vmem:[%s18448_s3 + $0x160] ss:$8 sps:$4 sm:$0xff]  }
 0x9c9   :  { %v4586_v40 = vsel %vm4560_vm4, %v4523_v34, %v4585_v20  ;;  %v4519_v48 = vrot.slane %v15772_v31, %v15107_v60  ;;  %v4577_v50 = vsel %vm4556_vm2, %v4503_v12, %v4495_v24  ;;  %v109_v55 = vsel %vm15882_vm10, 0, %v108_v27  ;;  %5364 = vmatprep.subr.bf16.mxu0 %v13648_v33  ;;  %v111_v34 = vld [vmem:[#allocation3 + $0x10] sm:$0x11]  ;;  %v13649_v27 = vld [vmem:[%s18448_s3 + $0x170] ss:$8 sps:$4 sm:$0xff]   ;;  %vm18464_vm6 = vmmov %vm18461_vm3 }
 0x9ca   :  { %v4587_v44 = vsel %vm104_vm7, %v4531_v56, %v4586_v40  ;;  %v4527_v0 = vrot.slane %v15841_v1, %v15107_v60  ;;  %v4578_v5 = vsel %vm18462_vm11, %v4511_v43, %v4577_v50  ;;  %110 = vst [vmem:[#allocation3] sm:$0x11] %v109_v55  ;;  %v119_v9 = vsel %vm15894_vm12, 0, %v118_v38  ;;  %v13651_v56 = vld [vmem:[%s18448_s3 + $0x174] ss:$8 sps:$4 sm:$0xff]   ;;  %vm18465_vm8 = vmmov %vm18461_vm3 }
 0x9cb   :  { %v4588_v62 = vsel %vm4564_vm5, %v4539_v28, %v4587_v44  ;;  %v4535_v29 = vrot.slane %v15869_v45, %v15107_v60  ;;  %v4579_v41 = vsel %vm4560_vm4, %v4519_v48, %v4578_v5  ;;  %120 = vst [vmem:[#allocation3 + $0x8] sm:$0x11] %v119_v9  ;;  %v4543_v15 = vrot.slane %v15862_v16, %v15107_v60  ;;  %v13652_v20 = vld [vmem:[%s18448_s3 + $0x180] ss:$8 sps:$4 sm:$0xff]   ;;  %v13657_v24 = vld [vmem:[%s18448_s3 + $0x194] ss:$8 sps:$4 sm:$0xff]   ;;  %vm18466_vm11 = vmmov %vm18461_vm3 }
 0x9cc   :  { %v4589_v11 = vsel %vm4566_vm9, %v4547_v21, %v4588_v62  ;;  %v4580_v35 = vsel %vm104_vm7, %v4527_v0, %v4579_v41  ;;  %v4551_v18 = vrot.slane %v15871_v51, %v15107_v60  ;;  %v122_v36 = vsel %vm15894_vm12, 0, %v121_v19  ;;  %5365 = vmatpush1.bf16.msra.mxu0 %v13646_v23  ;;  %v13654_v21 = vld [vmem:[%s18448_s3 + $0x184] ss:$8 sps:$4 sm:$0xff]   ;;  %v13655_v12 = vld [vmem:[%s18448_s3 + $0x190] ss:$8 sps:$4 sm:$0xff]  }
 0x9cd   :  { %v4590_v49 = vsel %vm4568_vm0, %v4555_v32, %v4589_v11  ;;  %v4581_v57 = vsel %vm4564_vm5, %v4535_v29, %v4580_v35  ;;  %123 = vst [vmem:[#allocation3 + $0x18] sm:$0x11] %v122_v36  ;;  %v112_v4 = vsel %vm15882_vm10, 0, %v111_v34  ;;  %5366 = vmatprep.subr.bf16.mxu0 %v13651_v56  ;;  %v13660_v38 = vld [vmem:[%s18448_s3 + $0x1a4] ss:$8 sps:$4 sm:$0xff]   ;;  %v16013_v11 = vand.u32 127, %v2391_v58 }
 0x9ce   :  { %4601 = vrot.lane.b32.xlu1 %v4590_v49, %s14227_s27  ;;  %v4582_v30 = vsel %vm4566_vm9, %v4543_v15, %v4581_v57  ;;  %113 = vst [vmem:[#allocation3 + $0x10] sm:$0x11] %v112_v4  ;;  %v13658_v28 = vld [vmem:[%s18448_s3 + $0x1a0] ss:$8 sps:$4 sm:$0xff]   ;;  %v13663_v32 = vld [vmem:[%s18448_s3 + $0x1b4] ss:$8 sps:$4 sm:$0xff]  }
 0x9cf   :  { %v4583_v52 = vsel %vm4568_vm0, %v4551_v18, %v4582_v30  ;;  %v13661_v40 = vld [vmem:[%s18448_s3 + $0x1b0] ss:$8 sps:$4 sm:$0xff]   ;;  %v13666_v43 = vld [vmem:[%s18448_s3 + $0x1c4] ss:$8 sps:$4 sm:$0xff]   ;;  %v13664_v44 = vld [vmem:[%s18448_s3 + $0x1c0] ss:$8 sps:$4 sm:$0xff]  }
 0x9d0   :  { %4597 = vrot.lane.b32.xlu0 %v4583_v52, %s14227_s27  ;;  %5367 = vmatpush1.bf16.msra.mxu0 %v13649_v27  ;;  %v13667_v48 = vld [vmem:[%s18448_s3 + $0x1d0] ss:$8 sps:$4 sm:$0xff]   ;;  %v13669_v50 = vld [vmem:[%s18448_s3 + $0x1d4] ss:$8 sps:$4 sm:$0xff]   ;;  %v13672_v55 = vld [vmem:[%s18448_s3 + $0x1e4] ss:$8 sps:$4 sm:$0xff]  }
 0x9d1   :  { %5368 = vmatprep.subr.bf16.mxu0 %v13654_v21  ;;  %v13670_v62 = vld [vmem:[%s18448_s3 + $0x1e0] ss:$8 sps:$4 sm:$0xff]   ;;  %v13675_v0 = vld [vmem:[%s18448_s3 + $0x1f4] ss:$8 sps:$4 sm:$0xff]   ;;  %v13673_v5 = vld [vmem:[%s18448_s3 + $0x1f0] ss:$8 sps:$4 sm:$0xff]  }
 0x9d2   :  { %v13678_v9 = vld [vmem:[%s18448_s3 + $0x4] ss:$8 sps:$4 sm:$0xff]   ;;  %18463 = vst [vmem:[#allocation11_spill] sm:$0xff] %v16013_v11  ;;  %vm4605_vm1 = vcmp.lt.s32.totalorder %v16013_v11, 112 }
 0x9d4   :  { %5369 = vmatpush1.bf16.msra.mxu0 %v13652_v20 }
 0x9d5   :  { %5370 = vmatprep.subr.bf16.mxu0 %v13657_v24 }
 0x9d8   :  { %5371 = vmatpush1.bf16.msra.mxu0 %v13655_v12 }
 0x9d9   :  { %5372 = vmatprep.subr.bf16.mxu0 %v13660_v38 }
 0x9dc   :  { %5373 = vmatpush1.bf16.msra.mxu0 %v13658_v28 }
 0x9dd   :  { %5374 = vmatprep.subr.bf16.mxu0 %v13663_v32 }
 0x9e0   :  { %5375 = vmatpush1.bf16.msra.mxu0 %v13661_v40 }
 0x9e1   :  { %5376 = vmatprep.subr.bf16.mxu0 %v13666_v43 }
 0x9e4   :  { %5377 = vmatpush1.bf16.msra.mxu0 %v13664_v44 }
 0x9e5   :  { %5378 = vmatprep.subr.bf16.mxu0 %v13669_v50 }
 0x9e8   :  { %5379 = vmatpush1.bf16.msra.mxu0 %v13667_v48 }
 0x9e9   :  { %5380 = vmatprep.subr.bf16.mxu0 %v13672_v55 }
 0x9ec   :  { %5381 = vmatpush1.bf16.msra.mxu0 %v13670_v62 }
 0x9ed   :  { %5382 = vmatprep.subr.bf16.mxu0 %v13675_v0 }
 0x9f0   :  { %5383 = vmatpush1.bf16.msra.mxu0 %v13673_v5 }
 0x9f1   :  { %5565 = vmatprep.subr.bf16.mxu0 %v13678_v9 }
 0xa36   :  { %v4600_v29 = vpop.permute.xlu1 %4599 }
 0xa39   :  { %v4596_v41 = vpop.permute.xlu0 %4595 }
 0xa3a   :  { %v4606_v49 = vsel %vm4605_vm1, %v4596_v41, %v4600_v29  ;;  %v4608_v15 = vsel %vm4605_vm1, %v4600_v29, %v4596_v41 }
 0xa3b   :  { %v4614_v35 = vcombine.low %v4606_v49, %v4608_v15  ;;  %v4615_v18 = vcombine.high %v4606_v49, %v4608_v15 }
 0xa3d   :  { %v4622_v57 = vrot.slane %v4614_v35, %v15742_v17  ;;  %v4629_v30 = vrot.slane %v4615_v18, %v15742_v17 }
 0xa3f   :  { %v4630_v52 = vcombine.high %v4622_v57, %v4622_v57  ;;  %v4631_v19 = vcombine.high %v4629_v30, %v4629_v30  ;;  %v4650_v58 = vrot.slane %v4622_v57, 1  ;;  %v4652_v36 = vrot.slane %v4629_v30, 1 }
 0xa40   :  { %v4674_v10 = vmax.f32 %v15760_v13, %v4622_v57  ;;  %v4678_v61 = vmax.f32 %v15776_v46, %v4629_v30 }
 0xa41   :  { %v4651_v33 = vrot.slane %v4630_v52, 1  ;;  %v4653_v23 = vrot.slane %v4631_v19, 1  ;;  %v4675_v34 = vmax.f32 %v15762_v54, %v4650_v58  ;;  %v4676_v56 = vmax.f32 %v15764_v39, %v4630_v52 }
 0xa42   :  { %v4679_v4 = vmax.f32 %v15784_v25, %v4652_v36  ;;  %v4680_v27 = vmax.f32 %v15778_v47, %v4631_v19  ;;  %v4709_v21 = vrot.slane %v4674_v10, %v15107_v60  ;;  %v4713_v20 = vrot.slane %v4674_v10, %v15745_v3 }
 0xa43   :  { %v4677_v24 = vmax.f32 %v15774_v26, %v4651_v33  ;;  %v4681_v13 = vmax.f32 %v15792_v14, %v4653_v23  ;;  %v4717_v46 = vrot.slane %v4675_v34, %v15107_v60  ;;  %v4721_v12 = vrot.slane %v4675_v34, %v15745_v3 }
 0xa44   :  { %v4725_v54 = vrot.slane %v4676_v56, %v15107_v60  ;;  %v4729_v39 = vrot.slane %v4676_v56, %v15745_v3  ;;  %v4741_v25 = vrot.slane %v4678_v61, %v15107_v60  ;;  %v4745_v47 = vrot.slane %v4678_v61, %v15745_v3 }
 0xa45   :  { %v4733_v38 = vrot.slane %v4677_v24, %v15107_v60  ;;  %v4737_v28 = vrot.slane %v4677_v24, %v15745_v3  ;;  %v4749_v26 = vrot.slane %v4679_v4, %v15107_v60  ;;  %v4753_v14 = vrot.slane %v4679_v4, %v15745_v3 }
 0xa46   :  { %v4757_v32 = vrot.slane %v4680_v27, %v15107_v60  ;;  %v4761_v40 = vrot.slane %v4680_v27, %v15745_v3  ;;  %v4765_v43 = vrot.slane %v4681_v13, %v15107_v60  ;;  %v4769_v44 = vrot.slane %v4681_v13, %v15745_v3 }
 0xa47   :  { %v11876_v48 = vpack.c.bf16 %v4713_v20, %v4709_v21  ;;  %v11877_v50 = vpack.c.bf16 %v4721_v12, %v4717_v46  ;;  %v11878_v55 = vpack.c.bf16 %v4729_v39, %v4725_v54  ;;  %v11879_v62 = vpack.c.bf16 %v4737_v28, %v4733_v38  ;;  %v5078_v21 = vld [vmem:[#allocation3 + $0x8] sm:$0x11]  ;;  %v4602_v12 = vpop.permute.xlu1 %4601  ;;  %v4598_v54 = vpop.permute.xlu0 %4597 }
 0xa48   :  { %v11880_v0 = vpack.c.bf16 %v4745_v47, %v4741_v25  ;;  %v11881_v5 = vpack.c.bf16 %v4753_v14, %v4749_v26  ;;  %v11882_v9 = vpack.c.bf16 %v4761_v40, %v4757_v32  ;;  %v11883_v29 = vpack.c.bf16 %v4769_v44, %v4765_v43 }
 0xa49   :  { %v4978_v41 = vunpack.c.l.b16 %v11876_v48  ;;  %v4979_v49 = vunpack.c.h.b16 %v11876_v48  ;;  %v4980_v15 = vunpack.c.l.b16 %v11877_v50  ;;  %v4981_v35 = vunpack.c.h.b16 %v11877_v50 }
 0xa4a   :  { %v4982_v18 = vunpack.c.l.b16 %v11878_v55  ;;  %v4983_v57 = vunpack.c.h.b16 %v11878_v55  ;;  %v4984_v30 = vunpack.c.l.b16 %v11879_v62  ;;  %v4985_v52 = vunpack.c.h.b16 %v11879_v62 }
 0xa4b   :  { %v4986_v19 = vunpack.c.l.b16 %v11880_v0  ;;  %v4987_v58 = vunpack.c.h.b16 %v11880_v0  ;;  %v4988_v36 = vunpack.c.l.b16 %v11881_v5  ;;  %v4989_v10 = vunpack.c.h.b16 %v11881_v5 }
 0xa4c   :  { %v4990_v61 = vunpack.c.l.b16 %v11882_v9  ;;  %v5010_v33 = vrot.slane %v4978_v41, 7  ;;  %v5011_v23 = vrot.slane %v4980_v15, 6  ;;  %v4991_v34 = vunpack.c.h.b16 %v11882_v9  ;;  %v5075_v15 = vld [vmem:[#allocation3] sm:$0xff] }
 0xa4d   :  { %v5013_v56 = vrot.slane %v4982_v18, 5  ;;  %v5015_v4 = vrot.slane %v4984_v30, 4  ;;  %v5017_v27 = vrot.slane %v4986_v19, 3  ;;  %v5019_v24 = vrot.slane %v4988_v36, 2 }
 0xa4e   :  { %v5012_v20 = vsel %vm18464_vm6, %v5011_v23, %v5010_v33  ;;  %v5023_v13 = vrot.slane %v4979_v49, 7  ;;  %v5024_v46 = vrot.slane %v4981_v35, 6  ;;  %v5021_v25 = vrot.slane %v4990_v61, 1 }
 0xa4f   :  { %v5014_v39 = vsel %vm4560_vm4, %v5013_v56, %v5012_v20  ;;  %v5026_v47 = vrot.slane %v4983_v57, 5  ;;  %v5028_v38 = vrot.slane %v4985_v52, 4  ;;  %v5030_v14 = vrot.slane %v4987_v58, 3 }
 0xa50   :  { %v5016_v28 = vsel %vm104_vm7, %v5015_v4, %v5014_v39  ;;  %v5025_v26 = vsel %vm18465_vm8, %v5024_v46, %v5023_v13  ;;  %v5032_v32 = vrot.slane %v4989_v10, 2  ;;  %v5079_v44 = vsel %vm15882_vm10, %v11883_v29, %v5078_v21 }
 0xa51   :  { %v5018_v40 = vsel %vm4564_vm5, %v5017_v27, %v5016_v28  ;;  %v5027_v43 = vsel %vm4560_vm4, %v5026_v47, %v5025_v26  ;;  %v4607_v48 = vsel %vm4605_vm1, %v4598_v54, %v4602_v12  ;;  %v5034_v62 = vrot.slane %v4991_v34, 1  ;;  %5080 = vst [vmem:[#allocation3 + $0x8] sm:$0x11] %v5079_v44 }
 0xa52   :  { %v5020_v50 = vsel %vm4566_vm9, %v5019_v24, %v5018_v40  ;;  %v5029_v55 = vsel %vm104_vm7, %v5028_v38, %v5027_v43  ;;  %v4609_v0 = vsel %vm4605_vm1, %v4602_v12, %v4598_v54  ;;  %vm6093_vm1 = vcmask 261120  }
 0xa53   :  { %v5022_v5 = vsel %vm4568_vm0, %v5021_v25, %v5020_v50  ;;  %v5031_v9 = vsel %vm4564_vm5, %v5030_v14, %v5029_v55  ;;  %v4632_v41 = vcombine.low %v4607_v48, %v4609_v0  ;;  %v4633_v49 = vcombine.high %v4607_v48, %v4609_v0 }
 0xa54   :  { %v5033_v29 = vsel %vm4566_vm9, %v5032_v32, %v5031_v9 }
 0xa55   :  { %v5035_v35 = vsel %vm4568_vm0, %v5034_v62, %v5033_v29  ;;  %v4640_v18 = vrot.slane %v4632_v41, %v15742_v17  ;;  %v4647_v57 = vrot.slane %v4633_v49, %v15742_v17 }
 0xa56   :  { %v5062_v30 = vpack.c.b16 %v5035_v35, %v5022_v5 }
 0xa57   :  { %v4648_v52 = vcombine.high %v4640_v18, %v4640_v18  ;;  %v4649_v19 = vcombine.high %v4647_v57, %v4647_v57  ;;  %v4654_v58 = vrot.slane %v4640_v18, 1  ;;  %v4656_v36 = vrot.slane %v4647_v57, 1 }
 0xa58   :  { %v16068_v10 = vsel %vm15087_vm15, %v5062_v30, %v5075_v15  ;;  %v4682_v61 = vmax.f32 %v15766_v37, %v4640_v18  ;;  %v4686_v33 = vmax.f32 %v15841_v1, %v4647_v57 }
 0xa59   :  { %5077 = vst [vmem:[#allocation3] sm:$0xff] %v16068_v10  ;;  %v4655_v23 = vrot.slane %v4648_v52, 1  ;;  %v4657_v34 = vrot.slane %v4649_v19, 1  ;;  %v4683_v56 = vmax.f32 %v15768_v63, %v4654_v58  ;;  %v4684_v4 = vmax.f32 %v15770_v6, %v4648_v52 }
 0xa5a   :  { %v4687_v27 = vmax.f32 %v15869_v45, %v4656_v36  ;;  %v4688_v21 = vmax.f32 %v15862_v16, %v4649_v19  ;;  %v4773_v20 = vrot.slane %v4682_v61, %v15107_v60  ;;  %v4777_v24 = vrot.slane %v4682_v61, %v15745_v3  ;;  %v5084_v61 = vld [vmem:[#allocation3 + $0x18] sm:$0x11] }
 0xa5b   :  { %v4685_v37 = vmax.f32 %v15772_v31, %v4655_v23  ;;  %v4689_v1 = vmax.f32 %v15871_v51, %v4657_v34  ;;  %v4781_v13 = vrot.slane %v4683_v56, %v15107_v60  ;;  %v4785_v46 = vrot.slane %v4683_v56, %v15745_v3 }
 0xa5c   :  { %v4789_v63 = vrot.slane %v4684_v4, %v15107_v60  ;;  %v4793_v6 = vrot.slane %v4684_v4, %v15745_v3  ;;  %v4805_v45 = vrot.slane %v4686_v33, %v15107_v60  ;;  %v4809_v16 = vrot.slane %v4686_v33, %v15745_v3 }
 0xa5d   :  { %v4797_v12 = vrot.slane %v4685_v37, %v15107_v60  ;;  %v4801_v54 = vrot.slane %v4685_v37, %v15745_v3  ;;  %v4813_v31 = vrot.slane %v4687_v27, %v15107_v60  ;;  %v4817_v51 = vrot.slane %v4687_v27, %v15745_v3 }
 0xa5e   :  { %v4821_v39 = vrot.slane %v4688_v21, %v15107_v60  ;;  %v4825_v25 = vrot.slane %v4688_v21, %v15745_v3  ;;  %v4829_v47 = vrot.slane %v4689_v1, %v15107_v60  ;;  %v4833_v38 = vrot.slane %v4689_v1, %v15745_v3 }
 0xa5f   :  { %v11884_v28 = vpack.c.bf16 %v4777_v24, %v4773_v20  ;;  %v11885_v26 = vpack.c.bf16 %v4785_v46, %v4781_v13  ;;  %v11886_v14 = vpack.c.bf16 %v4793_v6, %v4789_v63  ;;  %v11887_v32 = vpack.c.bf16 %v4801_v54, %v4797_v12 }
 0xa60   :  { %v11888_v40 = vpack.c.bf16 %v4809_v16, %v4805_v45  ;;  %v11889_v43 = vpack.c.bf16 %v4817_v51, %v4813_v31  ;;  %v11890_v44 = vpack.c.bf16 %v4825_v25, %v4821_v39  ;;  %v11891_v48 = vpack.c.bf16 %v4833_v38, %v4829_v47  ;;  %v5081_v38 = vld [vmem:[#allocation3 + $0x10] sm:$0xff] }
 0xa61   :  { %v4994_v50 = vunpack.c.l.b16 %v11884_v28  ;;  %v4996_v55 = vunpack.c.l.b16 %v11885_v26  ;;  %v4995_v62 = vunpack.c.h.b16 %v11884_v28  ;;  %v4997_v0 = vunpack.c.h.b16 %v11885_v26 }
 0xa62   :  { %v4998_v5 = vunpack.c.l.b16 %v11886_v14  ;;  %v5000_v9 = vunpack.c.l.b16 %v11887_v32  ;;  %v4999_v41 = vunpack.c.h.b16 %v11886_v14  ;;  %v5001_v49 = vunpack.c.h.b16 %v11887_v32 }
 0xa63   :  { %v5002_v29 = vunpack.c.l.b16 %v11888_v40  ;;  %v5004_v15 = vunpack.c.l.b16 %v11889_v43  ;;  %v5003_v35 = vunpack.c.h.b16 %v11888_v40  ;;  %v5006_v18 = vunpack.c.l.b16 %v11890_v44 }
 0xa64   :  { %v5036_v57 = vrot.slane %v4994_v50, 7  ;;  %v5037_v30 = vrot.slane %v4996_v55, 6  ;;  %v5005_v52 = vunpack.c.h.b16 %v11889_v43  ;;  %v5007_v19 = vunpack.c.h.b16 %v11890_v44  ;;  %v5121_v43 = vld [vmem:[#allocation3 + $0x8] sm:$0x11] }
 0xa65   :  { %v5039_v58 = vrot.slane %v4998_v5, 5  ;;  %v5041_v36 = vrot.slane %v5000_v9, 4  ;;  %v5043_v23 = vrot.slane %v5002_v29, 3  ;;  %v5049_v34 = vrot.slane %v4995_v62, 7 }
 0xa66   :  { %v5038_v33 = vsel %vm18461_vm3, %v5037_v30, %v5036_v57  ;;  %v5050_v56 = vrot.slane %v4997_v0, 6  ;;  %v5045_v27 = vrot.slane %v5004_v15, 2  ;;  %v5052_v21 = vrot.slane %v4999_v41, 5 }
 0xa67   :  { %v5040_v4 = vsel %vm4560_vm4, %v5039_v58, %v5038_v33  ;;  %v5054_v20 = vrot.slane %v5001_v49, 4  ;;  %v5047_v37 = vrot.slane %v5006_v18, 1  ;;  %v5056_v13 = vrot.slane %v5003_v35, 3  ;;  %v5608_v49 = vld [vmem:[#allocation3] sm:$0xee] }
 0xa68   :  { %v5042_v24 = vsel %vm104_vm7, %v5041_v36, %v5040_v4  ;;  %v5051_v1 = vsel %vm18466_vm11, %v5050_v56, %v5049_v34  ;;  %v5085_v6 = vsel %vm15882_vm10, %v11891_v48, %v5084_v61  ;;  %v5124_v45 = vshrl.u32 %v16068_v10, 16  ;;  %v13676_v56 = vld [vmem:[%s18448_s3] ss:$8 sps:$4 sm:$0xff]   ;;  %v13681_v4 = vld [vmem:[%s18448_s3 + $0x14] ss:$8 sps:$4 sm:$0xff]  }
 0xa69   :  { %v5044_v46 = vsel %vm4564_vm5, %v5043_v23, %v5042_v24  ;;  %v5053_v63 = vsel %vm4560_vm4, %v5052_v21, %v5051_v1  ;;  %v5058_v54 = vrot.slane %v5005_v52, 2  ;;  %5086 = vst [vmem:[#allocation3 + $0x18] sm:$0x11] %v5085_v6  ;;  %v5127_v31 = vshll.u32 %v16068_v10, 16  ;;  %v13679_v24 = vld [vmem:[%s18448_s3 + $0x10] ss:$8 sps:$4 sm:$0xff]  }
 0xa6a   :  { %v5046_v16 = vsel %vm4566_vm9, %v5045_v27, %v5044_v46  ;;  %v5055_v12 = vsel %vm104_vm7, %v5054_v20, %v5053_v63  ;;  %v5060_v25 = vrot.slane %v5007_v19, 1  ;;  %v5126_v26 = vrot.slane %v5124_v45, 4  ;;  %v5918_v46 = vld [vmem:[%s18390_s20 + $0x80] sm:$0xff]  ;;  %v5919_v63 = vld [vmem:[%s18390_s20 + $0x88] sm:$0xff] }
 0xa6b   :  { %v5048_v51 = vsel %vm4568_vm0, %v5047_v37, %v5046_v16  ;;  %v5057_v39 = vsel %vm4564_vm5, %v5056_v13, %v5055_v12  ;;  %v5129_v14 = vrot.slane %v5127_v31, 5  ;;  %v5133_v0 = vshll.u32 %v5121_v43, 16  ;;  %v13684_v13 = vld [vmem:[%s18448_s3 + $0x24] ss:$8 sps:$4 sm:$0xff]   ;;  %v5920_v12 = vld [vmem:[%s18390_s20 + $0x90] sm:$0xff] }
 0xa6c   :  { %v5059_v47 = vsel %vm4566_vm9, %v5058_v54, %v5057_v39  ;;  %v11135_v30 = vrot.slane %v5608_v49, 9  ;;  %v5616_v19 = vrot.slane %v5121_v43, 5  ;;  %v5902_v6 = vld [vmem:[%s18390_s20] sm:$0xff]  ;;  %v16159_v45 = vpack.c.bf16 %v5919_v63, %v5918_v46  ;;  %v5903_v16 = vld [vmem:[%s18390_s20 + $0x8] sm:$0xff]  ;;  %v5921_v54 = vld [vmem:[%s18390_s20 + $0x98] sm:$0xff] }
 0xa6d   :  { %v5061_v28 = vsel %vm4568_vm0, %v5060_v25, %v5059_v47  ;;  %v5130_v48 = vor.u32 %v5129_v14, %v5126_v26  ;;  %v5135_v35 = vrot.slane %v5133_v0, 5  ;;  %v16170_v31 = vpack.c.bf16 %v5903_v16, %v5902_v6  ;;  %v5904_v39 = vld [vmem:[%s18390_s20 + $0x10] sm:$0xff]  ;;  %v5905_v25 = vld [vmem:[%s18390_s20 + $0x18] sm:$0xff]  ;;  %v5922_v47 = vld [vmem:[%s18390_s20 + $0xa0] sm:$0xff] }
 0xa6e   :  { %v5064_v32 = vpack.c.b16 %v5061_v28, %v5048_v51  ;;  %v16132_v27 = vsel %vm15202_vm13, %v11135_v30, %v5616_v19  ;;  %v16172_v51 = vpack.c.bf16 %v5921_v54, %v5920_v12  ;;  %13022 = vmatprep.subr.bf16.mxu1 %v16159_v45  ;;  %v16188_v28 = vpack.c.bf16 %v5905_v25, %v5904_v39  ;;  %v13682_v26 = vld [vmem:[%s18448_s3 + $0x20] ss:$8 sps:$4 sm:$0xff]   ;;  %v13685_v0 = vld [vmem:[%s18448_s3 + $0x30] ss:$8 sps:$4 sm:$0xff]   ;;  %v13690_v49 = vld [vmem:[%s18448_s3 + $0x44] ss:$8 sps:$4 sm:$0xff]  }
 0xa6f   :  { %v5131_v29 = vrot.slane %v5130_v48, 4  ;;  %13024 = vmatpush3.bf16.msra.mxu1 %v16170_v31  ;;  %v5907_v43 = vld [vmem:[%s18390_s20 + $0x28] sm:$0xff]  ;;  %v5924_v48 = vld [vmem:[%s18390_s20 + $0xb0] sm:$0xff] }
 0xa70   :  { %v16113_v40 = vsel %vm15087_vm15, %v5064_v32, %v5081_v38  ;;  %v5122_v44 = vld [vmem:[#allocation3 + $0x18] sm:$0x11]  ;;  %v5923_v38 = vld [vmem:[%s18390_s20 + $0xa8] sm:$0xff]  ;;  %13026 = vmatprep.subr.bf16.mxu1 %v16172_v51  ;;  %v5906_v32 = vld [vmem:[%s18390_s20 + $0x20] sm:$0xff] }
 0xa71   :  { %5083 = vst [vmem:[#allocation3 + $0x10] sm:$0xff] %v16113_v40  ;;  %v5138_v50 = vshrl.u32 %v16113_v40, 16  ;;  %v5141_v55 = vshll.u32 %v16113_v40, 16  ;;  %v11101_v62 = vcombine.low %v16068_v10, %v16113_v40  ;;  %v5147_v41 = vshll.u32 %v5122_v44, 16  ;;  %v13694_v30 = vld [vmem:[%s18448_s3 + $0x60] ss:$8 sps:$4 sm:$0xff]  }
 0xa72   :  { %v5136_v58 = vsel %vm15163_vm14, %v5131_v29, %v5135_v35  ;;  %v5620_v33 = vrot.slane %v5122_v44, 5  ;;  %v11102_v20 = vcombine.high %v16068_v10, %v16113_v40  ;;  %v16194_v14 = vpack.c.bf16 %v5923_v38, %v5922_v47  ;;  %v13687_v44 = vld [vmem:[%s18448_s3 + $0x34] ss:$8 sps:$4 sm:$0xff]   ;;  %v13697_v19 = vld [vmem:[%s18448_s3 + $0x70] ss:$8 sps:$4 sm:$0xff]  }
 0xa73   :  { %v5140_v5 = vrot.slane %v5138_v50, 4  ;;  %v5143_v9 = vrot.slane %v5141_v55, 5  ;;  %v5149_v57 = vrot.slane %v5147_v41, 5  ;;  %v5925_v50 = vld [vmem:[%s18390_s20 + $0xb8] sm:$0xff]  ;;  %13028 = vmatpush3.bf16.msra.mxu1 %v16188_v28  ;;  %v16212_v55 = vpack.c.bf16 %v5907_v43, %v5906_v32  ;;  %v13720_v63 = vld [vmem:[%s18448_s3 + $0xe4] ss:$8 sps:$4 sm:$0xff]  }
 0xa74   :  { %13030 = vmatprep.subr.bf16.mxu1 %v16194_v14  ;;  %v5909_v41 = vld [vmem:[%s18390_s20 + $0x38] sm:$0xff]  ;;  %v13718_v6 = vld [vmem:[%s18448_s3 + $0xe0] ss:$8 sps:$4 sm:$0xff]   ;;  %v13726_v54 = vld [vmem:[%s18448_s3 + $0x204] ss:$8 sps:$4 sm:$0xff]  }
 0xa75   :  { %v5144_v15 = vor.u32 %v5143_v9, %v5140_v5  ;;  %v16218_v5 = vpack.c.bf16 %v5925_v50, %v5924_v48  ;;  %v5908_v9 = vld [vmem:[%s18390_s20 + $0x30] sm:$0xff]  ;;  %v13724_v39 = vld [vmem:[%s18448_s3 + $0x200] ss:$8 sps:$4 sm:$0xff]   ;;  %v13732_v38 = vld [vmem:[%s18448_s3 + $0x224] ss:$8 sps:$4 sm:$0xff]  }
 0xa76   :  { %v16230_v29 = vpack.c.bf16 %v5909_v41, %v5908_v9  ;;  %v13693_v35 = vld [vmem:[%s18448_s3 + $0x54] ss:$8 sps:$4 sm:$0xff]   ;;  %v13715_v46 = vld [vmem:[%s18448_s3 + $0xd0] ss:$8 sps:$4 sm:$0xff]   ;;  %v13730_v10 = vld [vmem:[%s18448_s3 + $0x220] ss:$8 sps:$4 sm:$0xff]  }
 0xa77   :  { %v5145_v18 = vrot.slane %v5144_v15, 4  ;;  %13032 = vmatpush3.bf16.msra.mxu1 %v16212_v55  ;;  %v13688_v15 = vld [vmem:[%s18448_s3 + $0x40] ss:$8 sps:$4 sm:$0xff]   ;;  %v13723_v16 = vld [vmem:[%s18448_s3 + $0xf4] ss:$8 sps:$4 sm:$0xff]  }
 0xa78   :  { %v5609_v52 = vld [vmem:[#allocation3 + $0x10] sm:$0xee]  ;;  %13034 = vmatprep.subr.bf16.mxu1 %v16218_v5  ;;  %v13721_v12 = vld [vmem:[%s18448_s3 + $0xf0] ss:$8 sps:$4 sm:$0xff]   ;;  %v13729_v25 = vld [vmem:[%s18448_s3 + $0x214] ss:$8 sps:$4 sm:$0xff]  }
 0xa79   :  { %v5150_v36 = vsel %vm15163_vm14, %v5145_v18, %v5149_v57  ;;  %v11136_v61 = vrot.slane %v5609_v52, 9  ;;  %v13691_v18 = vld [vmem:[%s18448_s3 + $0x50] ss:$8 sps:$4 sm:$0xff]   ;;  %v13696_v57 = vld [vmem:[%s18448_s3 + $0x64] ss:$8 sps:$4 sm:$0xff]  }
 0xa7a   :  { %v11067_v23 = vcombine.low %v5136_v58, %v5150_v36  ;;  %v11068_v34 = vcombine.high %v5136_v58, %v5150_v36  ;;  %v13699_v52 = vld [vmem:[%s18448_s3 + $0x74] ss:$8 sps:$4 sm:$0xff]   ;;  %v13702_v58 = vld [vmem:[%s18448_s3 + $0x84] ss:$8 sps:$4 sm:$0xff]   ;;  %v13700_v36 = vld [vmem:[%s18448_s3 + $0x80] ss:$8 sps:$4 sm:$0xff]  }
 0xa7b   :  { %v16136_v21 = vsel %vm15202_vm13, %v11136_v61, %v5620_v33  ;;  %13036 = vmatpush3.bf16.msra.mxu1 %v16230_v29  ;;  %v13705_v61 = vld [vmem:[%s18448_s3 + $0x94] ss:$8 sps:$4 sm:$0xff]   ;;  %v13703_v33 = vld [vmem:[%s18448_s3 + $0x90] ss:$8 sps:$4 sm:$0xff]   ;;  %v13742_v48 = vld [vmem:[%s18448_s3 + $0x260] ss:$8 sps:$4 sm:$0xff]  }
 0xa7c   :  { %5384 = vmatprep.mubr.bf16.mxu0 %v11068_v34  ;;  %v11169_v37 = vcombine.low %v16132_v27, %v16136_v21  ;;  %v11170_v1 = vcombine.high %v16132_v27, %v16136_v21  ;;  %v13706_v34 = vld [vmem:[%s18448_s3 + $0xa0] ss:$8 sps:$4 sm:$0xff]   ;;  %v13727_v47 = vld [vmem:[%s18448_s3 + $0x210] ss:$8 sps:$4 sm:$0xff]   ;;  %v13735_v40 = vld [vmem:[%s18448_s3 + $0x234] ss:$8 sps:$4 sm:$0xff]  }
 0xa7d   :  { %5385 = vmatmul.mubr.bf16.vlgmr.msra.gmra.mrb[64].mxu0 %v11067_v23  ;;  %v13708_v23 = vld [vmem:[%s18448_s3 + $0xa4] ss:$8 sps:$4 sm:$0xff]   ;;  %v13741_v32 = vld [vmem:[%s18448_s3 + $0x254] ss:$8 sps:$4 sm:$0xff]   ;;  %v13739_v43 = vld [vmem:[%s18448_s3 + $0x250] ss:$8 sps:$4 sm:$0xff]  }
 0xa7e   :  { %5566 = vmatpush1.bf16.msra.mxu0 %v13676_v56  ;;  %5597 = vmatprep.mubr.bf16.mxu0 %v11102_v20  ;;  %v13711_v56 = vld [vmem:[%s18448_s3 + $0xb4] ss:$8 sps:$4 sm:$0xff]   ;;  %v13714_v20 = vld [vmem:[%s18448_s3 + $0xc4] ss:$8 sps:$4 sm:$0xff]   ;;  %v13748_v41 = vld [vmem:[%s18448_s3 + $0x280] ss:$8 sps:$4 sm:$0xff]  }
 0xa7f   :  { %5567 = vmatprep.subr.bf16.mxu0 %v13681_v4  ;;  %v13709_v4 = vld [vmem:[%s18448_s3 + $0xb0] ss:$8 sps:$4 sm:$0xff]   ;;  %v13747_v50 = vld [vmem:[%s18448_s3 + $0x274] ss:$8 sps:$4 sm:$0xff]   ;;  %v13750_v9 = vld [vmem:[%s18448_s3 + $0x284] ss:$8 sps:$4 sm:$0xff]  }
 0xa80   :  { %v5928_v21 = vld [vmem:[%s18390_s20 + $0xd0] sm:$0xff] }
 0xa82   :  { %5568 = vmatpush1.bf16.msra.mxu0 %v13679_v24  ;;  %v13712_v24 = vld [vmem:[%s18448_s3 + $0xc0] ss:$8 sps:$4 sm:$0xff]  }
 0xa83   :  { %5569 = vmatprep.subr.bf16.mxu0 %v13684_v13  ;;  %v13717_v13 = vld [vmem:[%s18448_s3 + $0xd4] ss:$8 sps:$4 sm:$0xff]  }
 0xa86   :  { %5570 = vmatpush1.bf16.msra.mxu0 %v13682_v26  ;;  %v13736_v26 = vld [vmem:[%s18448_s3 + $0x240] ss:$8 sps:$4 sm:$0xff]  }
 0xa87   :  { %5571 = vmatprep.subr.bf16.mxu0 %v13687_v44  ;;  %v13744_v44 = vld [vmem:[%s18448_s3 + $0x264] ss:$8 sps:$4 sm:$0xff]  }
 0xa8a   :  { %5572 = vmatpush1.bf16.msra.mxu0 %v13685_v0  ;;  %v13745_v0 = vld [vmem:[%s18448_s3 + $0x270] ss:$8 sps:$4 sm:$0xff]  }
 0xa8b   :  { %5573 = vmatprep.subr.bf16.mxu0 %v13690_v49  ;;  %v13753_v49 = vld [vmem:[%s18448_s3 + $0x294] ss:$8 sps:$4 sm:$0xff]  }
 0xa8e   :  { %5574 = vmatpush1.bf16.msra.mxu0 %v13688_v15  ;;  %v13751_v15 = vld [vmem:[%s18448_s3 + $0x290] ss:$8 sps:$4 sm:$0xff]  }
 0xa8f   :  { %5575 = vmatprep.subr.bf16.mxu0 %v13693_v35  ;;  %v13756_v35 = vld [vmem:[%s18448_s3 + $0x2a4] ss:$8 sps:$4 sm:$0xff]  }
 0xa92   :  { %5576 = vmatpush1.bf16.msra.mxu0 %v13691_v18  ;;  %v13754_v18 = vld [vmem:[%s18448_s3 + $0x2a0] ss:$8 sps:$4 sm:$0xff]  }
 0xa93   :  { %5577 = vmatprep.subr.bf16.mxu0 %v13696_v57  ;;  %v13759_v57 = vld [vmem:[%s18448_s3 + $0x2b4] ss:$8 sps:$4 sm:$0xff]  }
 0xa96   :  { %5578 = vmatpush1.bf16.msra.mxu0 %v13694_v30  ;;  %v13757_v30 = vld [vmem:[%s18448_s3 + $0x2b0] ss:$8 sps:$4 sm:$0xff]  }
 0xa97   :  { %5579 = vmatprep.subr.bf16.mxu0 %v13699_v52  ;;  %v13762_v52 = vld [vmem:[%s18448_s3 + $0x2c4] ss:$8 sps:$4 sm:$0xff]  }
 0xa9a   :  { %5580 = vmatpush1.bf16.msra.mxu0 %v13697_v19  ;;  %v13760_v19 = vld [vmem:[%s18448_s3 + $0x2c0] ss:$8 sps:$4 sm:$0xff]  }
 0xa9b   :  { %5581 = vmatprep.subr.bf16.mxu0 %v13702_v58  ;;  %v13765_v58 = vld [vmem:[%s18448_s3 + $0x2d4] ss:$8 sps:$4 sm:$0xff]  }
 0xa9e   :  { %5582 = vmatpush1.bf16.msra.mxu0 %v13700_v36  ;;  %v13763_v36 = vld [vmem:[%s18448_s3 + $0x2d0] ss:$8 sps:$4 sm:$0xff]  }
 0xa9f   :  { %5583 = vmatprep.subr.bf16.mxu0 %v13705_v61  ;;  %v13768_v61 = vld [vmem:[%s18448_s3 + $0x2e4] ss:$8 sps:$4 sm:$0xff]  }
 0xaa2   :  { %5584 = vmatpush1.bf16.msra.mxu0 %v13703_v33  ;;  %v13766_v33 = vld [vmem:[%s18448_s3 + $0x2e0] ss:$8 sps:$4 sm:$0xff]  }
 0xaa3   :  { %5585 = vmatprep.subr.bf16.mxu0 %v13708_v23  ;;  %v13771_v23 = vld [vmem:[%s18448_s3 + $0x2f4] ss:$8 sps:$4 sm:$0xff]  }
 0xaa6   :  { %5586 = vmatpush1.bf16.msra.mxu0 %v13706_v34  ;;  %v13769_v34 = vld [vmem:[%s18448_s3 + $0x2f0] ss:$8 sps:$4 sm:$0xff]  }
 0xaa7   :  { %5587 = vmatprep.subr.bf16.mxu0 %v13711_v56  ;;  %v5926_v56 = vld [vmem:[%s18390_s20 + $0xc0] sm:$0xff] }
 0xaaa   :  { %5588 = vmatpush1.bf16.msra.mxu0 %v13709_v4  ;;  %v5927_v4 = vld [vmem:[%s18390_s20 + $0xc8] sm:$0xff] }
 0xaab   :  { %5589 = vmatprep.subr.bf16.mxu0 %v13714_v20  ;;  %v16414_v20 = vpack.c.bf16 %v5927_v4, %v5926_v56 }
 0xaad   :  { %13038 = vmatprep.subr.bf16.mxu1 %v16414_v20 }
 0xaae   :  { %5590 = vmatpush1.bf16.msra.mxu0 %v13712_v24  ;;  %v5910_v24 = vld [vmem:[%s18390_s20 + $0x40] sm:$0xff] }
 0xaaf   :  { %5591 = vmatprep.subr.bf16.mxu0 %v13717_v13  ;;  %v5911_v13 = vld [vmem:[%s18390_s20 + $0x48] sm:$0xff] }
 0xab0   :  { %v16422_v27 = vpack.c.bf16 %v5911_v13, %v5910_v24 }
 0xab2   :  { %5592 = vmatpush1.bf16.msra.mxu0 %v13715_v46  ;;  %13040 = vmatpush3.bf16.msra.mxu1 %v16422_v27 }
 0xab3   :  { %5593 = vmatprep.subr.bf16.mxu0 %v13720_v63  ;;  %v5912_v63 = vld [vmem:[%s18390_s20 + $0x50] sm:$0xff] }
 0xab6   :  { %5594 = vmatpush1.bf16.msra.mxu0 %v13718_v6  ;;  %v5913_v6 = vld [vmem:[%s18390_s20 + $0x58] sm:$0xff] }
 0xab7   :  { %5595 = vmatprep.subr.bf16.mxu0 %v13723_v16  ;;  %v16440_v16 = vpack.c.bf16 %v5913_v6, %v5912_v63 }
 0xaba   :  { %5596 = vmatpush1.bf16.msra.mxu0 %v13721_v12  ;;  %v5930_v12 = vld [vmem:[%s18390_s20 + $0xe0] sm:$0xff] }
 0xabb   :  { %5823 = vmatprep.subr.bf16.mxu0 %v13726_v54  ;;  %v5931_v54 = vld [vmem:[%s18390_s20 + $0xe8] sm:$0xff] }
 0xabd   :  { %5598 = vmatmul.mubr.bf16.vlgmr.msra.gmra.mrb[64].mxu0 %v11101_v62  ;;  %v13733_v62 = vld [vmem:[%s18448_s3 + $0x230] ss:$8 sps:$4 sm:$0xff]  }
 0xabe   :  { %5824 = vmatpush1.bf16.msra.mxu0 %v13724_v39  ;;  %5855 = vmatprep.mubr.bf16.mxu0 %v11170_v1  ;;  %v13738_v1 = vld [vmem:[%s18448_s3 + $0x244] ss:$8 sps:$4 sm:$0xff]   ;;  %v13045_v39 = vpack.c.bf16 %v5931_v54, %v5930_v12 }
 0xabf   :  { %5825 = vmatprep.subr.bf16.mxu0 %v13729_v25  ;;  %v5914_v25 = vld [vmem:[%s18390_s20 + $0x60] sm:$0xff] }
 0xac2   :  { %5826 = vmatpush1.bf16.msra.mxu0 %v13727_v47  ;;  %v5915_v47 = vld [vmem:[%s18390_s20 + $0x68] sm:$0xff] }
 0xac3   :  { %5827 = vmatprep.subr.bf16.mxu0 %v13732_v38  ;;  %v13047_v38 = vpack.c.bf16 %v5915_v47, %v5914_v25  ;;  %v6089_v47 = vld [vmem:[%s18391_s21 + $0x20] sm:$0xff] }
 0xac6   :  { %5828 = vmatpush1.bf16.msra.mxu0 %v13730_v10  ;;  %v5932_v10 = vld [vmem:[%s18390_s20 + $0xf0] sm:$0xff] }
 0xac7   :  { %5829 = vmatprep.subr.bf16.mxu0 %v13735_v40  ;;  %v5933_v40 = vld [vmem:[%s18390_s20 + $0xf8] sm:$0xff] }
 0xaca   :  { %5830 = vmatpush1.bf16.msra.mxu0 %v13733_v62  ;;  %v5916_v62 = vld [vmem:[%s18390_s20 + $0x70] sm:$0xff] }
 0xacb   :  { %5831 = vmatprep.subr.bf16.mxu0 %v13738_v1  ;;  %v13049_v1 = vpack.c.bf16 %v5933_v40, %v5932_v10 }
 0xace   :  { %5832 = vmatpush1.bf16.msra.mxu0 %v13736_v26  ;;  %v5917_v26 = vld [vmem:[%s18390_s20 + $0x78] sm:$0xff] }
 0xacf   :  { %5833 = vmatprep.subr.bf16.mxu0 %v13741_v32  ;;  %v13051_v32 = vpack.c.bf16 %v5917_v26, %v5916_v62 }
 0xad2   :  { %5834 = vmatpush1.bf16.msra.mxu0 %v13739_v43 }
 0xad3   :  { %5835 = vmatprep.subr.bf16.mxu0 %v13744_v44 }
 0xad6   :  { %5836 = vmatpush1.bf16.msra.mxu0 %v13742_v48 }
 0xad7   :  { %5837 = vmatprep.subr.bf16.mxu0 %v13747_v50 }
 0xada   :  { %5838 = vmatpush1.bf16.msra.mxu0 %v13745_v0 }
 0xadb   :  { %5839 = vmatprep.subr.bf16.mxu0 %v13750_v9 }
 0xade   :  { %5840 = vmatpush1.bf16.msra.mxu0 %v13748_v41 }
 0xadf   :  { %5841 = vmatprep.subr.bf16.mxu0 %v13753_v49 }
 0xae2   :  { %5842 = vmatpush1.bf16.msra.mxu0 %v13751_v15 }
 0xae3   :  { %5843 = vmatprep.subr.bf16.mxu0 %v13756_v35 }
 0xae6   :  { %5844 = vmatpush1.bf16.msra.mxu0 %v13754_v18 }
 0xae7   :  { %5845 = vmatprep.subr.bf16.mxu0 %v13759_v57 }
 0xaea   :  { %5846 = vmatpush1.bf16.msra.mxu0 %v13757_v30 }
 0xaeb   :  { %5847 = vmatprep.subr.bf16.mxu0 %v13762_v52 }
 0xaee   :  { %5848 = vmatpush1.bf16.msra.mxu0 %v13760_v19 }
 0xaef   :  { %5849 = vmatprep.subr.bf16.mxu0 %v13765_v58 }
 0xaf2   :  { %5850 = vmatpush1.bf16.msra.mxu0 %v13763_v36 }
 0xaf3   :  { %5851 = vmatprep.subr.bf16.mxu0 %v13768_v61 }
 0xaf6   :  { %5852 = vmatpush1.bf16.msra.mxu0 %v13766_v33 }
 0xaf7   :  { %5853 = vmatprep.subr.bf16.mxu0 %v13771_v23 }
 0xafa   :  { %5854 = vmatpush1.bf16.msra.mxu0 %v13769_v34 }
 0xafd   :  { %5856 = vmatmul.mubr.bf16.vlgmr.msra.gmra.mrb[64].mxu0 %v11169_v37  ;;  %v5929_v37 = vld [vmem:[%s18390_s20 + $0xd8] sm:$0xff] }
 0xafe   :  { %v16432_v46 = vpack.c.bf16 %v5929_v37, %v5928_v21 }
 0xb00   :  { %13042 = vmatprep.subr.bf16.mxu1 %v16432_v46 }
 0xb01   :  { %13044 = vmatpush3.bf16.msra.mxu1 %v16440_v16 }
 0xb02   :  { %13046 = vmatprep.subr.bf16.mxu1 %v13045_v39 }
 0xb05   :  { %13048 = vmatpush3.bf16.msra.mxu1 %v13047_v38 }
 0xb06   :  { %13050 = vmatprep.subr.bf16.mxu1 %v13049_v1 }
 0xb09   :  { %13052 = vmatpush3.bf16.msra.mxu1 %v13051_v32 }
 0xb0a   :  { %13054 = vmatprep.subr.bf16.mxu1 %v16159_v45 }
 0xbd0   :  { %v16469_v43 = vpop.f32.mrb[64].mxu0 }
 0xbd1   :  { %v16471_v44 = vpop.f32.mrb[65].mxu0  ;;  %v5884_v50 = vmul.f32 %v16469_v43, %v16469_v43 }
 0xbd2   :  { %v16473_v48 = vpop.f32.mrb[66].mxu0  ;;  %v5885_v45 = vmul.f32 %v16471_v44, %v16471_v44 }
 0xbd3   :  { %v5870_v0 = vadd.f32 %v16473_v48, %v16469_v43  ;;  %v5886_v9 = vmul.f32 %v16473_v48, %v16473_v48  ;;  %v16481_v41 = vpop.f32.mrb[67].mxu0 }
 0xbd4   :  { %v5877_v49 = vadd.f32 %v16481_v41, %v16471_v44  ;;  %v5887_v15 = vmul.f32 %v16481_v41, %v16481_v41 }
 0xbd5   :  { %v5871_v35 = vrot.slane %v5870_v0, 4  ;;  %v5888_v18 = vadd.f32 %v5886_v9, %v5884_v50 }
 0xbd6   :  { %v5878_v57 = vrot.slane %v5877_v49, 4  ;;  %v5895_v30 = vadd.f32 %v5887_v15, %v5885_v45 }
 0xbd7   :  { %v5872_v52 = vadd.f32 %v5871_v35, %v5870_v0  ;;  %v5889_v12 = vrot.slane %v5888_v18, 4  ;;  %v6078_v35 = vld [vmem:[%s18382_s12] sm:$0x1] }
 0xbd8   :  { %v5879_v19 = vadd.f32 %v5878_v57, %v5877_v49  ;;  %v5896_v58 = vrot.slane %v5895_v30, 4 }
 0xbd9   :  { %v5873_v36 = vrot.slane %v5872_v52, 2  ;;  %v5890_v54 = vadd.f32 %v5889_v12, %v5888_v18  ;;  %v13795_v12 = vld [vmem:[%s18467_s11 + $0x2e4] ss:$16 sps:$4 sm:$0xff]  }
 0xbda   :  { %v5880_v61 = vrot.slane %v5879_v19, 2  ;;  %v5897_v33 = vadd.f32 %v5896_v58, %v5895_v30  ;;  %v13772_v58 = vld [vmem:[%s18467_s11 + $0x200] ss:$16 sps:$4 sm:$0xff]  }
 0xbdb   :  { %v5874_v23 = vadd.f32 %v5873_v36, %v5872_v52  ;;  %v13774_v52 = vld [vmem:[%s18467_s11 + $0x204] ss:$16 sps:$4 sm:$0xff]  }
 0xbdc   :  { %v5881_v34 = vadd.f32 %v5880_v61, %v5879_v19  ;;  %v5898_v56 = vrot.slane %v5897_v33, 2  ;;  %v6082_v19 = vld [vmem:[%s18383_s13] sm:$0x1]  ;;  %v13777_v61 = vld [vmem:[%s18467_s11 + $0x224] ss:$16 sps:$4 sm:$0xff]  }
 0xbdd   :  { %v5875_v4 = vrot.slane %v5874_v23, 1 }
 0xbde   :  { %v5882_v24 = vrot.slane %v5881_v34, 1  ;;  %v5899_v13 = vadd.f32 %v5898_v56, %v5897_v33  ;;  %v13775_v33 = vld [vmem:[%s18467_s11 + $0x220] ss:$16 sps:$4 sm:$0xff]   ;;  %v13783_v56 = vld [vmem:[%s18467_s11 + $0x264] ss:$16 sps:$4 sm:$0xff]  }
 0xbdf   :  { %v5876_v63 = vadd.f32 %v5875_v4, %v5874_v23  ;;  %v13780_v23 = vld [vmem:[%s18467_s11 + $0x244] ss:$16 sps:$4 sm:$0xff]   ;;  %v13781_v4 = vld [vmem:[%s18467_s11 + $0x260] ss:$16 sps:$4 sm:$0xff]  }
 0xbe0   :  { %v5883_v21 = vadd.f32 %v5882_v24, %v5881_v34  ;;  %v5900_v37 = vrot.slane %v5899_v13, 1  ;;  %v13778_v34 = vld [vmem:[%s18467_s11 + $0x240] ss:$16 sps:$4 sm:$0xff]   ;;  %v13786_v24 = vld [vmem:[%s18467_s11 + $0x284] ss:$16 sps:$4 sm:$0xff]  }
 0xbe2   :  { %5998 = vmatprep.mubr.f32.mxu1 %v5883_v21  ;;  %v5901_v6 = vadd.f32 %v5900_v37, %v5899_v13  ;;  %v13784_v13 = vld [vmem:[%s18467_s11 + $0x280] ss:$16 sps:$4 sm:$0xff]   ;;  %v13789_v21 = vld [vmem:[%s18467_s11 + $0x2a4] ss:$16 sps:$4 sm:$0xff]  }
 0xbe3   :  { %5999 = vmatmul.mubr.f32.vlgmr.msra.gmra.mrb[50].mxu1 %v5876_v63  ;;  %v13787_v37 = vld [vmem:[%s18467_s11 + $0x2a0] ss:$16 sps:$4 sm:$0xff]   ;;  %v13792_v63 = vld [vmem:[%s18467_s11 + $0x2c4] ss:$16 sps:$4 sm:$0xff]  }
 0xbe4   :  { %13056 = vmatpush3.bf16.msra.mxu1 %v16170_v31  ;;  %6068 = vmatprep.mubr.f32.mxu1 %v5901_v6  ;;  %v5891_v31 = vrot.slane %v5890_v54, 2  ;;  %v13790_v6 = vld [vmem:[%s18467_s11 + $0x2c0] ss:$16 sps:$4 sm:$0xff]  }
 0xbe5   :  { %13058 = vmatprep.subr.bf16.mxu1 %v16172_v51 }
 0xbe6   :  { %v5892_v51 = vadd.f32 %v5891_v31, %v5890_v54  ;;  %v13793_v54 = vld [vmem:[%s18467_s11 + $0x2e0] ss:$16 sps:$4 sm:$0xff]   ;;  %v13798_v31 = vld [vmem:[%s18467_s11 + $0x304] ss:$16 sps:$4 sm:$0xff]  }
 0xbe8   :  { %13060 = vmatpush3.bf16.msra.mxu1 %v16188_v28  ;;  %v5893_v28 = vrot.slane %v5892_v51, 1 }
 0xbe9   :  { %13062 = vmatprep.subr.bf16.mxu1 %v16194_v14 }
 0xbea   :  { %v5894_v14 = vadd.f32 %v5893_v28, %v5892_v51  ;;  %v13796_v51 = vld [vmem:[%s18467_s11 + $0x300] ss:$16 sps:$4 sm:$0xff]   ;;  %v13801_v28 = vld [vmem:[%s18467_s11 + $0x324] ss:$16 sps:$4 sm:$0xff]  }
 0xbec   :  { %13064 = vmatpush3.bf16.msra.mxu1 %v16212_v55  ;;  %v6086_v55 = vld [vmem:[%s18391_s21 + $0x8] sm:$0xff] }
 0xbed   :  { %13066 = vmatprep.subr.bf16.mxu1 %v16218_v5  ;;  %v6088_v5 = vld [vmem:[%s18391_s21 + $0x18] sm:$0xff] }
 0xbf0   :  { %13068 = vmatpush3.bf16.msra.mxu1 %v16230_v29  ;;  %v6085_v29 = vld [vmem:[%s18391_s21] sm:$0xff] }
 0xbf1   :  { %13070 = vmatprep.subr.bf16.mxu1 %v16414_v20  ;;  %v13085_v20 = vpack.c.bf16 %v6088_v5, %v6086_v55  ;;  %v124_v55 = vld [vmem:[#allocation4] sm:$0x11]  ;;  %v127_v5 = vld [vmem:[#allocation4 + $0x10] sm:$0x11] }
 0xbf4   :  { %13072 = vmatpush3.bf16.msra.mxu1 %v16422_v27  ;;  %v6087_v27 = vld [vmem:[%s18391_s21 + $0x10] sm:$0xff] }
 0xbf5   :  { %13074 = vmatprep.subr.bf16.mxu1 %v16432_v46  ;;  %v6090_v46 = vld [vmem:[%s18391_s21 + $0x28] sm:$0xff] }
 0xbf8   :  { %13076 = vmatpush3.bf16.msra.mxu1 %v16440_v16  ;;  %v6092_v16 = vld [vmem:[%s18391_s21 + $0x38] sm:$0xff] }
 0xbf9   :  { %13078 = vmatprep.subr.bf16.mxu1 %v13045_v39  ;;  %v13087_v39 = vpack.c.bf16 %v6087_v27, %v6085_v29  ;;  %v13089_v25 = vpack.c.bf16 %v6092_v16, %v6090_v46  ;;  %v130_v29 = vld [vmem:[#allocation4 + $0x8] sm:$0x11]  ;;  %v128_v27 = vsel %vm15882_vm10, 0, %v127_v5  ;;  %v133_v16 = vld [vmem:[#allocation4 + $0x18] sm:$0x11] }
 0xbfa   :  { %v131_v46 = vsel %vm15894_vm12, 0, %v130_v29  ;;  %129 = vst [vmem:[#allocation4 + $0x10] sm:$0x11] %v128_v27 }
 0xbfb   :  { %132 = vst [vmem:[#allocation4 + $0x8] sm:$0x11] %v131_v46 }
 0xbfc   :  { %13080 = vmatpush3.bf16.msra.mxu1 %v13047_v38  ;;  %v6091_v38 = vld [vmem:[%s18391_s21 + $0x30] sm:$0xff] }
 0xbfd   :  { %13082 = vmatprep.subr.bf16.mxu1 %v13049_v1  ;;  %v13091_v10 = vpack.c.bf16 %v6091_v38, %v6089_v47  ;;  %v13804_v47 = vld [vmem:[%s18467_s11 + $0x344] ss:$16 sps:$4 sm:$0xff]  }
 0xbfe   :  { %v13807_v38 = vld [vmem:[%s18467_s11 + $0x364] ss:$16 sps:$4 sm:$0xff]  }
 0xc00   :  { %13084 = vmatpush3.bf16.msra.mxu1 %v13051_v32 }
 0xc01   :  { %13086 = vmatprep.subr.bf16.mxu1 %v13085_v20 }
 0xc03   :  { %6069 = vmatmul.mubr.f32.vlgmr.msra.gmra.mrb[52].mxu1 %v5894_v14  ;;  %v13799_v14 = vld [vmem:[%s18467_s11 + $0x320] ss:$16 sps:$4 sm:$0xff]  }
 0xc04   :  { %6161 = vmatprep.mubr.f32.mxu1 %v18404_v8  ;;  %13088 = vmatpush1.bf16.msra.mxu1 %v13087_v39 }
 0xc05   :  { %13090 = vmatprep.subr.bf16.mxu1 %v13089_v25 }
 0xc08   :  { %13092 = vmatpush1.bf16.msra.mxu1 %v13091_v10 }
 0xc09   :  { %13094 = vmatprep.subr.bf16.mxu1 %v13085_v20  ;;  %v125_v20 = vsel %vm15882_vm10, 0, %v124_v55 }
 0xc0a   :  { %126 = vst [vmem:[#allocation4] sm:$0x11] %v125_v20 }
 0xcb6   :  { %v12337_v40 = vpop.f32.mrb[50].mxu1 }
 0xcb7   :  { %v12338_v62 = vpop.f32.mrb[51].mxu1 }
 0xcb8   :  { %v12339_v1 = vadd.f32 %v12338_v62, %v12337_v40  ;;  %v13808_v40 = vld [vmem:[%s18467_s11 + $0x380] ss:$16 sps:$4 sm:$0xff]   ;;  %v13813_v62 = vld [vmem:[%s18467_s11 + $0x3a4] ss:$16 sps:$4 sm:$0xff]  }
 0xcba   :  { %v6074_v26 = vmul.f32 0.0078125, %v12339_v1  ;;  %v13811_v1 = vld [vmem:[%s18467_s11 + $0x3a0] ss:$16 sps:$4 sm:$0xff]  }
 0xcbc   :  { %v6076_v9 = vmul.f32 %v6074_v26, %v6074_v26 }
 0xcd6   :  { %v12372_v32 = vpop.f32.mrb[52].mxu1 }
 0xcd7   :  { %v12373_v50 = vpop.f32.mrb[53].mxu1 }
 0xcd8   :  { %v12374_v0 = vadd.f32 %v12373_v50, %v12372_v32  ;;  %v13814_v32 = vld [vmem:[%s18467_s11 + $0x3c0] ss:$16 sps:$4 sm:$0xff]   ;;  %v13819_v50 = vld [vmem:[%s18467_s11 + $0x3e4] ss:$16 sps:$4 sm:$0xff]  }
 0xcda   :  { %v6075_v45 = vmul.f32 0.0078125, %v12374_v0  ;;  %v13817_v0 = vld [vmem:[%s18467_s11 + $0x3e0] ss:$16 sps:$4 sm:$0xff]  }
 0xcdc   :  { %v6077_v49 = vsub.f32 %v6075_v45, %v6076_v9  ;;  %v13822_v9 = vld [vmem:[%s18467_s11 + $0x20c] ss:$16 sps:$4 sm:$0xff]  }
 0xcde   :  { %v6079_v15 = vadd.f32 1e-05, %v6077_v49 }
 0xce0   :  { %14194 = vrsqrt.f32 %v6079_v15 }
 0xcea   :  { %v14195_v18 = vpop.eup %14194 }
 0xceb   :  { %v6081_v57 = vmul.f32 %v14195_v18, %v6078_v35 }
 0xced   :  { %11203 = vmatmul.mubr.msk.f32.vlgmr.msra.gmra.mrb[54].mxu1 %vm6093_vm1, %v6081_v57  ;;  %v6083_v30 = vmul.f32 %v6081_v57, %v6074_v26  ;;  %v13816_v26 = vld [vmem:[%s18467_s11 + $0x3c4] ss:$16 sps:$4 sm:$0xff]  }
 0xcee   :  { %13096 = vmatpush1.bf16.msra.mxu1 %v13087_v39  ;;  %6235 = vmatprep.mubr.f32.mxu1 %v18404_v8  ;;  %v134_v39 = vsel %vm15894_vm12, 0, %v133_v16  ;;  %vm18479_vm12 = vmmov %vm18461_vm3 }
 0xcef   :  { %13098 = vmatprep.subr.bf16.mxu1 %v13089_v25  ;;  %v6084_v36 = vsub.f32 %v6082_v19, %v6083_v30  ;;  %v13802_v25 = vld [vmem:[%s18467_s11 + $0x340] ss:$16 sps:$4 sm:$0xff]   ;;  %135 = vst [vmem:[#allocation4 + $0x18] sm:$0x11] %v134_v39 }
 0xcf2   :  { %13100 = vmatpush1.bf16.msra.mxu1 %v13091_v10  ;;  %v13810_v10 = vld [vmem:[%s18467_s11 + $0x384] ss:$16 sps:$4 sm:$0xff]  }
 0xcf3   :  { %6801 = vmatprep.subr.bf16.mxu1 %v13774_v52 }
 0xcf5   :  { %11204 = vmatmul.mubr.msk.f32.vlgmr.msra.gmra.mrb[56].mxu1 %vm6093_vm1, %v6084_v36 }
 0xcf6   :  { %6802 = vmatpush1.bf16.msra.mxu1 %v13772_v58 }
 0xcf7   :  { %6803 = vmatprep.subr.bf16.mxu1 %v13777_v61 }
 0xcfa   :  { %6804 = vmatpush1.bf16.msra.mxu1 %v13775_v33 }
 0xcfb   :  { %6805 = vmatprep.subr.bf16.mxu1 %v13780_v23 }
 0xcfe   :  { %6806 = vmatpush1.bf16.msra.mxu1 %v13778_v34 }
 0xcff   :  { %6807 = vmatprep.subr.bf16.mxu1 %v13783_v56 }
 0xd02   :  { %6808 = vmatpush1.bf16.msra.mxu1 %v13781_v4 }
 0xd03   :  { %6809 = vmatprep.subr.bf16.mxu1 %v13786_v24 }
 0xd06   :  { %6810 = vmatpush1.bf16.msra.mxu1 %v13784_v13 }
 0xd07   :  { %6811 = vmatprep.subr.bf16.mxu1 %v13789_v21 }
 0xd0a   :  { %6812 = vmatpush1.bf16.msra.mxu1 %v13787_v37 }
 0xd0b   :  { %6813 = vmatprep.subr.bf16.mxu1 %v13792_v63 }
 0xd0e   :  { %6814 = vmatpush1.bf16.msra.mxu1 %v13790_v6 }
 0xd0f   :  { %6815 = vmatprep.subr.bf16.mxu1 %v13795_v12 }
 0xd12   :  { %6816 = vmatpush1.bf16.msra.mxu1 %v13793_v54  ;;  %v6300_v54 = vld [vmem:[#allocation4] sm:$0xff] }
 0xd13   :  { %6817 = vmatprep.subr.bf16.mxu1 %v13798_v31  ;;  %v6303_v31 = vld [vmem:[#allocation4 + $0x8] sm:$0x11] }
 0xd16   :  { %6818 = vmatpush1.bf16.msra.mxu1 %v13796_v51  ;;  %v6306_v51 = vld [vmem:[#allocation4 + $0x10] sm:$0xff] }
 0xd17   :  { %6819 = vmatprep.subr.bf16.mxu1 %v13801_v28  ;;  %v6309_v28 = vld [vmem:[#allocation4 + $0x18] sm:$0x11] }
 0xd1a   :  { %6820 = vmatpush1.bf16.msra.mxu1 %v13799_v14 }
 0xd1b   :  { %6821 = vmatprep.subr.bf16.mxu1 %v13804_v47 }
 0xd1e   :  { %6822 = vmatpush1.bf16.msra.mxu1 %v13802_v25 }
 0xd1f   :  { %6823 = vmatprep.subr.bf16.mxu1 %v13807_v38 }
 0xd22   :  { %6824 = vmatpush1.bf16.msra.mxu1 %v13805_v42 }
 0xd23   :  { %6825 = vmatprep.subr.bf16.mxu1 %v13810_v10 }
 0xd26   :  { %6826 = vmatpush1.bf16.msra.mxu1 %v13808_v40 }
 0xd27   :  { %6827 = vmatprep.subr.bf16.mxu1 %v13813_v62 }
 0xd2a   :  { %6828 = vmatpush1.bf16.msra.mxu1 %v13811_v1 }
 0xd2b   :  { %6829 = vmatprep.subr.bf16.mxu1 %v13816_v26 }
 0xd2e   :  { %6830 = vmatpush1.bf16.msra.mxu1 %v13814_v32 }
 0xd2f   :  { %6831 = vmatprep.subr.bf16.mxu1 %v13819_v50 }
 0xd32   :  { %6832 = vmatpush1.bf16.msra.mxu1 %v13817_v0 }
 0xd33   :  { %6844 = vmatprep.subr.bf16.mxu1 %v13822_v9 }
 0xdc0   :  { %v6163_v45 = vpop.f32.mrb[54].mxu1 }
 0xdc1   :  { %v6245_v49 = vrot.slane %v6163_v45, %v15107_v60  ;;  %v6165_v15 = vpop.f32.mrb[55].mxu1 }
 0xdc2   :  { %v6249_v35 = vrot.slane %v6165_v15, %v15107_v60 }
 0xdc3   :  { %v6250_v18 = vmul.f32 %v6245_v49, %v16469_v43  ;;  %v6252_v57 = vmul.f32 %v6245_v49, %v16473_v48 }
 0xdc4   :  { %v6251_v30 = vmul.f32 %v6249_v35, %v16471_v44  ;;  %v6253_v52 = vmul.f32 %v6249_v35, %v16481_v41 }
 0xdc8   :  { %v6237_v19 = vpop.f32.mrb[56].mxu1 }
 0xdc9   :  { %v6257_v58 = vrot.slane %v6237_v19, %v15107_v60  ;;  %v6239_v36 = vpop.f32.mrb[57].mxu1 }
 0xdca   :  { %v6261_v61 = vrot.slane %v6239_v36, %v15107_v60 }
 0xdcb   :  { %v6262_v33 = vadd.f32 %v6257_v58, %v6250_v18  ;;  %v6264_v23 = vadd.f32 %v6257_v58, %v6252_v57 }
 0xdcc   :  { %v6263_v34 = vadd.f32 %v6261_v61, %v6251_v30  ;;  %v6265_v56 = vadd.f32 %v6261_v61, %v6253_v52 }
 0xdcd   :  { %v6266_v4 = vmax.f32 %v6262_v33, 0.0  ;;  %v6268_v24 = vmax.f32 %v6264_v23, 0.0 }
 0xdce   :  { %v6267_v13 = vmax.f32 %v6263_v34, 0.0  ;;  %v6269_v43 = vmax.f32 %v6265_v56, 0.0 }
 0xdd0   :  { %v11892_v21 = vpack.c.bf16 %v6267_v13, %v6266_v4  ;;  %v11893_v48 = vpack.c.bf16 %v6269_v43, %v6268_v24  ;;  %v13820_v13 = vld [vmem:[%s18467_s11 + $0x208] ss:$16 sps:$4 sm:$0xff]   ;;  %v13828_v43 = vld [vmem:[%s18467_s11 + $0x24c] ss:$16 sps:$4 sm:$0xff]  }
 0xdd2   :  { %v6281_v37 = vshrl.u32 %v11892_v21, 16  ;;  %v6289_v44 = vshrl.u32 %v11893_v48, 16  ;;  %v6284_v41 = vshll.u32 %v11892_v21, 16  ;;  %v6292_v12 = vshll.u32 %v11893_v48, 16  ;;  %v13826_v21 = vld [vmem:[%s18467_s11 + $0x248] ss:$16 sps:$4 sm:$0xff]  }
 0xdd3   :  { %v13831_v48 = vld [vmem:[%s18467_s11 + $0x26c] ss:$16 sps:$4 sm:$0xff]  }
 0xdd4   :  { %v6283_v63 = vrot.slane %v6281_v37, 7  ;;  %v6291_v6 = vrot.slane %v6289_v44, 7  ;;  %v13829_v37 = vld [vmem:[%s18467_s11 + $0x268] ss:$16 sps:$4 sm:$0xff]   ;;  %v13834_v44 = vld [vmem:[%s18467_s11 + $0x28c] ss:$16 sps:$4 sm:$0xff]  }
 0xdd6   :  { %v6286_v14 = vor.u32 %v6284_v41, %v6283_v63  ;;  %v6287_v55 = vrot.slane %v6283_v63, 4  ;;  %v6294_v5 = vor.u32 %v6292_v12, %v6291_v6  ;;  %v6295_v29 = vrot.slane %v6291_v6, 4  ;;  %v13832_v63 = vld [vmem:[%s18467_s11 + $0x288] ss:$16 sps:$4 sm:$0xff]   ;;  %v13837_v41 = vld [vmem:[%s18467_s11 + $0x2ac] ss:$16 sps:$4 sm:$0xff]  }
 0xdd7   :  { %v13835_v6 = vld [vmem:[%s18467_s11 + $0x2a8] ss:$16 sps:$4 sm:$0xff]   ;;  %v13840_v12 = vld [vmem:[%s18467_s11 + $0x2cc] ss:$16 sps:$4 sm:$0xff]  }
 0xdd8   :  { %v6301_v20 = vsel %vm15087_vm15, %v6286_v14, %v6300_v54  ;;  %v6304_v27 = vsel %vm15882_vm10, %v6287_v55, %v6303_v31  ;;  %v6307_v46 = vsel %vm15087_vm15, %v6294_v5, %v6306_v51  ;;  %v6310_v16 = vsel %vm15882_vm10, %v6295_v29, %v6309_v28  ;;  %v13838_v54 = vld [vmem:[%s18467_s11 + $0x2c8] ss:$16 sps:$4 sm:$0xff]   ;;  %v13843_v31 = vld [vmem:[%s18467_s11 + $0x2ec] ss:$16 sps:$4 sm:$0xff]   ;;  %vm18478_vm10 = vmmov %vm18461_vm3 }
 0xdd9   :  { %6302 = vst [vmem:[#allocation4] sm:$0xff] %v6301_v20  ;;  %6305 = vst [vmem:[#allocation4 + $0x8] sm:$0x11] %v6304_v27  ;;  %v6381_v39 = vshrl.u32 %v6301_v20, 16  ;;  %v6384_v25 = vshll.u32 %v6301_v20, 16  ;;  %v6395_v47 = vshrl.u32 %v6307_v46, 16  ;;  %v16655_v42 = vcombine.high %v6301_v20, %v6307_v46 }
 0xdda   :  { %6308 = vst [vmem:[#allocation4 + $0x10] sm:$0xff] %v6307_v46  ;;  %6311 = vst [vmem:[#allocation4 + $0x18] sm:$0x11] %v6310_v16  ;;  %v6398_v38 = vshll.u32 %v6307_v46, 16  ;;  %v16657_v10 = vcombine.low %v6301_v20, %v6307_v46  ;;  %v13841_v51 = vld [vmem:[%s18467_s11 + $0x2e8] ss:$16 sps:$4 sm:$0xff]  }
 0xddb   :  { %v6383_v40 = vrot.slane %v6381_v39, 4  ;;  %v6386_v62 = vrot.slane %v6384_v25, 5  ;;  %v6397_v1 = vrot.slane %v6395_v47, 4  ;;  %v13846_v28 = vld [vmem:[%s18467_s11 + $0x30c] ss:$16 sps:$4 sm:$0xff]   ;;  %vm8255_vm15 = vcmask 523264  }
 0xddc   :  { %v6400_v53 = vrot.slane %v6398_v38, 5  ;;  %v13844_v14 = vld [vmem:[%s18467_s11 + $0x308] ss:$16 sps:$4 sm:$0xff]   ;;  %v13849_v55 = vld [vmem:[%s18467_s11 + $0x32c] ss:$16 sps:$4 sm:$0xff]  }
 0xddd   :  { %v6387_v26 = vor.u32 %v6386_v62, %v6383_v40  ;;  %v13847_v5 = vld [vmem:[%s18467_s11 + $0x328] ss:$16 sps:$4 sm:$0xff]   ;;  %v13852_v29 = vld [vmem:[%s18467_s11 + $0x34c] ss:$16 sps:$4 sm:$0xff]  }
 0xdde   :  { %v6401_v32 = vor.u32 %v6400_v53, %v6397_v1  ;;  %v13850_v20 = vld [vmem:[%s18467_s11 + $0x348] ss:$16 sps:$4 sm:$0xff]   ;;  %v13855_v27 = vld [vmem:[%s18467_s11 + $0x36c] ss:$16 sps:$4 sm:$0xff]   ;;  %v13870_v53 = vld [vmem:[%s18467_s11 + $0x4] ss:$16 sps:$4 sm:$0xff]  }
 0xddf   :  { %v6388_v18 = vrot.slane %v6387_v26, 4  ;;  %v13853_v46 = vld [vmem:[%s18467_s11 + $0x368] ss:$16 sps:$4 sm:$0xff]   ;;  %v13858_v16 = vld [vmem:[%s18467_s11 + $0x38c] ss:$16 sps:$4 sm:$0xff]  }
 0xde0   :  { %v6378_v7 = vld [vmem:[#allocation4 + $0x8] sm:$0x11]  ;;  %v7303_v0 = vld [vmem:[#allocation4] sm:$0xee]  ;;  %v6402_v19 = vrot.slane %v6401_v32, 4 }
 0xde1   :  { %v6379_v50 = vld [vmem:[#allocation4 + $0x18] sm:$0x11]  ;;  %v6390_v9 = vshll.u32 %v6378_v7, 16  ;;  %v7304_v49 = vld [vmem:[#allocation4 + $0x10] sm:$0xee]  ;;  %v11403_v15 = vrot.slane %v7303_v0, 9 }
 0xde2   :  { %v6404_v45 = vshll.u32 %v6379_v50, 16  ;;  %v7311_v35 = vrot.slane %v6378_v7, 5  ;;  %v11404_v57 = vrot.slane %v7304_v49, 9  ;;  %v7315_v30 = vrot.slane %v6379_v50, 5  ;;  %v13856_v39 = vld [vmem:[%s18467_s11 + $0x388] ss:$16 sps:$4 sm:$0xff]  }
 0xde3   :  { %v6392_v52 = vrot.slane %v6390_v9, 5  ;;  %v13861_v25 = vld [vmem:[%s18467_s11 + $0x3ac] ss:$16 sps:$4 sm:$0xff]   ;;  %v13859_v47 = vld [vmem:[%s18467_s11 + $0x3a8] ss:$16 sps:$4 sm:$0xff]  }
 0xde4   :  { %v6406_v58 = vrot.slane %v6404_v45, 5  ;;  %v7312_v36 = vsel %vm15202_vm13, %v11403_v15, %v7311_v35  ;;  %v7316_v61 = vsel %vm15202_vm13, %v11404_v57, %v7315_v30  ;;  %v13864_v38 = vld [vmem:[%s18467_s11 + $0x3cc] ss:$16 sps:$4 sm:$0xff]   ;;  %v13862_v40 = vld [vmem:[%s18467_s11 + $0x3c8] ss:$16 sps:$4 sm:$0xff]   ;;  %vm18477_vm13 = vmmov %vm18461_vm3 }
 0xde5   :  { %v6393_v33 = vsel %vm15163_vm14, %v6388_v18, %v6392_v52  ;;  %v16667_v34 = vcombine.low %v7312_v36, %v7316_v61  ;;  %v16669_v56 = vcombine.high %v7312_v36, %v7316_v61  ;;  %v13867_v62 = vld [vmem:[%s18467_s11 + $0x3ec] ss:$16 sps:$4 sm:$0xff]   ;;  %v13865_v1 = vld [vmem:[%s18467_s11 + $0x3e8] ss:$16 sps:$4 sm:$0xff]   ;;  %v13868_v26 = vld [vmem:[%s18467_s11] ss:$16 sps:$4 sm:$0xff]  }
 0xde6   :  { %v6407_v23 = vsel %vm15163_vm14, %v6402_v19, %v6406_v58  ;;  %v13873_v32 = vld [vmem:[%s18467_s11 + $0x24] ss:$16 sps:$4 sm:$0xff]   ;;  %v13871_v7 = vld [vmem:[%s18467_s11 + $0x20] ss:$16 sps:$4 sm:$0xff]   ;;  %vm18476_vm14 = vmmov %vm18461_vm3 }
 0xde7   :  { %v16671_v4 = vcombine.low %v6393_v33, %v6407_v23  ;;  %v11272_v24 = vcombine.high %v6393_v33, %v6407_v23  ;;  %v13876_v50 = vld [vmem:[%s18467_s11 + $0x44] ss:$16 sps:$4 sm:$0xff]   ;;  %v13874_v0 = vld [vmem:[%s18467_s11 + $0x40] ss:$16 sps:$4 sm:$0xff]  }
 0xde8   :  { %v13879_v9 = vld [vmem:[%s18467_s11 + $0x64] ss:$16 sps:$4 sm:$0xff]   ;;  %v13877_v45 = vld [vmem:[%s18467_s11 + $0x60] ss:$16 sps:$4 sm:$0xff]  }
 0xde9   :  { %6833 = vmatprep.mubr.bf16.mxu1 %v11272_v24  ;;  %v13882_v49 = vld [vmem:[%s18467_s11 + $0x84] ss:$16 sps:$4 sm:$0xff]   ;;  %v13880_v15 = vld [vmem:[%s18467_s11 + $0x80] ss:$16 sps:$4 sm:$0xff]  }
 0xdea   :  { %6834 = vmatmul.mubr.bf16.vlgmr.msra.gmra.mrb[60].mxu1 %v16671_v4  ;;  %v13885_v35 = vld [vmem:[%s18467_s11 + $0xa4] ss:$16 sps:$4 sm:$0xff]   ;;  %v13883_v18 = vld [vmem:[%s18467_s11 + $0xa0] ss:$16 sps:$4 sm:$0xff]  }
 0xdeb   :  { %6845 = vmatpush1.bf16.msra.mxu1 %v13820_v13  ;;  %6876 = vmatprep.mubr.bf16.mxu1 %v11272_v24  ;;  %v13888_v57 = vld [vmem:[%s18467_s11 + $0xc4] ss:$16 sps:$4 sm:$0xff]   ;;  %v13886_v30 = vld [vmem:[%s18467_s11 + $0xc0] ss:$16 sps:$4 sm:$0xff]  }
 0xdec   :  { %6846 = vmatprep.subr.bf16.mxu1 %v13825_v2  ;;  %v13891_v52 = vld [vmem:[%s18467_s11 + $0xe4] ss:$16 sps:$4 sm:$0xff]   ;;  %v13889_v19 = vld [vmem:[%s18467_s11 + $0xe0] ss:$16 sps:$4 sm:$0xff]  }
 0xded   :  { %v13894_v58 = vld [vmem:[%s18467_s11 + $0x104] ss:$16 sps:$4 sm:$0xff]   ;;  %v13892_v36 = vld [vmem:[%s18467_s11 + $0x100] ss:$16 sps:$4 sm:$0xff]  }
 0xdee   :  { %v13897_v61 = vld [vmem:[%s18467_s11 + $0x124] ss:$16 sps:$4 sm:$0xff]   ;;  %v13895_v33 = vld [vmem:[%s18467_s11 + $0x120] ss:$16 sps:$4 sm:$0xff]  }
 0xdef   :  { %6847 = vmatpush1.bf16.msra.mxu1 %v13823_v22  ;;  %v13900_v23 = vld [vmem:[%s18467_s11 + $0x144] ss:$16 sps:$4 sm:$0xff]   ;;  %v13901_v13 = vld [vmem:[%s18467_s11 + $0x160] ss:$16 sps:$4 sm:$0xff]  }
 0xdf0   :  { %6848 = vmatprep.subr.bf16.mxu1 %v13828_v43  ;;  %v13903_v24 = vld [vmem:[%s18467_s11 + $0x164] ss:$16 sps:$4 sm:$0xff]   ;;  %v13904_v22 = vld [vmem:[%s18467_s11 + $0x180] ss:$16 sps:$4 sm:$0xff]  }
 0xdf1   :  { %v13906_v2 = vld [vmem:[%s18467_s11 + $0x184] ss:$16 sps:$4 sm:$0xff]  }
 0xdf2   :  { %v13909_v43 = vld [vmem:[%s18467_s11 + $0x1a4] ss:$16 sps:$4 sm:$0xff]  }
 0xdf3   :  { %6849 = vmatpush1.bf16.msra.mxu1 %v13826_v21  ;;  %v13907_v21 = vld [vmem:[%s18467_s11 + $0x1a0] ss:$16 sps:$4 sm:$0xff]  }
 0xdf4   :  { %6850 = vmatprep.subr.bf16.mxu1 %v13831_v48  ;;  %v13912_v48 = vld [vmem:[%s18467_s11 + $0x1c4] ss:$16 sps:$4 sm:$0xff]  }
 0xdf7   :  { %6851 = vmatpush1.bf16.msra.mxu1 %v13829_v37  ;;  %v13910_v37 = vld [vmem:[%s18467_s11 + $0x1c0] ss:$16 sps:$4 sm:$0xff]  }
 0xdf8   :  { %6852 = vmatprep.subr.bf16.mxu1 %v13834_v44  ;;  %v13915_v44 = vld [vmem:[%s18467_s11 + $0x1e4] ss:$16 sps:$4 sm:$0xff]  }
 0xdfb   :  { %6853 = vmatpush1.bf16.msra.mxu1 %v13832_v63  ;;  %v13913_v63 = vld [vmem:[%s18467_s11 + $0x1e0] ss:$16 sps:$4 sm:$0xff]  }
 0xdfc   :  { %6854 = vmatprep.subr.bf16.mxu1 %v13837_v41  ;;  %v13918_v41 = vld [vmem:[%s18467_s11 + $0xc] ss:$16 sps:$4 sm:$0xff]  }
 0xdff   :  { %6855 = vmatpush1.bf16.msra.mxu1 %v13835_v6  ;;  %v13916_v6 = vld [vmem:[%s18467_s11 + $0x8] ss:$16 sps:$4 sm:$0xff]  }
 0xe00   :  { %6856 = vmatprep.subr.bf16.mxu1 %v13840_v12  ;;  %v13921_v12 = vld [vmem:[%s18467_s11 + $0x2c] ss:$16 sps:$4 sm:$0xff]  }
 0xe03   :  { %6857 = vmatpush1.bf16.msra.mxu1 %v13838_v54  ;;  %v13919_v54 = vld [vmem:[%s18467_s11 + $0x28] ss:$16 sps:$4 sm:$0xff]  }
 0xe04   :  { %6858 = vmatprep.subr.bf16.mxu1 %v13843_v31  ;;  %v13924_v31 = vld [vmem:[%s18467_s11 + $0x4c] ss:$16 sps:$4 sm:$0xff]  }
 0xe07   :  { %6859 = vmatpush1.bf16.msra.mxu1 %v13841_v51  ;;  %v13922_v51 = vld [vmem:[%s18467_s11 + $0x48] ss:$16 sps:$4 sm:$0xff]  }
 0xe08   :  { %6860 = vmatprep.subr.bf16.mxu1 %v13846_v28  ;;  %v13927_v28 = vld [vmem:[%s18467_s11 + $0x6c] ss:$16 sps:$4 sm:$0xff]  }
 0xe0b   :  { %6861 = vmatpush1.bf16.msra.mxu1 %v13844_v14  ;;  %v13930_v14 = vld [vmem:[%s18467_s11 + $0x8c] ss:$16 sps:$4 sm:$0xff]  }
 0xe0c   :  { %6862 = vmatprep.subr.bf16.mxu1 %v13849_v55  ;;  %v13928_v55 = vld [vmem:[%s18467_s11 + $0x88] ss:$16 sps:$4 sm:$0xff]  }
 0xe0f   :  { %6863 = vmatpush1.bf16.msra.mxu1 %v13847_v5  ;;  %v13933_v5 = vld [vmem:[%s18467_s11 + $0xac] ss:$16 sps:$4 sm:$0xff]  }
 0xe10   :  { %6864 = vmatprep.subr.bf16.mxu1 %v13852_v29  ;;  %v13931_v29 = vld [vmem:[%s18467_s11 + $0xa8] ss:$16 sps:$4 sm:$0xff]  }
 0xe13   :  { %6865 = vmatpush1.bf16.msra.mxu1 %v13850_v20  ;;  %v13936_v20 = vld [vmem:[%s18467_s11 + $0xcc] ss:$16 sps:$4 sm:$0xff]  }
 0xe14   :  { %6866 = vmatprep.subr.bf16.mxu1 %v13855_v27  ;;  %v13934_v27 = vld [vmem:[%s18467_s11 + $0xc8] ss:$16 sps:$4 sm:$0xff]  }
 0xe17   :  { %6867 = vmatpush1.bf16.msra.mxu1 %v13853_v46  ;;  %v13939_v46 = vld [vmem:[%s18467_s11 + $0xec] ss:$16 sps:$4 sm:$0xff]  }
 0xe18   :  { %6868 = vmatprep.subr.bf16.mxu1 %v13858_v16  ;;  %v13937_v16 = vld [vmem:[%s18467_s11 + $0xe8] ss:$16 sps:$4 sm:$0xff]  }
 0xe1b   :  { %6869 = vmatpush1.bf16.msra.mxu1 %v13856_v39  ;;  %v13942_v39 = vld [vmem:[%s18467_s11 + $0x10c] ss:$16 sps:$4 sm:$0xff]  }
 0xe1c   :  { %6870 = vmatprep.subr.bf16.mxu1 %v13861_v25  ;;  %v13940_v25 = vld [vmem:[%s18467_s11 + $0x108] ss:$16 sps:$4 sm:$0xff]  }
 0xe1f   :  { %6871 = vmatpush1.bf16.msra.mxu1 %v13859_v47  ;;  %v13945_v47 = vld [vmem:[%s18467_s11 + $0x12c] ss:$16 sps:$4 sm:$0xff]  }
 0xe20   :  { %6872 = vmatprep.subr.bf16.mxu1 %v13864_v38  ;;  %v13943_v38 = vld [vmem:[%s18467_s11 + $0x128] ss:$16 sps:$4 sm:$0xff]  }
 0xe23   :  { %6873 = vmatpush1.bf16.msra.mxu1 %v13862_v40  ;;  %v13948_v40 = vld [vmem:[%s18467_s11 + $0x14c] ss:$16 sps:$4 sm:$0xff]  }
 0xe24   :  { %6874 = vmatprep.subr.bf16.mxu1 %v13867_v62  ;;  %v13946_v62 = vld [vmem:[%s18467_s11 + $0x148] ss:$16 sps:$4 sm:$0xff]  }
 0xe27   :  { %6875 = vmatpush1.bf16.msra.mxu1 %v13865_v1  ;;  %v13951_v1 = vld [vmem:[%s18467_s11 + $0x16c] ss:$16 sps:$4 sm:$0xff]  }
 0xe28   :  { %7217 = vmatprep.subr.bf16.mxu1 %v13870_v53  ;;  %v13949_v53 = vld [vmem:[%s18467_s11 + $0x168] ss:$16 sps:$4 sm:$0xff]  }
 0xe2a   :  { %6877 = vmatmul.mubr.bf16.vlgmr.msra.gmra.mrb[64].mxu1 %v16671_v4  ;;  %v13898_v4 = vld [vmem:[%s18467_s11 + $0x140] ss:$16 sps:$4 sm:$0xff]  }
 0xe2b   :  { %7218 = vmatpush1.bf16.msra.mxu1 %v13868_v26  ;;  %7249 = vmatprep.mubr.bf16.mxu1 %v16655_v42  ;;  %v13954_v26 = vld [vmem:[%s18467_s11 + $0x18c] ss:$16 sps:$4 sm:$0xff]  }
 0xe2c   :  { %7219 = vmatprep.subr.bf16.mxu1 %v13873_v32  ;;  %v13952_v32 = vld [vmem:[%s18467_s11 + $0x188] ss:$16 sps:$4 sm:$0xff]  }
 0xe2f   :  { %7220 = vmatpush1.bf16.msra.mxu1 %v13871_v7  ;;  %v13957_v7 = vld [vmem:[%s18467_s11 + $0x1ac] ss:$16 sps:$4 sm:$0xff]  }
 0xe30   :  { %7221 = vmatprep.subr.bf16.mxu1 %v13876_v50  ;;  %v13955_v50 = vld [vmem:[%s18467_s11 + $0x1a8] ss:$16 sps:$4 sm:$0xff]  }
 0xe33   :  { %7222 = vmatpush1.bf16.msra.mxu1 %v13874_v0  ;;  %v13960_v0 = vld [vmem:[%s18467_s11 + $0x1cc] ss:$16 sps:$4 sm:$0xff]  }
 0xe34   :  { %7223 = vmatprep.subr.bf16.mxu1 %v13879_v9  ;;  %v13958_v9 = vld [vmem:[%s18467_s11 + $0x1c8] ss:$16 sps:$4 sm:$0xff]  }
 0xe37   :  { %7224 = vmatpush1.bf16.msra.mxu1 %v13877_v45  ;;  %v13963_v45 = vld [vmem:[%s18467_s11 + $0x1ec] ss:$16 sps:$4 sm:$0xff]  }
 0xe38   :  { %7225 = vmatprep.subr.bf16.mxu1 %v13882_v49  ;;  %v13961_v49 = vld [vmem:[%s18467_s11 + $0x1e8] ss:$16 sps:$4 sm:$0xff]  }
 0xe3b   :  { %7226 = vmatpush1.bf16.msra.mxu1 %v13880_v15  ;;  %v13966_v15 = vld [vmem:[%s18467_s11 + $0x404] ss:$16 sps:$4 sm:$0xff]  }
 0xe3c   :  { %7227 = vmatprep.subr.bf16.mxu1 %v13885_v35  ;;  %v13964_v35 = vld [vmem:[%s18467_s11 + $0x400] ss:$16 sps:$4 sm:$0xff]  }
 0xe3f   :  { %7228 = vmatpush1.bf16.msra.mxu1 %v13883_v18  ;;  %v13969_v18 = vld [vmem:[%s18467_s11 + $0x424] ss:$16 sps:$4 sm:$0xff]  }
 0xe40   :  { %7229 = vmatprep.subr.bf16.mxu1 %v13888_v57  ;;  %v13967_v57 = vld [vmem:[%s18467_s11 + $0x420] ss:$16 sps:$4 sm:$0xff]  }
 0xe43   :  { %7230 = vmatpush1.bf16.msra.mxu1 %v13886_v30  ;;  %v13972_v30 = vld [vmem:[%s18467_s11 + $0x444] ss:$16 sps:$4 sm:$0xff]  }
 0xe44   :  { %7231 = vmatprep.subr.bf16.mxu1 %v13891_v52  ;;  %v7884_v52 = vld [vmem:[%s18392_s22 + $0x80] sm:$0xff] }
 0xe47   :  { %7232 = vmatpush1.bf16.msra.mxu1 %v13889_v19  ;;  %v7885_v19 = vld [vmem:[%s18392_s22 + $0x88] sm:$0xff] }
 0xe48   :  { %7233 = vmatprep.subr.bf16.mxu1 %v13894_v58  ;;  %v7868_v58 = vld [vmem:[%s18392_s22] sm:$0xff] }
 0xe4b   :  { %7234 = vmatpush1.bf16.msra.mxu1 %v13892_v36  ;;  %v7869_v36 = vld [vmem:[%s18392_s22 + $0x8] sm:$0xff] }
 0xe4c   :  { %7235 = vmatprep.subr.bf16.mxu1 %v13897_v61  ;;  %v7886_v61 = vld [vmem:[%s18392_s22 + $0x90] sm:$0xff] }
 0xe4f   :  { %7236 = vmatpush1.bf16.msra.mxu1 %v13895_v33  ;;  %v7887_v33 = vld [vmem:[%s18392_s22 + $0x98] sm:$0xff] }
 0xe50   :  { %7237 = vmatprep.subr.bf16.mxu1 %v13900_v23  ;;  %v17000_v23 = vpack.c.bf16 %v7869_v36, %v7868_v58  ;;  %v14027_v58 = vld [vmem:[%s18467_s11 + $0x4a8] ss:$16 sps:$4 sm:$0xff]   ;;  %v14032_v36 = vld [vmem:[%s18467_s11 + $0x4cc] ss:$16 sps:$4 sm:$0xff]  }
 0xe53   :  { %7238 = vmatpush1.bf16.msra.mxu1 %v13898_v4  ;;  %v17002_v4 = vpack.c.bf16 %v7887_v33, %v7886_v61  ;;  %v14030_v61 = vld [vmem:[%s18467_s11 + $0x4c8] ss:$16 sps:$4 sm:$0xff]   ;;  %v14035_v33 = vld [vmem:[%s18467_s11 + $0x4ec] ss:$16 sps:$4 sm:$0xff]  }
 0xe54   :  { %7239 = vmatprep.subr.bf16.mxu1 %v13903_v24  ;;  %v7870_v24 = vld [vmem:[%s18392_s22 + $0x10] sm:$0xff] }
 0xe57   :  { %7240 = vmatpush1.bf16.msra.mxu1 %v13901_v13  ;;  %v7871_v13 = vld [vmem:[%s18392_s22 + $0x18] sm:$0xff] }
 0xe58   :  { %7241 = vmatprep.subr.bf16.mxu1 %v13906_v2  ;;  %v7888_v2 = vld [vmem:[%s18392_s22 + $0xa0] sm:$0xff] }
 0xe5b   :  { %7242 = vmatpush1.bf16.msra.mxu1 %v13904_v22  ;;  %v7889_v22 = vld [vmem:[%s18392_s22 + $0xa8] sm:$0xff] }
 0xe5c   :  { %7243 = vmatprep.subr.bf16.mxu1 %v13909_v43  ;;  %v17018_v43 = vpack.c.bf16 %v7871_v13, %v7870_v24  ;;  %v14033_v24 = vld [vmem:[%s18467_s11 + $0x4e8] ss:$16 sps:$4 sm:$0xff]   ;;  %v14038_v13 = vld [vmem:[%s18467_s11 + $0x50c] ss:$16 sps:$4 sm:$0xff]  }
 0xe5f   :  { %7244 = vmatpush1.bf16.msra.mxu1 %v13907_v21  ;;  %v13970_v21 = vld [vmem:[%s18467_s11 + $0x440] ss:$16 sps:$4 sm:$0xff]  }
 0xe60   :  { %7245 = vmatprep.subr.bf16.mxu1 %v13912_v48  ;;  %v17024_v48 = vpack.c.bf16 %v7889_v22, %v7888_v2  ;;  %v14036_v2 = vld [vmem:[%s18467_s11 + $0x508] ss:$16 sps:$4 sm:$0xff]   ;;  %v14041_v22 = vld [vmem:[%s18467_s11 + $0x52c] ss:$16 sps:$4 sm:$0xff]  }
 0xe63   :  { %7246 = vmatpush1.bf16.msra.mxu1 %v13910_v37  ;;  %v7872_v37 = vld [vmem:[%s18392_s22 + $0x20] sm:$0xff] }
 0xe64   :  { %7247 = vmatprep.subr.bf16.mxu1 %v13915_v44  ;;  %v7873_v44 = vld [vmem:[%s18392_s22 + $0x28] sm:$0xff] }
 0xe67   :  { %7248 = vmatpush1.bf16.msra.mxu1 %v13913_v63  ;;  %v13975_v63 = vld [vmem:[%s18467_s11 + $0x464] ss:$16 sps:$4 sm:$0xff]  }
 0xe68   :  { %7260 = vmatprep.subr.bf16.mxu1 %v13918_v41  ;;  %v7890_v41 = vld [vmem:[%s18392_s22 + $0xb0] sm:$0xff] }
 0xe6a   :  { %7250 = vmatmul.mubr.bf16.vlgmr.msra.gmra.mrb[60].mxu1 %v16657_v10 }
 0xe6b   :  { %7261 = vmatpush1.bf16.msra.mxu1 %v13916_v6  ;;  %7292 = vmatprep.mubr.bf16.mxu1 %v16655_v42  ;;  %v13925_v42 = vld [vmem:[%s18467_s11 + $0x68] ss:$16 sps:$4 sm:$0xff]  }
 0xe6c   :  { %7262 = vmatprep.subr.bf16.mxu1 %v13921_v12  ;;  %v7891_v6 = vld [vmem:[%s18392_s22 + $0xb8] sm:$0xff]  ;;  %v17042_v12 = vpack.c.bf16 %v7873_v44, %v7872_v37 }
 0xe6d   :  { %v14044_v37 = vld [vmem:[%s18467_s11 + $0x54c] ss:$16 sps:$4 sm:$0xff]   ;;  %v14042_v44 = vld [vmem:[%s18467_s11 + $0x548] ss:$16 sps:$4 sm:$0xff]  }
 0xe6f   :  { %7263 = vmatpush1.bf16.msra.mxu1 %v13919_v54  ;;  %v13973_v54 = vld [vmem:[%s18467_s11 + $0x460] ss:$16 sps:$4 sm:$0xff]  }
 0xe70   :  { %7264 = vmatprep.subr.bf16.mxu1 %v13924_v31  ;;  %v17048_v31 = vpack.c.bf16 %v7891_v6, %v7890_v41  ;;  %v14045_v41 = vld [vmem:[%s18467_s11 + $0x568] ss:$16 sps:$4 sm:$0xff]   ;;  %v14050_v6 = vld [vmem:[%s18467_s11 + $0x58c] ss:$16 sps:$4 sm:$0xff]  }
 0xe73   :  { %7265 = vmatpush1.bf16.msra.mxu1 %v13922_v51  ;;  %v13978_v51 = vld [vmem:[%s18467_s11 + $0x484] ss:$16 sps:$4 sm:$0xff]  }
 0xe74   :  { %7266 = vmatprep.subr.bf16.mxu1 %v13927_v28  ;;  %v13976_v28 = vld [vmem:[%s18467_s11 + $0x480] ss:$16 sps:$4 sm:$0xff]  }
 0xe77   :  { %7267 = vmatpush1.bf16.msra.mxu1 %v13925_v42  ;;  %v13981_v42 = vld [vmem:[%s18467_s11 + $0x4a4] ss:$16 sps:$4 sm:$0xff]  }
 0xe78   :  { %7268 = vmatprep.subr.bf16.mxu1 %v13930_v14  ;;  %v13979_v14 = vld [vmem:[%s18467_s11 + $0x4a0] ss:$16 sps:$4 sm:$0xff]  }
 0xe7b   :  { %7269 = vmatpush1.bf16.msra.mxu1 %v13928_v55  ;;  %v13984_v55 = vld [vmem:[%s18467_s11 + $0x4c4] ss:$16 sps:$4 sm:$0xff]  }
 0xe7c   :  { %7270 = vmatprep.subr.bf16.mxu1 %v13933_v5  ;;  %v13982_v5 = vld [vmem:[%s18467_s11 + $0x4c0] ss:$16 sps:$4 sm:$0xff]  }
 0xe7f   :  { %7271 = vmatpush1.bf16.msra.mxu1 %v13931_v29  ;;  %v13987_v29 = vld [vmem:[%s18467_s11 + $0x4e4] ss:$16 sps:$4 sm:$0xff]  }
 0xe80   :  { %7272 = vmatprep.subr.bf16.mxu1 %v13936_v20  ;;  %v13985_v20 = vld [vmem:[%s18467_s11 + $0x4e0] ss:$16 sps:$4 sm:$0xff]  }
 0xe83   :  { %7273 = vmatpush1.bf16.msra.mxu1 %v13934_v27  ;;  %v13990_v27 = vld [vmem:[%s18467_s11 + $0x504] ss:$16 sps:$4 sm:$0xff]  }
 0xe84   :  { %7274 = vmatprep.subr.bf16.mxu1 %v13939_v46  ;;  %v13988_v46 = vld [vmem:[%s18467_s11 + $0x500] ss:$16 sps:$4 sm:$0xff]  }
 0xe87   :  { %7275 = vmatpush1.bf16.msra.mxu1 %v13937_v16  ;;  %v13993_v16 = vld [vmem:[%s18467_s11 + $0x524] ss:$16 sps:$4 sm:$0xff]  }
 0xe88   :  { %7276 = vmatprep.subr.bf16.mxu1 %v13942_v39  ;;  %v13991_v39 = vld [vmem:[%s18467_s11 + $0x520] ss:$16 sps:$4 sm:$0xff]  }
 0xe8b   :  { %7277 = vmatpush1.bf16.msra.mxu1 %v13940_v25  ;;  %v13996_v25 = vld [vmem:[%s18467_s11 + $0x544] ss:$16 sps:$4 sm:$0xff]  }
 0xe8c   :  { %7278 = vmatprep.subr.bf16.mxu1 %v13945_v47  ;;  %v13994_v47 = vld [vmem:[%s18467_s11 + $0x540] ss:$16 sps:$4 sm:$0xff]  }
 0xe8f   :  { %7279 = vmatpush1.bf16.msra.mxu1 %v13943_v38  ;;  %v13999_v38 = vld [vmem:[%s18467_s11 + $0x564] ss:$16 sps:$4 sm:$0xff]  }
 0xe90   :  { %7280 = vmatprep.subr.bf16.mxu1 %v13948_v40  ;;  %v13997_v40 = vld [vmem:[%s18467_s11 + $0x560] ss:$16 sps:$4 sm:$0xff]  }
 0xe93   :  { %7281 = vmatpush1.bf16.msra.mxu1 %v13946_v62  ;;  %v14002_v62 = vld [vmem:[%s18467_s11 + $0x584] ss:$16 sps:$4 sm:$0xff]  }
 0xe94   :  { %7282 = vmatprep.subr.bf16.mxu1 %v13951_v1  ;;  %v14000_v1 = vld [vmem:[%s18467_s11 + $0x580] ss:$16 sps:$4 sm:$0xff]  }
 0xe97   :  { %7283 = vmatpush1.bf16.msra.mxu1 %v13949_v53  ;;  %v14005_v53 = vld [vmem:[%s18467_s11 + $0x5a4] ss:$16 sps:$4 sm:$0xff]  }
 0xe98   :  { %7284 = vmatprep.subr.bf16.mxu1 %v13954_v26  ;;  %v14003_v26 = vld [vmem:[%s18467_s11 + $0x5a0] ss:$16 sps:$4 sm:$0xff]  }
 0xe9b   :  { %7285 = vmatpush1.bf16.msra.mxu1 %v13952_v32  ;;  %v14008_v32 = vld [vmem:[%s18467_s11 + $0x5c4] ss:$16 sps:$4 sm:$0xff]  }
 0xe9c   :  { %7286 = vmatprep.subr.bf16.mxu1 %v13957_v7  ;;  %v14006_v7 = vld [vmem:[%s18467_s11 + $0x5c0] ss:$16 sps:$4 sm:$0xff]  }
 0xe9f   :  { %7287 = vmatpush1.bf16.msra.mxu1 %v13955_v50  ;;  %v14011_v50 = vld [vmem:[%s18467_s11 + $0x5e4] ss:$16 sps:$4 sm:$0xff]  }
 0xea0   :  { %7288 = vmatprep.subr.bf16.mxu1 %v13960_v0  ;;  %v14009_v0 = vld [vmem:[%s18467_s11 + $0x5e0] ss:$16 sps:$4 sm:$0xff]  }
 0xea3   :  { %7289 = vmatpush1.bf16.msra.mxu1 %v13958_v9  ;;  %v14014_v9 = vld [vmem:[%s18467_s11 + $0x40c] ss:$16 sps:$4 sm:$0xff]  }
 0xea4   :  { %7290 = vmatprep.subr.bf16.mxu1 %v13963_v45  ;;  %v14012_v45 = vld [vmem:[%s18467_s11 + $0x408] ss:$16 sps:$4 sm:$0xff]  }
 0xea7   :  { %7291 = vmatpush1.bf16.msra.mxu1 %v13961_v49  ;;  %v14017_v49 = vld [vmem:[%s18467_s11 + $0x42c] ss:$16 sps:$4 sm:$0xff]  }
 0xea8   :  { %7710 = vmatprep.subr.bf16.mxu1 %v13966_v15  ;;  %v14015_v15 = vld [vmem:[%s18467_s11 + $0x428] ss:$16 sps:$4 sm:$0xff]  }
 0xeaa   :  { %7293 = vmatmul.mubr.bf16.vlgmr.msra.gmra.mrb[64].mxu1 %v16657_v10  ;;  %v16989_v10 = vpack.c.bf16 %v7885_v19, %v7884_v52  ;;  %v14024_v52 = vld [vmem:[%s18467_s11 + $0x488] ss:$16 sps:$4 sm:$0xff]   ;;  %v14029_v19 = vld [vmem:[%s18467_s11 + $0x4ac] ss:$16 sps:$4 sm:$0xff]  }
 0xeab   :  { %7711 = vmatpush1.bf16.msra.mxu1 %v13964_v35  ;;  %7742 = vmatprep.mubr.bf16.mxu1 %v16669_v56  ;;  %v14020_v35 = vld [vmem:[%s18467_s11 + $0x44c] ss:$16 sps:$4 sm:$0xff]  }
 0xeac   :  { %7712 = vmatprep.subr.bf16.mxu1 %v13969_v18  ;;  %13102 = vmatprep.subr.bf16.mxu0 %v16989_v10  ;;  %v14018_v18 = vld [vmem:[%s18467_s11 + $0x448] ss:$16 sps:$4 sm:$0xff]  }
 0xead   :  { %13104 = vmatpush3.bf16.msra.mxu0 %v17000_v23 }
 0xeae   :  { %13106 = vmatprep.subr.bf16.mxu0 %v17002_v4 }
 0xeaf   :  { %7713 = vmatpush1.bf16.msra.mxu1 %v13967_v57  ;;  %v14023_v57 = vld [vmem:[%s18467_s11 + $0x46c] ss:$16 sps:$4 sm:$0xff]  }
 0xeb0   :  { %7714 = vmatprep.subr.bf16.mxu1 %v13972_v30  ;;  %v14026_v30 = vld [vmem:[%s18467_s11 + $0x48c] ss:$16 sps:$4 sm:$0xff]  }
 0xeb1   :  { %13108 = vmatpush3.bf16.msra.mxu0 %v17018_v43 }
 0xeb2   :  { %13110 = vmatprep.subr.bf16.mxu0 %v17024_v48 }
 0xeb3   :  { %7715 = vmatpush1.bf16.msra.mxu1 %v13970_v21  ;;  %v14039_v21 = vld [vmem:[%s18467_s11 + $0x528] ss:$16 sps:$4 sm:$0xff]  }
 0xeb4   :  { %7716 = vmatprep.subr.bf16.mxu1 %v13975_v63  ;;  %v14047_v63 = vld [vmem:[%s18467_s11 + $0x56c] ss:$16 sps:$4 sm:$0xff]  }
 0xeb5   :  { %13112 = vmatpush3.bf16.msra.mxu0 %v17042_v12 }
 0xeb6   :  { %13114 = vmatprep.subr.bf16.mxu0 %v17048_v31 }
 0xeb7   :  { %7717 = vmatpush1.bf16.msra.mxu1 %v13973_v54  ;;  %v14048_v54 = vld [vmem:[%s18467_s11 + $0x588] ss:$16 sps:$4 sm:$0xff]  }
 0xeb8   :  { %7718 = vmatprep.subr.bf16.mxu1 %v13978_v51  ;;  %v14053_v51 = vld [vmem:[%s18467_s11 + $0x5ac] ss:$16 sps:$4 sm:$0xff]  }
 0xebb   :  { %7719 = vmatpush1.bf16.msra.mxu1 %v13976_v28  ;;  %v14051_v28 = vld [vmem:[%s18467_s11 + $0x5a8] ss:$16 sps:$4 sm:$0xff]  }
 0xebc   :  { %7720 = vmatprep.subr.bf16.mxu1 %v13981_v42  ;;  %v14056_v42 = vld [vmem:[%s18467_s11 + $0x5cc] ss:$16 sps:$4 sm:$0xff]  }
 0xebf   :  { %7721 = vmatpush1.bf16.msra.mxu1 %v13979_v14  ;;  %v14054_v14 = vld [vmem:[%s18467_s11 + $0x5c8] ss:$16 sps:$4 sm:$0xff]  }
 0xec0   :  { %7722 = vmatprep.subr.bf16.mxu1 %v13984_v55  ;;  %v14059_v55 = vld [vmem:[%s18467_s11 + $0x5ec] ss:$16 sps:$4 sm:$0xff]  }
 0xec3   :  { %7723 = vmatpush1.bf16.msra.mxu1 %v13982_v5  ;;  %v14057_v5 = vld [vmem:[%s18467_s11 + $0x5e8] ss:$16 sps:$4 sm:$0xff]  }
 0xec4   :  { %7724 = vmatprep.subr.bf16.mxu1 %v13987_v29  ;;  %v7874_v29 = vld [vmem:[%s18392_s22 + $0x30] sm:$0xff] }
 0xec7   :  { %7725 = vmatpush1.bf16.msra.mxu1 %v13985_v20  ;;  %v7875_v20 = vld [vmem:[%s18392_s22 + $0x38] sm:$0xff] }
 0xec8   :  { %7726 = vmatprep.subr.bf16.mxu1 %v13990_v27  ;;  %v17229_v27 = vpack.c.bf16 %v7875_v20, %v7874_v29  ;;  %v7900_v29 = vld [vmem:[%s18392_s22 + $0x100] sm:$0xff]  ;;  %v7901_v20 = vld [vmem:[%s18392_s22 + $0x108] sm:$0xff] }
 0xeca   :  { %13116 = vmatpush3.bf16.msra.mxu0 %v17229_v27 }
 0xecb   :  { %7727 = vmatpush1.bf16.msra.mxu1 %v13988_v46  ;;  %v7892_v46 = vld [vmem:[%s18392_s22 + $0xc0] sm:$0xff] }
 0xecc   :  { %7728 = vmatprep.subr.bf16.mxu1 %v13993_v16 }
 0xecf   :  { %7729 = vmatpush1.bf16.msra.mxu1 %v13991_v39  ;;  %v7876_v39 = vld [vmem:[%s18392_s22 + $0x40] sm:$0xff] }
 0xed0   :  { %7730 = vmatprep.subr.bf16.mxu1 %v13996_v25  ;;  %v7877_v25 = vld [vmem:[%s18392_s22 + $0x48] sm:$0xff] }
 0xed3   :  { %7731 = vmatpush1.bf16.msra.mxu1 %v13994_v47  ;;  %v17246_v47 = vpack.c.bf16 %v7877_v25, %v7876_v39  ;;  %v7919_v39 = vld [vmem:[%s18392_s22 + $0x198] sm:$0xff] }
 0xed4   :  { %7732 = vmatprep.subr.bf16.mxu1 %v13999_v38  ;;  %v7894_v38 = vld [vmem:[%s18392_s22 + $0xd0] sm:$0xff] }
 0xed7   :  { %7733 = vmatpush1.bf16.msra.mxu1 %v13997_v40  ;;  %v7895_v40 = vld [vmem:[%s18392_s22 + $0xd8] sm:$0xff] }
 0xed8   :  { %7734 = vmatprep.subr.bf16.mxu1 %v14002_v62  ;;  %v17256_v62 = vpack.c.bf16 %v7895_v40, %v7894_v38  ;;  %v17349_v38 = vpack.c.bf16 %v7901_v20, %v7900_v29  ;;  %v7928_v29 = vld [vmem:[%s18392_s22 + $0x1e0] sm:$0xff]  ;;  %v7929_v20 = vld [vmem:[%s18392_s22 + $0x1e8] sm:$0xff] }
 0xedb   :  { %7735 = vmatpush1.bf16.msra.mxu1 %v14000_v1  ;;  %v7878_v1 = vld [vmem:[%s18392_s22 + $0x50] sm:$0xff] }
 0xedc   :  { %7736 = vmatprep.subr.bf16.mxu1 %v14005_v53  ;;  %v7879_v53 = vld [vmem:[%s18392_s22 + $0x58] sm:$0xff] }
 0xedf   :  { %7737 = vmatpush1.bf16.msra.mxu1 %v14003_v26  ;;  %v17264_v26 = vpack.c.bf16 %v7879_v53, %v7878_v1  ;;  %v7902_v53 = vld [vmem:[%s18392_s22 + $0x110] sm:$0xff] }
 0xee0   :  { %7738 = vmatprep.subr.bf16.mxu1 %v14008_v32  ;;  %v7896_v32 = vld [vmem:[%s18392_s22 + $0xe0] sm:$0xff] }
 0xee3   :  { %7739 = vmatpush1.bf16.msra.mxu1 %v14006_v7  ;;  %v7897_v7 = vld [vmem:[%s18392_s22 + $0xe8] sm:$0xff] }
 0xee4   :  { %7740 = vmatprep.subr.bf16.mxu1 %v14011_v50  ;;  %v17274_v50 = vpack.c.bf16 %v7897_v7, %v7896_v32  ;;  %v7903_v32 = vld [vmem:[%s18392_s22 + $0x118] sm:$0xff]  ;;  %v7920_v7 = vld [vmem:[%s18392_s22 + $0x1a0] sm:$0xff] }
 0xee7   :  { %7741 = vmatpush1.bf16.msra.mxu1 %v14009_v0  ;;  %v7880_v0 = vld [vmem:[%s18392_s22 + $0x60] sm:$0xff] }
 0xee8   :  { %7753 = vmatprep.subr.bf16.mxu1 %v14014_v9  ;;  %v7881_v9 = vld [vmem:[%s18392_s22 + $0x68] sm:$0xff] }
 0xeea   :  { %7743 = vmatmul.mubr.bf16.vlgmr.msra.gmra.mrb[60].mxu1 %v16667_v34 }
 0xeeb   :  { %7754 = vmatpush1.bf16.msra.mxu1 %v14012_v45  ;;  %7785 = vmatprep.mubr.bf16.mxu1 %v16669_v56  ;;  %v14021_v56 = vld [vmem:[%s18467_s11 + $0x468] ss:$16 sps:$4 sm:$0xff]   ;;  %v17282_v45 = vpack.c.bf16 %v7881_v9, %v7880_v0  ;;  %v17366_v9 = vpack.c.bf16 %v7903_v32, %v7902_v53 }
 0xeec   :  { %7755 = vmatprep.subr.bf16.mxu1 %v14017_v49  ;;  %v7898_v49 = vld [vmem:[%s18392_s22 + $0xf0] sm:$0xff]  ;;  %v7921_v0 = vld [vmem:[%s18392_s22 + $0x1a8] sm:$0xff]  ;;  %v7931_v53 = vld [vmem:[%s18392_s22 + $0x1f8] sm:$0xff] }
 0xeef   :  { %7756 = vmatpush1.bf16.msra.mxu1 %v14015_v15  ;;  %v7899_v15 = vld [vmem:[%s18392_s22 + $0xf8] sm:$0xff] }
 0xef0   :  { %7757 = vmatprep.subr.bf16.mxu1 %v14020_v35  ;;  %v7882_v35 = vld [vmem:[%s18392_s22 + $0x70] sm:$0xff] }
 0xef3   :  { %7758 = vmatpush1.bf16.msra.mxu1 %v14018_v18  ;;  %v17295_v18 = vpack.c.bf16 %v7899_v15, %v7898_v49  ;;  %v17369_v49 = vpack.c.bf16 %v7921_v0, %v7920_v7  ;;  %v7904_v15 = vld [vmem:[%s18392_s22 + $0x120] sm:$0xff]  ;;  %v7914_v0 = vld [vmem:[%s18392_s22 + $0x170] sm:$0xff] }
 0xef4   :  { %7759 = vmatprep.subr.bf16.mxu1 %v14023_v57  ;;  %v7883_v57 = vld [vmem:[%s18392_s22 + $0x78] sm:$0xff] }
 0xef7   :  { %7760 = vmatpush1.bf16.msra.mxu1 %v14021_v56  ;;  %v17300_v56 = vpack.c.bf16 %v7883_v57, %v7882_v35  ;;  %v7905_v35 = vld [vmem:[%s18392_s22 + $0x128] sm:$0xff]  ;;  %v7922_v57 = vld [vmem:[%s18392_s22 + $0x1b0] sm:$0xff] }
 0xef8   :  { %7761 = vmatprep.subr.bf16.mxu1 %v14026_v30  ;;  %v7916_v30 = vld [vmem:[%s18392_s22 + $0x180] sm:$0xff] }
 0xefb   :  { %7762 = vmatpush1.bf16.msra.mxu1 %v14024_v52  ;;  %v7917_v52 = vld [vmem:[%s18392_s22 + $0x188] sm:$0xff] }
 0xefc   :  { %7763 = vmatprep.subr.bf16.mxu1 %v14029_v19  ;;  %v17310_v19 = vpack.c.bf16 %v7917_v52, %v7916_v30  ;;  %v7923_v30 = vld [vmem:[%s18392_s22 + $0x1b8] sm:$0xff]  ;;  %v17384_v52 = vpack.c.bf16 %v7905_v35, %v7904_v15 }
 0xefd   :  { %v7915_v15 = vld [vmem:[%s18392_s22 + $0x178] sm:$0xff] }
 0xefe   :  { %v17468_v35 = vpack.c.bf16 %v7915_v15, %v7914_v0 }
 0xeff   :  { %7764 = vmatpush1.bf16.msra.mxu1 %v14027_v58 }
 0xf00   :  { %7765 = vmatprep.subr.bf16.mxu1 %v14032_v36 }
 0xf03   :  { %7766 = vmatpush1.bf16.msra.mxu1 %v14030_v61 }
 0xf04   :  { %7767 = vmatprep.subr.bf16.mxu1 %v14035_v33 }
 0xf07   :  { %7768 = vmatpush1.bf16.msra.mxu1 %v14033_v24 }
 0xf08   :  { %7769 = vmatprep.subr.bf16.mxu1 %v14038_v13 }
 0xf0b   :  { %7770 = vmatpush1.bf16.msra.mxu1 %v14036_v2 }
 0xf0c   :  { %7771 = vmatprep.subr.bf16.mxu1 %v14041_v22 }
 0xf0f   :  { %7772 = vmatpush1.bf16.msra.mxu1 %v14039_v21 }
 0xf10   :  { %7773 = vmatprep.subr.bf16.mxu1 %v14044_v37 }
 0xf13   :  { %7774 = vmatpush1.bf16.msra.mxu1 %v14042_v44 }
 0xf14   :  { %7775 = vmatprep.subr.bf16.mxu1 %v14047_v63 }
 0xf17   :  { %7776 = vmatpush1.bf16.msra.mxu1 %v14045_v41 }
 0xf18   :  { %7777 = vmatprep.subr.bf16.mxu1 %v14050_v6 }
 0xf1b   :  { %7778 = vmatpush1.bf16.msra.mxu1 %v14048_v54 }
 0xf1c   :  { %7779 = vmatprep.subr.bf16.mxu1 %v14053_v51 }
 0xf1f   :  { %7780 = vmatpush1.bf16.msra.mxu1 %v14051_v28 }
 0xf20   :  { %7781 = vmatprep.subr.bf16.mxu1 %v14056_v42 }
 0xf23   :  { %7782 = vmatpush1.bf16.msra.mxu1 %v14054_v14 }
 0xf24   :  { %7783 = vmatprep.subr.bf16.mxu1 %v14059_v55 }
 0xf27   :  { %7784 = vmatpush1.bf16.msra.mxu1 %v14057_v5 }
 0xf2a   :  { %7786 = vmatmul.mubr.bf16.vlgmr.msra.gmra.mrb[64].mxu1 %v16667_v34  ;;  %v7893_v34 = vld [vmem:[%s18392_s22 + $0xc8] sm:$0xff] }
 0xf2b   :  { %v17238_v16 = vpack.c.bf16 %v7893_v34, %v7892_v46  ;;  %v7918_v34 = vld [vmem:[%s18392_s22 + $0x190] sm:$0xff] }
 0xf2c   :  { %v17351_v1 = vpack.c.bf16 %v7919_v39, %v7918_v34  ;;  %v17441_v34 = vpack.c.bf16 %v7929_v20, %v7928_v29  ;;  %v7912_v39 = vld [vmem:[%s18392_s22 + $0x160] sm:$0xff] }
 0xf2d   :  { %13118 = vmatprep.subr.bf16.mxu0 %v17238_v16 }
 0xf2e   :  { %13120 = vmatpush3.bf16.msra.mxu0 %v17246_v47 }
 0xf2f   :  { %13122 = vmatprep.subr.bf16.mxu0 %v17256_v62 }
 0xf32   :  { %13124 = vmatpush3.bf16.msra.mxu0 %v17264_v26 }
 0xf33   :  { %13126 = vmatprep.subr.bf16.mxu0 %v17274_v50 }
 0xf36   :  { %13128 = vmatpush3.bf16.msra.mxu0 %v17282_v45 }
 0xf37   :  { %13130 = vmatprep.subr.bf16.mxu0 %v17295_v18 }
 0xf3a   :  { %13132 = vmatpush3.bf16.msra.mxu0 %v17300_v56 }
 0xf3b   :  { %13134 = vmatprep.subr.bf16.mxu0 %v17310_v19 }
 0xfbd   :  { %v17313_v58 = vpop.f32.mrb[60].mxu1 }
 0xfbe   :  { %v17315_v36 = vpop.f32.mrb[61].mxu1  ;;  %v7832_v33 = vmul.f32 %v17313_v58, %v17313_v58 }
 0xfbf   :  { %v17317_v61 = vpop.f32.mrb[62].mxu1  ;;  %v7833_v22 = vmul.f32 %v17315_v36, %v17315_v36 }
 0xfc0   :  { %v7804_v24 = vadd.f32 %v17317_v61, %v17313_v58  ;;  %v7836_v13 = vmul.f32 %v17317_v61, %v17317_v61  ;;  %v17325_v2 = vpop.f32.mrb[63].mxu1 }
 0xfc1   :  { %v7811_v21 = vadd.f32 %v17325_v2, %v17315_v36  ;;  %v7837_v37 = vmul.f32 %v17325_v2, %v17325_v2 }
 0xfc2   :  { %v7805_v44 = vrot.slane %v7804_v24, 4  ;;  %v17333_v63 = vadd.f32 %v7836_v13, %v7832_v33  ;;  %v17387_v33 = vpack.c.bf16 %v7923_v30, %v7922_v57  ;;  %v7907_v13 = vld [vmem:[%s18392_s22 + $0x138] sm:$0xff] }
 0xfc3   :  { %v7812_v41 = vrot.slane %v7811_v21, 4  ;;  %v17335_v6 = vadd.f32 %v7837_v37, %v7833_v22  ;;  %v7924_v22 = vld [vmem:[%s18392_s22 + $0x1c0] sm:$0xff] }
 0xfc4   :  { %v7806_v54 = vadd.f32 %v7805_v44, %v7804_v24  ;;  %v7906_v24 = vld [vmem:[%s18392_s22 + $0x130] sm:$0xff] }
 0xfc5   :  { %v7813_v51 = vadd.f32 %v7812_v41, %v7811_v21  ;;  %v7925_v21 = vld [vmem:[%s18392_s22 + $0x1c8] sm:$0xff]  ;;  %v17402_v37 = vpack.c.bf16 %v7907_v13, %v7906_v24  ;;  %v7908_v41 = vld [vmem:[%s18392_s22 + $0x140] sm:$0xff]  ;;  %v7848_v57 = vrot.slane %v17335_v6, 4 }
 0xfc6   :  { %v7807_v28 = vrot.slane %v7806_v54, 2  ;;  %v17405_v44 = vpack.c.bf16 %v7925_v21, %v7924_v22 }
 0xfc7   :  { %v7814_v42 = vrot.slane %v7813_v51, 2  ;;  %v7849_v13 = vadd.f32 %v7848_v57, %v17335_v6 }
 0xfc8   :  { %v7808_v14 = vadd.f32 %v7807_v28, %v7806_v54  ;;  %v7909_v54 = vld [vmem:[%s18392_s22 + $0x148] sm:$0xff]  ;;  %v7927_v28 = vld [vmem:[%s18392_s22 + $0x1d8] sm:$0xff] }
 0xfc9   :  { %v7815_v55 = vadd.f32 %v7814_v42, %v7813_v51  ;;  %v7926_v51 = vld [vmem:[%s18392_s22 + $0x1d0] sm:$0xff]  ;;  %v17420_v42 = vpack.c.bf16 %v7909_v54, %v7908_v41 }
 0xfca   :  { %v7809_v5 = vrot.slane %v7808_v14, 1 }
 0xfcb   :  { %v7816_v46 = vrot.slane %v7815_v55, 1 }
 0xfcc   :  { %v7810_v40 = vadd.f32 %v7809_v5, %v7808_v14  ;;  %v17423_v14 = vpack.c.bf16 %v7927_v28, %v7926_v51  ;;  %v7911_v5 = vld [vmem:[%s18392_s22 + $0x158] sm:$0xff] }
 0xfcd   :  { %v7817_v25 = vadd.f32 %v7816_v46, %v7815_v55  ;;  %v7910_v55 = vld [vmem:[%s18392_s22 + $0x150] sm:$0xff] }
 0xfce   :  { %v17438_v46 = vpack.c.bf16 %v7911_v5, %v7910_v55 }
 0xfcf   :  { %7996 = vmatprep.mubr.f32.mxu0 %v7817_v25  ;;  %v7913_v25 = vld [vmem:[%s18392_s22 + $0x168] sm:$0xff] }
 0xfd0   :  { %7997 = vmatmul.mubr.f32.vlgmr.msra.gmra.mrb[54].mxu0 %v7810_v40  ;;  %v7930_v40 = vld [vmem:[%s18392_s22 + $0x1f0] sm:$0xff]  ;;  %v17456_v32 = vpack.c.bf16 %v7913_v25, %v7912_v39  ;;  %v7850_v39 = vrot.slane %v7849_v13, 2 }
 0xfd1   :  { %13136 = vmatpush3.bf16.msra.mxu0 %v17349_v38  ;;  %v17459_v7 = vpack.c.bf16 %v7931_v53, %v7930_v40 }
 0xfd2   :  { %13138 = vmatprep.subr.bf16.mxu0 %v17351_v1  ;;  %v7851_v15 = vadd.f32 %v7850_v39, %v7849_v13  ;;  %v7841_v13 = vrot.slane %v17333_v63, 4 }
 0xfd4   :  { %v7852_v3 = vrot.slane %v7851_v15, 1 }
 0xfd5   :  { %13140 = vmatpush3.bf16.msra.mxu0 %v17366_v9 }
 0xfd6   :  { %13142 = vmatprep.subr.bf16.mxu0 %v17369_v49 }
 0xfd9   :  { %13144 = vmatpush3.bf16.msra.mxu0 %v17384_v52 }
 0xfda   :  { %13146 = vmatprep.subr.bf16.mxu0 %v17387_v33 }
 0xfdd   :  { %13148 = vmatpush3.bf16.msra.mxu0 %v17402_v37 }
 0xfde   :  { %13150 = vmatprep.subr.bf16.mxu0 %v17405_v44 }
 0xfe1   :  { %13152 = vmatpush3.bf16.msra.mxu0 %v17420_v42 }
 0xfe2   :  { %13154 = vmatprep.subr.bf16.mxu0 %v17423_v14 }
 0xfe5   :  { %13156 = vmatpush3.bf16.msra.mxu0 %v17438_v46 }
 0xfe6   :  { %13158 = vmatprep.subr.bf16.mxu0 %v17441_v34 }
 0xfe9   :  { %13160 = vmatpush3.bf16.msra.mxu0 %v17456_v32 }
 0xfea   :  { %13162 = vmatprep.subr.bf16.mxu0 %v17459_v7 }
 0xfed   :  { %13164 = vmatpush3.bf16.msra.mxu0 %v17468_v35 }
 0xfee   :  { %13166 = vmatprep.subr.bf16.mxu0 %v16989_v10 }
 0xffd   :  { %v17474_v30 = vpop.f32.mrb[64].mxu1 }
 0xffe   :  { %v17476_v24 = vpop.f32.mrb[65].mxu1  ;;  %v7834_v21 = vmul.f32 %v17474_v30, %v17474_v30 }
 0xfff   :  { %18468 = vst [vmem:[#allocation12_spill] sm:$0xff] %v17476_v24  ;;  %v17479_v22 = vpop.f32.mrb[66].mxu1  ;;  %v7835_v51 = vmul.f32 %v17476_v24, %v17476_v24 }
0x1000   :  { %18469 = vst [vmem:[#allocation13_spill] sm:$0xff] %v17479_v22  ;;  %v7818_v41 = vadd.f32 %v17479_v22, %v17474_v30  ;;  %v7838_v54 = vmul.f32 %v17479_v22, %v17479_v22  ;;  %v17487_v10 = vpop.f32.mrb[67].mxu1  ;;  %v7853_v22 = vadd.f32 %v7852_v3, %v7851_v15 }
0x1001   :  { %v7825_v28 = vadd.f32 %v17487_v10, %v17476_v24  ;;  %v7839_v6 = vmul.f32 %v17487_v10, %v17487_v10 }
0x1002   :  { %v7819_v55 = vrot.slane %v7818_v41, 4  ;;  %v7854_v5 = vadd.f32 %v7838_v54, %v7834_v21  ;;  %v8252_v21 = vld [vmem:[%s18393_s23 + $0xe8] sm:$0xff] }
0x1003   :  { %v7826_v29 = vrot.slane %v7825_v28, 4  ;;  %v7861_v20 = vadd.f32 %v7839_v6, %v7835_v51  ;;  %v8247_v51 = vld [vmem:[%s18393_s23 + $0xc0] sm:$0xff]  ;;  %v8226_v6 = vld [vmem:[%s18393_s23 + $0x18] sm:$0xff] }
0x1004   :  { %v7820_v25 = vadd.f32 %v7819_v55, %v7818_v41  ;;  %v8230_v55 = vld [vmem:[%s18393_s23 + $0x38] sm:$0xff] }
0x1005   :  { %v7827_v40 = vadd.f32 %v7826_v29, %v7825_v28  ;;  %v8251_v28 = vld [vmem:[%s18393_s23 + $0xe0] sm:$0xff]  ;;  %v17606_v29 = vpack.c.bf16 %v8230_v55, %v8226_v6 }
0x1006   :  { %v7821_v53 = vrot.slane %v7820_v25, 2 }
0x1007   :  { %v7828_v0 = vrot.slane %v7827_v40, 2 }
0x1008   :  { %v7822_v57 = vadd.f32 %v7821_v53, %v7820_v25 }
0x1009   :  { %v7829_v8 = vadd.f32 %v7828_v0, %v7827_v40 }
0x100a   :  { %v7823_v11 = vrot.slane %v7822_v57, 1 }
0x100b   :  { %v7830_v59 = vrot.slane %v7829_v8, 1 }
0x100c   :  { %v7824_v24 = vadd.f32 %v7823_v11, %v7822_v57 }
0x100d   :  { %v7831_v17 = vadd.f32 %v7830_v59, %v7829_v8  ;;  %v7862_v8 = vrot.slane %v7861_v20, 4  ;;  %v7842_v59 = vadd.f32 %v7841_v13, %v17333_v63  ;;  %v8224_v63 = vld [vmem:[%s18393_s23 + $0x8] sm:$0xff] }
0x100f   :  { %8066 = vmatprep.mubr.f32.mxu0 %v7831_v17  ;;  %v7863_v17 = vadd.f32 %v7862_v8, %v7861_v20  ;;  %v7843_v3 = vrot.slane %v7842_v59, 2 }
0x1010   :  { %8067 = vmatmul.mubr.f32.vlgmr.msra.gmra.mrb[68].mxu0 %v7824_v24  ;;  %v8243_v24 = vld [vmem:[%s18393_s23 + $0xa0] sm:$0xff] }
0x1011   :  { %13168 = vmatpush3.bf16.msra.mxu0 %v17000_v23  ;;  %8136 = vmatprep.mubr.f32.mxu0 %v7853_v22  ;;  %v7864_v11 = vrot.slane %v7863_v17, 2  ;;  %v7844_v23 = vadd.f32 %v7843_v3, %v7842_v59  ;;  %v8248_v22 = vld [vmem:[%s18393_s23 + $0xc8] sm:$0xff] }
0x1012   :  { %13170 = vmatprep.subr.bf16.mxu0 %v17002_v4  ;;  %v17587_v54 = vpack.c.bf16 %v8252_v21, %v8248_v22  ;;  %v14066_v21 = vld [vmem:[%s18394_s24 + $0x148] sm:$0xff]  }
0x1013   :  { %v7865_v4 = vadd.f32 %v7864_v11, %v7863_v17 }
0x1015   :  { %13172 = vmatpush3.bf16.msra.mxu0 %v17018_v43  ;;  %v7845_v43 = vrot.slane %v7844_v23, 1 }
0x1016   :  { %13174 = vmatprep.subr.bf16.mxu0 %v17024_v48  ;;  %v7866_v48 = vrot.slane %v7865_v4, 1 }
0x1019   :  { %13176 = vmatpush3.bf16.msra.mxu0 %v17042_v12  ;;  %v7846_v12 = vadd.f32 %v7845_v43, %v7844_v23  ;;  %v8225_v43 = vld [vmem:[%s18393_s23 + $0x10] sm:$0xff] }
0x101a   :  { %13178 = vmatprep.subr.bf16.mxu0 %v17048_v31  ;;  %v7867_v31 = vadd.f32 %v7866_v48, %v7865_v4  ;;  %v8229_v48 = vld [vmem:[%s18393_s23 + $0x30] sm:$0xff] }
0x101d   :  { %13180 = vmatpush3.bf16.msra.mxu0 %v17229_v27  ;;  %v7855_v27 = vrot.slane %v7854_v5, 4 }
0x101e   :  { %13182 = vmatprep.subr.bf16.mxu0 %v17238_v16 }
0x101f   :  { %v7856_v16 = vadd.f32 %v7855_v27, %v7854_v5  ;;  %v17603_v5 = vpack.c.bf16 %v8251_v28, %v8247_v51  ;;  %v8238_v27 = vld [vmem:[%s18393_s23 + $0x78] sm:$0xff] }
0x1021   :  { %13184 = vmatpush3.bf16.msra.mxu0 %v17246_v47  ;;  %v7857_v47 = vrot.slane %v7856_v16, 2 }
0x1022   :  { %13186 = vmatprep.subr.bf16.mxu0 %v17256_v62 }
0x1023   :  { %v7858_v62 = vadd.f32 %v7857_v47, %v7856_v16  ;;  %v13247_v47 = vpack.c.bf16 %v8229_v48, %v8225_v43 }
0x1025   :  { %13188 = vmatpush3.bf16.msra.mxu0 %v17264_v26  ;;  %v7859_v26 = vrot.slane %v7858_v62, 1 }
0x1026   :  { %13190 = vmatprep.subr.bf16.mxu0 %v17274_v50 }
0x1027   :  { %v7860_v50 = vadd.f32 %v7859_v26, %v7858_v62 }
0x1029   :  { %13192 = vmatpush3.bf16.msra.mxu0 %v17282_v45  ;;  %v18470_v45 = vmov 0.0  }
0x102a   :  { %13194 = vmatprep.subr.bf16.mxu0 %v17295_v18 }
0x102d   :  { %13196 = vmatpush3.bf16.msra.mxu0 %v17300_v56 }
0x102e   :  { %13198 = vmatprep.subr.bf16.mxu0 %v17310_v19 }
0x1030   :  { %8137 = vmatmul.mubr.f32.vlgmr.msra.gmra.mrb[70].mxu0 %v7846_v12  ;;  %v8216_v12 = vld [vmem:[%s18384_s14] sm:$0x1] }
0x1031   :  { %13200 = vmatpush3.bf16.msra.mxu0 %v17349_v38  ;;  %8206 = vmatprep.mubr.f32.mxu0 %v7867_v31  ;;  %v8228_v38 = vld [vmem:[%s18393_s23 + $0x28] sm:$0xff]  ;;  %v8234_v31 = vld [vmem:[%s18393_s23 + $0x58] sm:$0xff] }
0x1032   :  { %13202 = vmatprep.subr.bf16.mxu0 %v17351_v1  ;;  %v17535_v1 = vpack.c.bf16 %v8228_v38, %v8224_v63  ;;  %v13249_v26 = vpack.c.bf16 %v8238_v27, %v8234_v31 }
0x1035   :  { %13204 = vmatpush3.bf16.msra.mxu0 %v17366_v9  ;;  %v8223_v9 = vld [vmem:[%s18393_s23] sm:$0xff] }
0x1036   :  { %13206 = vmatprep.subr.bf16.mxu0 %v17369_v49  ;;  %v8227_v49 = vld [vmem:[%s18393_s23 + $0x20] sm:$0xff] }
0x1039   :  { %13208 = vmatpush3.bf16.msra.mxu0 %v17384_v52  ;;  %v17543_v52 = vpack.c.bf16 %v8227_v49, %v8223_v9  ;;  %v8241_v49 = vld [vmem:[%s18393_s23 + $0x90] sm:$0xff] }
0x103a   :  { %13210 = vmatprep.subr.bf16.mxu0 %v17387_v33  ;;  %v8232_v33 = vld [vmem:[%s18393_s23 + $0x48] sm:$0xff] }
0x103d   :  { %13212 = vmatpush3.bf16.msra.mxu0 %v17402_v37  ;;  %v8236_v37 = vld [vmem:[%s18393_s23 + $0x68] sm:$0xff] }
0x103e   :  { %13214 = vmatprep.subr.bf16.mxu0 %v17405_v44  ;;  %v17553_v44 = vpack.c.bf16 %v8236_v37, %v8232_v33  ;;  %v8245_v33 = vld [vmem:[%s18393_s23 + $0xb0] sm:$0xff]  ;;  %v8250_v37 = vld [vmem:[%s18393_s23 + $0xd8] sm:$0xff] }
0x1041   :  { %13216 = vmatpush3.bf16.msra.mxu0 %v17420_v42  ;;  %v8231_v42 = vld [vmem:[%s18393_s23 + $0x40] sm:$0xff] }
0x1042   :  { %13218 = vmatprep.subr.bf16.mxu0 %v17423_v14  ;;  %v8235_v14 = vld [vmem:[%s18393_s23 + $0x60] sm:$0xff] }
0x1045   :  { %13220 = vmatpush3.bf16.msra.mxu0 %v17438_v46  ;;  %v17561_v46 = vpack.c.bf16 %v8235_v14, %v8231_v42  ;;  %v8254_v42 = vld [vmem:[%s18393_s23 + $0xf8] sm:$0xff]  ;;  %v13255_v14 = vpack.c.bf16 %v8245_v33, %v8241_v49 }
0x1046   :  { %13222 = vmatprep.subr.bf16.mxu0 %v17441_v34  ;;  %v8240_v34 = vld [vmem:[%s18393_s23 + $0x88] sm:$0xff] }
0x1049   :  { %13224 = vmatpush3.bf16.msra.mxu0 %v17456_v32  ;;  %v8244_v32 = vld [vmem:[%s18393_s23 + $0xa8] sm:$0xff] }
0x104a   :  { %13226 = vmatprep.subr.bf16.mxu0 %v17459_v7  ;;  %v8239_v7 = vld [vmem:[%s18393_s23 + $0x80] sm:$0xff] }
0x104b   :  { %v17585_v41 = vpack.c.bf16 %v8243_v24, %v8239_v7  ;;  %v8253_v7 = vld [vmem:[%s18393_s23 + $0xf0] sm:$0xff] }
0x104d   :  { %13228 = vmatpush3.bf16.msra.mxu0 %v17468_v35  ;;  %v17574_v35 = vpack.c.bf16 %v8244_v32, %v8240_v34  ;;  %v13257_v34 = vpack.c.bf16 %v8254_v42, %v8250_v37  ;;  %v8249_v32 = vld [vmem:[%s18393_s23 + $0xd0] sm:$0xff] }
0x104e   :  { %13230 = vmatprep.subr.bf16.mxu0 %v17535_v1  ;;  %v13259_v24 = vpack.c.bf16 %v8253_v7, %v8249_v32  ;;  %v18473_v32 = vld [vmem:[#allocation9_spill] sm:$0xff] }
0x1050   :  { %8207 = vmatmul.mubr.f32.vlgmr.msra.gmra.mrb[72].mxu0 %v7860_v50  ;;  %v8233_v50 = vld [vmem:[%s18393_s23 + $0x50] sm:$0xff] }
0x1051   :  { %8323 = vmatprep.mubr.f32.mxu0 %v18470_v45  ;;  %13232 = vmatpush1.bf16.msra.mxu0 %v17543_v52 }
0x1052   :  { %13234 = vmatprep.subr.bf16.mxu0 %v17553_v44 }
0x1055   :  { %13236 = vmatpush1.bf16.msra.mxu0 %v17561_v46 }
0x1056   :  { %13238 = vmatprep.subr.bf16.mxu0 %v17574_v35 }
0x1059   :  { %13240 = vmatpush1.bf16.msra.mxu0 %v17585_v41 }
0x105a   :  { %13242 = vmatprep.subr.bf16.mxu0 %v17587_v54 }
0x105d   :  { %13244 = vmatpush1.bf16.msra.mxu0 %v17603_v5 }
0x105e   :  { %13246 = vmatprep.subr.bf16.mxu0 %v17606_v29 }
0x10a3   :  { %v12407_v18 = vpop.f32.mrb[54].mxu0 }
0x10a4   :  { %v12408_v56 = vpop.f32.mrb[55].mxu0 }
0x10a5   :  { %v12409_v19 = vadd.f32 %v12408_v56, %v12407_v18  ;;  %v8237_v18 = vld [vmem:[%s18393_s23 + $0x70] sm:$0xff]  ;;  %v8242_v56 = vld [vmem:[%s18393_s23 + $0x98] sm:$0xff] }
0x10a6   :  { %v13251_v38 = vpack.c.bf16 %v8237_v18, %v8233_v50 }
0x10e3   :  { %v12442_v20 = vpop.f32.mrb[68].mxu0 }
0x10e4   :  { %v12443_v39 = vpop.f32.mrb[69].mxu0 }
0x10e5   :  { %v12444_v25 = vadd.f32 %v12443_v39, %v12442_v20 }
0x10e7   :  { %v8069_v40 = vadd.f32 %v12444_v25, %v12409_v19  ;;  %v8246_v19 = vld [vmem:[%s18393_s23 + $0xb8] sm:$0xff] }
0x10e8   :  { %v13253_v9 = vpack.c.bf16 %v8246_v19, %v8242_v56 }
0x10e9   :  { %v8212_v8 = vmul.f32 0.0078125, %v8069_v40 }
0x10eb   :  { %v8214_v3 = vmul.f32 %v8212_v8, %v8212_v8 }
0x1103   :  { %v12477_v53 = vpop.f32.mrb[70].mxu0 }
0x1104   :  { %v12478_v0 = vpop.f32.mrb[71].mxu0 }
0x1105   :  { %v12479_v15 = vadd.f32 %v12478_v0, %v12477_v53 }
0x1123   :  { %v12512_v57 = vpop.f32.mrb[72].mxu0 }
0x1124   :  { %v12513_v13 = vpop.f32.mrb[73].mxu0 }
0x1125   :  { %v12514_v59 = vadd.f32 %v12513_v13, %v12512_v57  ;;  %v18471_v57 = vld [vmem:[#allocation13_spill] sm:$0xff] }
0x1127   :  { %v8209_v17 = vadd.f32 %v12514_v59, %v12479_v15 }
0x1129   :  { %v8213_v11 = vmul.f32 0.0078125, %v8209_v17 }
0x112b   :  { %v8215_v23 = vsub.f32 %v8213_v11, %v8214_v3 }
0x112d   :  { %v8217_v4 = vadd.f32 1e-05, %v8215_v23 }
0x112f   :  { %14196 = vrsqrt.f32 %v8217_v4 }
0x1139   :  { %v14197_v16 = vpop.eup %14196 }
0x113a   :  { %v8219_v62 = vmul.f32 %v14197_v16, %v8216_v12 }
0x113c   :  { %11535 = vmatmul.mubr.msk.f32.vlgmr.msra.gmra.mrb[74].mxu0 %vm8255_vm15, %v8219_v62  ;;  %v8221_v63 = vmul.f32 %v8219_v62, %v8212_v8  ;;  %v18472_v8 = vld [vmem:[#allocation12_spill] sm:$0xff] }
0x113d   :  { %13248 = vmatpush1.bf16.msra.mxu0 %v13247_v47  ;;  %8394 = vmatprep.mubr.f32.mxu0 %v18470_v45 }
0x113e   :  { %13250 = vmatprep.subr.bf16.mxu0 %v13249_v26 }
0x1141   :  { %13252 = vmatpush1.bf16.msra.mxu0 %v13251_v38 }
0x1142   :  { %13254 = vmatprep.subr.bf16.mxu0 %v13253_v9 }
0x1145   :  { %13256 = vmatpush1.bf16.msra.mxu0 %v13255_v14 }
0x1146   :  { %13258 = vmatprep.subr.bf16.mxu0 %v13257_v34 }
0x1149   :  { %13260 = vmatpush1.bf16.msra.mxu0 %v13259_v24 }
0x114a   :  { %13262 = vmatprep.subr.bf16.mxu0 %v17535_v1  ;;  %v8220_v1 = vld [vmem:[%s18385_s15] sm:$0x1] }
0x114b   :  { %v8222_v22 = vsub.f32 %v8220_v1, %v8221_v63 }
0x114c   :  { %11536 = vmatmul.mubr.msk.f32.vlgmr.msra.gmra.mrb[76].mxu0 %vm8255_vm15, %v8219_v62 }
0x114d   :  { %13264 = vmatpush1.bf16.msra.mxu0 %v17543_v52  ;;  %8468 = vmatprep.mubr.f32.mxu0 %v18470_v45  ;;  %v14060_v52 = vld [vmem:[%s18394_s24 + $0xc0] sm:$0xff]  }
0x114e   :  { %13266 = vmatprep.subr.bf16.mxu0 %v17553_v44  ;;  %v14061_v44 = vld [vmem:[%s18394_s24 + $0x80] sm:$0xff]   ;;  %12581 = vmatprep.subr.bf16.mxu1 %v14060_v52 }
0x114f   :  { %12582 = vmatpush3.bf16.msra.mxu1 %v14061_v44 }
0x1151   :  { %13268 = vmatpush1.bf16.msra.mxu0 %v17561_v46  ;;  %v14063_v46 = vld [vmem:[%s18394_s24 + $0x100] sm:$0xff]  }
0x1152   :  { %13270 = vmatprep.subr.bf16.mxu0 %v17574_v35  ;;  %v14064_v35 = vld [vmem:[%s18394_s24 + $0xc8] sm:$0xff]  }
0x1153   :  { %12583 = vmatprep.subr.bf16.mxu1 %v14064_v35 }
0x1155   :  { %13272 = vmatpush1.bf16.msra.mxu0 %v17585_v41  ;;  %v14065_v41 = vld [vmem:[%s18394_s24 + $0x88] sm:$0xff]  }
0x1156   :  { %13274 = vmatprep.subr.bf16.mxu0 %v17587_v54  ;;  %v14067_v54 = vld [vmem:[%s18394_s24 + $0x108] sm:$0xff]   ;;  %12584 = vmatpush3.bf16.msra.mxu1 %v14065_v41 }
0x1159   :  { %13276 = vmatpush1.bf16.msra.mxu0 %v17603_v5 }
0x115a   :  { %13278 = vmatprep.subr.bf16.mxu0 %v17606_v29 }
0x115c   :  { %11537 = vmatmul.mubr.msk.f32.vlgmr.msra.gmra.mrb[78].mxu0 %vm8255_vm15, %v8222_v22 }
0x115d   :  { %13280 = vmatpush1.bf16.msra.mxu0 %v13247_v47  ;;  %8539 = vmatprep.mubr.f32.mxu0 %v18470_v45  ;;  %v14062_v45 = vld [vmem:[%s18394_s24 + $0x140] sm:$0xff]  }
0x115e   :  { %13282 = vmatprep.subr.bf16.mxu0 %v13249_v26 }
0x1161   :  { %13284 = vmatpush1.bf16.msra.mxu0 %v13251_v38 }
0x1162   :  { %13286 = vmatprep.subr.bf16.mxu0 %v13253_v9 }
0x1165   :  { %13288 = vmatpush1.bf16.msra.mxu0 %v13255_v14 }
0x1166   :  { %13290 = vmatprep.subr.bf16.mxu0 %v13257_v34 }
0x1169   :  { %13292 = vmatpush1.bf16.msra.mxu0 %v13259_v24 }
0x116a   :  { %12515 = vmatprep.subr.bf16.mxu0 %v14062_v45 }
0x116c   :  { %11538 = vmatmul.mubr.msk.f32.vlgmr.msra.gmra.mrb[80].mxu0 %vm8255_vm15, %v8222_v22 }
0x116d   :  { %12516 = vmatpush3.bf16.msra.mxu0 %v14063_v46 }
0x116e   :  { %12517 = vmatprep.subr.bf16.mxu0 %v14066_v21 }
0x1171   :  { %12518 = vmatpush3.bf16.msra.mxu0 %v14067_v54 }
0x120f   :  { %v8325_v51 = vpop.f32.mrb[74].mxu0 }
0x1210   :  { %v8549_v28 = vrot.slane %v8325_v51, %v15107_v60  ;;  %v8327_v6 = vpop.f32.mrb[75].mxu0 }
0x1211   :  { %v8553_v55 = vrot.slane %v8327_v6, %v15107_v60 }
0x1212   :  { %v8562_v5 = vmul.f32 %v8549_v28, %v17313_v58  ;;  %v8566_v29 = vmul.f32 %v8549_v28, %v17317_v61 }
0x1213   :  { %v8563_v20 = vmul.f32 %v8553_v55, %v17315_v36  ;;  %v8567_v39 = vmul.f32 %v8553_v55, %v17325_v2 }
0x121f   :  { %v8396_v25 = vpop.f32.mrb[76].mxu0 }
0x1220   :  { %v8557_v40 = vrot.slane %v8396_v25, %v15107_v60  ;;  %v8398_v53 = vpop.f32.mrb[77].mxu0 }
0x1221   :  { %v8561_v0 = vrot.slane %v8398_v53, %v15107_v60 }
0x1222   :  { %v8564_v15 = vmul.f32 %v8557_v40, %v17474_v30  ;;  %v8568_v13 = vmul.f32 %v8557_v40, %v18471_v57 }
0x1223   :  { %v8565_v59 = vmul.f32 %v8561_v0, %v18472_v8  ;;  %v8569_v58 = vmul.f32 %v8561_v0, %v17487_v10 }
0x122f   :  { %v8470_v17 = vpop.f32.mrb[78].mxu0 }
0x1230   :  { %v8573_v61 = vrot.slane %v8470_v17, %v15107_v60  ;;  %v8472_v36 = vpop.f32.mrb[79].mxu0  ;;  %v14070_v17 = vld [vmem:[%s18394_s24 + $0x150] sm:$0xff]  }
0x1231   :  { %v8577_v2 = vrot.slane %v8472_v36, %v15107_v60  ;;  %12519 = vmatprep.subr.bf16.mxu0 %v14070_v17  ;;  %v14074_v17 = vld [vmem:[%s18394_s24 + $0x158] sm:$0xff]  }
0x1232   :  { %v8586_v3 = vadd.f32 %v8573_v61, %v8562_v5  ;;  %v8590_v11 = vadd.f32 %v8573_v61, %v8566_v29 }
0x1233   :  { %v8587_v23 = vadd.f32 %v8577_v2, %v8563_v20  ;;  %v8591_v4 = vadd.f32 %v8577_v2, %v8567_v39 }
0x1234   :  { %v8594_v43 = vmax.f32 %v8586_v3, 0.0  ;;  %v8598_v48 = vmax.f32 %v8590_v11, 0.0  ;;  %v14071_v11 = vld [vmem:[%s18394_s24 + $0x110] sm:$0xff]  }
0x1235   :  { %v8595_v12 = vmax.f32 %v8587_v23, 0.0  ;;  %v8599_v30 = vmax.f32 %v8591_v4, 0.0  ;;  %v18474_v23 = vld [vmem:[#allocation10_spill] sm:$0xff]  ;;  %12520 = vmatpush3.bf16.msra.mxu0 %v14071_v11 }
0x1236   :  { %12521 = vmatprep.subr.bf16.mxu0 %v14074_v17 }
0x1237   :  { %v8610_v31 = vcombine.low %v8594_v43, %v8595_v12  ;;  %v8611_v27 = vcombine.high %v8594_v43, %v8595_v12  ;;  %v8646_v16 = vcombine.low %v8598_v48, %v8599_v30  ;;  %v8647_v47 = vcombine.high %v8598_v48, %v8599_v30 }
0x1239   :  { %v8620_v7 = vrot.slane %v8610_v31, %v18473_v32  ;;  %v8627_v24 = vrot.slane %v8611_v27, %v18473_v32  ;;  %v8656_v45 = vrot.slane %v8646_v16, %v18473_v32  ;;  %v8663_v46 = vrot.slane %v8647_v47, %v18473_v32  ;;  %v18475_v31 = vld [vmem:[#allocation8_spill] sm:$0xff] }
0x123a   :  { %v17761_v27 = vsub.s32 6, %v18475_v31  ;;  %v17764_v16 = vsub.s32 4, %v18475_v31 }
0x123f   :  { %v8541_v62 = vpop.f32.mrb[80].mxu0 }
0x1240   :  { %v8581_v10 = vrot.slane %v8541_v62, %v15107_v60  ;;  %v8543_v26 = vpop.f32.mrb[81].mxu0 }
0x1241   :  { %v8585_v50 = vrot.slane %v8543_v26, %v15107_v60 }
0x1242   :  { %v8588_v18 = vadd.f32 %v8581_v10, %v8564_v15  ;;  %v8592_v56 = vadd.f32 %v8581_v10, %v8568_v13 }
0x1243   :  { %v8589_v19 = vadd.f32 %v8585_v50, %v8565_v59  ;;  %v8593_v63 = vadd.f32 %v8585_v50, %v8569_v58  ;;  %v14068_v59 = vld [vmem:[%s18394_s24 + $0xd0] sm:$0xff]  }
0x1244   :  { %v8596_v38 = vmax.f32 %v8588_v18, 0.0  ;;  %v8600_v9 = vmax.f32 %v8592_v56, 0.0  ;;  %v14069_v58 = vld [vmem:[%s18394_s24 + $0x90] sm:$0xff]   ;;  %12585 = vmatprep.subr.bf16.mxu1 %v14068_v59 }
0x1245   :  { %v8597_v49 = vmax.f32 %v8589_v19, 0.0  ;;  %v8601_v33 = vmax.f32 %v8593_v63, 0.0  ;;  %12586 = vmatpush3.bf16.msra.mxu1 %v14069_v58 }
0x1247   :  { %v8612_v37 = vcombine.low %v8596_v38, %v8597_v49  ;;  %v8613_v42 = vcombine.high %v8596_v38, %v8597_v49  ;;  %v8648_v14 = vcombine.low %v8600_v9, %v8601_v33  ;;  %v8649_v34 = vcombine.high %v8600_v9, %v8601_v33 }
0x1249   :  { %v8634_v1 = vrot.slane %v8612_v37, %v18473_v32  ;;  %v8641_v22 = vrot.slane %v8613_v42, %v18473_v32  ;;  %v8670_v52 = vrot.slane %v8648_v14, %v18473_v32  ;;  %v8677_v44 = vrot.slane %v8649_v34, %v18473_v32 }
0x124b   :  { %v8642_v35 = vcombine.low %v8620_v7, %v8634_v1  ;;  %v8643_v21 = vcombine.high %v8620_v7, %v8634_v1  ;;  %v8644_v41 = vcombine.low %v8627_v24, %v8641_v22  ;;  %v8645_v54 = vcombine.high %v8627_v24, %v8641_v22 }
0x124c   :  { %v8678_v51 = vcombine.low %v8656_v45, %v8670_v52  ;;  %v8679_v28 = vcombine.high %v8656_v45, %v8670_v52  ;;  %v8680_v6 = vcombine.low %v8663_v46, %v8677_v44  ;;  %v8681_v55 = vcombine.high %v8663_v46, %v8677_v44 }
0x124d   :  { %v11539_v5 = vrot.slane %v8642_v35, 9  ;;  %v11540_v29 = vrot.slane %v8643_v21, 9  ;;  %v11541_v20 = vrot.slane %v8644_v41, 9  ;;  %v11542_v39 = vrot.slane %v8645_v54, 9 }
0x124e   :  { %v11543_v25 = vrot.slane %v8678_v51, 9  ;;  %v11544_v40 = vrot.slane %v8679_v28, 9  ;;  %v11545_v53 = vrot.slane %v8680_v6, 9  ;;  %v11546_v0 = vrot.slane %v8681_v55, 9 }
0x124f   :  { %v17722_v15 = vmax.f32 %v8642_v35, %v11539_v5  ;;  %v17724_v57 = vmax.f32 %v8643_v21, %v11540_v29  ;;  %v17726_v13 = vmax.f32 %v8644_v41, %v11541_v20  ;;  %v17728_v8 = vmax.f32 %v8645_v54, %v11542_v39  ;;  %v14072_v20 = vld [vmem:[%s18394_s24 + $0xd8] sm:$0xff]  }
0x1250   :  { %v17739_v61 = vmax.f32 %v8678_v51, %v11543_v25  ;;  %v17741_v36 = vmax.f32 %v8679_v28, %v11544_v40  ;;  %v17743_v2 = vmax.f32 %v8680_v6, %v11545_v53  ;;  %v17745_v3 = vmax.f32 %v8681_v55, %v11546_v0  ;;  %v14073_v40 = vld [vmem:[%s18394_s24 + $0x98] sm:$0xff]   ;;  %12587 = vmatprep.subr.bf16.mxu1 %v14072_v20 }
0x1251   :  { %v8737_v4 = vrot.slane %v17722_v15, %v18474_v23  ;;  %v8753_v43 = vrot.slane %v17724_v57, %v18474_v23  ;;  %v8769_v48 = vrot.slane %v17726_v13, %v18474_v23  ;;  %v8785_v12 = vrot.slane %v17728_v8, %v18474_v23  ;;  %12588 = vmatpush3.bf16.msra.mxu1 %v14073_v40 }
0x1252   :  { %v8801_v30 = vrot.slane %v17739_v61, %v18474_v23  ;;  %v8733_v62 = vrot.slane %v17722_v15, %v15107_v60  ;;  %v8749_v10 = vrot.slane %v17724_v57, %v15107_v60  ;;  %v8765_v26 = vrot.slane %v17726_v13, %v15107_v60 }
0x1253   :  { %v8865_v47 = vsel %vm4556_vm2, %v8753_v43, %v8737_v4  ;;  %v8817_v50 = vrot.slane %v17741_v36, %v18474_v23  ;;  %v8833_v18 = vrot.slane %v17743_v2, %v18474_v23  ;;  %v8849_v56 = vrot.slane %v17745_v3, %v18474_v23 }
0x1254   :  { %v8866_v19 = vsel %vm18476_vm14, %v8769_v48, %v8865_v47  ;;  %v8781_v38 = vrot.slane %v17728_v8, %v15107_v60  ;;  %v8797_v9 = vrot.slane %v17739_v61, %v15107_v60  ;;  %v8858_v49 = vsel %vm4556_vm2, %v8749_v10, %v8733_v62  ;;  %v14076_v62 = vld [vmem:[%s18394_s24 + $0xe0] sm:$0xff]  }
0x1255   :  { %v8867_v63 = vsel %vm4560_vm4, %v8785_v12, %v8866_v19  ;;  %v8859_v37 = vsel %vm18477_vm13, %v8765_v26, %v8858_v49  ;;  %v8745_v42 = vrot.slane %v17722_v15, %v17761_v27  ;;  %v8761_v14 = vrot.slane %v17724_v57, %v17761_v27  ;;  %v14075_v12 = vld [vmem:[%s18394_s24 + $0x118] sm:$0xff]   ;;  %v14079_v19 = vld [vmem:[%s18394_s24 + $0x120] sm:$0xff]   ;;  %12589 = vmatprep.subr.bf16.mxu1 %v14076_v62  ;;  %v14082_v49 = vld [vmem:[%s18394_s24 + $0x168] sm:$0xff]  }
0x1256   :  { %v8868_v33 = vsel %vm104_vm7, %v8801_v30, %v8867_v63  ;;  %v8813_v7 = vrot.slane %v17741_v36, %v15107_v60  ;;  %v8860_v24 = vsel %vm4560_vm4, %v8781_v38, %v8859_v37  ;;  %v8777_v1 = vrot.slane %v17726_v13, %v17761_v27  ;;  %12522 = vmatpush3.bf16.msra.mxu0 %v14075_v12  ;;  %v14081_v37 = vld [vmem:[%s18394_s24 + $0xa8] sm:$0xff]  }
0x1257   :  { %v8869_v34 = vsel %vm4564_vm5, %v8817_v50, %v8868_v33  ;;  %v8829_v52 = vrot.slane %v17743_v2, %v15107_v60  ;;  %v8861_v44 = vsel %vm104_vm7, %v8797_v9, %v8860_v24  ;;  %v8845_v46 = vrot.slane %v17745_v3, %v15107_v60  ;;  %v14080_v9 = vld [vmem:[%s18394_s24 + $0xe8] sm:$0xff]   ;;  %v14085_v24 = vld [vmem:[%s18394_s24 + $0xb0] sm:$0xff]  }
0x1258   :  { %v8870_v22 = vsel %vm4566_vm9, %v8833_v18, %v8869_v34  ;;  %v8862_v35 = vsel %vm4564_vm5, %v8813_v7, %v8861_v44  ;;  %v8793_v21 = vrot.slane %v17728_v8, %v17761_v27  ;;  %v8879_v54 = vsel %vm4556_vm2, %v8761_v14, %v8745_v42  ;;  %v14077_v18 = vld [vmem:[%s18394_s24 + $0xa0] sm:$0xff]   ;;  %v14084_v14 = vld [vmem:[%s18394_s24 + $0xf0] sm:$0xff]   ;;  %v14083_v34 = vld [vmem:[%s18394_s24 + $0x128] sm:$0xff]  }
0x1259   :  { %v8871_v45 = vsel %vm4568_vm0, %v8849_v56, %v8870_v22  ;;  %v8863_v41 = vsel %vm4566_vm9, %v8829_v52, %v8862_v35  ;;  %v8741_v51 = vrot.slane %v17722_v15, %v17764_v16  ;;  %v8757_v28 = vrot.slane %v17724_v57, %v17764_v16  ;;  %v14078_v56 = vld [vmem:[%s18394_s24 + $0x160] sm:$0xff]   ;;  %12590 = vmatpush3.bf16.msra.mxu1 %v14077_v18  ;;  %v14086_v7 = vld [vmem:[%s18394_s24 + $0x170] sm:$0xff]   ;;  %v14090_v52 = vld [vmem:[%s18394_s24 + $0x178] sm:$0xff]  }
0x125a   :  { %8892 = vrot.lane.b32.xlu1 %v8871_v45, %s14228_s19  ;;  %v8864_v6 = vsel %vm4568_vm0, %v8845_v46, %v8863_v41  ;;  %v8809_v55 = vrot.slane %v17739_v61, %v17761_v27  ;;  %v8880_v5 = vsel %vm18478_vm10, %v8777_v1, %v8879_v54  ;;  %v8773_v29 = vrot.slane %v17726_v13, %v17764_v16  ;;  %v14088_v1 = vld [vmem:[%s18394_s24 + $0xf8] sm:$0xff]   ;;  %v14087_v22 = vld [vmem:[%s18394_s24 + $0x130] sm:$0xff]   ;;  %v14092_v46 = vld [vmem:[%s18394_s24 + $0x2c0] sm:$0xff]  }
0x125b   :  { %8890 = vrot.lane.b32.xlu0 %v8864_v6, %s14228_s19  ;;  %v8825_v39 = vrot.slane %v17741_v36, %v17761_v27  ;;  %v8881_v25 = vsel %vm4560_vm4, %v8793_v21, %v8880_v5  ;;  %v8841_v53 = vrot.slane %v17743_v2, %v17761_v27  ;;  %v8789_v59 = vrot.slane %v17728_v8, %v17764_v16  ;;  %v14089_v44 = vld [vmem:[%s18394_s24 + $0xb8] sm:$0xff]   ;;  %v14094_v35 = vld [vmem:[%s18394_s24 + $0x1c0] sm:$0xff]  }
0x125c   :  { %v8882_v0 = vsel %vm104_vm7, %v8809_v55, %v8881_v25  ;;  %v8872_v58 = vsel %vm4556_vm2, %v8757_v28, %v8741_v51  ;;  %v8857_v11 = vrot.slane %v17745_v3, %v17761_v27  ;;  %v8805_v43 = vrot.slane %v17739_v61, %v17764_v16  ;;  %12523 = vmatprep.subr.bf16.mxu0 %v14078_v56  ;;  %v14091_v45 = vld [vmem:[%s18394_s24 + $0x138] sm:$0xff]  }
0x125d   :  { %v8883_v4 = vsel %vm4564_vm5, %v8825_v39, %v8882_v0  ;;  %v8873_v48 = vsel %vm18479_vm12, %v8773_v29, %v8872_v58  ;;  %v8821_v31 = vrot.slane %v17741_v36, %v17764_v16  ;;  %v8837_v26 = vrot.slane %v17743_v2, %v17764_v16  ;;  %12591 = vmatprep.subr.bf16.mxu1 %v14080_v9  ;;  %v18480_v51 = vld [vmem:[#allocation11_spill] sm:$0xff] }
0x125e   :  { %v8884_v30 = vsel %vm4566_vm9, %v8841_v53, %v8883_v4  ;;  %v8874_v47 = vsel %vm4560_vm4, %v8789_v59, %v8873_v48  ;;  %v8853_v63 = vrot.slane %v17745_v3, %v17764_v16  ;;  %12524 = vmatpush3.bf16.msra.mxu0 %v14079_v19  ;;  %12592 = vmatpush3.bf16.msra.mxu1 %v14081_v37  ;;  %vm8898_vm4 = vcmp.lt.s32.totalorder %v18480_v51, 64 }
0x125f   :  { %v8885_v10 = vsel %vm4568_vm0, %v8857_v11, %v8884_v30  ;;  %v8875_v50 = vsel %vm104_vm7, %v8805_v43, %v8874_v47  ;;  %12525 = vmatprep.subr.bf16.mxu0 %v14082_v49  ;;  %12593 = vmatprep.subr.bf16.mxu1 %v14084_v14 }
0x1260   :  { %8896 = vrot.lane.b32.xlu1 %v8885_v10, %s14228_s19  ;;  %v8876_v38 = vsel %vm4564_vm5, %v8821_v31, %v8875_v50 }
0x1261   :  { %v8877_v33 = vsel %vm4566_vm9, %v8837_v26, %v8876_v38 }
0x1262   :  { %v8878_v42 = vsel %vm4568_vm0, %v8853_v63, %v8877_v33  ;;  %12526 = vmatpush3.bf16.msra.mxu0 %v14083_v34  ;;  %12594 = vmatpush3.bf16.msra.mxu1 %v14085_v24 }
0x1263   :  { %8894 = vrot.lane.b32.xlu0 %v8878_v42, %s14228_s19  ;;  %12527 = vmatprep.subr.bf16.mxu0 %v14086_v7 }
0x1264   :  { %12595 = vmatprep.subr.bf16.mxu1 %v14088_v1 }
0x1266   :  { %12528 = vmatpush3.bf16.msra.mxu0 %v14087_v22  ;;  %12596 = vmatpush3.bf16.msra.mxu1 %v14089_v44 }
0x1267   :  { %12529 = vmatprep.subr.bf16.mxu0 %v14090_v52  ;;  %12625 = vmatprep.subr.bf16.mxu1 %v14092_v46 }
0x126a   :  { %12530 = vmatpush3.bf16.msra.mxu0 %v14091_v45 }
0x126b   :  { %12537 = vmatprep.subr.bf16.mxu0 %v14094_v35 }
0x12cc   :  { %v8893_v21 = vpop.permute.xlu1 %8892 }
0x12cd   :  { %v8891_v41 = vpop.permute.xlu0 %8890 }
0x12ce   :  { %v8901_v55 = vsel %vm8898_vm4, %v8891_v41, %v8893_v21 }
0x12d2   :  { %v8897_v54 = vpop.permute.xlu1 %8896 }
0x12d3   :  { %v8902_v28 = vsel %vm8898_vm4, %v8897_v54, %v8891_v41 }
0x12d5   :  { %v8895_v6 = vpop.permute.xlu0 %8894 }
0x12d6   :  { %v8899_v5 = vsel %vm8898_vm4, %v8895_v6, %v8897_v54  ;;  %v8900_v29 = vsel %vm8898_vm4, %v8893_v21, %v8895_v6 }
0x12d7   :  { %v8907_v20 = vcombine.low %v8901_v55, %v8900_v29  ;;  %v8908_v39 = vcombine.high %v8901_v55, %v8900_v29  ;;  %v8909_v25 = vcombine.low %v8899_v5, %v8902_v28  ;;  %v8910_v40 = vcombine.high %v8899_v5, %v8902_v28 }
0x12d9   :  { %v8917_v53 = vrot.slane %v8907_v20, %v18473_v32  ;;  %v8924_v0 = vrot.slane %v8908_v39, %v18473_v32  ;;  %v8931_v59 = vrot.slane %v8909_v25, %v18473_v32  ;;  %v8938_v58 = vrot.slane %v8910_v40, %v18473_v32  ;;  %v14093_v20 = vld [vmem:[%s18394_s24 + $0x280] sm:$0xff]  }
0x12db   :  { %v8939_v17 = vcombine.low %v8917_v53, %v8931_v59  ;;  %v17923_v11 = vcombine.high %v8917_v53, %v8931_v59  ;;  %v8941_v4 = vcombine.low %v8924_v0, %v8938_v58  ;;  %v17925_v43 = vcombine.high %v8924_v0, %v8938_v58  ;;  %v14096_v0 = vld [vmem:[%s18394_s24 + $0x2c8] sm:$0xff]  }
0x12dd   :  { %v8943_v48 = vrot.slane %v8939_v17, 1  ;;  %v8945_v12 = vrot.slane %v8941_v4, 1  ;;  %v17928_v30 = vmax.f32 %v17722_v15, %v8939_v17  ;;  %v17932_v31 = vmax.f32 %v17726_v13, %v17923_v11 }
0x12de   :  { %v17935_v47 = vmax.f32 %v17739_v61, %v8941_v4  ;;  %v17939_v32 = vmax.f32 %v17743_v2, %v17925_v43  ;;  %v8946_v4 = vrot.slane %v17925_v43, 1  ;;  %v14100_v43 = vld [vmem:[%s18394_s24 + $0x2d0] sm:$0xff]  }
0x12df   :  { %v17942_v62 = vmax.f32 %v17724_v57, %v8943_v48  ;;  %v17945_v10 = vmax.f32 %v17741_v36, %v8945_v12  ;;  %v8986_v15 = vrot.slane %v17928_v30, %v17761_v27  ;;  %v8982_v61 = vrot.slane %v17928_v30, %v17764_v16 }
0x12e0   :  { %v9050_v13 = vrot.slane %v17935_v47, %v17761_v27  ;;  %v9046_v26 = vrot.slane %v17935_v47, %v17764_v16  ;;  %v9018_v36 = vrot.slane %v17932_v31, %v17761_v27  ;;  %v9082_v50 = vrot.slane %v17939_v32, %v17761_v27 }
0x12e1   :  { %v8994_v2 = vrot.slane %v17942_v62, %v18474_v23  ;;  %v9058_v57 = vrot.slane %v17945_v10, %v18474_v23  ;;  %v9134_v18 = vpack.c.bf16 %v8986_v15, %v8986_v15  ;;  %v9133_v19 = vpack.c.bf16 %v8982_v61, %v8982_v61 }
0x12e2   :  { %v9150_v56 = vpack.c.bf16 %v9050_v13, %v9050_v13  ;;  %v9149_v63 = vpack.c.bf16 %v9046_v26, %v9046_v26  ;;  %v9142_v49 = vpack.c.bf16 %v9018_v36, %v9018_v36  ;;  %v9158_v33 = vpack.c.bf16 %v9082_v50, %v9082_v50  ;;  %v14097_v13 = vld [vmem:[%s18394_s24 + $0x288] sm:$0xff]   ;;  %v14095_v26 = vld [vmem:[%s18394_s24 + $0x180] sm:$0xff]  }
0x12e3   :  { %v9136_v38 = vpack.c.bf16 %v8994_v2, %v8994_v2  ;;  %v9152_v9 = vpack.c.bf16 %v9058_v57, %v9058_v57  ;;  %v9607_v37 = vunpack.c.l.b16 %v9134_v18  ;;  %v9606_v14 = vunpack.c.l.b16 %v9133_v19  ;;  %v14098_v50 = vld [vmem:[%s18394_s24 + $0x1c8] sm:$0xff]  }
0x12e4   :  { %v9611_v42 = vunpack.c.l.b16 %v9150_v56  ;;  %v9610_v34 = vunpack.c.l.b16 %v9149_v63  ;;  %v9976_v1 = vunpack.c.l.b16 %v9142_v49  ;;  %v9980_v22 = vunpack.c.l.b16 %v9158_v33  ;;  %v14101_v63 = vld [vmem:[%s18394_s24 + $0x290] sm:$0xff]  }
0x12e5   :  { %v9301_v7 = vunpack.c.l.b16 %v9136_v38  ;;  %v9305_v24 = vunpack.c.l.b16 %v9152_v9  ;;  %v8990_v45 = vrot.slane %v17942_v62, %v15107_v60  ;;  %v9054_v46 = vrot.slane %v17945_v10, %v15107_v60  ;;  %v14099_v9 = vld [vmem:[%s18394_s24 + $0x188] sm:$0xff]   ;;  %v14102_v49 = vld [vmem:[%s18394_s24 + $0x1d0] sm:$0xff]  }
0x12e6   :  { %v9618_v52 = vrot.slane %v9611_v42, 7  ;;  %v9616_v44 = vrot.slane %v9610_v34, 7  ;;  %v9987_v21 = vrot.slane %v9980_v22, 7  ;;  %v9002_v41 = vrot.slane %v17942_v62, %v17761_v27  ;;  %v14105_v42 = vld [vmem:[%s18394_s24 + $0x298] sm:$0xff]  }
0x12e7   :  { %v9310_v35 = vrot.slane %v9305_v24, 7  ;;  %v9066_v54 = vrot.slane %v17945_v10, %v17761_v27  ;;  %v9135_v6 = vpack.c.bf16 %v8990_v45, %v8990_v45  ;;  %v9151_v55 = vpack.c.bf16 %v9054_v46, %v9054_v46 }
0x12e8   :  { %v9619_v51 = vsel %vm4556_vm2, %v9618_v52, %v9607_v37  ;;  %v9617_v28 = vsel %vm4556_vm2, %v9616_v44, %v9606_v14  ;;  %v9988_v25 = vsel %vm4556_vm2, %v9987_v21, %v9976_v1  ;;  %v9138_v58 = vpack.c.bf16 %v9002_v41, %v9002_v41  ;;  %v14103_v14 = vld [vmem:[%s18394_s24 + $0x190] sm:$0xff]   ;;  %v14106_v1 = vld [vmem:[%s18394_s24 + $0x1d8] sm:$0xff]  }
0x12e9   :  { %v9623_v5 = vpack.c.b16 %v9619_v51, %v9619_v51  ;;  %v9622_v29 = vpack.c.b16 %v9617_v28, %v9617_v28  ;;  %v9311_v39 = vsel %vm4556_vm2, %v9310_v35, %v9301_v7  ;;  %v9304_v53 = vunpack.c.l.b16 %v9151_v55  ;;  %v14109_v35 = vld [vmem:[%s18394_s24 + $0x2a0] sm:$0xff]   ;;  %v14107_v51 = vld [vmem:[%s18394_s24 + $0x198] sm:$0xff]   ;;  %v14112_v28 = vld [vmem:[%s18394_s24 + $0x2e8] sm:$0xff]  }
0x12ea   :  { %v9317_v40 = vpack.c.b16 %v9311_v39, %v9311_v39  ;;  %v9992_v59 = vpack.c.b16 %v9988_v25, %v9988_v25  ;;  %v9154_v17 = vpack.c.bf16 %v9066_v54, %v9066_v54  ;;  %v9300_v48 = vunpack.c.l.b16 %v9135_v6 }
0x12eb   :  { %9892 = vmatprep.mubr.bf16.mxu1 %v9623_v5  ;;  %v9308_v12 = vrot.slane %v9304_v53, 7  ;;  %v9303_v57 = vunpack.c.l.b16 %v9138_v58  ;;  %v8944_v18 = vrot.slane %v17923_v11, 1  ;;  %v17997_v56 = vmax.f32 %v17745_v3, %v8946_v4  ;;  %v14104_v3 = vld [vmem:[%s18394_s24 + $0x2d8] sm:$0xff]   ;;  %v14110_v5 = vld [vmem:[%s18394_s24 + $0x1e0] sm:$0xff]  }
0x12ec   :  { %9893 = vmatmul.mubr.bf16.vlgmr.msra.gmra.mrb[68].mxu1 %v9622_v29  ;;  %9548 = vmatprep.mubr.bf16.mxu0 %v9317_v40  ;;  %v9307_v15 = vunpack.c.l.b16 %v9154_v17  ;;  %v9078_v11 = vrot.slane %v17939_v32, %v17764_v16  ;;  %v18030_v34 = vrot.slane %v17932_v31, %v17764_v16  ;;  %v8974_v24 = vrot.slane %v17928_v30, %v15107_v60 }
0x12ed   :  { %12626 = vmatpush3.bf16.msra.mxu1 %v14093_v20  ;;  %10261 = vmatprep.mubr.bf16.mxu1 %v9992_v59  ;;  %v9309_v61 = vsel %vm4556_vm2, %v9308_v12, %v9300_v48  ;;  %v18015_v33 = vmax.f32 %v17728_v8, %v8944_v18  ;;  %v9098_v37 = vrot.slane %v17997_v56, %v17761_v27  ;;  %v14108_v8 = vld [vmem:[%s18394_s24 + $0x2e0] sm:$0xff]   ;;  %v14116_v12 = vld [vmem:[%s18394_s24 + $0x2f0] sm:$0xff]  }
0x12ee   :  { %12627 = vmatprep.subr.bf16.mxu1 %v14096_v0  ;;  %v9316_v2 = vpack.c.b16 %v9309_v61, %v9309_v61  ;;  %v9314_v36 = vrot.slane %v9307_v15, 7  ;;  %v9157_v7 = vpack.c.bf16 %v9078_v11, %v9078_v11  ;;  %v9038_v22 = vrot.slane %v17935_v47, %v15107_v60  ;;  %v14111_v48 = vld [vmem:[%s18394_s24 + $0x1a0] sm:$0xff]  }
0x12ef   :  { %v18041_v52 = vrot.slane %v18015_v33, %v17761_v27  ;;  %v9162_v44 = vpack.c.bf16 %v9098_v37, %v9098_v37  ;;  %v9010_v45 = vrot.slane %v17932_v31, %v18474_v23  ;;  %v9074_v46 = vrot.slane %v17939_v32, %v18474_v23  ;;  %v14120_v37 = vld [vmem:[%s18394_s24 + $0x2f8] sm:$0xff]  }
0x12f0   :  { %9549 = vmatmul.mubr.bf16.vlgmr.msra.gmra.mrb[84].mxu0 %v9316_v2  ;;  %v9315_v19 = vsel %vm4556_vm2, %v9314_v36, %v9303_v57  ;;  %v9131_v21 = vpack.c.bf16 %v8974_v24, %v8974_v24  ;;  %v9147_v41 = vpack.c.bf16 %v9038_v22, %v9038_v22  ;;  %v9006_v54 = vrot.slane %v17932_v31, %v15107_v60 }
0x12f1   :  { %12628 = vmatpush3.bf16.msra.mxu1 %v14097_v13  ;;  %12538 = vmatpush3.bf16.msra.mxu0 %v14095_v26  ;;  %v9319_v38 = vpack.c.b16 %v9315_v19, %v9315_v19  ;;  %v9070_v27 = vrot.slane %v17939_v32, %v15107_v60  ;;  %v9141_v6 = vpack.c.bf16 %v18030_v34, %v18030_v34  ;;  %v18062_v55 = vunpack.c.l.b16 %v9157_v7  ;;  %v14118_v7 = vld [vmem:[%s18394_s24 + $0x1f0] sm:$0xff]  }
0x12f2   :  { %12629 = vmatprep.subr.bf16.mxu1 %v14100_v43  ;;  %12539 = vmatprep.subr.bf16.mxu0 %v14098_v50  ;;  %v18066_v31 = vrot.slane %v17942_v62, %v17764_v16  ;;  %v9062_v32 = vrot.slane %v17945_v10, %v17764_v16  ;;  %v9608_v29 = vunpack.c.l.b16 %v9147_v41  ;;  %v9140_v20 = vpack.c.bf16 %v9010_v45, %v9010_v45  ;;  %v14113_v10 = vld [vmem:[%s18394_s24 + $0x2a8] sm:$0xff]  }
0x12f3   :  { %9588 = vmatprep.mubr.bf16.mxu0 %v9319_v38  ;;  %v9156_v39 = vpack.c.bf16 %v9074_v46, %v9074_v46  ;;  %v9155_v25 = vpack.c.bf16 %v9070_v27, %v9070_v27  ;;  %v18073_v40 = vunpack.c.l.b16 %v9162_v44  ;;  %v9139_v53 = vpack.c.bf16 %v9006_v54, %v9006_v54  ;;  %v14117_v38 = vld [vmem:[%s18394_s24 + $0x2b0] sm:$0xff]   ;;  %v14121_v46 = vld [vmem:[%s18394_s24 + $0x2b8] sm:$0xff]  }
0x12f4   :  { %v9026_v0 = vrot.slane %v18015_v33, %v18474_v23  ;;  %v9090_v62 = vrot.slane %v17997_v56, %v18474_v23  ;;  %v9042_v59 = vrot.slane %v17935_v47, %v18474_v23  ;;  %v9604_v58 = vunpack.c.l.b16 %v9131_v21  ;;  %v14114_v47 = vld [vmem:[%s18394_s24 + $0x1e8] sm:$0xff]  }
0x12f5   :  { %12630 = vmatpush3.bf16.msra.mxu1 %v14101_v63  ;;  %12540 = vmatpush3.bf16.msra.mxu0 %v14099_v9  ;;  %v9612_v17 = vrot.slane %v9608_v29, 7  ;;  %v9978_v4 = vunpack.c.l.b16 %v9156_v39  ;;  %v9977_v15 = vunpack.c.l.b16 %v9155_v25  ;;  %v9022_v26 = vrot.slane %v18015_v33, %v15107_v60  ;;  %v14123_v39 = vld [vmem:[%s18394_s24 + $0x1b8] sm:$0xff]  }
0x12f6   :  { %12631 = vmatprep.subr.bf16.mxu1 %v14104_v3  ;;  %12541 = vmatprep.subr.bf16.mxu0 %v14102_v49  ;;  %v9144_v13 = vpack.c.bf16 %v9026_v0, %v9026_v0  ;;  %v9160_v61 = vpack.c.bf16 %v9090_v62, %v9090_v62  ;;  %v9974_v2 = vunpack.c.l.b16 %v9140_v20  ;;  %v9086_v36 = vrot.slane %v17997_v56, %v15107_v60  ;;  %v14115_v60 = vld [vmem:[%s18394_s24 + $0x1a8] sm:$0xff]   ;;  %v14125_v20 = vld [vmem:[%s18394_s24 + $0x380] sm:$0xff]  }
0x12f7   :  { %v18096_v43 = vsel %vm4556_vm2, %v9612_v17, %v9604_v58  ;;  %v9983_v57 = vrot.slane %v9978_v4, 7  ;;  %v9153_v50 = vpack.c.bf16 %v9062_v32, %v9062_v32  ;;  %v9973_v18 = vunpack.c.l.b16 %v9139_v53  ;;  %v14128_v53 = vld [vmem:[%s18394_s24 + $0x3c8] sm:$0xff]   ;;  %v14126_v62 = vld [vmem:[%s18394_s24 + $0x40] sm:$0xff]  }
0x12f8   :  { %v9981_v19 = vrot.slane %v9977_v15, 7  ;;  %v10348_v63 = vunpack.c.l.b16 %v9160_v61  ;;  %v9148_v9 = vpack.c.bf16 %v9042_v59, %v9042_v59  ;;  %v9143_v11 = vpack.c.bf16 %v9022_v26, %v9022_v26  ;;  %v14129_v17 = vld [vmem:[%s18394_s24 + $0x388] sm:$0xff]   ;;  %v14127_v4 = vld [vmem:[%s18394_s24] sm:$0xff]   ;;  %v14132_v15 = vld [vmem:[%s18394_s24 + $0x3d0] sm:$0xff]  }
0x12f9   :  { %12632 = vmatpush3.bf16.msra.mxu1 %v14105_v42  ;;  %12542 = vmatpush3.bf16.msra.mxu0 %v14103_v14  ;;  %v18104_v3 = vsel %vm4556_vm2, %v9983_v57, %v9974_v2  ;;  %v9159_v49 = vpack.c.bf16 %v9086_v36, %v9086_v36  ;;  %v9146_v42 = vpack.c.bf16 %v18041_v52, %v18041_v52  ;;  %v9985_v24 = vrot.slane %v18062_v55, 7  ;;  %v14133_v61 = vld [vmem:[%s18394_s24 + $0x390] sm:$0xff]   ;;  %v14131_v26 = vld [vmem:[%s18394_s24 + $0x8] sm:$0xff]   ;;  %v14137_v57 = vld [vmem:[%s18394_s24 + $0x398] sm:$0xff]  }
0x12fa   :  { %12633 = vmatprep.subr.bf16.mxu1 %v14108_v8  ;;  %12543 = vmatprep.subr.bf16.mxu0 %v14106_v1  ;;  %v18115_v14 = vsel %vm4556_vm2, %v9981_v19, %v9973_v18  ;;  %v10344_v8 = vunpack.c.l.b16 %v9144_v13  ;;  %v10353_v34 = vrot.slane %v10348_v63, 7  ;;  %v8978_v1 = vrot.slane %v17928_v30, %v18474_v23  ;;  %v14119_v23 = vld [vmem:[%s18394_s24 + $0x1b0] sm:$0xff]   ;;  %v14124_v30 = vld [vmem:[%s18394_s24 + $0x3c0] sm:$0xff]   ;;  %v14138_v18 = vld [vmem:[%s18394_s24 + $0x58] sm:$0xff]  }
0x12fb   :  { %v10347_v22 = vunpack.c.l.b16 %v9159_v49  ;;  %v10357_v44 = vrot.slane %v18073_v40, 7  ;;  %v9306_v45 = vunpack.c.l.b16 %v9153_v50  ;;  %v9609_v21 = vunpack.c.l.b16 %v9148_v9  ;;  %v14134_v2 = vld [vmem:[%s18394_s24 + $0x50] sm:$0xff]   ;;  %v14140_v50 = vld [vmem:[%s18394_s24 + $0x3e0] sm:$0xff]   ;;  %v14144_v9 = vld [vmem:[%s18394_s24 + $0x3e8] sm:$0xff]  }
0x12fc   :  { %v18125_v52 = vsel %vm4556_vm2, %v10353_v34, %v10344_v8  ;;  %v10343_v41 = vunpack.c.l.b16 %v9143_v11  ;;  %v10346_v27 = vunpack.c.l.b16 %v9146_v42  ;;  %v9132_v55 = vpack.c.bf16 %v8978_v1, %v8978_v1  ;;  %v14135_v36 = vld [vmem:[%s18394_s24 + $0x10] sm:$0xff]   ;;  %v14141_v63 = vld [vmem:[%s18394_s24 + $0x3a0] sm:$0xff]   ;;  %v14145_v49 = vld [vmem:[%s18394_s24 + $0x3a8] sm:$0xff]  }
0x12fd   :  { %12634 = vmatpush3.bf16.msra.mxu1 %v14109_v35  ;;  %12544 = vmatpush3.bf16.msra.mxu0 %v14107_v51  ;;  %v9975_v35 = vunpack.c.l.b16 %v9141_v6  ;;  %v10351_v54 = vrot.slane %v10347_v22, 7  ;;  %v9137_v51 = vpack.c.bf16 %v18066_v31, %v18066_v31  ;;  %v9312_v29 = vrot.slane %v9306_v45, 7  ;;  %v14148_v42 = vld [vmem:[%s18394_s24 + $0x3f0] sm:$0xff]   ;;  %v14146_v8 = vld [vmem:[%s18394_s24 + $0x68] sm:$0xff]  }
0x12fe   :  { %12635 = vmatprep.subr.bf16.mxu1 %v14112_v28  ;;  %12545 = vmatprep.subr.bf16.mxu0 %v14110_v5  ;;  %v14122_v28 = vld [vmem:[%s18394_s24 + $0x1f8] sm:$0xff]   ;;  %v10358_v5 = vsel %vm4556_vm2, %v10357_v44, %v10346_v27  ;;  %v9614_v31 = vrot.slane %v9609_v21, 7  ;;  %v9094_v19 = vrot.slane %v17997_v56, %v17764_v16  ;;  %v14142_v56 = vld [vmem:[%s18394_s24 + $0x60] sm:$0xff]   ;;  %v14150_v1 = vld [vmem:[%s18394_s24 + $0x70] sm:$0xff]   ;;  %v9620_v27 = vpack.c.b16 %v18096_v43, %v18096_v43 }
0x12ff   :  { %v9986_v6 = vsel %vm4556_vm2, %v9985_v24, %v9975_v35  ;;  %v18143_v32 = vsel %vm4556_vm2, %v10351_v54, %v10343_v41  ;;  %v9302_v40 = vunpack.c.l.b16 %v9137_v51  ;;  %v10362_v0 = vpack.c.b16 %v10358_v5, %v10358_v5  ;;  %v14152_v24 = vld [vmem:[%s18394_s24 + $0x3f8] sm:$0xff]   ;;  %v14158_v51 = vld [vmem:[%s18394_s24 + $0x248] sm:$0xff]   ;;  %v14160_v43 = vld [vmem:[%s18394_s24 + $0x250] sm:$0xff]  }
0x1300   :  { %v9991_v25 = vpack.c.b16 %v9986_v6, %v9986_v6  ;;  %v9161_v11 = vpack.c.bf16 %v9094_v19, %v9094_v19  ;;  %v14153_v44 = vld [vmem:[%s18394_s24 + $0x3b8] sm:$0xff]   ;;  %v14159_v6 = vld [vmem:[%s18394_s24 + $0x208] sm:$0xff]  }
0x1301   :  { %12636 = vmatpush3.bf16.msra.mxu1 %v14113_v10  ;;  %12546 = vmatpush3.bf16.msra.mxu0 %v14111_v48  ;;  %v9605_v10 = vunpack.c.l.b16 %v9132_v55  ;;  %v9313_v59 = vsel %vm4556_vm2, %v9312_v29, %v9302_v40  ;;  %v14154_v35 = vld [vmem:[%s18394_s24 + $0x78] sm:$0xff]   ;;  %v14161_v55 = vld [vmem:[%s18394_s24 + $0x210] sm:$0xff]   ;;  %v14164_v29 = vld [vmem:[%s18394_s24 + $0x260] sm:$0xff]  }
0x1302   :  { %12637 = vmatprep.subr.bf16.mxu1 %v14116_v12  ;;  %12547 = vmatprep.subr.bf16.mxu0 %v14114_v47  ;;  %v9318_v48 = vpack.c.b16 %v9313_v59, %v9313_v59  ;;  %v14130_v12 = vld [vmem:[%s18394_s24 + $0x48] sm:$0xff]   ;;  %v14136_v47 = vld [vmem:[%s18394_s24 + $0x3d8] sm:$0xff]   ;;  %v10349_v34 = vunpack.c.l.b16 %v9161_v11  ;;  %v14169_v40 = vld [vmem:[%s18394_s24 + $0x230] sm:$0xff]   ;;  %v9989_v59 = vpack.c.b16 %v18115_v14, %v18115_v14 }
0x1303   :  { %v9615_v58 = vsel %vm4556_vm2, %v9614_v31, %v9605_v10  ;;  %v14155_v41 = vld [vmem:[%s18394_s24 + $0x38] sm:$0xff]   ;;  %v14166_v31 = vld [vmem:[%s18394_s24 + $0x268] sm:$0xff]   ;;  %v14173_v10 = vld [vmem:[%s18394_s24 + $0x300] sm:$0xff]  }
0x1304   :  { %v9621_v13 = vpack.c.b16 %v9615_v58, %v9615_v58  ;;  %v10355_v22 = vrot.slane %v10349_v34, 7  ;;  %v14163_v5 = vld [vmem:[%s18394_s24 + $0x218] sm:$0xff]   ;;  %v14174_v58 = vld [vmem:[%s18394_s24 + $0x348] sm:$0xff]   ;;  %v14176_v14 = vld [vmem:[%s18394_s24 + $0x350] sm:$0xff]  }
0x1305   :  { %12638 = vmatpush3.bf16.msra.mxu1 %v14117_v38  ;;  %12548 = vmatpush3.bf16.msra.mxu0 %v14115_v60  ;;  %v14139_v38 = vld [vmem:[%s18394_s24 + $0x18] sm:$0xff]   ;;  %v9030_v60 = vrot.slane %v18015_v33, %v17764_v16  ;;  %v14149_v16 = vld [vmem:[%s18394_s24 + $0x3b0] sm:$0xff]  }
0x1306   :  { %12639 = vmatprep.subr.bf16.mxu1 %v14120_v37  ;;  %12549 = vmatprep.subr.bf16.mxu0 %v14118_v7  ;;  %v14143_v37 = vld [vmem:[%s18394_s24 + $0x20] sm:$0xff]   ;;  %v14147_v7 = vld [vmem:[%s18394_s24 + $0x28] sm:$0xff]  }
0x1307   :  { %v9145_v33 = vpack.c.bf16 %v9030_v60, %v9030_v60 }
0x1309   :  { %12640 = vmatpush3.bf16.msra.mxu1 %v14121_v46  ;;  %12550 = vmatpush3.bf16.msra.mxu0 %v14119_v23  ;;  %v10345_v45 = vunpack.c.l.b16 %v9145_v33  ;;  %v14151_v46 = vld [vmem:[%s18394_s24 + $0x30] sm:$0xff]   ;;  %v14156_v23 = vld [vmem:[%s18394_s24 + $0x240] sm:$0xff]  }
0x130a   :  { %12669 = vmatprep.subr.bf16.mxu1 %v14124_v30  ;;  %12551 = vmatprep.subr.bf16.mxu0 %v14122_v28  ;;  %v14157_v30 = vld [vmem:[%s18394_s24 + $0x200] sm:$0xff]   ;;  %v9990_v28 = vpack.c.b16 %v18104_v3, %v18104_v3  ;;  %v14162_v3 = vld [vmem:[%s18394_s24 + $0x258] sm:$0xff]  }
0x130b   :  { %v10356_v21 = vsel %vm4556_vm2, %v10355_v22, %v10345_v45  ;;  %vm10648_vm2 = vcmask 74752  }
0x130c   :  { %10262 = vmatmul.mubr.bf16.vlgmr.msra.gmra.mrb[72].mxu1 %v9991_v25  ;;  %v10361_v54 = vpack.c.b16 %v10356_v21, %v10356_v21  ;;  %v14168_v25 = vld [vmem:[%s18394_s24 + $0x270] sm:$0xff]  }
0x130d   :  { %12670 = vmatpush3.bf16.msra.mxu1 %v14125_v20  ;;  %10631 = vmatprep.mubr.bf16.mxu1 %v10362_v0  ;;  %v14165_v20 = vld [vmem:[%s18394_s24 + $0x220] sm:$0xff]   ;;  %v14171_v0 = vld [vmem:[%s18394_s24 + $0x238] sm:$0xff]  }
0x130e   :  { %12552 = vmatpush3.bf16.msra.mxu0 %v14123_v39  ;;  %12671 = vmatprep.subr.bf16.mxu1 %v14128_v53  ;;  %v14167_v39 = vld [vmem:[%s18394_s24 + $0x228] sm:$0xff]   ;;  %v14170_v53 = vld [vmem:[%s18394_s24 + $0x278] sm:$0xff]  }
0x130f   :  { %12559 = vmatprep.subr.bf16.mxu0 %v14126_v62  ;;  %v14172_v62 = vld [vmem:[%s18394_s24 + $0x340] sm:$0xff]  }
0x1311   :  { %9589 = vmatmul.mubr.bf16.vlgmr.msra.gmra.mrb[88].mxu0 %v9318_v48  ;;  %12672 = vmatpush3.bf16.msra.mxu1 %v14129_v17  ;;  %v10360_v17 = vpack.c.b16 %v18125_v52, %v18125_v52  ;;  %v14177_v48 = vld [vmem:[%s18394_s24 + $0x310] sm:$0xff]   ;;  %v14178_v52 = vld [vmem:[%s18394_s24 + $0x358] sm:$0xff]  }
0x1312   :  { %12560 = vmatpush3.bf16.msra.mxu0 %v14127_v4  ;;  %9852 = vmatprep.mubr.bf16.mxu0 %v9621_v13  ;;  %v14175_v4 = vld [vmem:[%s18394_s24 + $0x308] sm:$0xff]   ;;  %v14181_v13 = vld [vmem:[%s18394_s24 + $0x320] sm:$0xff]  }
0x1313   :  { %12561 = vmatprep.subr.bf16.mxu0 %v14130_v12  ;;  %12673 = vmatprep.subr.bf16.mxu1 %v14132_v15  ;;  %v14179_v12 = vld [vmem:[%s18394_s24 + $0x318] sm:$0xff]   ;;  %v14180_v15 = vld [vmem:[%s18394_s24 + $0x360] sm:$0xff]  }
0x1315   :  { %12674 = vmatpush3.bf16.msra.mxu1 %v14133_v61  ;;  %v14182_v61 = vld [vmem:[%s18394_s24 + $0x368] sm:$0xff]  }
0x1316   :  { %12562 = vmatpush3.bf16.msra.mxu0 %v14131_v26  ;;  %12675 = vmatprep.subr.bf16.mxu1 %v14136_v47  ;;  %v14183_v26 = vld [vmem:[%s18394_s24 + $0x328] sm:$0xff]   ;;  %v14184_v47 = vld [vmem:[%s18394_s24 + $0x370] sm:$0xff]  }
0x1317   :  { %12563 = vmatprep.subr.bf16.mxu0 %v14134_v2  ;;  %v14185_v2 = vld [vmem:[%s18394_s24 + $0x330] sm:$0xff]  }
0x1319   :  { %12676 = vmatpush3.bf16.msra.mxu1 %v14137_v57  ;;  %v14186_v57 = vld [vmem:[%s18394_s24 + $0x378] sm:$0xff]  }
0x131a   :  { %12564 = vmatpush3.bf16.msra.mxu0 %v14135_v36  ;;  %12677 = vmatprep.subr.bf16.mxu1 %v14140_v50  ;;  %v14187_v36 = vld [vmem:[%s18394_s24 + $0x338] sm:$0xff]   ;;  %v10359_v50 = vpack.c.b16 %v18143_v32, %v18143_v32 }
0x131b   :  { %12565 = vmatprep.subr.bf16.mxu0 %v14138_v18 }
0x131d   :  { %12678 = vmatpush3.bf16.msra.mxu1 %v14141_v63 }
0x131e   :  { %12566 = vmatpush3.bf16.msra.mxu0 %v14139_v38  ;;  %12679 = vmatprep.subr.bf16.mxu1 %v14144_v9 }
0x131f   :  { %12567 = vmatprep.subr.bf16.mxu0 %v14142_v56 }
0x1321   :  { %12680 = vmatpush3.bf16.msra.mxu1 %v14145_v49 }
0x1322   :  { %12568 = vmatpush3.bf16.msra.mxu0 %v14143_v37  ;;  %12681 = vmatprep.subr.bf16.mxu1 %v14148_v42 }
0x1323   :  { %12569 = vmatprep.subr.bf16.mxu0 %v14146_v8 }
0x1325   :  { %12682 = vmatpush3.bf16.msra.mxu1 %v14149_v16 }
0x1326   :  { %12570 = vmatpush3.bf16.msra.mxu0 %v14147_v7  ;;  %12683 = vmatprep.subr.bf16.mxu1 %v14152_v24 }
0x1327   :  { %12571 = vmatprep.subr.bf16.mxu0 %v14150_v1 }
0x1329   :  { %12684 = vmatpush3.bf16.msra.mxu1 %v14153_v44 }
0x132a   :  { %12572 = vmatpush3.bf16.msra.mxu0 %v14151_v46 }
0x132b   :  { %12573 = vmatprep.subr.bf16.mxu0 %v14154_v35 }
0x132c   :  { %10632 = vmatmul.mubr.bf16.vlgmr.msra.gmra.mrb[76].mxu1 %v10361_v54 }
0x132e   :  { %12574 = vmatpush3.bf16.msra.mxu0 %v14155_v41 }
0x132f   :  { %12603 = vmatprep.subr.bf16.mxu0 %v14156_v23 }
0x1331   :  { %9853 = vmatmul.mubr.bf16.vlgmr.msra.gmra.mrb[92].mxu0 %v9620_v27 }
0x1332   :  { %12604 = vmatpush3.bf16.msra.mxu0 %v14157_v30  ;;  %10221 = vmatprep.mubr.bf16.mxu0 %v9990_v28 }
0x1333   :  { %12605 = vmatprep.subr.bf16.mxu0 %v14158_v51 }
0x1336   :  { %12606 = vmatpush3.bf16.msra.mxu0 %v14159_v6 }
0x1337   :  { %12607 = vmatprep.subr.bf16.mxu0 %v14160_v43 }
0x133a   :  { %12608 = vmatpush3.bf16.msra.mxu0 %v14161_v55 }
0x133b   :  { %12609 = vmatprep.subr.bf16.mxu0 %v14162_v3 }
0x133e   :  { %12610 = vmatpush3.bf16.msra.mxu0 %v14163_v5 }
0x133f   :  { %12611 = vmatprep.subr.bf16.mxu0 %v14164_v29 }
0x1342   :  { %12612 = vmatpush3.bf16.msra.mxu0 %v14165_v20 }
0x1343   :  { %12613 = vmatprep.subr.bf16.mxu0 %v14166_v31 }
0x1346   :  { %12614 = vmatpush3.bf16.msra.mxu0 %v14167_v39 }
0x1347   :  { %12615 = vmatprep.subr.bf16.mxu0 %v14168_v25 }
0x134a   :  { %12616 = vmatpush3.bf16.msra.mxu0 %v14169_v40 }
0x134b   :  { %12617 = vmatprep.subr.bf16.mxu0 %v14170_v53 }
0x134e   :  { %12618 = vmatpush3.bf16.msra.mxu0 %v14171_v0 }
0x134f   :  { %12647 = vmatprep.subr.bf16.mxu0 %v14172_v62 }
0x1351   :  { %10222 = vmatmul.mubr.bf16.vlgmr.msra.gmra.mrb[96].mxu0 %v9989_v59 }
0x1352   :  { %12648 = vmatpush3.bf16.msra.mxu0 %v14173_v10  ;;  %10591 = vmatprep.mubr.bf16.mxu0 %v10360_v17  ;;  %v11867_v10 = vld [vmem:[%s18395_s25] ss:$0 sm:$0xff] }
0x1353   :  { %12649 = vmatprep.subr.bf16.mxu0 %v14174_v58 }
0x1356   :  { %12650 = vmatpush3.bf16.msra.mxu0 %v14175_v4 }
0x1357   :  { %12651 = vmatprep.subr.bf16.mxu0 %v14176_v14 }
0x135a   :  { %12652 = vmatpush3.bf16.msra.mxu0 %v14177_v48 }
0x135b   :  { %12653 = vmatprep.subr.bf16.mxu0 %v14178_v52 }
0x135e   :  { %12654 = vmatpush3.bf16.msra.mxu0 %v14179_v12 }
0x135f   :  { %12655 = vmatprep.subr.bf16.mxu0 %v14180_v15 }
0x1362   :  { %12656 = vmatpush3.bf16.msra.mxu0 %v14181_v13 }
0x1363   :  { %12657 = vmatprep.subr.bf16.mxu0 %v14182_v61 }
0x1366   :  { %12658 = vmatpush3.bf16.msra.mxu0 %v14183_v26 }
0x1367   :  { %12659 = vmatprep.subr.bf16.mxu0 %v14184_v47 }
0x136a   :  { %12660 = vmatpush3.bf16.msra.mxu0 %v14185_v2 }
0x136b   :  { %12661 = vmatprep.subr.bf16.mxu0 %v14186_v57 }
0x136e   :  { %12662 = vmatpush3.bf16.msra.mxu0 %v14187_v36 }
0x1371   :  { %10592 = vmatmul.mubr.bf16.vlgmr.msra.gmra.mrb[100].mxu0 %v10359_v50 }
0x13bf   :  { %v12597_v18 = vpop.f32.mrb[68].mxu1 }
0x13c0   :  { %v12598_v19 = vpop.f32.mrb[69].mxu1 }
0x13c1   :  { %v12599_v63 = vadd.f32 %v12598_v19, %v12597_v18  ;;  %v12600_v38 = vpop.f32.mrb[70].mxu1 }
0x13c2   :  { %v12601_v9 = vpop.f32.mrb[71].mxu1 }
0x13c3   :  { %v12531_v56 = vpop.f32.mrb[84].mxu0 }
0x13c4   :  { %v12532_v11 = vpop.f32.mrb[85].mxu0 }
0x13c5   :  { %v12533_v49 = vadd.f32 %v12532_v11, %v12531_v56  ;;  %v12534_v60 = vpop.f32.mrb[86].mxu0 }
0x13c6   :  { %v12535_v37 = vpop.f32.mrb[87].mxu0 }
0x13df   :  { %v12641_v42 = vpop.f32.mrb[72].mxu1 }
0x13e0   :  { %v12642_v8 = vpop.f32.mrb[73].mxu1 }
0x13e1   :  { %v12643_v34 = vadd.f32 %v12642_v8, %v12641_v42  ;;  %v12644_v16 = vpop.f32.mrb[74].mxu1 }
0x13e2   :  { %v12645_v33 = vpop.f32.mrb[75].mxu1 }
0x13e4   :  { %v12553_v7 = vpop.f32.mrb[88].mxu0 }
0x13e5   :  { %v12554_v24 = vpop.f32.mrb[89].mxu0 }
0x13e6   :  { %v12555_v1 = vadd.f32 %v12554_v24, %v12553_v7  ;;  %v12556_v32 = vpop.f32.mrb[90].mxu0 }
0x13e7   :  { %v12557_v22 = vpop.f32.mrb[91].mxu0 }
0x13e8   :  { %v9591_v44 = vadd.f32 %v12555_v1, %v12533_v49 }
0x13ff   :  { %v12685_v45 = vpop.f32.mrb[76].mxu1 }
0x1400   :  { %v12686_v46 = vpop.f32.mrb[77].mxu1 }
0x1401   :  { %v12687_v35 = vadd.f32 %v12686_v46, %v12685_v45  ;;  %v12688_v21 = vpop.f32.mrb[78].mxu1 }
0x1402   :  { %v12689_v41 = vpop.f32.mrb[79].mxu1 }
0x1404   :  { %v12575_v54 = vpop.f32.mrb[92].mxu0 }
0x1405   :  { %v12576_v23 = vpop.f32.mrb[93].mxu0 }
0x1406   :  { %v12577_v30 = vadd.f32 %v12576_v23, %v12575_v54  ;;  %v12578_v27 = vpop.f32.mrb[94].mxu0 }
0x1407   :  { %v12579_v51 = vpop.f32.mrb[95].mxu0 }
0x1408   :  { %v9855_v28 = vadd.f32 %v12577_v30, %v9591_v44 }
0x140a   :  { %v9895_v6 = vadd.f32 %v12599_v63, %v9855_v28 }
0x1424   :  { %v12619_v43 = vpop.f32.mrb[96].mxu0 }
0x1425   :  { %v12620_v55 = vpop.f32.mrb[97].mxu0 }
0x1426   :  { %v12621_v3 = vadd.f32 %v12620_v55, %v12619_v43  ;;  %v12622_v5 = vpop.f32.mrb[98].mxu0 }
0x1427   :  { %v12623_v29 = vpop.f32.mrb[99].mxu0 }
0x1428   :  { %v10264_v20 = vadd.f32 %v12643_v34, %v12621_v3 }
0x142a   :  { %v10269_v31 = vadd.f32 %v10264_v20, %v9895_v6 }
0x1444   :  { %v12663_v39 = vpop.f32.mrb[100].mxu0 }
0x1445   :  { %v12664_v25 = vpop.f32.mrb[101].mxu0 }
0x1446   :  { %v12665_v40 = vadd.f32 %v12664_v25, %v12663_v39  ;;  %v12666_v53 = vpop.f32.mrb[102].mxu0 }
0x1447   :  { %v12667_v0 = vpop.f32.mrb[103].mxu0 }
0x1448   :  { %v10634_v62 = vadd.f32 %v12687_v35, %v12665_v40 }
0x144a   :  { %v10639_v59 = vadd.f32 %v10634_v62, %v10269_v31 }
0x144c   :  { %v10647_v58 = vadd.f32 %v11867_v10, %v10639_v59 }
0x144e   :  { %10649 = vst.msk [vmem:[#allocation5] sm:$0x3] %vm10648_vm2, %v10647_v58 }
0x144f   :  { %14209 = shalt.err (!%p14206_p4)
}
0x1450   :  { %s14210_s22 = scalar_lea.hbm %s18396_s26, 32 }
0x1451   :  { %p14211_p5 = scmp.ne.s32.totalorder %s18396_s26, %s14210_s22  ;;  %p14214_p6 = scmp.lt.u32.totalorder %s14210_s22, %s18396_s26 }
0x1453   :  { %p14216_p7 = pnand %p14214_p6, %p14211_p5 }
0x1455   :  { %14219 = shalt.err (!%p14216_p7)
}
0x1456   :  { %10659 = dma.vmem_to_hbm [thread:$0]  %s10657_s18, 32, %s18396_s26, [#allocation6]  }
0x1457   :  { %14220 = dma.done.wait [#allocation6], 32  }
0x1458   :  { %14221 = vsyncadd [#allocation6], 4294967264 }
0x1459   :  { %10663 = vsyncpa [#allocation6], 1 }

</bundles_post_ra>
